<compile_context>
chip_gen: v6e
topology: v6e:2x2x1
jax: 0.10.0
libtpu: 0.0.40
codegen_flags: <defaults>
</compile_context>

<pallas_src>
import math

import jax
import jax.numpy as jnp
from jax.experimental import pallas as pl
from jax.experimental.pallas import tpu as pltpu

# ------------------------- config constants -------------------------
ENC_IN = 4
DEC_IN = 4
C_OUT = 4
D_MODEL = 32
N_HEADS = 4
D_HEAD = D_MODEL // N_HEADS
D_FF = 64
E_LAYERS = 2
D_LAYERS = 1
FACTOR = 5
SEQ_LEN = 16
LABEL_LEN = 8
PRED_LEN = 8
FREQ_DIM = 4  # freq='h' -> 4 timeF features
DEC_LEN = LABEL_LEN + PRED_LEN
LN_EPS = 1e-5
_SQRT1_2 = 1.0 / math.sqrt(2.0)


# ------------------------- fixed operand ordering -------------------------
def _build_input_names():
    names = ["x_enc_cat", "x_dec_cat", "pos_emb", "enc_emb_w", "dec_emb_w"]
    for li in range(E_LAYERS):
        names += [f"cnt_enc{li}"]
        pre = f"enc{li}_"
        names += [pre + n for n in (
            "wqkv", "bqkv", "wo", "bo", "ln1_g", "ln1_b",
            "w1", "b1", "w2", "b2", "ln2_g", "ln2_b")]
    names += ["enc_norm_g", "enc_norm_b"]
    for li in range(D_LAYERS):
        names += [f"cnt_dec{li}_self", f"cnt_dec{li}_cross"]
        pre = f"dec{li}_"
        names += [pre + n for n in (
            "self_wqkv", "self_bqkv", "self_wo", "self_bo", "ln1_g", "ln1_b",
            "cross_wqkv", "cross_bqkv", "cross_wo", "cross_bo", "ln2_g", "ln2_b",
            "w1", "b1", "w2", "b2", "ln3_g", "ln3_b")]
    names += ["dec_norm_g", "dec_norm_b", "proj_w", "proj_b"]
    return tuple(names)


_INPUT_NAMES = _build_input_names()
_BATCHED = frozenset(("x_enc_cat", "x_dec_cat"))  # tiled over the batch grid axis


# ------------------------- the fused kernel -------------------------
def _make_kernel(names):
    num_in = len(names)

    def kernel(*refs):
        out_ref = refs[num_in]
        env = dict(zip(names, refs[:num_in]))
        f32 = jnp.float32

        def W(name):  # whole small weight / constant tile
            return env[name][...]

        # ---------- helpers (all trace-time inlined) ----------
        def layer_norm(x, g, b):
            mu = jnp.mean(x, axis=-1, keepdims=True)
            var = jnp.mean((x - mu) ** 2, axis=-1, keepdims=True)
            return (x - mu) * jax.lax.rsqrt(var + LN_EPS) * g + b

        def gelu(x):
            # exact-erf GELU, matching F.gelu(approximate='none').
            # TODO(synk): lax.erf has no Pallas-TPU lowering; erf is evaluated
            # in-kernel via Abramowitz-Stegun 7.1.26 (|abs err| <= 1.5e-7, i.e.
            # at f32 rounding level).
            z = x * _SQRT1_2
            a = jnp.abs(z)
            t = 1.0 / (1.0 + 0.3275911 * a)
            poly = t * (0.254829592 + t * (-0.284496736 + t * (1.421413741
                        + t * (-1.453152027 + t * 1.061405429))))
            erf_a = 1.0 - poly * jnp.exp(-(a * a))
            erf_z = jnp.where(z < 0.0, -erf_a, erf_a)
            return 0.5 * x * (1.0 + erf_z)

        def prob_attention(xq, xkv, self_attn, wqkv, bqkv, wo, bo, cnt, mask_flag):
            # xq: (Lq, d_model), xkv: (Lk, d_model)
            # cnt: (Lq, Lk) multiplicities of the randomly sampled keys per query.
            Lq = xq.shape[0]
            Lk = xkv.shape[0]
            u = min(int(FACTOR * math.ceil(math.log(Lq))), Lq)  # top-u queries
            scale = 1.0 / math.sqrt(D_HEAD)

            # fused QKV projection(s) on the MXU
            if self_attn:
                qkv = jnp.dot(xq, wqkv, preferred_element_type=f32) + bqkv
                q = qkv[:, 0 * D_MODEL:1 * D_MODEL]
                k = qkv[:, 1 * D_MODEL:2 * D_MODEL]
                v = qkv[:, 2 * D_MODEL:3 * D_MODEL]
            else:
                q = (jnp.dot(xq, wqkv[:, :D_MODEL], preferred_element_type=f32)
                     + bqkv[:, :D_MODEL])
                kv = (jnp.dot(xkv, wqkv[:, D_MODEL:], preferred_element_type=f32)
                      + bqkv[:, D_MODEL:])
                k = kv[:, :D_MODEL]
                v = kv[:, D_MODEL:]

            row = jax.lax.broadcasted_iota(jnp.int32, (Lq, Lk), 0)
            col = jax.lax.broadcasted_iota(jnp.int32, (Lq, Lk), 1)
            if mask_flag:
                # initial context = cumsum(V) over key positions (lower-tri matmul)
                w_init = jnp.where(col <= row, 1.0, 0.0)
            else:
                # initial context = mean(V) broadcast to every query row
                w_init = jnp.full((Lq, Lk), 1.0 / Lk, f32)
            ctx0 = jnp.dot(w_init, v, preferred_element_type=f32)  # (Lq, d_model)

            qi = jax.lax.broadcasted_iota(jnp.int32, (Lq, Lq), 0)
            qj = jax.lax.broadcasted_iota(jnp.int32, (Lq, Lq), 1)
            eye = jnp.where(qi == qj, 1.0, 0.0)
            ones_row = jnp.ones((1, Lq), f32)
            sampled = cnt > 0.0

            out = None
            for h in range(N_HEADS):
                sl = slice(h * D_HEAD, (h + 1) * D_HEAD)
                qh, kh, vh = q[:, sl], k[:, sl], v[:, sl]
                # raw (unscaled) scores for every query row: (Lq, Lk) on the MXU
                s_raw = jax.lax.dot_general(
                    qh, kh, (((1,), (1,)), ((), ())), preferred_element_type=f32)
                # ProbSparse metric on the sampled keys:
                #   M = max_sampled(q.k) - sum_sampled(q.k) / L_K
                m_c = (jnp.max(jnp.where(sampled, s_raw, -1e30), axis=-1, keepdims=True)
                       - jnp.sum(s_raw * cnt, axis=-1, keepdims=True) / Lk)  # (Lq, 1)
                # same values laid out along lanes (exact: 1s @ diag(M)) for ranking
                m_r = jnp.dot(ones_row, m_c * eye, preferred_element_type=f32)  # (1, Lq)
                # top-u selection via rank; ties broken toward the lower index
                before = (m_r > m_c) | ((m_r == m_c) & (qj < qi))
                rank = jnp.sum(jnp.where(before, 1.0, 0.0), axis=-1, keepdims=True)
                sel = rank < float(u)                                        # (Lq, 1)
                # softmax attention at the original query positions (VPU/EUP)
                s = s_raw * scale
                if mask_flag:
                    # ProbMask == causal mask at the original query positions
                    s = jnp.where(col > row, -1e30, s)
                s = s - jnp.max(s, axis=-1, keepdims=True)
                p = jnp.exp(s)
                p = p / jnp.sum(p, axis=-1, keepdims=True)
                attn_h = jnp.dot(p, vh, preferred_element_type=f32)          # (Lq, Dh)
                # "scatter": top-u rows take the attention output, rest keep ctx0
                head_out = jnp.where(sel, attn_h, ctx0[:, sl])
                # fold the head into the output projection (== concat(heads) @ wo)
                contrib = jnp.dot(head_out, wo[sl, :], preferred_element_type=f32)
                out = contrib if out is None else out + contrib
            return out + bo

        # ---------------- embeddings (conv-3 token + timeF fused) + pos ----------------
        pe = W("pos_emb")
        x = (jnp.dot(env["x_enc_cat"][0], W("enc_emb_w"), preferred_element_type=f32)
             + pe[:SEQ_LEN])

        # ---------------- encoder ----------------
        for li in range(E_LAYERS):
            pre = f"enc{li}_"
            a = prob_attention(x, x, True, W(pre + "wqkv"), W(pre + "bqkv"),
                               W(pre + "wo"), W(pre + "bo"),
                               W(f"cnt_enc{li}"), False)
            x = layer_norm(x + a, W(pre + "ln1_g"), W(pre + "ln1_b"))
            h = gelu(jnp.dot(x, W(pre + "w1"), preferred_element_type=f32) + W(pre + "b1"))
            y = jnp.dot(h, W(pre + "w2"), preferred_element_type=f32) + W(pre + "b2")
            x = layer_norm(x + y, W(pre + "ln2_g"), W(pre + "ln2_b"))
        enc_out = layer_norm(x, W("enc_norm_g"), W("enc_norm_b"))

        # ---------------- decoder ----------------
        x = (jnp.dot(env["x_dec_cat"][0], W("dec_emb_w"), preferred_element_type=f32)
             + pe[:DEC_LEN])
        for li in range(D_LAYERS):
            pre = f"dec{li}_"
            a = prob_attention(x, x, True, W(pre + "self_wqkv"), W(pre + "self_bqkv"),
                               W(pre + "self_wo"), W(pre + "self_bo"),
                               W(f"cnt_dec{li}_self"), True)
            x = layer_norm(x + a, W(pre + "ln1_g"), W(pre + "ln1_b"))
            a = prob_attention(x, enc_out, False, W(pre + "cross_wqkv"), W(pre + "cross_bqkv"),
                               W(pre + "cross_wo"), W(pre + "cross_bo"),
                               W(f"cnt_dec{li}_cross"), False)
            x = layer_norm(x + a, W(pre + "ln2_g"), W(pre + "ln2_b"))
            h = gelu(jnp.dot(x, W(pre + "w1"), preferred_element_type=f32) + W(pre + "b1"))
            y = jnp.dot(h, W(pre + "w2"), preferred_element_type=f32) + W(pre + "b2")
            x = layer_norm(x + y, W(pre + "ln3_g"), W(pre + "ln3_b"))

        x = layer_norm(x, W("dec_norm_g"), W("dec_norm_b"))
        # final projection, padded to d_model lanes (sliced to c_out in the wrapper)
        out_ref[0] = jnp.dot(x, W("proj_w"), preferred_element_type=f32) + W("proj_b")

    return kernel


def _informer_pallas_call(arrays, B):
    in_specs = []
    inputs = []
    for name in _INPUT_NAMES:
        a = arrays[name]
        inputs.append(a)
        if name in _BATCHED:
            in_specs.append(pl.BlockSpec((1,) + a.shape[1:], lambda b: (b, 0, 0)))
        else:
            in_specs.append(pl.BlockSpec(a.shape, lambda b: (0, 0)))
    return pl.pallas_call(
        _make_kernel(_INPUT_NAMES),
        out_shape=jax.ShapeDtypeStruct((B, DEC_LEN, D_MODEL), jnp.float32),
        grid=(B,),
        in_specs=in_specs,
        out_specs=pl.BlockSpec((1, DEC_LEN, D_MODEL), lambda b: (b, 0, 0)),
        compiler_params=pltpu.CompilerParams(dimension_semantics=("parallel",)),
    )(*inputs)


# ------------------------- JAX wrapper (all under one jit) -------------------------
@jax.jit
def model_forward(params, x_enc, x_mark_enc, x_dec, x_mark_dec, rng):
    B = x_enc.shape[0]

    # im2col of the circular conv-3 token embedding + timeF features (tiny XLA prep)
    def tokens(x, x_mark):
        return jnp.concatenate(
            [jnp.roll(x, 1, axis=1), x, jnp.roll(x, -1, axis=1), x_mark], axis=-1)

    # ProbSparse random key sampling -> per-attention sample-count matrices (L_Q, L_K).
    # TODO(synk): torch.randint's RNG stream cannot be reproduced; deterministic jax.random used.
    def sample_counts(key, L_Q, L_K):
        sample_k = min(int(FACTOR * math.ceil(math.log(L_K))), L_K)
        idx = jax.random.randint(key, (L_Q, sample_k), 0, L_K)
        return jnp.sum(jax.nn.one_hot(idx, L_K, dtype=jnp.float32), axis=1)

    keys = jax.random.split(rng, E_LAYERS + 2 * D_LAYERS)
    arrays = dict(params)
    arrays["x_enc_cat"] = tokens(x_enc, x_mark_enc)
    arrays["x_dec_cat"] = tokens(x_dec, x_mark_dec)
    ki = 0
    for li in range(E_LAYERS):
        arrays[f"cnt_enc{li}"] = sample_counts(keys[ki], SEQ_LEN, SEQ_LEN)
        ki += 1
    for li in range(D_LAYERS):
        arrays[f"cnt_dec{li}_self"] = sample_counts(keys[ki], DEC_LEN, DEC_LEN)
        ki += 1
        arrays[f"cnt_dec{li}_cross"] = sample_counts(keys[ki], DEC_LEN, SEQ_LEN)
        ki += 1

    out = _informer_pallas_call(arrays, B)  # (B, DEC_LEN, d_model) padded projection
    return out[:, -PRED_LEN:, :C_OUT]       # output_attention=False


# ------------------------- deterministic parameter init -------------------------
def positional_embedding(L, d_model):
    position = jnp.arange(L, dtype=jnp.float32)[:, None]
    div_term = jnp.exp(
        jnp.arange(0, d_model, 2, dtype=jnp.float32) * -(math.log(10000.0) / d_model))
    pe = jnp.zeros((L, d_model), jnp.float32)
    pe = pe.at[:, 0::2].set(jnp.sin(position * div_term))
    pe = pe.at[:, 1::2].set(jnp.cos(position * div_term))
    return pe


class KeyGen:
    def __init__(self, key):
        self.key = key

    def __call__(self):
        self.key, sub = jax.random.split(self.key)
        return sub


def init_params(key):
    kg = KeyGen(key)

    def w_(shape, std=0.05):
        return std * jax.random.normal(kg(), shape, dtype=jnp.float32)

    ones32 = jnp.ones((1, D_MODEL), jnp.float32)
    zeros32 = jnp.zeros((1, D_MODEL), jnp.float32)
    p = {}

    max_len = max(SEQ_LEN, DEC_LEN)
    p["pos_emb"] = positional_embedding(max_len, D_MODEL)
    # token conv-3 taps (3*c_in) + timeF linear (freq) fused along the input axis
    p["enc_emb_w"] = jnp.concatenate(
        [w_((3 * ENC_IN, D_MODEL)), w_((FREQ_DIM, D_MODEL))], axis=0)
    p["dec_emb_w"] = jnp.concatenate(
        [w_((3 * DEC_IN, D_MODEL)), w_((FREQ_DIM, D_MODEL))], axis=0)

    def attn(prefix):
        p[prefix + "wqkv"] = w_((D_MODEL, 3 * D_MODEL))     # Wq | Wk | Wv
        p[prefix + "bqkv"] = jnp.zeros((1, 3 * D_MODEL), jnp.float32)
        p[prefix + "wo"] = w_((D_MODEL, D_MODEL))
        p[prefix + "bo"] = jnp.zeros((1, D_MODEL), jnp.float32)

    def ffn(prefix):
        p[prefix + "w1"] = w_((D_MODEL, D_FF))
        p[prefix + "b1"] = jnp.zeros((1, D_FF), jnp.float32)
        p[prefix + "w2"] = w_((D_FF, D_MODEL))
        p[prefix + "b2"] = jnp.zeros((1, D_MODEL), jnp.float32)

    for li in range(E_LAYERS):
        pre = f"enc{li}_"
        attn(pre)
        ffn(pre)
        p[pre + "ln1_g"] = ones32
        p[pre + "ln1_b"] = zeros32
        p[pre + "ln2_g"] = ones32
        p[pre + "ln2_b"] = zeros32
    p["enc_norm_g"] = ones32
    p["enc_norm_b"] = zeros32

    for li in range(D_LAYERS):
        pre = f"dec{li}_"
        attn(pre + "self_")
        attn(pre + "cross_")
        ffn(pre)
        for j in (1, 2, 3):
            p[pre + f"ln{j}_g"] = ones32
            p[pre + f"ln{j}_b"] = zeros32
    p["dec_norm_g"] = ones32
    p["dec_norm_b"] = zeros32

    # projection padded to a 32-wide lane-dense output; sliced to c_out in the wrapper
    proj_w = w_((D_MODEL, C_OUT))
    p["proj_w"] = jnp.pad(proj_w, ((0, 0), (0, D_MODEL - C_OUT)))
    p["proj_b"] = jnp.zeros((1, D_MODEL), jnp.float32)
    return p


# ------------------------- main -------------------------
if __name__ == "__main__":
    key = jax.random.PRNGKey(0)
    k1, k2, k3, k4, kp, kr = jax.random.split(key, 6)

    B = 2
    x_enc = jax.random.normal(k1, (B, SEQ_LEN, ENC_IN), jnp.float32)
    x_mark_enc = jax.random.normal(k2, (B, SEQ_LEN, FREQ_DIM), jnp.float32)
    x_dec = jax.random.normal(k3, (B, DEC_LEN, DEC_IN), jnp.float32)
    x_mark_dec = jax.random.normal(k4, (B, DEC_LEN, FREQ_DIM), jnp.float32)

    params = init_params(kp)
    out = model_forward(params, x_enc, x_mark_enc, x_dec, x_mark_dec, kr)
    out = jax.block_until_ready(out)
    assert out.shape == (B, PRED_LEN, C_OUT), out.shape
    assert bool(jnp.all(jnp.isfinite(out)))
    print("KERNEL_OK")
</pallas_src>

<mosaic_0001>
module attributes {stable_mosaic.version = 11 : i64} {
  func.func @kernel(%arg0: i32, %arg1: memref<1x16x16xf32, #tpu.memory_space<vmem>>, %arg2: memref<1x16x16xf32, #tpu.memory_space<vmem>>, %arg3: memref<16x32xf32, #tpu.memory_space<vmem>>, %arg4: memref<16x32xf32, #tpu.memory_space<vmem>>, %arg5: memref<16x32xf32, #tpu.memory_space<vmem>>, %arg6: memref<16x16xf32, #tpu.memory_space<vmem>>, %arg7: memref<32x96xf32, #tpu.memory_space<vmem>>, %arg8: memref<1x96xf32, #tpu.memory_space<vmem>>, %arg9: memref<32x32xf32, #tpu.memory_space<vmem>>, %arg10: memref<1x32xf32, #tpu.memory_space<vmem>>, %arg11: memref<1x32xf32, #tpu.memory_space<vmem>>, %arg12: memref<1x32xf32, #tpu.memory_space<vmem>>, %arg13: memref<32x64xf32, #tpu.memory_space<vmem>>, %arg14: memref<1x64xf32, #tpu.memory_space<vmem>>, %arg15: memref<64x32xf32, #tpu.memory_space<vmem>>, %arg16: memref<1x32xf32, #tpu.memory_space<vmem>>, %arg17: memref<1x32xf32, #tpu.memory_space<vmem>>, %arg18: memref<1x32xf32, #tpu.memory_space<vmem>>, %arg19: memref<16x16xf32, #tpu.memory_space<vmem>>, %arg20: memref<32x96xf32, #tpu.memory_space<vmem>>, %arg21: memref<1x96xf32, #tpu.memory_space<vmem>>, %arg22: memref<32x32xf32, #tpu.memory_space<vmem>>, %arg23: memref<1x32xf32, #tpu.memory_space<vmem>>, %arg24: memref<1x32xf32, #tpu.memory_space<vmem>>, %arg25: memref<1x32xf32, #tpu.memory_space<vmem>>, %arg26: memref<32x64xf32, #tpu.memory_space<vmem>>, %arg27: memref<1x64xf32, #tpu.memory_space<vmem>>, %arg28: memref<64x32xf32, #tpu.memory_space<vmem>>, %arg29: memref<1x32xf32, #tpu.memory_space<vmem>>, %arg30: memref<1x32xf32, #tpu.memory_space<vmem>>, %arg31: memref<1x32xf32, #tpu.memory_space<vmem>>, %arg32: memref<1x32xf32, #tpu.memory_space<vmem>>, %arg33: memref<1x32xf32, #tpu.memory_space<vmem>>, %arg34: memref<16x16xf32, #tpu.memory_space<vmem>>, %arg35: memref<16x16xf32, #tpu.memory_space<vmem>>, %arg36: memref<32x96xf32, #tpu.memory_space<vmem>>, %arg37: memref<1x96xf32, #tpu.memory_space<vmem>>, %arg38: memref<32x32xf32, #tpu.memory_space<vmem>>, %arg39: memref<1x32xf32, #tpu.memory_space<vmem>>, %arg40: memref<1x32xf32, #tpu.memory_space<vmem>>, %arg41: memref<1x32xf32, #tpu.memory_space<vmem>>, %arg42: memref<32x96xf32, #tpu.memory_space<vmem>>, %arg43: memref<1x96xf32, #tpu.memory_space<vmem>>, %arg44: memref<32x32xf32, #tpu.memory_space<vmem>>, %arg45: memref<1x32xf32, #tpu.memory_space<vmem>>, %arg46: memref<1x32xf32, #tpu.memory_space<vmem>>, %arg47: memref<1x32xf32, #tpu.memory_space<vmem>>, %arg48: memref<32x64xf32, #tpu.memory_space<vmem>>, %arg49: memref<1x64xf32, #tpu.memory_space<vmem>>, %arg50: memref<64x32xf32, #tpu.memory_space<vmem>>, %arg51: memref<1x32xf32, #tpu.memory_space<vmem>>, %arg52: memref<1x32xf32, #tpu.memory_space<vmem>>, %arg53: memref<1x32xf32, #tpu.memory_space<vmem>>, %arg54: memref<1x32xf32, #tpu.memory_space<vmem>>, %arg55: memref<1x32xf32, #tpu.memory_space<vmem>>, %arg56: memref<32x32xf32, #tpu.memory_space<vmem>>, %arg57: memref<1x32xf32, #tpu.memory_space<vmem>>, %arg58: memref<1x16x32xf32, #tpu.memory_space<vmem>>) attributes {dimension_semantics = [#tpu.dimension_semantics<parallel>], iteration_bounds = array<i64: 2>, scalar_prefetch = 0 : i64, scratch_operands = 0 : i64, tpu.core_type = #tpu.core_type<tc>, window_params = [{transform_indices = @transform_0, window_bounds = array<i64: 1, 16, 16>}, {transform_indices = @transform_1, window_bounds = array<i64: 1, 16, 16>}, {pipeline_mode = #tpu.pipeline_mode<synchronous>, transform_indices = @transform_2, window_bounds = array<i64: 16, 32>}, {pipeline_mode = #tpu.pipeline_mode<synchronous>, transform_indices = @transform_3, window_bounds = array<i64: 16, 32>}, {pipeline_mode = #tpu.pipeline_mode<synchronous>, transform_indices = @transform_4, window_bounds = array<i64: 16, 32>}, {pipeline_mode = #tpu.pipeline_mode<synchronous>, transform_indices = @transform_5, window_bounds = array<i64: 16, 16>}, {pipeline_mode = #tpu.pipeline_mode<synchronous>, transform_indices = @transform_6, window_bounds = array<i64: 32, 96>}, {pipeline_mode = #tpu.pipeline_mode<synchronous>, transform_indices = @transform_7, window_bounds = array<i64: 1, 96>}, {pipeline_mode = #tpu.pipeline_mode<synchronous>, transform_indices = @transform_8, window_bounds = array<i64: 32, 32>}, {pipeline_mode = #tpu.pipeline_mode<synchronous>, transform_indices = @transform_9, window_bounds = array<i64: 1, 32>}, {pipeline_mode = #tpu.pipeline_mode<synchronous>, transform_indices = @transform_10, window_bounds = array<i64: 1, 32>}, {pipeline_mode = #tpu.pipeline_mode<synchronous>, transform_indices = @transform_11, window_bounds = array<i64: 1, 32>}, {pipeline_mode = #tpu.pipeline_mode<synchronous>, transform_indices = @transform_12, window_bounds = array<i64: 32, 64>}, {pipeline_mode = #tpu.pipeline_mode<synchronous>, transform_indices = @transform_13, window_bounds = array<i64: 1, 64>}, {pipeline_mode = #tpu.pipeline_mode<synchronous>, transform_indices = @transform_14, window_bounds = array<i64: 64, 32>}, {pipeline_mode = #tpu.pipeline_mode<synchronous>, transform_indices = @transform_15, window_bounds = array<i64: 1, 32>}, {pipeline_mode = #tpu.pipeline_mode<synchronous>, transform_indices = @transform_16, window_bounds = array<i64: 1, 32>}, {pipeline_mode = #tpu.pipeline_mode<synchronous>, transform_indices = @transform_17, window_bounds = array<i64: 1, 32>}, {pipeline_mode = #tpu.pipeline_mode<synchronous>, transform_indices = @transform_18, window_bounds = array<i64: 16, 16>}, {pipeline_mode = #tpu.pipeline_mode<synchronous>, transform_indices = @transform_19, window_bounds = array<i64: 32, 96>}, {pipeline_mode = #tpu.pipeline_mode<synchronous>, transform_indices = @transform_20, window_bounds = array<i64: 1, 96>}, {pipeline_mode = #tpu.pipeline_mode<synchronous>, transform_indices = @transform_21, window_bounds = array<i64: 32, 32>}, {pipeline_mode = #tpu.pipeline_mode<synchronous>, transform_indices = @transform_22, window_bounds = array<i64: 1, 32>}, {pipeline_mode = #tpu.pipeline_mode<synchronous>, transform_indices = @transform_23, window_bounds = array<i64: 1, 32>}, {pipeline_mode = #tpu.pipeline_mode<synchronous>, transform_indices = @transform_24, window_bounds = array<i64: 1, 32>}, {pipeline_mode = #tpu.pipeline_mode<synchronous>, transform_indices = @transform_25, window_bounds = array<i64: 32, 64>}, {pipeline_mode = #tpu.pipeline_mode<synchronous>, transform_indices = @transform_26, window_bounds = array<i64: 1, 64>}, {pipeline_mode = #tpu.pipeline_mode<synchronous>, transform_indices = @transform_27, window_bounds = array<i64: 64, 32>}, {pipeline_mode = #tpu.pipeline_mode<synchronous>, transform_indices = @transform_28, window_bounds = array<i64: 1, 32>}, {pipeline_mode = #tpu.pipeline_mode<synchronous>, transform_indices = @transform_29, window_bounds = array<i64: 1, 32>}, {pipeline_mode = #tpu.pipeline_mode<synchronous>, transform_indices = @transform_30, window_bounds = array<i64: 1, 32>}, {pipeline_mode = #tpu.pipeline_mode<synchronous>, transform_indices = @transform_31, window_bounds = array<i64: 1, 32>}, {pipeline_mode = #tpu.pipeline_mode<synchronous>, transform_indices = @transform_32, window_bounds = array<i64: 1, 32>}, {pipeline_mode = #tpu.pipeline_mode<synchronous>, transform_indices = @transform_33, window_bounds = array<i64: 16, 16>}, {pipeline_mode = #tpu.pipeline_mode<synchronous>, transform_indices = @transform_34, window_bounds = array<i64: 16, 16>}, {pipeline_mode = #tpu.pipeline_mode<synchronous>, transform_indices = @transform_35, window_bounds = array<i64: 32, 96>}, {pipeline_mode = #tpu.pipeline_mode<synchronous>, transform_indices = @transform_36, window_bounds = array<i64: 1, 96>}, {pipeline_mode = #tpu.pipeline_mode<synchronous>, transform_indices = @transform_37, window_bounds = array<i64: 32, 32>}, {pipeline_mode = #tpu.pipeline_mode<synchronous>, transform_indices = @transform_38, window_bounds = array<i64: 1, 32>}, {pipeline_mode = #tpu.pipeline_mode<synchronous>, transform_indices = @transform_39, window_bounds = array<i64: 1, 32>}, {pipeline_mode = #tpu.pipeline_mode<synchronous>, transform_indices = @transform_40, window_bounds = array<i64: 1, 32>}, {pipeline_mode = #tpu.pipeline_mode<synchronous>, transform_indices = @transform_41, window_bounds = array<i64: 32, 96>}, {pipeline_mode = #tpu.pipeline_mode<synchronous>, transform_indices = @transform_42, window_bounds = array<i64: 1, 96>}, {pipeline_mode = #tpu.pipeline_mode<synchronous>, transform_indices = @transform_43, window_bounds = array<i64: 32, 32>}, {pipeline_mode = #tpu.pipeline_mode<synchronous>, transform_indices = @transform_44, window_bounds = array<i64: 1, 32>}, {pipeline_mode = #tpu.pipeline_mode<synchronous>, transform_indices = @transform_45, window_bounds = array<i64: 1, 32>}, {pipeline_mode = #tpu.pipeline_mode<synchronous>, transform_indices = @transform_46, window_bounds = array<i64: 1, 32>}, {pipeline_mode = #tpu.pipeline_mode<synchronous>, transform_indices = @transform_47, window_bounds = array<i64: 32, 64>}, {pipeline_mode = #tpu.pipeline_mode<synchronous>, transform_indices = @transform_48, window_bounds = array<i64: 1, 64>}, {pipeline_mode = #tpu.pipeline_mode<synchronous>, transform_indices = @transform_49, window_bounds = array<i64: 64, 32>}, {pipeline_mode = #tpu.pipeline_mode<synchronous>, transform_indices = @transform_50, window_bounds = array<i64: 1, 32>}, {pipeline_mode = #tpu.pipeline_mode<synchronous>, transform_indices = @transform_51, window_bounds = array<i64: 1, 32>}, {pipeline_mode = #tpu.pipeline_mode<synchronous>, transform_indices = @transform_52, window_bounds = array<i64: 1, 32>}, {pipeline_mode = #tpu.pipeline_mode<synchronous>, transform_indices = @transform_53, window_bounds = array<i64: 1, 32>}, {pipeline_mode = #tpu.pipeline_mode<synchronous>, transform_indices = @transform_54, window_bounds = array<i64: 1, 32>}, {pipeline_mode = #tpu.pipeline_mode<synchronous>, transform_indices = @transform_55, window_bounds = array<i64: 32, 32>}, {pipeline_mode = #tpu.pipeline_mode<synchronous>, transform_indices = @transform_56, window_bounds = array<i64: 1, 32>}, {transform_indices = @transform_57, window_bounds = array<i64: 1, 16, 32>}]} {
    %c0 = arith.constant 0 : index
    %c0_0 = arith.constant 0 : index
    %0 = vector.load %arg3[%c0, %c0_0] : memref<16x32xf32, #tpu.memory_space<vmem>>, vector<16x32xf32>
    %c0_1 = arith.constant 0 : index
    %c0_2 = arith.constant 0 : index
    %c0_3 = arith.constant 0 : index
    %1 = vector.load %arg1[%c0_1, %c0_2, %c0_3] : memref<1x16x16xf32, #tpu.memory_space<vmem>>, vector<1x16x16xf32>
    %2 = vector.shape_cast %1 : vector<1x16x16xf32> to vector<16x16xf32>
    %c0_4 = arith.constant 0 : index
    %c0_5 = arith.constant 0 : index
    %3 = vector.load %arg4[%c0_4, %c0_5] : memref<16x32xf32, #tpu.memory_space<vmem>>, vector<16x32xf32>
    %cst = arith.constant dense<0.000000e+00> : vector<16x32xf32>
    %4 = tpu.matmul %2, %3, %cst {dimension_numbers = #tpu.dot_dimension_numbers<[1], [0], [0], [1], [0, 0, 1, 1], [], []>} : vector<16x16xf32>, vector<16x32xf32>, vector<16x32xf32> -> vector<16x32xf32>
    %5 = arith.addf %4, %0 : vector<16x32xf32>
    %c0_6 = arith.constant 0 : index
    %c0_7 = arith.constant 0 : index
    %6 = vector.load %arg7[%c0_6, %c0_7] : memref<32x96xf32, #tpu.memory_space<vmem>>, vector<32x96xf32>
    %c0_8 = arith.constant 0 : index
    %c0_9 = arith.constant 0 : index
    %7 = vector.load %arg8[%c0_8, %c0_9] : memref<1x96xf32, #tpu.memory_space<vmem>>, vector<1x96xf32>
    %c0_10 = arith.constant 0 : index
    %c0_11 = arith.constant 0 : index
    %8 = vector.load %arg9[%c0_10, %c0_11] : memref<32x32xf32, #tpu.memory_space<vmem>>, vector<32x32xf32>
    %c0_12 = arith.constant 0 : index
    %c0_13 = arith.constant 0 : index
    %9 = vector.load %arg10[%c0_12, %c0_13] : memref<1x32xf32, #tpu.memory_space<vmem>>, vector<1x32xf32>
    %c0_14 = arith.constant 0 : index
    %c0_15 = arith.constant 0 : index
    %10 = vector.load %arg6[%c0_14, %c0_15] : memref<16x16xf32, #tpu.memory_space<vmem>>, vector<16x16xf32>
    %cst_16 = arith.constant dense<0.000000e+00> : vector<16x96xf32>
    %11 = tpu.matmul %5, %6, %cst_16 {dimension_numbers = #tpu.dot_dimension_numbers<[1], [0], [0], [1], [0, 0, 1, 1], [], []>} : vector<16x32xf32>, vector<32x96xf32>, vector<16x96xf32> -> vector<16x96xf32>
    %12 = vector.broadcast %7 : vector<1x96xf32> to vector<16x96xf32>
    %13 = arith.addf %11, %12 : vector<16x96xf32>
    %14 = vector.extract_strided_slice %13 {offsets = [0, 0], sizes = [16, 32], strides = [1, 1]} : vector<16x96xf32> to vector<16x32xf32>
    %15 = vector.extract_strided_slice %13 {offsets = [0, 32], sizes = [16, 32], strides = [1, 1]} : vector<16x96xf32> to vector<16x32xf32>
    %16 = vector.extract_strided_slice %13 {offsets = [0, 64], sizes = [16, 32], strides = [1, 1]} : vector<16x96xf32> to vector<16x32xf32>
    %cst_17 = arith.constant 6.250000e-02 : f32
    %17 = vector.broadcast %cst_17 : f32 to vector<16x16xf32>
    %cst_18 = arith.constant dense<0.000000e+00> : vector<16x32xf32>
    %18 = tpu.matmul %17, %16, %cst_18 {dimension_numbers = #tpu.dot_dimension_numbers<[1], [0], [0], [1], [0, 0, 1, 1], [], []>} : vector<16x16xf32>, vector<16x32xf32>, vector<16x32xf32> -> vector<16x32xf32>
    %19 = tpu.iota {dimensions = array<i32: 0>} : vector<16x16xi32>
    %20 = tpu.iota {dimensions = array<i32: 1>} : vector<16x16xi32>
    %21 = arith.cmpi eq, %19, %20 : vector<16x16xi32>
    %cst_19 = arith.constant 1.000000e+00 : f32
    %cst_20 = arith.constant 0.000000e+00 : f32
    %22 = vector.broadcast %cst_19 : f32 to vector<16x16xf32>
    %23 = vector.broadcast %cst_20 : f32 to vector<16x16xf32>
    %24 = arith.select %21, %22, %23 : vector<16x16xi1>, vector<16x16xf32>
    %cst_21 = arith.constant 1.000000e+00 : f32
    %25 = vector.broadcast %cst_21 : f32 to vector<1x16xf32>
    %cst_22 = arith.constant 0.000000e+00 : f32
    %26 = vector.broadcast %cst_22 : f32 to vector<16x16xf32>
    %27 = arith.cmpf ogt, %10, %26 : vector<16x16xf32>
    %28 = vector.extract_strided_slice %14 {offsets = [0, 0], sizes = [16, 8], strides = [1, 1]} : vector<16x32xf32> to vector<16x8xf32>
    %29 = vector.extract_strided_slice %15 {offsets = [0, 0], sizes = [16, 8], strides = [1, 1]} : vector<16x32xf32> to vector<16x8xf32>
    %30 = vector.extract_strided_slice %16 {offsets = [0, 0], sizes = [16, 8], strides = [1, 1]} : vector<16x32xf32> to vector<16x8xf32>
    %cst_23 = arith.constant dense<0.000000e+00> : vector<16x16xf32>
    %31 = tpu.matmul %28, %29, %cst_23 {dimension_numbers = #tpu.dot_dimension_numbers<[1], [1], [0], [0], [0, 0, 1, 0], [], []>} : vector<16x8xf32>, vector<16x8xf32>, vector<16x16xf32> -> vector<16x16xf32>
    %cst_24 = arith.constant -1.000000e+30 : f32
    %32 = vector.broadcast %cst_24 : f32 to vector<16x16xf32>
    %33 = arith.select %27, %31, %32 : vector<16x16xi1>, vector<16x16xf32>
    %cst_25 = arith.constant dense<0xFF800000> : vector<16xf32>
    %34 = vector.multi_reduction <maximumf>, %33, %cst_25 [1] : vector<16x16xf32> to vector<16xf32>
    %35 = vector.shape_cast %34 : vector<16xf32> to vector<16x1xf32>
    %36 = arith.mulf %31, %10 : vector<16x16xf32>
    %cst_26 = arith.constant dense<0.000000e+00> : vector<16xf32>
    %37 = vector.multi_reduction <add>, %36, %cst_26 [1] : vector<16x16xf32> to vector<16xf32>
    %38 = vector.shape_cast %37 : vector<16xf32> to vector<16x1xf32>
    %cst_27 = arith.constant 1.600000e+01 : f32
    %39 = vector.broadcast %cst_27 : f32 to vector<16x1xf32>
    %40 = arith.divf %38, %39 : vector<16x1xf32>
    %41 = arith.subf %35, %40 : vector<16x1xf32>
    %42 = vector.broadcast %41 : vector<16x1xf32> to vector<16x16xf32>
    %43 = arith.mulf %42, %24 : vector<16x16xf32>
    %cst_28 = arith.constant dense<0.000000e+00> : vector<1x16xf32>
    %44 = tpu.matmul %25, %43, %cst_28 {dimension_numbers = #tpu.dot_dimension_numbers<[1], [0], [0], [1], [0, 0, 1, 1], [], []>} : vector<1x16xf32>, vector<16x16xf32>, vector<1x16xf32> -> vector<1x16xf32>
    %45 = vector.broadcast %44 : vector<1x16xf32> to vector<16x16xf32>
    %46 = vector.broadcast %41 : vector<16x1xf32> to vector<16x16xf32>
    %47 = arith.cmpf ogt, %45, %46 : vector<16x16xf32>
    %48 = vector.broadcast %44 : vector<1x16xf32> to vector<16x16xf32>
    %49 = vector.broadcast %41 : vector<16x1xf32> to vector<16x16xf32>
    %50 = arith.cmpf oeq, %48, %49 : vector<16x16xf32>
    %51 = arith.cmpi slt, %20, %19 : vector<16x16xi32>
    %52 = arith.andi %50, %51 : vector<16x16xi1>
    %53 = arith.ori %47, %52 : vector<16x16xi1>
    %cst_29 = arith.constant 1.000000e+00 : f32
    %cst_30 = arith.constant 0.000000e+00 : f32
    %54 = vector.broadcast %cst_29 : f32 to vector<16x16xf32>
    %55 = vector.broadcast %cst_30 : f32 to vector<16x16xf32>
    %56 = arith.select %53, %54, %55 : vector<16x16xi1>, vector<16x16xf32>
    %cst_31 = arith.constant dense<0.000000e+00> : vector<16xf32>
    %57 = vector.multi_reduction <add>, %56, %cst_31 [1] : vector<16x16xf32> to vector<16xf32>
    %58 = vector.shape_cast %57 : vector<16xf32> to vector<16x1xf32>
    %cst_32 = arith.constant 1.500000e+01 : f32
    %59 = vector.broadcast %cst_32 : f32 to vector<16x1xf32>
    %60 = arith.cmpf olt, %58, %59 : vector<16x1xf32>
    %cst_33 = arith.constant 0.353553385 : f32
    %61 = vector.broadcast %cst_33 : f32 to vector<16x16xf32>
    %62 = arith.mulf %31, %61 : vector<16x16xf32>
    %cst_34 = arith.constant dense<0xFF800000> : vector<16xf32>
    %63 = vector.multi_reduction <maximumf>, %62, %cst_34 [1] : vector<16x16xf32> to vector<16xf32>
    %64 = vector.shape_cast %63 : vector<16xf32> to vector<16x1xf32>
    %65 = vector.broadcast %64 : vector<16x1xf32> to vector<16x16xf32>
    %66 = arith.subf %62, %65 : vector<16x16xf32>
    %67 = math.exp %66 : vector<16x16xf32>
    %cst_35 = arith.constant dense<0.000000e+00> : vector<16xf32>
    %68 = vector.multi_reduction <add>, %67, %cst_35 [1] : vector<16x16xf32> to vector<16xf32>
    %69 = vector.shape_cast %68 : vector<16xf32> to vector<16x1xf32>
    %70 = vector.broadcast %69 : vector<16x1xf32> to vector<16x16xf32>
    %71 = arith.divf %67, %70 : vector<16x16xf32>
    %cst_36 = arith.constant dense<0.000000e+00> : vector<16x8xf32>
    %72 = tpu.matmul %71, %30, %cst_36 {dimension_numbers = #tpu.dot_dimension_numbers<[1], [0], [0], [1], [0, 0, 1, 1], [], []>} : vector<16x16xf32>, vector<16x8xf32>, vector<16x8xf32> -> vector<16x8xf32>
    %73 = vector.extract_strided_slice %18 {offsets = [0, 0], sizes = [16, 8], strides = [1, 1]} : vector<16x32xf32> to vector<16x8xf32>
    %74 = vector.shape_cast %60 : vector<16x1xi1> to vector<16x1xi1>
    %75 = vector.broadcast %74 : vector<16x1xi1> to vector<16x8xi1>
    %76 = arith.select %75, %72, %73 : vector<16x8xi1>, vector<16x8xf32>
    %77 = vector.extract_strided_slice %8 {offsets = [0, 0], sizes = [8, 32], strides = [1, 1]} : vector<32x32xf32> to vector<8x32xf32>
    %cst_37 = arith.constant dense<0.000000e+00> : vector<16x32xf32>
    %78 = tpu.matmul %76, %77, %cst_37 {dimension_numbers = #tpu.dot_dimension_numbers<[1], [0], [0], [1], [0, 0, 1, 1], [], []>} : vector<16x8xf32>, vector<8x32xf32>, vector<16x32xf32> -> vector<16x32xf32>
    %79 = vector.extract_strided_slice %14 {offsets = [0, 8], sizes = [16, 8], strides = [1, 1]} : vector<16x32xf32> to vector<16x8xf32>
    %80 = vector.extract_strided_slice %15 {offsets = [0, 8], sizes = [16, 8], strides = [1, 1]} : vector<16x32xf32> to vector<16x8xf32>
    %81 = vector.extract_strided_slice %16 {offsets = [0, 8], sizes = [16, 8], strides = [1, 1]} : vector<16x32xf32> to vector<16x8xf32>
    %cst_38 = arith.constant dense<0.000000e+00> : vector<16x16xf32>
    %82 = tpu.matmul %79, %80, %cst_38 {dimension_numbers = #tpu.dot_dimension_numbers<[1], [1], [0], [0], [0, 0, 1, 0], [], []>} : vector<16x8xf32>, vector<16x8xf32>, vector<16x16xf32> -> vector<16x16xf32>
    %cst_39 = arith.constant -1.000000e+30 : f32
    %83 = vector.broadcast %cst_39 : f32 to vector<16x16xf32>
    %84 = arith.select %27, %82, %83 : vector<16x16xi1>, vector<16x16xf32>
    %cst_40 = arith.constant dense<0xFF800000> : vector<16xf32>
    %85 = vector.multi_reduction <maximumf>, %84, %cst_40 [1] : vector<16x16xf32> to vector<16xf32>
    %86 = vector.shape_cast %85 : vector<16xf32> to vector<16x1xf32>
    %87 = arith.mulf %82, %10 : vector<16x16xf32>
    %cst_41 = arith.constant dense<0.000000e+00> : vector<16xf32>
    %88 = vector.multi_reduction <add>, %87, %cst_41 [1] : vector<16x16xf32> to vector<16xf32>
    %89 = vector.shape_cast %88 : vector<16xf32> to vector<16x1xf32>
    %cst_42 = arith.constant 1.600000e+01 : f32
    %90 = vector.broadcast %cst_42 : f32 to vector<16x1xf32>
    %91 = arith.divf %89, %90 : vector<16x1xf32>
    %92 = arith.subf %86, %91 : vector<16x1xf32>
    %93 = vector.broadcast %92 : vector<16x1xf32> to vector<16x16xf32>
    %94 = arith.mulf %93, %24 : vector<16x16xf32>
    %cst_43 = arith.constant dense<0.000000e+00> : vector<1x16xf32>
    %95 = tpu.matmul %25, %94, %cst_43 {dimension_numbers = #tpu.dot_dimension_numbers<[1], [0], [0], [1], [0, 0, 1, 1], [], []>} : vector<1x16xf32>, vector<16x16xf32>, vector<1x16xf32> -> vector<1x16xf32>
    %96 = vector.broadcast %95 : vector<1x16xf32> to vector<16x16xf32>
    %97 = vector.broadcast %92 : vector<16x1xf32> to vector<16x16xf32>
    %98 = arith.cmpf ogt, %96, %97 : vector<16x16xf32>
    %99 = vector.broadcast %95 : vector<1x16xf32> to vector<16x16xf32>
    %100 = vector.broadcast %92 : vector<16x1xf32> to vector<16x16xf32>
    %101 = arith.cmpf oeq, %99, %100 : vector<16x16xf32>
    %102 = arith.cmpi slt, %20, %19 : vector<16x16xi32>
    %103 = arith.andi %101, %102 : vector<16x16xi1>
    %104 = arith.ori %98, %103 : vector<16x16xi1>
    %cst_44 = arith.constant 1.000000e+00 : f32
    %cst_45 = arith.constant 0.000000e+00 : f32
    %105 = vector.broadcast %cst_44 : f32 to vector<16x16xf32>
    %106 = vector.broadcast %cst_45 : f32 to vector<16x16xf32>
    %107 = arith.select %104, %105, %106 : vector<16x16xi1>, vector<16x16xf32>
    %cst_46 = arith.constant dense<0.000000e+00> : vector<16xf32>
    %108 = vector.multi_reduction <add>, %107, %cst_46 [1] : vector<16x16xf32> to vector<16xf32>
    %109 = vector.shape_cast %108 : vector<16xf32> to vector<16x1xf32>
    %cst_47 = arith.constant 1.500000e+01 : f32
    %110 = vector.broadcast %cst_47 : f32 to vector<16x1xf32>
    %111 = arith.cmpf olt, %109, %110 : vector<16x1xf32>
    %cst_48 = arith.constant 0.353553385 : f32
    %112 = vector.broadcast %cst_48 : f32 to vector<16x16xf32>
    %113 = arith.mulf %82, %112 : vector<16x16xf32>
    %cst_49 = arith.constant dense<0xFF800000> : vector<16xf32>
    %114 = vector.multi_reduction <maximumf>, %113, %cst_49 [1] : vector<16x16xf32> to vector<16xf32>
    %115 = vector.shape_cast %114 : vector<16xf32> to vector<16x1xf32>
    %116 = vector.broadcast %115 : vector<16x1xf32> to vector<16x16xf32>
    %117 = arith.subf %113, %116 : vector<16x16xf32>
    %118 = math.exp %117 : vector<16x16xf32>
    %cst_50 = arith.constant dense<0.000000e+00> : vector<16xf32>
    %119 = vector.multi_reduction <add>, %118, %cst_50 [1] : vector<16x16xf32> to vector<16xf32>
    %120 = vector.shape_cast %119 : vector<16xf32> to vector<16x1xf32>
    %121 = vector.broadcast %120 : vector<16x1xf32> to vector<16x16xf32>
    %122 = arith.divf %118, %121 : vector<16x16xf32>
    %cst_51 = arith.constant dense<0.000000e+00> : vector<16x8xf32>
    %123 = tpu.matmul %122, %81, %cst_51 {dimension_numbers = #tpu.dot_dimension_numbers<[1], [0], [0], [1], [0, 0, 1, 1], [], []>} : vector<16x16xf32>, vector<16x8xf32>, vector<16x8xf32> -> vector<16x8xf32>
    %124 = vector.extract_strided_slice %18 {offsets = [0, 8], sizes = [16, 8], strides = [1, 1]} : vector<16x32xf32> to vector<16x8xf32>
    %125 = vector.shape_cast %111 : vector<16x1xi1> to vector<16x1xi1>
    %126 = vector.broadcast %125 : vector<16x1xi1> to vector<16x8xi1>
    %127 = arith.select %126, %123, %124 : vector<16x8xi1>, vector<16x8xf32>
    %128 = vector.extract_strided_slice %8 {offsets = [8, 0], sizes = [8, 32], strides = [1, 1]} : vector<32x32xf32> to vector<8x32xf32>
    %cst_52 = arith.constant dense<0.000000e+00> : vector<16x32xf32>
    %129 = tpu.matmul %127, %128, %cst_52 {dimension_numbers = #tpu.dot_dimension_numbers<[1], [0], [0], [1], [0, 0, 1, 1], [], []>} : vector<16x8xf32>, vector<8x32xf32>, vector<16x32xf32> -> vector<16x32xf32>
    %130 = arith.addf %78, %129 : vector<16x32xf32>
    %131 = vector.extract_strided_slice %14 {offsets = [0, 16], sizes = [16, 8], strides = [1, 1]} : vector<16x32xf32> to vector<16x8xf32>
    %132 = vector.extract_strided_slice %15 {offsets = [0, 16], sizes = [16, 8], strides = [1, 1]} : vector<16x32xf32> to vector<16x8xf32>
    %133 = vector.extract_strided_slice %16 {offsets = [0, 16], sizes = [16, 8], strides = [1, 1]} : vector<16x32xf32> to vector<16x8xf32>
    %cst_53 = arith.constant dense<0.000000e+00> : vector<16x16xf32>
    %134 = tpu.matmul %131, %132, %cst_53 {dimension_numbers = #tpu.dot_dimension_numbers<[1], [1], [0], [0], [0, 0, 1, 0], [], []>} : vector<16x8xf32>, vector<16x8xf32>, vector<16x16xf32> -> vector<16x16xf32>
    %cst_54 = arith.constant -1.000000e+30 : f32
    %135 = vector.broadcast %cst_54 : f32 to vector<16x16xf32>
    %136 = arith.select %27, %134, %135 : vector<16x16xi1>, vector<16x16xf32>
    %cst_55 = arith.constant dense<0xFF800000> : vector<16xf32>
    %137 = vector.multi_reduction <maximumf>, %136, %cst_55 [1] : vector<16x16xf32> to vector<16xf32>
    %138 = vector.shape_cast %137 : vector<16xf32> to vector<16x1xf32>
    %139 = arith.mulf %134, %10 : vector<16x16xf32>
    %cst_56 = arith.constant dense<0.000000e+00> : vector<16xf32>
    %140 = vector.multi_reduction <add>, %139, %cst_56 [1] : vector<16x16xf32> to vector<16xf32>
    %141 = vector.shape_cast %140 : vector<16xf32> to vector<16x1xf32>
    %cst_57 = arith.constant 1.600000e+01 : f32
    %142 = vector.broadcast %cst_57 : f32 to vector<16x1xf32>
    %143 = arith.divf %141, %142 : vector<16x1xf32>
    %144 = arith.subf %138, %143 : vector<16x1xf32>
    %145 = vector.broadcast %144 : vector<16x1xf32> to vector<16x16xf32>
    %146 = arith.mulf %145, %24 : vector<16x16xf32>
    %cst_58 = arith.constant dense<0.000000e+00> : vector<1x16xf32>
    %147 = tpu.matmul %25, %146, %cst_58 {dimension_numbers = #tpu.dot_dimension_numbers<[1], [0], [0], [1], [0, 0, 1, 1], [], []>} : vector<1x16xf32>, vector<16x16xf32>, vector<1x16xf32> -> vector<1x16xf32>
    %148 = vector.broadcast %147 : vector<1x16xf32> to vector<16x16xf32>
    %149 = vector.broadcast %144 : vector<16x1xf32> to vector<16x16xf32>
    %150 = arith.cmpf ogt, %148, %149 : vector<16x16xf32>
    %151 = vector.broadcast %147 : vector<1x16xf32> to vector<16x16xf32>
    %152 = vector.broadcast %144 : vector<16x1xf32> to vector<16x16xf32>
    %153 = arith.cmpf oeq, %151, %152 : vector<16x16xf32>
    %154 = arith.cmpi slt, %20, %19 : vector<16x16xi32>
    %155 = arith.andi %153, %154 : vector<16x16xi1>
    %156 = arith.ori %150, %155 : vector<16x16xi1>
    %cst_59 = arith.constant 1.000000e+00 : f32
    %cst_60 = arith.constant 0.000000e+00 : f32
    %157 = vector.broadcast %cst_59 : f32 to vector<16x16xf32>
    %158 = vector.broadcast %cst_60 : f32 to vector<16x16xf32>
    %159 = arith.select %156, %157, %158 : vector<16x16xi1>, vector<16x16xf32>
    %cst_61 = arith.constant dense<0.000000e+00> : vector<16xf32>
    %160 = vector.multi_reduction <add>, %159, %cst_61 [1] : vector<16x16xf32> to vector<16xf32>
    %161 = vector.shape_cast %160 : vector<16xf32> to vector<16x1xf32>
    %cst_62 = arith.constant 1.500000e+01 : f32
    %162 = vector.broadcast %cst_62 : f32 to vector<16x1xf32>
    %163 = arith.cmpf olt, %161, %162 : vector<16x1xf32>
    %cst_63 = arith.constant 0.353553385 : f32
    %164 = vector.broadcast %cst_63 : f32 to vector<16x16xf32>
    %165 = arith.mulf %134, %164 : vector<16x16xf32>
    %cst_64 = arith.constant dense<0xFF800000> : vector<16xf32>
    %166 = vector.multi_reduction <maximumf>, %165, %cst_64 [1] : vector<16x16xf32> to vector<16xf32>
    %167 = vector.shape_cast %166 : vector<16xf32> to vector<16x1xf32>
    %168 = vector.broadcast %167 : vector<16x1xf32> to vector<16x16xf32>
    %169 = arith.subf %165, %168 : vector<16x16xf32>
    %170 = math.exp %169 : vector<16x16xf32>
    %cst_65 = arith.constant dense<0.000000e+00> : vector<16xf32>
    %171 = vector.multi_reduction <add>, %170, %cst_65 [1] : vector<16x16xf32> to vector<16xf32>
    %172 = vector.shape_cast %171 : vector<16xf32> to vector<16x1xf32>
    %173 = vector.broadcast %172 : vector<16x1xf32> to vector<16x16xf32>
    %174 = arith.divf %170, %173 : vector<16x16xf32>
    %cst_66 = arith.constant dense<0.000000e+00> : vector<16x8xf32>
    %175 = tpu.matmul %174, %133, %cst_66 {dimension_numbers = #tpu.dot_dimension_numbers<[1], [0], [0], [1], [0, 0, 1, 1], [], []>} : vector<16x16xf32>, vector<16x8xf32>, vector<16x8xf32> -> vector<16x8xf32>
    %176 = vector.extract_strided_slice %18 {offsets = [0, 16], sizes = [16, 8], strides = [1, 1]} : vector<16x32xf32> to vector<16x8xf32>
    %177 = vector.shape_cast %163 : vector<16x1xi1> to vector<16x1xi1>
    %178 = vector.broadcast %177 : vector<16x1xi1> to vector<16x8xi1>
    %179 = arith.select %178, %175, %176 : vector<16x8xi1>, vector<16x8xf32>
    %180 = vector.extract_strided_slice %8 {offsets = [16, 0], sizes = [8, 32], strides = [1, 1]} : vector<32x32xf32> to vector<8x32xf32>
    %cst_67 = arith.constant dense<0.000000e+00> : vector<16x32xf32>
    %181 = tpu.matmul %179, %180, %cst_67 {dimension_numbers = #tpu.dot_dimension_numbers<[1], [0], [0], [1], [0, 0, 1, 1], [], []>} : vector<16x8xf32>, vector<8x32xf32>, vector<16x32xf32> -> vector<16x32xf32>
    %182 = arith.addf %130, %181 : vector<16x32xf32>
    %183 = vector.extract_strided_slice %14 {offsets = [0, 24], sizes = [16, 8], strides = [1, 1]} : vector<16x32xf32> to vector<16x8xf32>
    %184 = vector.extract_strided_slice %15 {offsets = [0, 24], sizes = [16, 8], strides = [1, 1]} : vector<16x32xf32> to vector<16x8xf32>
    %185 = vector.extract_strided_slice %16 {offsets = [0, 24], sizes = [16, 8], strides = [1, 1]} : vector<16x32xf32> to vector<16x8xf32>
    %cst_68 = arith.constant dense<0.000000e+00> : vector<16x16xf32>
    %186 = tpu.matmul %183, %184, %cst_68 {dimension_numbers = #tpu.dot_dimension_numbers<[1], [1], [0], [0], [0, 0, 1, 0], [], []>} : vector<16x8xf32>, vector<16x8xf32>, vector<16x16xf32> -> vector<16x16xf32>
    %cst_69 = arith.constant -1.000000e+30 : f32
    %187 = vector.broadcast %cst_69 : f32 to vector<16x16xf32>
    %188 = arith.select %27, %186, %187 : vector<16x16xi1>, vector<16x16xf32>
    %cst_70 = arith.constant dense<0xFF800000> : vector<16xf32>
    %189 = vector.multi_reduction <maximumf>, %188, %cst_70 [1] : vector<16x16xf32> to vector<16xf32>
    %190 = vector.shape_cast %189 : vector<16xf32> to vector<16x1xf32>
    %191 = arith.mulf %186, %10 : vector<16x16xf32>
    %cst_71 = arith.constant dense<0.000000e+00> : vector<16xf32>
    %192 = vector.multi_reduction <add>, %191, %cst_71 [1] : vector<16x16xf32> to vector<16xf32>
    %193 = vector.shape_cast %192 : vector<16xf32> to vector<16x1xf32>
    %cst_72 = arith.constant 1.600000e+01 : f32
    %194 = vector.broadcast %cst_72 : f32 to vector<16x1xf32>
    %195 = arith.divf %193, %194 : vector<16x1xf32>
    %196 = arith.subf %190, %195 : vector<16x1xf32>
    %197 = vector.broadcast %196 : vector<16x1xf32> to vector<16x16xf32>
    %198 = arith.mulf %197, %24 : vector<16x16xf32>
    %cst_73 = arith.constant dense<0.000000e+00> : vector<1x16xf32>
    %199 = tpu.matmul %25, %198, %cst_73 {dimension_numbers = #tpu.dot_dimension_numbers<[1], [0], [0], [1], [0, 0, 1, 1], [], []>} : vector<1x16xf32>, vector<16x16xf32>, vector<1x16xf32> -> vector<1x16xf32>
    %200 = vector.broadcast %199 : vector<1x16xf32> to vector<16x16xf32>
    %201 = vector.broadcast %196 : vector<16x1xf32> to vector<16x16xf32>
    %202 = arith.cmpf ogt, %200, %201 : vector<16x16xf32>
    %203 = vector.broadcast %199 : vector<1x16xf32> to vector<16x16xf32>
    %204 = vector.broadcast %196 : vector<16x1xf32> to vector<16x16xf32>
    %205 = arith.cmpf oeq, %203, %204 : vector<16x16xf32>
    %206 = arith.cmpi slt, %20, %19 : vector<16x16xi32>
    %207 = arith.andi %205, %206 : vector<16x16xi1>
    %208 = arith.ori %202, %207 : vector<16x16xi1>
    %cst_74 = arith.constant 1.000000e+00 : f32
    %cst_75 = arith.constant 0.000000e+00 : f32
    %209 = vector.broadcast %cst_74 : f32 to vector<16x16xf32>
    %210 = vector.broadcast %cst_75 : f32 to vector<16x16xf32>
    %211 = arith.select %208, %209, %210 : vector<16x16xi1>, vector<16x16xf32>
    %cst_76 = arith.constant dense<0.000000e+00> : vector<16xf32>
    %212 = vector.multi_reduction <add>, %211, %cst_76 [1] : vector<16x16xf32> to vector<16xf32>
    %213 = vector.shape_cast %212 : vector<16xf32> to vector<16x1xf32>
    %cst_77 = arith.constant 1.500000e+01 : f32
    %214 = vector.broadcast %cst_77 : f32 to vector<16x1xf32>
    %215 = arith.cmpf olt, %213, %214 : vector<16x1xf32>
    %cst_78 = arith.constant 0.353553385 : f32
    %216 = vector.broadcast %cst_78 : f32 to vector<16x16xf32>
    %217 = arith.mulf %186, %216 : vector<16x16xf32>
    %cst_79 = arith.constant dense<0xFF800000> : vector<16xf32>
    %218 = vector.multi_reduction <maximumf>, %217, %cst_79 [1] : vector<16x16xf32> to vector<16xf32>
    %219 = vector.shape_cast %218 : vector<16xf32> to vector<16x1xf32>
    %220 = vector.broadcast %219 : vector<16x1xf32> to vector<16x16xf32>
    %221 = arith.subf %217, %220 : vector<16x16xf32>
    %222 = math.exp %221 : vector<16x16xf32>
    %cst_80 = arith.constant dense<0.000000e+00> : vector<16xf32>
    %223 = vector.multi_reduction <add>, %222, %cst_80 [1] : vector<16x16xf32> to vector<16xf32>
    %224 = vector.shape_cast %223 : vector<16xf32> to vector<16x1xf32>
    %225 = vector.broadcast %224 : vector<16x1xf32> to vector<16x16xf32>
    %226 = arith.divf %222, %225 : vector<16x16xf32>
    %cst_81 = arith.constant dense<0.000000e+00> : vector<16x8xf32>
    %227 = tpu.matmul %226, %185, %cst_81 {dimension_numbers = #tpu.dot_dimension_numbers<[1], [0], [0], [1], [0, 0, 1, 1], [], []>} : vector<16x16xf32>, vector<16x8xf32>, vector<16x8xf32> -> vector<16x8xf32>
    %228 = vector.extract_strided_slice %18 {offsets = [0, 24], sizes = [16, 8], strides = [1, 1]} : vector<16x32xf32> to vector<16x8xf32>
    %229 = vector.shape_cast %215 : vector<16x1xi1> to vector<16x1xi1>
    %230 = vector.broadcast %229 : vector<16x1xi1> to vector<16x8xi1>
    %231 = arith.select %230, %227, %228 : vector<16x8xi1>, vector<16x8xf32>
    %232 = vector.extract_strided_slice %8 {offsets = [24, 0], sizes = [8, 32], strides = [1, 1]} : vector<32x32xf32> to vector<8x32xf32>
    %cst_82 = arith.constant dense<0.000000e+00> : vector<16x32xf32>
    %233 = tpu.matmul %231, %232, %cst_82 {dimension_numbers = #tpu.dot_dimension_numbers<[1], [0], [0], [1], [0, 0, 1, 1], [], []>} : vector<16x8xf32>, vector<8x32xf32>, vector<16x32xf32> -> vector<16x32xf32>
    %234 = arith.addf %182, %233 : vector<16x32xf32>
    %235 = vector.broadcast %9 : vector<1x32xf32> to vector<16x32xf32>
    %236 = arith.addf %234, %235 : vector<16x32xf32>
    %237 = arith.addf %5, %236 : vector<16x32xf32>
    %c0_83 = arith.constant 0 : index
    %c0_84 = arith.constant 0 : index
    %238 = vector.load %arg11[%c0_83, %c0_84] : memref<1x32xf32, #tpu.memory_space<vmem>>, vector<1x32xf32>
    %c0_85 = arith.constant 0 : index
    %c0_86 = arith.constant 0 : index
    %239 = vector.load %arg12[%c0_85, %c0_86] : memref<1x32xf32, #tpu.memory_space<vmem>>, vector<1x32xf32>
    %cst_87 = arith.constant dense<0.000000e+00> : vector<16xf32>
    %240 = vector.multi_reduction <add>, %237, %cst_87 [1] : vector<16x32xf32> to vector<16xf32>
    %241 = vector.shape_cast %240 : vector<16xf32> to vector<16x1xf32>
    %cst_88 = arith.constant 3.200000e+01 : f32
    %242 = vector.broadcast %cst_88 : f32 to vector<16x1xf32>
    %243 = arith.divf %241, %242 : vector<16x1xf32>
    %244 = vector.broadcast %243 : vector<16x1xf32> to vector<16x32xf32>
    %245 = arith.subf %237, %244 : vector<16x32xf32>
    %246 = arith.mulf %245, %245 : vector<16x32xf32>
    %cst_89 = arith.constant dense<0.000000e+00> : vector<16xf32>
    %247 = vector.multi_reduction <add>, %246, %cst_89 [1] : vector<16x32xf32> to vector<16xf32>
    %248 = vector.shape_cast %247 : vector<16xf32> to vector<16x1xf32>
    %cst_90 = arith.constant 3.200000e+01 : f32
    %249 = vector.broadcast %cst_90 : f32 to vector<16x1xf32>
    %250 = arith.divf %248, %249 : vector<16x1xf32>
    %251 = vector.broadcast %243 : vector<16x1xf32> to vector<16x32xf32>
    %252 = arith.subf %237, %251 : vector<16x32xf32>
    %cst_91 = arith.constant 9.99999974E-6 : f32
    %253 = vector.broadcast %cst_91 : f32 to vector<16x1xf32>
    %254 = arith.addf %250, %253 : vector<16x1xf32>
    %255 = math.rsqrt %254 : vector<16x1xf32>
    %256 = vector.broadcast %255 : vector<16x1xf32> to vector<16x32xf32>
    %257 = arith.mulf %252, %256 : vector<16x32xf32>
    %258 = vector.broadcast %238 : vector<1x32xf32> to vector<16x32xf32>
    %259 = arith.mulf %257, %258 : vector<16x32xf32>
    %260 = vector.broadcast %239 : vector<1x32xf32> to vector<16x32xf32>
    %261 = arith.addf %259, %260 : vector<16x32xf32>
    %c0_92 = arith.constant 0 : index
    %c0_93 = arith.constant 0 : index
    %262 = vector.load %arg13[%c0_92, %c0_93] : memref<32x64xf32, #tpu.memory_space<vmem>>, vector<32x64xf32>
    %cst_94 = arith.constant dense<0.000000e+00> : vector<16x64xf32>
    %263 = tpu.matmul %261, %262, %cst_94 {dimension_numbers = #tpu.dot_dimension_numbers<[1], [0], [0], [1], [0, 0, 1, 1], [], []>} : vector<16x32xf32>, vector<32x64xf32>, vector<16x64xf32> -> vector<16x64xf32>
    %c0_95 = arith.constant 0 : index
    %c0_96 = arith.constant 0 : index
    %264 = vector.load %arg14[%c0_95, %c0_96] : memref<1x64xf32, #tpu.memory_space<vmem>>, vector<1x64xf32>
    %265 = vector.broadcast %264 : vector<1x64xf32> to vector<16x64xf32>
    %266 = arith.addf %263, %265 : vector<16x64xf32>
    %cst_97 = arith.constant 0.707106769 : f32
    %267 = vector.broadcast %cst_97 : f32 to vector<16x64xf32>
    %268 = arith.mulf %266, %267 : vector<16x64xf32>
    %269 = math.absf %268 : vector<16x64xf32>
    %cst_98 = arith.constant 0.327591091 : f32
    %270 = vector.broadcast %cst_98 : f32 to vector<16x64xf32>
    %271 = arith.mulf %270, %269 : vector<16x64xf32>
    %cst_99 = arith.constant 1.000000e+00 : f32
    %272 = vector.broadcast %cst_99 : f32 to vector<16x64xf32>
    %273 = arith.addf %272, %271 : vector<16x64xf32>
    %cst_100 = arith.constant 1.000000e+00 : f32
    %274 = vector.broadcast %cst_100 : f32 to vector<16x64xf32>
    %275 = arith.divf %274, %273 : vector<16x64xf32>
    %cst_101 = arith.constant 1.06140542 : f32
    %276 = vector.broadcast %cst_101 : f32 to vector<16x64xf32>
    %277 = arith.mulf %275, %276 : vector<16x64xf32>
    %cst_102 = arith.constant -1.45315206 : f32
    %278 = vector.broadcast %cst_102 : f32 to vector<16x64xf32>
    %279 = arith.addf %278, %277 : vector<16x64xf32>
    %280 = arith.mulf %275, %279 : vector<16x64xf32>
    %cst_103 = arith.constant 1.42141378 : f32
    %281 = vector.broadcast %cst_103 : f32 to vector<16x64xf32>
    %282 = arith.addf %281, %280 : vector<16x64xf32>
    %283 = arith.mulf %275, %282 : vector<16x64xf32>
    %cst_104 = arith.constant -0.284496725 : f32
    %284 = vector.broadcast %cst_104 : f32 to vector<16x64xf32>
    %285 = arith.addf %284, %283 : vector<16x64xf32>
    %286 = arith.mulf %275, %285 : vector<16x64xf32>
    %cst_105 = arith.constant 0.254829586 : f32
    %287 = vector.broadcast %cst_105 : f32 to vector<16x64xf32>
    %288 = arith.addf %287, %286 : vector<16x64xf32>
    %289 = arith.mulf %275, %288 : vector<16x64xf32>
    %290 = arith.mulf %269, %269 : vector<16x64xf32>
    %cst_106 = arith.constant 0.000000e+00 : f32
    %291 = vector.broadcast %cst_106 : f32 to vector<16x64xf32>
    %292 = arith.subf %291, %290 : vector<16x64xf32>
    %293 = math.exp %292 : vector<16x64xf32>
    %294 = arith.mulf %289, %293 : vector<16x64xf32>
    %cst_107 = arith.constant 1.000000e+00 : f32
    %295 = vector.broadcast %cst_107 : f32 to vector<16x64xf32>
    %296 = arith.subf %295, %294 : vector<16x64xf32>
    %cst_108 = arith.constant 0.000000e+00 : f32
    %297 = vector.broadcast %cst_108 : f32 to vector<16x64xf32>
    %298 = arith.cmpf olt, %268, %297 : vector<16x64xf32>
    %cst_109 = arith.constant 0.000000e+00 : f32
    %299 = vector.broadcast %cst_109 : f32 to vector<16x64xf32>
    %300 = arith.subf %299, %296 : vector<16x64xf32>
    %301 = arith.select %298, %300, %296 : vector<16x64xi1>, vector<16x64xf32>
    %cst_110 = arith.constant 5.000000e-01 : f32
    %302 = vector.broadcast %cst_110 : f32 to vector<16x64xf32>
    %303 = arith.mulf %302, %266 : vector<16x64xf32>
    %cst_111 = arith.constant 1.000000e+00 : f32
    %304 = vector.broadcast %cst_111 : f32 to vector<16x64xf32>
    %305 = arith.addf %304, %301 : vector<16x64xf32>
    %306 = arith.mulf %303, %305 : vector<16x64xf32>
    %c0_112 = arith.constant 0 : index
    %c0_113 = arith.constant 0 : index
    %307 = vector.load %arg15[%c0_112, %c0_113] : memref<64x32xf32, #tpu.memory_space<vmem>>, vector<64x32xf32>
    %cst_114 = arith.constant dense<0.000000e+00> : vector<16x32xf32>
    %308 = tpu.matmul %306, %307, %cst_114 {dimension_numbers = #tpu.dot_dimension_numbers<[1], [0], [0], [1], [0, 0, 1, 1], [], []>} : vector<16x64xf32>, vector<64x32xf32>, vector<16x32xf32> -> vector<16x32xf32>
    %c0_115 = arith.constant 0 : index
    %c0_116 = arith.constant 0 : index
    %309 = vector.load %arg16[%c0_115, %c0_116] : memref<1x32xf32, #tpu.memory_space<vmem>>, vector<1x32xf32>
    %310 = vector.broadcast %309 : vector<1x32xf32> to vector<16x32xf32>
    %311 = arith.addf %308, %310 : vector<16x32xf32>
    %312 = arith.addf %261, %311 : vector<16x32xf32>
    %c0_117 = arith.constant 0 : index
    %c0_118 = arith.constant 0 : index
    %313 = vector.load %arg17[%c0_117, %c0_118] : memref<1x32xf32, #tpu.memory_space<vmem>>, vector<1x32xf32>
    %c0_119 = arith.constant 0 : index
    %c0_120 = arith.constant 0 : index
    %314 = vector.load %arg18[%c0_119, %c0_120] : memref<1x32xf32, #tpu.memory_space<vmem>>, vector<1x32xf32>
    %cst_121 = arith.constant dense<0.000000e+00> : vector<16xf32>
    %315 = vector.multi_reduction <add>, %312, %cst_121 [1] : vector<16x32xf32> to vector<16xf32>
    %316 = vector.shape_cast %315 : vector<16xf32> to vector<16x1xf32>
    %cst_122 = arith.constant 3.200000e+01 : f32
    %317 = vector.broadcast %cst_122 : f32 to vector<16x1xf32>
    %318 = arith.divf %316, %317 : vector<16x1xf32>
    %319 = vector.broadcast %318 : vector<16x1xf32> to vector<16x32xf32>
    %320 = arith.subf %312, %319 : vector<16x32xf32>
    %321 = arith.mulf %320, %320 : vector<16x32xf32>
    %cst_123 = arith.constant dense<0.000000e+00> : vector<16xf32>
    %322 = vector.multi_reduction <add>, %321, %cst_123 [1] : vector<16x32xf32> to vector<16xf32>
    %323 = vector.shape_cast %322 : vector<16xf32> to vector<16x1xf32>
    %cst_124 = arith.constant 3.200000e+01 : f32
    %324 = vector.broadcast %cst_124 : f32 to vector<16x1xf32>
    %325 = arith.divf %323, %324 : vector<16x1xf32>
    %326 = vector.broadcast %318 : vector<16x1xf32> to vector<16x32xf32>
    %327 = arith.subf %312, %326 : vector<16x32xf32>
    %cst_125 = arith.constant 9.99999974E-6 : f32
    %328 = vector.broadcast %cst_125 : f32 to vector<16x1xf32>
    %329 = arith.addf %325, %328 : vector<16x1xf32>
    %330 = math.rsqrt %329 : vector<16x1xf32>
    %331 = vector.broadcast %330 : vector<16x1xf32> to vector<16x32xf32>
    %332 = arith.mulf %327, %331 : vector<16x32xf32>
    %333 = vector.broadcast %313 : vector<1x32xf32> to vector<16x32xf32>
    %334 = arith.mulf %332, %333 : vector<16x32xf32>
    %335 = vector.broadcast %314 : vector<1x32xf32> to vector<16x32xf32>
    %336 = arith.addf %334, %335 : vector<16x32xf32>
    %c0_126 = arith.constant 0 : index
    %c0_127 = arith.constant 0 : index
    %337 = vector.load %arg20[%c0_126, %c0_127] : memref<32x96xf32, #tpu.memory_space<vmem>>, vector<32x96xf32>
    %c0_128 = arith.constant 0 : index
    %c0_129 = arith.constant 0 : index
    %338 = vector.load %arg21[%c0_128, %c0_129] : memref<1x96xf32, #tpu.memory_space<vmem>>, vector<1x96xf32>
    %c0_130 = arith.constant 0 : index
    %c0_131 = arith.constant 0 : index
    %339 = vector.load %arg22[%c0_130, %c0_131] : memref<32x32xf32, #tpu.memory_space<vmem>>, vector<32x32xf32>
    %c0_132 = arith.constant 0 : index
    %c0_133 = arith.constant 0 : index
    %340 = vector.load %arg23[%c0_132, %c0_133] : memref<1x32xf32, #tpu.memory_space<vmem>>, vector<1x32xf32>
    %c0_134 = arith.constant 0 : index
    %c0_135 = arith.constant 0 : index
    %341 = vector.load %arg19[%c0_134, %c0_135] : memref<16x16xf32, #tpu.memory_space<vmem>>, vector<16x16xf32>
    %cst_136 = arith.constant dense<0.000000e+00> : vector<16x96xf32>
    %342 = tpu.matmul %336, %337, %cst_136 {dimension_numbers = #tpu.dot_dimension_numbers<[1], [0], [0], [1], [0, 0, 1, 1], [], []>} : vector<16x32xf32>, vector<32x96xf32>, vector<16x96xf32> -> vector<16x96xf32>
    %343 = vector.broadcast %338 : vector<1x96xf32> to vector<16x96xf32>
    %344 = arith.addf %342, %343 : vector<16x96xf32>
    %345 = vector.extract_strided_slice %344 {offsets = [0, 0], sizes = [16, 32], strides = [1, 1]} : vector<16x96xf32> to vector<16x32xf32>
    %346 = vector.extract_strided_slice %344 {offsets = [0, 32], sizes = [16, 32], strides = [1, 1]} : vector<16x96xf32> to vector<16x32xf32>
    %347 = vector.extract_strided_slice %344 {offsets = [0, 64], sizes = [16, 32], strides = [1, 1]} : vector<16x96xf32> to vector<16x32xf32>
    %cst_137 = arith.constant 6.250000e-02 : f32
    %348 = vector.broadcast %cst_137 : f32 to vector<16x16xf32>
    %cst_138 = arith.constant dense<0.000000e+00> : vector<16x32xf32>
    %349 = tpu.matmul %348, %347, %cst_138 {dimension_numbers = #tpu.dot_dimension_numbers<[1], [0], [0], [1], [0, 0, 1, 1], [], []>} : vector<16x16xf32>, vector<16x32xf32>, vector<16x32xf32> -> vector<16x32xf32>
    %350 = tpu.iota {dimensions = array<i32: 0>} : vector<16x16xi32>
    %351 = tpu.iota {dimensions = array<i32: 1>} : vector<16x16xi32>
    %352 = arith.cmpi eq, %350, %351 : vector<16x16xi32>
    %cst_139 = arith.constant 1.000000e+00 : f32
    %cst_140 = arith.constant 0.000000e+00 : f32
    %353 = vector.broadcast %cst_139 : f32 to vector<16x16xf32>
    %354 = vector.broadcast %cst_140 : f32 to vector<16x16xf32>
    %355 = arith.select %352, %353, %354 : vector<16x16xi1>, vector<16x16xf32>
    %cst_141 = arith.constant 1.000000e+00 : f32
    %356 = vector.broadcast %cst_141 : f32 to vector<1x16xf32>
    %cst_142 = arith.constant 0.000000e+00 : f32
    %357 = vector.broadcast %cst_142 : f32 to vector<16x16xf32>
    %358 = arith.cmpf ogt, %341, %357 : vector<16x16xf32>
    %359 = vector.extract_strided_slice %345 {offsets = [0, 0], sizes = [16, 8], strides = [1, 1]} : vector<16x32xf32> to vector<16x8xf32>
    %360 = vector.extract_strided_slice %346 {offsets = [0, 0], sizes = [16, 8], strides = [1, 1]} : vector<16x32xf32> to vector<16x8xf32>
    %361 = vector.extract_strided_slice %347 {offsets = [0, 0], sizes = [16, 8], strides = [1, 1]} : vector<16x32xf32> to vector<16x8xf32>
    %cst_143 = arith.constant dense<0.000000e+00> : vector<16x16xf32>
    %362 = tpu.matmul %359, %360, %cst_143 {dimension_numbers = #tpu.dot_dimension_numbers<[1], [1], [0], [0], [0, 0, 1, 0], [], []>} : vector<16x8xf32>, vector<16x8xf32>, vector<16x16xf32> -> vector<16x16xf32>
    %cst_144 = arith.constant -1.000000e+30 : f32
    %363 = vector.broadcast %cst_144 : f32 to vector<16x16xf32>
    %364 = arith.select %358, %362, %363 : vector<16x16xi1>, vector<16x16xf32>
    %cst_145 = arith.constant dense<0xFF800000> : vector<16xf32>
    %365 = vector.multi_reduction <maximumf>, %364, %cst_145 [1] : vector<16x16xf32> to vector<16xf32>
    %366 = vector.shape_cast %365 : vector<16xf32> to vector<16x1xf32>
    %367 = arith.mulf %362, %341 : vector<16x16xf32>
    %cst_146 = arith.constant dense<0.000000e+00> : vector<16xf32>
    %368 = vector.multi_reduction <add>, %367, %cst_146 [1] : vector<16x16xf32> to vector<16xf32>
    %369 = vector.shape_cast %368 : vector<16xf32> to vector<16x1xf32>
    %cst_147 = arith.constant 1.600000e+01 : f32
    %370 = vector.broadcast %cst_147 : f32 to vector<16x1xf32>
    %371 = arith.divf %369, %370 : vector<16x1xf32>
    %372 = arith.subf %366, %371 : vector<16x1xf32>
    %373 = vector.broadcast %372 : vector<16x1xf32> to vector<16x16xf32>
    %374 = arith.mulf %373, %355 : vector<16x16xf32>
    %cst_148 = arith.constant dense<0.000000e+00> : vector<1x16xf32>
    %375 = tpu.matmul %356, %374, %cst_148 {dimension_numbers = #tpu.dot_dimension_numbers<[1], [0], [0], [1], [0, 0, 1, 1], [], []>} : vector<1x16xf32>, vector<16x16xf32>, vector<1x16xf32> -> vector<1x16xf32>
    %376 = vector.broadcast %375 : vector<1x16xf32> to vector<16x16xf32>
    %377 = vector.broadcast %372 : vector<16x1xf32> to vector<16x16xf32>
    %378 = arith.cmpf ogt, %376, %377 : vector<16x16xf32>
    %379 = vector.broadcast %375 : vector<1x16xf32> to vector<16x16xf32>
    %380 = vector.broadcast %372 : vector<16x1xf32> to vector<16x16xf32>
    %381 = arith.cmpf oeq, %379, %380 : vector<16x16xf32>
    %382 = arith.cmpi slt, %351, %350 : vector<16x16xi32>
    %383 = arith.andi %381, %382 : vector<16x16xi1>
    %384 = arith.ori %378, %383 : vector<16x16xi1>
    %cst_149 = arith.constant 1.000000e+00 : f32
    %cst_150 = arith.constant 0.000000e+00 : f32
    %385 = vector.broadcast %cst_149 : f32 to vector<16x16xf32>
    %386 = vector.broadcast %cst_150 : f32 to vector<16x16xf32>
    %387 = arith.select %384, %385, %386 : vector<16x16xi1>, vector<16x16xf32>
    %cst_151 = arith.constant dense<0.000000e+00> : vector<16xf32>
    %388 = vector.multi_reduction <add>, %387, %cst_151 [1] : vector<16x16xf32> to vector<16xf32>
    %389 = vector.shape_cast %388 : vector<16xf32> to vector<16x1xf32>
    %cst_152 = arith.constant 1.500000e+01 : f32
    %390 = vector.broadcast %cst_152 : f32 to vector<16x1xf32>
    %391 = arith.cmpf olt, %389, %390 : vector<16x1xf32>
    %cst_153 = arith.constant 0.353553385 : f32
    %392 = vector.broadcast %cst_153 : f32 to vector<16x16xf32>
    %393 = arith.mulf %362, %392 : vector<16x16xf32>
    %cst_154 = arith.constant dense<0xFF800000> : vector<16xf32>
    %394 = vector.multi_reduction <maximumf>, %393, %cst_154 [1] : vector<16x16xf32> to vector<16xf32>
    %395 = vector.shape_cast %394 : vector<16xf32> to vector<16x1xf32>
    %396 = vector.broadcast %395 : vector<16x1xf32> to vector<16x16xf32>
    %397 = arith.subf %393, %396 : vector<16x16xf32>
    %398 = math.exp %397 : vector<16x16xf32>
    %cst_155 = arith.constant dense<0.000000e+00> : vector<16xf32>
    %399 = vector.multi_reduction <add>, %398, %cst_155 [1] : vector<16x16xf32> to vector<16xf32>
    %400 = vector.shape_cast %399 : vector<16xf32> to vector<16x1xf32>
    %401 = vector.broadcast %400 : vector<16x1xf32> to vector<16x16xf32>
    %402 = arith.divf %398, %401 : vector<16x16xf32>
    %cst_156 = arith.constant dense<0.000000e+00> : vector<16x8xf32>
    %403 = tpu.matmul %402, %361, %cst_156 {dimension_numbers = #tpu.dot_dimension_numbers<[1], [0], [0], [1], [0, 0, 1, 1], [], []>} : vector<16x16xf32>, vector<16x8xf32>, vector<16x8xf32> -> vector<16x8xf32>
    %404 = vector.extract_strided_slice %349 {offsets = [0, 0], sizes = [16, 8], strides = [1, 1]} : vector<16x32xf32> to vector<16x8xf32>
    %405 = vector.shape_cast %391 : vector<16x1xi1> to vector<16x1xi1>
    %406 = vector.broadcast %405 : vector<16x1xi1> to vector<16x8xi1>
    %407 = arith.select %406, %403, %404 : vector<16x8xi1>, vector<16x8xf32>
    %408 = vector.extract_strided_slice %339 {offsets = [0, 0], sizes = [8, 32], strides = [1, 1]} : vector<32x32xf32> to vector<8x32xf32>
    %cst_157 = arith.constant dense<0.000000e+00> : vector<16x32xf32>
    %409 = tpu.matmul %407, %408, %cst_157 {dimension_numbers = #tpu.dot_dimension_numbers<[1], [0], [0], [1], [0, 0, 1, 1], [], []>} : vector<16x8xf32>, vector<8x32xf32>, vector<16x32xf32> -> vector<16x32xf32>
    %410 = vector.extract_strided_slice %345 {offsets = [0, 8], sizes = [16, 8], strides = [1, 1]} : vector<16x32xf32> to vector<16x8xf32>
    %411 = vector.extract_strided_slice %346 {offsets = [0, 8], sizes = [16, 8], strides = [1, 1]} : vector<16x32xf32> to vector<16x8xf32>
    %412 = vector.extract_strided_slice %347 {offsets = [0, 8], sizes = [16, 8], strides = [1, 1]} : vector<16x32xf32> to vector<16x8xf32>
    %cst_158 = arith.constant dense<0.000000e+00> : vector<16x16xf32>
    %413 = tpu.matmul %410, %411, %cst_158 {dimension_numbers = #tpu.dot_dimension_numbers<[1], [1], [0], [0], [0, 0, 1, 0], [], []>} : vector<16x8xf32>, vector<16x8xf32>, vector<16x16xf32> -> vector<16x16xf32>
    %cst_159 = arith.constant -1.000000e+30 : f32
    %414 = vector.broadcast %cst_159 : f32 to vector<16x16xf32>
    %415 = arith.select %358, %413, %414 : vector<16x16xi1>, vector<16x16xf32>
    %cst_160 = arith.constant dense<0xFF800000> : vector<16xf32>
    %416 = vector.multi_reduction <maximumf>, %415, %cst_160 [1] : vector<16x16xf32> to vector<16xf32>
    %417 = vector.shape_cast %416 : vector<16xf32> to vector<16x1xf32>
    %418 = arith.mulf %413, %341 : vector<16x16xf32>
    %cst_161 = arith.constant dense<0.000000e+00> : vector<16xf32>
    %419 = vector.multi_reduction <add>, %418, %cst_161 [1] : vector<16x16xf32> to vector<16xf32>
    %420 = vector.shape_cast %419 : vector<16xf32> to vector<16x1xf32>
    %cst_162 = arith.constant 1.600000e+01 : f32
    %421 = vector.broadcast %cst_162 : f32 to vector<16x1xf32>
    %422 = arith.divf %420, %421 : vector<16x1xf32>
    %423 = arith.subf %417, %422 : vector<16x1xf32>
    %424 = vector.broadcast %423 : vector<16x1xf32> to vector<16x16xf32>
    %425 = arith.mulf %424, %355 : vector<16x16xf32>
    %cst_163 = arith.constant dense<0.000000e+00> : vector<1x16xf32>
    %426 = tpu.matmul %356, %425, %cst_163 {dimension_numbers = #tpu.dot_dimension_numbers<[1], [0], [0], [1], [0, 0, 1, 1], [], []>} : vector<1x16xf32>, vector<16x16xf32>, vector<1x16xf32> -> vector<1x16xf32>
    %427 = vector.broadcast %426 : vector<1x16xf32> to vector<16x16xf32>
    %428 = vector.broadcast %423 : vector<16x1xf32> to vector<16x16xf32>
    %429 = arith.cmpf ogt, %427, %428 : vector<16x16xf32>
    %430 = vector.broadcast %426 : vector<1x16xf32> to vector<16x16xf32>
    %431 = vector.broadcast %423 : vector<16x1xf32> to vector<16x16xf32>
    %432 = arith.cmpf oeq, %430, %431 : vector<16x16xf32>
    %433 = arith.cmpi slt, %351, %350 : vector<16x16xi32>
    %434 = arith.andi %432, %433 : vector<16x16xi1>
    %435 = arith.ori %429, %434 : vector<16x16xi1>
    %cst_164 = arith.constant 1.000000e+00 : f32
    %cst_165 = arith.constant 0.000000e+00 : f32
    %436 = vector.broadcast %cst_164 : f32 to vector<16x16xf32>
    %437 = vector.broadcast %cst_165 : f32 to vector<16x16xf32>
    %438 = arith.select %435, %436, %437 : vector<16x16xi1>, vector<16x16xf32>
    %cst_166 = arith.constant dense<0.000000e+00> : vector<16xf32>
    %439 = vector.multi_reduction <add>, %438, %cst_166 [1] : vector<16x16xf32> to vector<16xf32>
    %440 = vector.shape_cast %439 : vector<16xf32> to vector<16x1xf32>
    %cst_167 = arith.constant 1.500000e+01 : f32
    %441 = vector.broadcast %cst_167 : f32 to vector<16x1xf32>
    %442 = arith.cmpf olt, %440, %441 : vector<16x1xf32>
    %cst_168 = arith.constant 0.353553385 : f32
    %443 = vector.broadcast %cst_168 : f32 to vector<16x16xf32>
    %444 = arith.mulf %413, %443 : vector<16x16xf32>
    %cst_169 = arith.constant dense<0xFF800000> : vector<16xf32>
    %445 = vector.multi_reduction <maximumf>, %444, %cst_169 [1] : vector<16x16xf32> to vector<16xf32>
    %446 = vector.shape_cast %445 : vector<16xf32> to vector<16x1xf32>
    %447 = vector.broadcast %446 : vector<16x1xf32> to vector<16x16xf32>
    %448 = arith.subf %444, %447 : vector<16x16xf32>
    %449 = math.exp %448 : vector<16x16xf32>
    %cst_170 = arith.constant dense<0.000000e+00> : vector<16xf32>
    %450 = vector.multi_reduction <add>, %449, %cst_170 [1] : vector<16x16xf32> to vector<16xf32>
    %451 = vector.shape_cast %450 : vector<16xf32> to vector<16x1xf32>
    %452 = vector.broadcast %451 : vector<16x1xf32> to vector<16x16xf32>
    %453 = arith.divf %449, %452 : vector<16x16xf32>
    %cst_171 = arith.constant dense<0.000000e+00> : vector<16x8xf32>
    %454 = tpu.matmul %453, %412, %cst_171 {dimension_numbers = #tpu.dot_dimension_numbers<[1], [0], [0], [1], [0, 0, 1, 1], [], []>} : vector<16x16xf32>, vector<16x8xf32>, vector<16x8xf32> -> vector<16x8xf32>
    %455 = vector.extract_strided_slice %349 {offsets = [0, 8], sizes = [16, 8], strides = [1, 1]} : vector<16x32xf32> to vector<16x8xf32>
    %456 = vector.shape_cast %442 : vector<16x1xi1> to vector<16x1xi1>
    %457 = vector.broadcast %456 : vector<16x1xi1> to vector<16x8xi1>
    %458 = arith.select %457, %454, %455 : vector<16x8xi1>, vector<16x8xf32>
    %459 = vector.extract_strided_slice %339 {offsets = [8, 0], sizes = [8, 32], strides = [1, 1]} : vector<32x32xf32> to vector<8x32xf32>
    %cst_172 = arith.constant dense<0.000000e+00> : vector<16x32xf32>
    %460 = tpu.matmul %458, %459, %cst_172 {dimension_numbers = #tpu.dot_dimension_numbers<[1], [0], [0], [1], [0, 0, 1, 1], [], []>} : vector<16x8xf32>, vector<8x32xf32>, vector<16x32xf32> -> vector<16x32xf32>
    %461 = arith.addf %409, %460 : vector<16x32xf32>
    %462 = vector.extract_strided_slice %345 {offsets = [0, 16], sizes = [16, 8], strides = [1, 1]} : vector<16x32xf32> to vector<16x8xf32>
    %463 = vector.extract_strided_slice %346 {offsets = [0, 16], sizes = [16, 8], strides = [1, 1]} : vector<16x32xf32> to vector<16x8xf32>
    %464 = vector.extract_strided_slice %347 {offsets = [0, 16], sizes = [16, 8], strides = [1, 1]} : vector<16x32xf32> to vector<16x8xf32>
    %cst_173 = arith.constant dense<0.000000e+00> : vector<16x16xf32>
    %465 = tpu.matmul %462, %463, %cst_173 {dimension_numbers = #tpu.dot_dimension_numbers<[1], [1], [0], [0], [0, 0, 1, 0], [], []>} : vector<16x8xf32>, vector<16x8xf32>, vector<16x16xf32> -> vector<16x16xf32>
    %cst_174 = arith.constant -1.000000e+30 : f32
    %466 = vector.broadcast %cst_174 : f32 to vector<16x16xf32>
    %467 = arith.select %358, %465, %466 : vector<16x16xi1>, vector<16x16xf32>
    %cst_175 = arith.constant dense<0xFF800000> : vector<16xf32>
    %468 = vector.multi_reduction <maximumf>, %467, %cst_175 [1] : vector<16x16xf32> to vector<16xf32>
    %469 = vector.shape_cast %468 : vector<16xf32> to vector<16x1xf32>
    %470 = arith.mulf %465, %341 : vector<16x16xf32>
    %cst_176 = arith.constant dense<0.000000e+00> : vector<16xf32>
    %471 = vector.multi_reduction <add>, %470, %cst_176 [1] : vector<16x16xf32> to vector<16xf32>
    %472 = vector.shape_cast %471 : vector<16xf32> to vector<16x1xf32>
    %cst_177 = arith.constant 1.600000e+01 : f32
    %473 = vector.broadcast %cst_177 : f32 to vector<16x1xf32>
    %474 = arith.divf %472, %473 : vector<16x1xf32>
    %475 = arith.subf %469, %474 : vector<16x1xf32>
    %476 = vector.broadcast %475 : vector<16x1xf32> to vector<16x16xf32>
    %477 = arith.mulf %476, %355 : vector<16x16xf32>
    %cst_178 = arith.constant dense<0.000000e+00> : vector<1x16xf32>
    %478 = tpu.matmul %356, %477, %cst_178 {dimension_numbers = #tpu.dot_dimension_numbers<[1], [0], [0], [1], [0, 0, 1, 1], [], []>} : vector<1x16xf32>, vector<16x16xf32>, vector<1x16xf32> -> vector<1x16xf32>
    %479 = vector.broadcast %478 : vector<1x16xf32> to vector<16x16xf32>
    %480 = vector.broadcast %475 : vector<16x1xf32> to vector<16x16xf32>
    %481 = arith.cmpf ogt, %479, %480 : vector<16x16xf32>
    %482 = vector.broadcast %478 : vector<1x16xf32> to vector<16x16xf32>
    %483 = vector.broadcast %475 : vector<16x1xf32> to vector<16x16xf32>
    %484 = arith.cmpf oeq, %482, %483 : vector<16x16xf32>
    %485 = arith.cmpi slt, %351, %350 : vector<16x16xi32>
    %486 = arith.andi %484, %485 : vector<16x16xi1>
    %487 = arith.ori %481, %486 : vector<16x16xi1>
    %cst_179 = arith.constant 1.000000e+00 : f32
    %cst_180 = arith.constant 0.000000e+00 : f32
    %488 = vector.broadcast %cst_179 : f32 to vector<16x16xf32>
    %489 = vector.broadcast %cst_180 : f32 to vector<16x16xf32>
    %490 = arith.select %487, %488, %489 : vector<16x16xi1>, vector<16x16xf32>
    %cst_181 = arith.constant dense<0.000000e+00> : vector<16xf32>
    %491 = vector.multi_reduction <add>, %490, %cst_181 [1] : vector<16x16xf32> to vector<16xf32>
    %492 = vector.shape_cast %491 : vector<16xf32> to vector<16x1xf32>
    %cst_182 = arith.constant 1.500000e+01 : f32
    %493 = vector.broadcast %cst_182 : f32 to vector<16x1xf32>
    %494 = arith.cmpf olt, %492, %493 : vector<16x1xf32>
    %cst_183 = arith.constant 0.353553385 : f32
    %495 = vector.broadcast %cst_183 : f32 to vector<16x16xf32>
    %496 = arith.mulf %465, %495 : vector<16x16xf32>
    %cst_184 = arith.constant dense<0xFF800000> : vector<16xf32>
    %497 = vector.multi_reduction <maximumf>, %496, %cst_184 [1] : vector<16x16xf32> to vector<16xf32>
    %498 = vector.shape_cast %497 : vector<16xf32> to vector<16x1xf32>
    %499 = vector.broadcast %498 : vector<16x1xf32> to vector<16x16xf32>
    %500 = arith.subf %496, %499 : vector<16x16xf32>
    %501 = math.exp %500 : vector<16x16xf32>
    %cst_185 = arith.constant dense<0.000000e+00> : vector<16xf32>
    %502 = vector.multi_reduction <add>, %501, %cst_185 [1] : vector<16x16xf32> to vector<16xf32>
    %503 = vector.shape_cast %502 : vector<16xf32> to vector<16x1xf32>
    %504 = vector.broadcast %503 : vector<16x1xf32> to vector<16x16xf32>
    %505 = arith.divf %501, %504 : vector<16x16xf32>
    %cst_186 = arith.constant dense<0.000000e+00> : vector<16x8xf32>
    %506 = tpu.matmul %505, %464, %cst_186 {dimension_numbers = #tpu.dot_dimension_numbers<[1], [0], [0], [1], [0, 0, 1, 1], [], []>} : vector<16x16xf32>, vector<16x8xf32>, vector<16x8xf32> -> vector<16x8xf32>
    %507 = vector.extract_strided_slice %349 {offsets = [0, 16], sizes = [16, 8], strides = [1, 1]} : vector<16x32xf32> to vector<16x8xf32>
    %508 = vector.shape_cast %494 : vector<16x1xi1> to vector<16x1xi1>
    %509 = vector.broadcast %508 : vector<16x1xi1> to vector<16x8xi1>
    %510 = arith.select %509, %506, %507 : vector<16x8xi1>, vector<16x8xf32>
    %511 = vector.extract_strided_slice %339 {offsets = [16, 0], sizes = [8, 32], strides = [1, 1]} : vector<32x32xf32> to vector<8x32xf32>
    %cst_187 = arith.constant dense<0.000000e+00> : vector<16x32xf32>
    %512 = tpu.matmul %510, %511, %cst_187 {dimension_numbers = #tpu.dot_dimension_numbers<[1], [0], [0], [1], [0, 0, 1, 1], [], []>} : vector<16x8xf32>, vector<8x32xf32>, vector<16x32xf32> -> vector<16x32xf32>
    %513 = arith.addf %461, %512 : vector<16x32xf32>
    %514 = vector.extract_strided_slice %345 {offsets = [0, 24], sizes = [16, 8], strides = [1, 1]} : vector<16x32xf32> to vector<16x8xf32>
    %515 = vector.extract_strided_slice %346 {offsets = [0, 24], sizes = [16, 8], strides = [1, 1]} : vector<16x32xf32> to vector<16x8xf32>
    %516 = vector.extract_strided_slice %347 {offsets = [0, 24], sizes = [16, 8], strides = [1, 1]} : vector<16x32xf32> to vector<16x8xf32>
    %cst_188 = arith.constant dense<0.000000e+00> : vector<16x16xf32>
    %517 = tpu.matmul %514, %515, %cst_188 {dimension_numbers = #tpu.dot_dimension_numbers<[1], [1], [0], [0], [0, 0, 1, 0], [], []>} : vector<16x8xf32>, vector<16x8xf32>, vector<16x16xf32> -> vector<16x16xf32>
    %cst_189 = arith.constant -1.000000e+30 : f32
    %518 = vector.broadcast %cst_189 : f32 to vector<16x16xf32>
    %519 = arith.select %358, %517, %518 : vector<16x16xi1>, vector<16x16xf32>
    %cst_190 = arith.constant dense<0xFF800000> : vector<16xf32>
    %520 = vector.multi_reduction <maximumf>, %519, %cst_190 [1] : vector<16x16xf32> to vector<16xf32>
    %521 = vector.shape_cast %520 : vector<16xf32> to vector<16x1xf32>
    %522 = arith.mulf %517, %341 : vector<16x16xf32>
    %cst_191 = arith.constant dense<0.000000e+00> : vector<16xf32>
    %523 = vector.multi_reduction <add>, %522, %cst_191 [1] : vector<16x16xf32> to vector<16xf32>
    %524 = vector.shape_cast %523 : vector<16xf32> to vector<16x1xf32>
    %cst_192 = arith.constant 1.600000e+01 : f32
    %525 = vector.broadcast %cst_192 : f32 to vector<16x1xf32>
    %526 = arith.divf %524, %525 : vector<16x1xf32>
    %527 = arith.subf %521, %526 : vector<16x1xf32>
    %528 = vector.broadcast %527 : vector<16x1xf32> to vector<16x16xf32>
    %529 = arith.mulf %528, %355 : vector<16x16xf32>
    %cst_193 = arith.constant dense<0.000000e+00> : vector<1x16xf32>
    %530 = tpu.matmul %356, %529, %cst_193 {dimension_numbers = #tpu.dot_dimension_numbers<[1], [0], [0], [1], [0, 0, 1, 1], [], []>} : vector<1x16xf32>, vector<16x16xf32>, vector<1x16xf32> -> vector<1x16xf32>
    %531 = vector.broadcast %530 : vector<1x16xf32> to vector<16x16xf32>
    %532 = vector.broadcast %527 : vector<16x1xf32> to vector<16x16xf32>
    %533 = arith.cmpf ogt, %531, %532 : vector<16x16xf32>
    %534 = vector.broadcast %530 : vector<1x16xf32> to vector<16x16xf32>
    %535 = vector.broadcast %527 : vector<16x1xf32> to vector<16x16xf32>
    %536 = arith.cmpf oeq, %534, %535 : vector<16x16xf32>
    %537 = arith.cmpi slt, %351, %350 : vector<16x16xi32>
    %538 = arith.andi %536, %537 : vector<16x16xi1>
    %539 = arith.ori %533, %538 : vector<16x16xi1>
    %cst_194 = arith.constant 1.000000e+00 : f32
    %cst_195 = arith.constant 0.000000e+00 : f32
    %540 = vector.broadcast %cst_194 : f32 to vector<16x16xf32>
    %541 = vector.broadcast %cst_195 : f32 to vector<16x16xf32>
    %542 = arith.select %539, %540, %541 : vector<16x16xi1>, vector<16x16xf32>
    %cst_196 = arith.constant dense<0.000000e+00> : vector<16xf32>
    %543 = vector.multi_reduction <add>, %542, %cst_196 [1] : vector<16x16xf32> to vector<16xf32>
    %544 = vector.shape_cast %543 : vector<16xf32> to vector<16x1xf32>
    %cst_197 = arith.constant 1.500000e+01 : f32
    %545 = vector.broadcast %cst_197 : f32 to vector<16x1xf32>
    %546 = arith.cmpf olt, %544, %545 : vector<16x1xf32>
    %cst_198 = arith.constant 0.353553385 : f32
    %547 = vector.broadcast %cst_198 : f32 to vector<16x16xf32>
    %548 = arith.mulf %517, %547 : vector<16x16xf32>
    %cst_199 = arith.constant dense<0xFF800000> : vector<16xf32>
    %549 = vector.multi_reduction <maximumf>, %548, %cst_199 [1] : vector<16x16xf32> to vector<16xf32>
    %550 = vector.shape_cast %549 : vector<16xf32> to vector<16x1xf32>
    %551 = vector.broadcast %550 : vector<16x1xf32> to vector<16x16xf32>
    %552 = arith.subf %548, %551 : vector<16x16xf32>
    %553 = math.exp %552 : vector<16x16xf32>
    %cst_200 = arith.constant dense<0.000000e+00> : vector<16xf32>
    %554 = vector.multi_reduction <add>, %553, %cst_200 [1] : vector<16x16xf32> to vector<16xf32>
    %555 = vector.shape_cast %554 : vector<16xf32> to vector<16x1xf32>
    %556 = vector.broadcast %555 : vector<16x1xf32> to vector<16x16xf32>
    %557 = arith.divf %553, %556 : vector<16x16xf32>
    %cst_201 = arith.constant dense<0.000000e+00> : vector<16x8xf32>
    %558 = tpu.matmul %557, %516, %cst_201 {dimension_numbers = #tpu.dot_dimension_numbers<[1], [0], [0], [1], [0, 0, 1, 1], [], []>} : vector<16x16xf32>, vector<16x8xf32>, vector<16x8xf32> -> vector<16x8xf32>
    %559 = vector.extract_strided_slice %349 {offsets = [0, 24], sizes = [16, 8], strides = [1, 1]} : vector<16x32xf32> to vector<16x8xf32>
    %560 = vector.shape_cast %546 : vector<16x1xi1> to vector<16x1xi1>
    %561 = vector.broadcast %560 : vector<16x1xi1> to vector<16x8xi1>
    %562 = arith.select %561, %558, %559 : vector<16x8xi1>, vector<16x8xf32>
    %563 = vector.extract_strided_slice %339 {offsets = [24, 0], sizes = [8, 32], strides = [1, 1]} : vector<32x32xf32> to vector<8x32xf32>
    %cst_202 = arith.constant dense<0.000000e+00> : vector<16x32xf32>
    %564 = tpu.matmul %562, %563, %cst_202 {dimension_numbers = #tpu.dot_dimension_numbers<[1], [0], [0], [1], [0, 0, 1, 1], [], []>} : vector<16x8xf32>, vector<8x32xf32>, vector<16x32xf32> -> vector<16x32xf32>
    %565 = arith.addf %513, %564 : vector<16x32xf32>
    %566 = vector.broadcast %340 : vector<1x32xf32> to vector<16x32xf32>
    %567 = arith.addf %565, %566 : vector<16x32xf32>
    %568 = arith.addf %336, %567 : vector<16x32xf32>
    %c0_203 = arith.constant 0 : index
    %c0_204 = arith.constant 0 : index
    %569 = vector.load %arg24[%c0_203, %c0_204] : memref<1x32xf32, #tpu.memory_space<vmem>>, vector<1x32xf32>
    %c0_205 = arith.constant 0 : index
    %c0_206 = arith.constant 0 : index
    %570 = vector.load %arg25[%c0_205, %c0_206] : memref<1x32xf32, #tpu.memory_space<vmem>>, vector<1x32xf32>
    %cst_207 = arith.constant dense<0.000000e+00> : vector<16xf32>
    %571 = vector.multi_reduction <add>, %568, %cst_207 [1] : vector<16x32xf32> to vector<16xf32>
    %572 = vector.shape_cast %571 : vector<16xf32> to vector<16x1xf32>
    %cst_208 = arith.constant 3.200000e+01 : f32
    %573 = vector.broadcast %cst_208 : f32 to vector<16x1xf32>
    %574 = arith.divf %572, %573 : vector<16x1xf32>
    %575 = vector.broadcast %574 : vector<16x1xf32> to vector<16x32xf32>
    %576 = arith.subf %568, %575 : vector<16x32xf32>
    %577 = arith.mulf %576, %576 : vector<16x32xf32>
    %cst_209 = arith.constant dense<0.000000e+00> : vector<16xf32>
    %578 = vector.multi_reduction <add>, %577, %cst_209 [1] : vector<16x32xf32> to vector<16xf32>
    %579 = vector.shape_cast %578 : vector<16xf32> to vector<16x1xf32>
    %cst_210 = arith.constant 3.200000e+01 : f32
    %580 = vector.broadcast %cst_210 : f32 to vector<16x1xf32>
    %581 = arith.divf %579, %580 : vector<16x1xf32>
    %582 = vector.broadcast %574 : vector<16x1xf32> to vector<16x32xf32>
    %583 = arith.subf %568, %582 : vector<16x32xf32>
    %cst_211 = arith.constant 9.99999974E-6 : f32
    %584 = vector.broadcast %cst_211 : f32 to vector<16x1xf32>
    %585 = arith.addf %581, %584 : vector<16x1xf32>
    %586 = math.rsqrt %585 : vector<16x1xf32>
    %587 = vector.broadcast %586 : vector<16x1xf32> to vector<16x32xf32>
    %588 = arith.mulf %583, %587 : vector<16x32xf32>
    %589 = vector.broadcast %569 : vector<1x32xf32> to vector<16x32xf32>
    %590 = arith.mulf %588, %589 : vector<16x32xf32>
    %591 = vector.broadcast %570 : vector<1x32xf32> to vector<16x32xf32>
    %592 = arith.addf %590, %591 : vector<16x32xf32>
    %c0_212 = arith.constant 0 : index
    %c0_213 = arith.constant 0 : index
    %593 = vector.load %arg26[%c0_212, %c0_213] : memref<32x64xf32, #tpu.memory_space<vmem>>, vector<32x64xf32>
    %cst_214 = arith.constant dense<0.000000e+00> : vector<16x64xf32>
    %594 = tpu.matmul %592, %593, %cst_214 {dimension_numbers = #tpu.dot_dimension_numbers<[1], [0], [0], [1], [0, 0, 1, 1], [], []>} : vector<16x32xf32>, vector<32x64xf32>, vector<16x64xf32> -> vector<16x64xf32>
    %c0_215 = arith.constant 0 : index
    %c0_216 = arith.constant 0 : index
    %595 = vector.load %arg27[%c0_215, %c0_216] : memref<1x64xf32, #tpu.memory_space<vmem>>, vector<1x64xf32>
    %596 = vector.broadcast %595 : vector<1x64xf32> to vector<16x64xf32>
    %597 = arith.addf %594, %596 : vector<16x64xf32>
    %cst_217 = arith.constant 0.707106769 : f32
    %598 = vector.broadcast %cst_217 : f32 to vector<16x64xf32>
    %599 = arith.mulf %597, %598 : vector<16x64xf32>
    %600 = math.absf %599 : vector<16x64xf32>
    %cst_218 = arith.constant 0.327591091 : f32
    %601 = vector.broadcast %cst_218 : f32 to vector<16x64xf32>
    %602 = arith.mulf %601, %600 : vector<16x64xf32>
    %cst_219 = arith.constant 1.000000e+00 : f32
    %603 = vector.broadcast %cst_219 : f32 to vector<16x64xf32>
    %604 = arith.addf %603, %602 : vector<16x64xf32>
    %cst_220 = arith.constant 1.000000e+00 : f32
    %605 = vector.broadcast %cst_220 : f32 to vector<16x64xf32>
    %606 = arith.divf %605, %604 : vector<16x64xf32>
    %cst_221 = arith.constant 1.06140542 : f32
    %607 = vector.broadcast %cst_221 : f32 to vector<16x64xf32>
    %608 = arith.mulf %606, %607 : vector<16x64xf32>
    %cst_222 = arith.constant -1.45315206 : f32
    %609 = vector.broadcast %cst_222 : f32 to vector<16x64xf32>
    %610 = arith.addf %609, %608 : vector<16x64xf32>
    %611 = arith.mulf %606, %610 : vector<16x64xf32>
    %cst_223 = arith.constant 1.42141378 : f32
    %612 = vector.broadcast %cst_223 : f32 to vector<16x64xf32>
    %613 = arith.addf %612, %611 : vector<16x64xf32>
    %614 = arith.mulf %606, %613 : vector<16x64xf32>
    %cst_224 = arith.constant -0.284496725 : f32
    %615 = vector.broadcast %cst_224 : f32 to vector<16x64xf32>
    %616 = arith.addf %615, %614 : vector<16x64xf32>
    %617 = arith.mulf %606, %616 : vector<16x64xf32>
    %cst_225 = arith.constant 0.254829586 : f32
    %618 = vector.broadcast %cst_225 : f32 to vector<16x64xf32>
    %619 = arith.addf %618, %617 : vector<16x64xf32>
    %620 = arith.mulf %606, %619 : vector<16x64xf32>
    %621 = arith.mulf %600, %600 : vector<16x64xf32>
    %cst_226 = arith.constant 0.000000e+00 : f32
    %622 = vector.broadcast %cst_226 : f32 to vector<16x64xf32>
    %623 = arith.subf %622, %621 : vector<16x64xf32>
    %624 = math.exp %623 : vector<16x64xf32>
    %625 = arith.mulf %620, %624 : vector<16x64xf32>
    %cst_227 = arith.constant 1.000000e+00 : f32
    %626 = vector.broadcast %cst_227 : f32 to vector<16x64xf32>
    %627 = arith.subf %626, %625 : vector<16x64xf32>
    %cst_228 = arith.constant 0.000000e+00 : f32
    %628 = vector.broadcast %cst_228 : f32 to vector<16x64xf32>
    %629 = arith.cmpf olt, %599, %628 : vector<16x64xf32>
    %cst_229 = arith.constant 0.000000e+00 : f32
    %630 = vector.broadcast %cst_229 : f32 to vector<16x64xf32>
    %631 = arith.subf %630, %627 : vector<16x64xf32>
    %632 = arith.select %629, %631, %627 : vector<16x64xi1>, vector<16x64xf32>
    %cst_230 = arith.constant 5.000000e-01 : f32
    %633 = vector.broadcast %cst_230 : f32 to vector<16x64xf32>
    %634 = arith.mulf %633, %597 : vector<16x64xf32>
    %cst_231 = arith.constant 1.000000e+00 : f32
    %635 = vector.broadcast %cst_231 : f32 to vector<16x64xf32>
    %636 = arith.addf %635, %632 : vector<16x64xf32>
    %637 = arith.mulf %634, %636 : vector<16x64xf32>
    %c0_232 = arith.constant 0 : index
    %c0_233 = arith.constant 0 : index
    %638 = vector.load %arg28[%c0_232, %c0_233] : memref<64x32xf32, #tpu.memory_space<vmem>>, vector<64x32xf32>
    %cst_234 = arith.constant dense<0.000000e+00> : vector<16x32xf32>
    %639 = tpu.matmul %637, %638, %cst_234 {dimension_numbers = #tpu.dot_dimension_numbers<[1], [0], [0], [1], [0, 0, 1, 1], [], []>} : vector<16x64xf32>, vector<64x32xf32>, vector<16x32xf32> -> vector<16x32xf32>
    %c0_235 = arith.constant 0 : index
    %c0_236 = arith.constant 0 : index
    %640 = vector.load %arg29[%c0_235, %c0_236] : memref<1x32xf32, #tpu.memory_space<vmem>>, vector<1x32xf32>
    %641 = vector.broadcast %640 : vector<1x32xf32> to vector<16x32xf32>
    %642 = arith.addf %639, %641 : vector<16x32xf32>
    %643 = arith.addf %592, %642 : vector<16x32xf32>
    %c0_237 = arith.constant 0 : index
    %c0_238 = arith.constant 0 : index
    %644 = vector.load %arg30[%c0_237, %c0_238] : memref<1x32xf32, #tpu.memory_space<vmem>>, vector<1x32xf32>
    %c0_239 = arith.constant 0 : index
    %c0_240 = arith.constant 0 : index
    %645 = vector.load %arg31[%c0_239, %c0_240] : memref<1x32xf32, #tpu.memory_space<vmem>>, vector<1x32xf32>
    %cst_241 = arith.constant dense<0.000000e+00> : vector<16xf32>
    %646 = vector.multi_reduction <add>, %643, %cst_241 [1] : vector<16x32xf32> to vector<16xf32>
    %647 = vector.shape_cast %646 : vector<16xf32> to vector<16x1xf32>
    %cst_242 = arith.constant 3.200000e+01 : f32
    %648 = vector.broadcast %cst_242 : f32 to vector<16x1xf32>
    %649 = arith.divf %647, %648 : vector<16x1xf32>
    %650 = vector.broadcast %649 : vector<16x1xf32> to vector<16x32xf32>
    %651 = arith.subf %643, %650 : vector<16x32xf32>
    %652 = arith.mulf %651, %651 : vector<16x32xf32>
    %cst_243 = arith.constant dense<0.000000e+00> : vector<16xf32>
    %653 = vector.multi_reduction <add>, %652, %cst_243 [1] : vector<16x32xf32> to vector<16xf32>
    %654 = vector.shape_cast %653 : vector<16xf32> to vector<16x1xf32>
    %cst_244 = arith.constant 3.200000e+01 : f32
    %655 = vector.broadcast %cst_244 : f32 to vector<16x1xf32>
    %656 = arith.divf %654, %655 : vector<16x1xf32>
    %657 = vector.broadcast %649 : vector<16x1xf32> to vector<16x32xf32>
    %658 = arith.subf %643, %657 : vector<16x32xf32>
    %cst_245 = arith.constant 9.99999974E-6 : f32
    %659 = vector.broadcast %cst_245 : f32 to vector<16x1xf32>
    %660 = arith.addf %656, %659 : vector<16x1xf32>
    %661 = math.rsqrt %660 : vector<16x1xf32>
    %662 = vector.broadcast %661 : vector<16x1xf32> to vector<16x32xf32>
    %663 = arith.mulf %658, %662 : vector<16x32xf32>
    %664 = vector.broadcast %644 : vector<1x32xf32> to vector<16x32xf32>
    %665 = arith.mulf %663, %664 : vector<16x32xf32>
    %666 = vector.broadcast %645 : vector<1x32xf32> to vector<16x32xf32>
    %667 = arith.addf %665, %666 : vector<16x32xf32>
    %c0_246 = arith.constant 0 : index
    %c0_247 = arith.constant 0 : index
    %668 = vector.load %arg32[%c0_246, %c0_247] : memref<1x32xf32, #tpu.memory_space<vmem>>, vector<1x32xf32>
    %c0_248 = arith.constant 0 : index
    %c0_249 = arith.constant 0 : index
    %669 = vector.load %arg33[%c0_248, %c0_249] : memref<1x32xf32, #tpu.memory_space<vmem>>, vector<1x32xf32>
    %cst_250 = arith.constant dense<0.000000e+00> : vector<16xf32>
    %670 = vector.multi_reduction <add>, %667, %cst_250 [1] : vector<16x32xf32> to vector<16xf32>
    %671 = vector.shape_cast %670 : vector<16xf32> to vector<16x1xf32>
    %cst_251 = arith.constant 3.200000e+01 : f32
    %672 = vector.broadcast %cst_251 : f32 to vector<16x1xf32>
    %673 = arith.divf %671, %672 : vector<16x1xf32>
    %674 = vector.broadcast %673 : vector<16x1xf32> to vector<16x32xf32>
    %675 = arith.subf %667, %674 : vector<16x32xf32>
    %676 = arith.mulf %675, %675 : vector<16x32xf32>
    %cst_252 = arith.constant dense<0.000000e+00> : vector<16xf32>
    %677 = vector.multi_reduction <add>, %676, %cst_252 [1] : vector<16x32xf32> to vector<16xf32>
    %678 = vector.shape_cast %677 : vector<16xf32> to vector<16x1xf32>
    %cst_253 = arith.constant 3.200000e+01 : f32
    %679 = vector.broadcast %cst_253 : f32 to vector<16x1xf32>
    %680 = arith.divf %678, %679 : vector<16x1xf32>
    %681 = vector.broadcast %673 : vector<16x1xf32> to vector<16x32xf32>
    %682 = arith.subf %667, %681 : vector<16x32xf32>
    %cst_254 = arith.constant 9.99999974E-6 : f32
    %683 = vector.broadcast %cst_254 : f32 to vector<16x1xf32>
    %684 = arith.addf %680, %683 : vector<16x1xf32>
    %685 = math.rsqrt %684 : vector<16x1xf32>
    %686 = vector.broadcast %685 : vector<16x1xf32> to vector<16x32xf32>
    %687 = arith.mulf %682, %686 : vector<16x32xf32>
    %688 = vector.broadcast %668 : vector<1x32xf32> to vector<16x32xf32>
    %689 = arith.mulf %687, %688 : vector<16x32xf32>
    %690 = vector.broadcast %669 : vector<1x32xf32> to vector<16x32xf32>
    %691 = arith.addf %689, %690 : vector<16x32xf32>
    %c0_255 = arith.constant 0 : index
    %c0_256 = arith.constant 0 : index
    %c0_257 = arith.constant 0 : index
    %692 = vector.load %arg2[%c0_255, %c0_256, %c0_257] : memref<1x16x16xf32, #tpu.memory_space<vmem>>, vector<1x16x16xf32>
    %693 = vector.shape_cast %692 : vector<1x16x16xf32> to vector<16x16xf32>
    %c0_258 = arith.constant 0 : index
    %c0_259 = arith.constant 0 : index
    %694 = vector.load %arg5[%c0_258, %c0_259] : memref<16x32xf32, #tpu.memory_space<vmem>>, vector<16x32xf32>
    %cst_260 = arith.constant dense<0.000000e+00> : vector<16x32xf32>
    %695 = tpu.matmul %693, %694, %cst_260 {dimension_numbers = #tpu.dot_dimension_numbers<[1], [0], [0], [1], [0, 0, 1, 1], [], []>} : vector<16x16xf32>, vector<16x32xf32>, vector<16x32xf32> -> vector<16x32xf32>
    %696 = arith.addf %695, %0 : vector<16x32xf32>
    %c0_261 = arith.constant 0 : index
    %c0_262 = arith.constant 0 : index
    %697 = vector.load %arg36[%c0_261, %c0_262] : memref<32x96xf32, #tpu.memory_space<vmem>>, vector<32x96xf32>
    %c0_263 = arith.constant 0 : index
    %c0_264 = arith.constant 0 : index
    %698 = vector.load %arg37[%c0_263, %c0_264] : memref<1x96xf32, #tpu.memory_space<vmem>>, vector<1x96xf32>
    %c0_265 = arith.constant 0 : index
    %c0_266 = arith.constant 0 : index
    %699 = vector.load %arg38[%c0_265, %c0_266] : memref<32x32xf32, #tpu.memory_space<vmem>>, vector<32x32xf32>
    %c0_267 = arith.constant 0 : index
    %c0_268 = arith.constant 0 : index
    %700 = vector.load %arg39[%c0_267, %c0_268] : memref<1x32xf32, #tpu.memory_space<vmem>>, vector<1x32xf32>
    %c0_269 = arith.constant 0 : index
    %c0_270 = arith.constant 0 : index
    %701 = vector.load %arg34[%c0_269, %c0_270] : memref<16x16xf32, #tpu.memory_space<vmem>>, vector<16x16xf32>
    %cst_271 = arith.constant dense<0.000000e+00> : vector<16x96xf32>
    %702 = tpu.matmul %696, %697, %cst_271 {dimension_numbers = #tpu.dot_dimension_numbers<[1], [0], [0], [1], [0, 0, 1, 1], [], []>} : vector<16x32xf32>, vector<32x96xf32>, vector<16x96xf32> -> vector<16x96xf32>
    %703 = vector.broadcast %698 : vector<1x96xf32> to vector<16x96xf32>
    %704 = arith.addf %702, %703 : vector<16x96xf32>
    %705 = vector.extract_strided_slice %704 {offsets = [0, 0], sizes = [16, 32], strides = [1, 1]} : vector<16x96xf32> to vector<16x32xf32>
    %706 = vector.extract_strided_slice %704 {offsets = [0, 32], sizes = [16, 32], strides = [1, 1]} : vector<16x96xf32> to vector<16x32xf32>
    %707 = vector.extract_strided_slice %704 {offsets = [0, 64], sizes = [16, 32], strides = [1, 1]} : vector<16x96xf32> to vector<16x32xf32>
    %708 = tpu.iota {dimensions = array<i32: 0>} : vector<16x16xi32>
    %709 = tpu.iota {dimensions = array<i32: 1>} : vector<16x16xi32>
    %710 = arith.cmpi sle, %709, %708 : vector<16x16xi32>
    %cst_272 = arith.constant 1.000000e+00 : f32
    %cst_273 = arith.constant 0.000000e+00 : f32
    %711 = vector.broadcast %cst_272 : f32 to vector<16x16xf32>
    %712 = vector.broadcast %cst_273 : f32 to vector<16x16xf32>
    %713 = arith.select %710, %711, %712 : vector<16x16xi1>, vector<16x16xf32>
    %cst_274 = arith.constant dense<0.000000e+00> : vector<16x32xf32>
    %714 = tpu.matmul %713, %707, %cst_274 {dimension_numbers = #tpu.dot_dimension_numbers<[1], [0], [0], [1], [0, 0, 1, 1], [], []>} : vector<16x16xf32>, vector<16x32xf32>, vector<16x32xf32> -> vector<16x32xf32>
    %715 = tpu.iota {dimensions = array<i32: 0>} : vector<16x16xi32>
    %716 = tpu.iota {dimensions = array<i32: 1>} : vector<16x16xi32>
    %717 = arith.cmpi eq, %715, %716 : vector<16x16xi32>
    %cst_275 = arith.constant 1.000000e+00 : f32
    %cst_276 = arith.constant 0.000000e+00 : f32
    %718 = vector.broadcast %cst_275 : f32 to vector<16x16xf32>
    %719 = vector.broadcast %cst_276 : f32 to vector<16x16xf32>
    %720 = arith.select %717, %718, %719 : vector<16x16xi1>, vector<16x16xf32>
    %cst_277 = arith.constant 1.000000e+00 : f32
    %721 = vector.broadcast %cst_277 : f32 to vector<1x16xf32>
    %cst_278 = arith.constant 0.000000e+00 : f32
    %722 = vector.broadcast %cst_278 : f32 to vector<16x16xf32>
    %723 = arith.cmpf ogt, %701, %722 : vector<16x16xf32>
    %724 = vector.extract_strided_slice %705 {offsets = [0, 0], sizes = [16, 8], strides = [1, 1]} : vector<16x32xf32> to vector<16x8xf32>
    %725 = vector.extract_strided_slice %706 {offsets = [0, 0], sizes = [16, 8], strides = [1, 1]} : vector<16x32xf32> to vector<16x8xf32>
    %726 = vector.extract_strided_slice %707 {offsets = [0, 0], sizes = [16, 8], strides = [1, 1]} : vector<16x32xf32> to vector<16x8xf32>
    %cst_279 = arith.constant dense<0.000000e+00> : vector<16x16xf32>
    %727 = tpu.matmul %724, %725, %cst_279 {dimension_numbers = #tpu.dot_dimension_numbers<[1], [1], [0], [0], [0, 0, 1, 0], [], []>} : vector<16x8xf32>, vector<16x8xf32>, vector<16x16xf32> -> vector<16x16xf32>
    %cst_280 = arith.constant -1.000000e+30 : f32
    %728 = vector.broadcast %cst_280 : f32 to vector<16x16xf32>
    %729 = arith.select %723, %727, %728 : vector<16x16xi1>, vector<16x16xf32>
    %cst_281 = arith.constant dense<0xFF800000> : vector<16xf32>
    %730 = vector.multi_reduction <maximumf>, %729, %cst_281 [1] : vector<16x16xf32> to vector<16xf32>
    %731 = vector.shape_cast %730 : vector<16xf32> to vector<16x1xf32>
    %732 = arith.mulf %727, %701 : vector<16x16xf32>
    %cst_282 = arith.constant dense<0.000000e+00> : vector<16xf32>
    %733 = vector.multi_reduction <add>, %732, %cst_282 [1] : vector<16x16xf32> to vector<16xf32>
    %734 = vector.shape_cast %733 : vector<16xf32> to vector<16x1xf32>
    %cst_283 = arith.constant 1.600000e+01 : f32
    %735 = vector.broadcast %cst_283 : f32 to vector<16x1xf32>
    %736 = arith.divf %734, %735 : vector<16x1xf32>
    %737 = arith.subf %731, %736 : vector<16x1xf32>
    %738 = vector.broadcast %737 : vector<16x1xf32> to vector<16x16xf32>
    %739 = arith.mulf %738, %720 : vector<16x16xf32>
    %cst_284 = arith.constant dense<0.000000e+00> : vector<1x16xf32>
    %740 = tpu.matmul %721, %739, %cst_284 {dimension_numbers = #tpu.dot_dimension_numbers<[1], [0], [0], [1], [0, 0, 1, 1], [], []>} : vector<1x16xf32>, vector<16x16xf32>, vector<1x16xf32> -> vector<1x16xf32>
    %741 = vector.broadcast %740 : vector<1x16xf32> to vector<16x16xf32>
    %742 = vector.broadcast %737 : vector<16x1xf32> to vector<16x16xf32>
    %743 = arith.cmpf ogt, %741, %742 : vector<16x16xf32>
    %744 = vector.broadcast %740 : vector<1x16xf32> to vector<16x16xf32>
    %745 = vector.broadcast %737 : vector<16x1xf32> to vector<16x16xf32>
    %746 = arith.cmpf oeq, %744, %745 : vector<16x16xf32>
    %747 = arith.cmpi slt, %716, %715 : vector<16x16xi32>
    %748 = arith.andi %746, %747 : vector<16x16xi1>
    %749 = arith.ori %743, %748 : vector<16x16xi1>
    %cst_285 = arith.constant 1.000000e+00 : f32
    %cst_286 = arith.constant 0.000000e+00 : f32
    %750 = vector.broadcast %cst_285 : f32 to vector<16x16xf32>
    %751 = vector.broadcast %cst_286 : f32 to vector<16x16xf32>
    %752 = arith.select %749, %750, %751 : vector<16x16xi1>, vector<16x16xf32>
    %cst_287 = arith.constant dense<0.000000e+00> : vector<16xf32>
    %753 = vector.multi_reduction <add>, %752, %cst_287 [1] : vector<16x16xf32> to vector<16xf32>
    %754 = vector.shape_cast %753 : vector<16xf32> to vector<16x1xf32>
    %cst_288 = arith.constant 1.500000e+01 : f32
    %755 = vector.broadcast %cst_288 : f32 to vector<16x1xf32>
    %756 = arith.cmpf olt, %754, %755 : vector<16x1xf32>
    %cst_289 = arith.constant 0.353553385 : f32
    %757 = vector.broadcast %cst_289 : f32 to vector<16x16xf32>
    %758 = arith.mulf %727, %757 : vector<16x16xf32>
    %759 = arith.cmpi sgt, %709, %708 : vector<16x16xi32>
    %cst_290 = arith.constant -1.000000e+30 : f32
    %760 = vector.broadcast %cst_290 : f32 to vector<16x16xf32>
    %761 = arith.select %759, %760, %758 : vector<16x16xi1>, vector<16x16xf32>
    %cst_291 = arith.constant dense<0xFF800000> : vector<16xf32>
    %762 = vector.multi_reduction <maximumf>, %761, %cst_291 [1] : vector<16x16xf32> to vector<16xf32>
    %763 = vector.shape_cast %762 : vector<16xf32> to vector<16x1xf32>
    %764 = vector.broadcast %763 : vector<16x1xf32> to vector<16x16xf32>
    %765 = arith.subf %761, %764 : vector<16x16xf32>
    %766 = math.exp %765 : vector<16x16xf32>
    %cst_292 = arith.constant dense<0.000000e+00> : vector<16xf32>
    %767 = vector.multi_reduction <add>, %766, %cst_292 [1] : vector<16x16xf32> to vector<16xf32>
    %768 = vector.shape_cast %767 : vector<16xf32> to vector<16x1xf32>
    %769 = vector.broadcast %768 : vector<16x1xf32> to vector<16x16xf32>
    %770 = arith.divf %766, %769 : vector<16x16xf32>
    %cst_293 = arith.constant dense<0.000000e+00> : vector<16x8xf32>
    %771 = tpu.matmul %770, %726, %cst_293 {dimension_numbers = #tpu.dot_dimension_numbers<[1], [0], [0], [1], [0, 0, 1, 1], [], []>} : vector<16x16xf32>, vector<16x8xf32>, vector<16x8xf32> -> vector<16x8xf32>
    %772 = vector.extract_strided_slice %714 {offsets = [0, 0], sizes = [16, 8], strides = [1, 1]} : vector<16x32xf32> to vector<16x8xf32>
    %773 = vector.shape_cast %756 : vector<16x1xi1> to vector<16x1xi1>
    %774 = vector.broadcast %773 : vector<16x1xi1> to vector<16x8xi1>
    %775 = arith.select %774, %771, %772 : vector<16x8xi1>, vector<16x8xf32>
    %776 = vector.extract_strided_slice %699 {offsets = [0, 0], sizes = [8, 32], strides = [1, 1]} : vector<32x32xf32> to vector<8x32xf32>
    %cst_294 = arith.constant dense<0.000000e+00> : vector<16x32xf32>
    %777 = tpu.matmul %775, %776, %cst_294 {dimension_numbers = #tpu.dot_dimension_numbers<[1], [0], [0], [1], [0, 0, 1, 1], [], []>} : vector<16x8xf32>, vector<8x32xf32>, vector<16x32xf32> -> vector<16x32xf32>
    %778 = vector.extract_strided_slice %705 {offsets = [0, 8], sizes = [16, 8], strides = [1, 1]} : vector<16x32xf32> to vector<16x8xf32>
    %779 = vector.extract_strided_slice %706 {offsets = [0, 8], sizes = [16, 8], strides = [1, 1]} : vector<16x32xf32> to vector<16x8xf32>
    %780 = vector.extract_strided_slice %707 {offsets = [0, 8], sizes = [16, 8], strides = [1, 1]} : vector<16x32xf32> to vector<16x8xf32>
    %cst_295 = arith.constant dense<0.000000e+00> : vector<16x16xf32>
    %781 = tpu.matmul %778, %779, %cst_295 {dimension_numbers = #tpu.dot_dimension_numbers<[1], [1], [0], [0], [0, 0, 1, 0], [], []>} : vector<16x8xf32>, vector<16x8xf32>, vector<16x16xf32> -> vector<16x16xf32>
    %cst_296 = arith.constant -1.000000e+30 : f32
    %782 = vector.broadcast %cst_296 : f32 to vector<16x16xf32>
    %783 = arith.select %723, %781, %782 : vector<16x16xi1>, vector<16x16xf32>
    %cst_297 = arith.constant dense<0xFF800000> : vector<16xf32>
    %784 = vector.multi_reduction <maximumf>, %783, %cst_297 [1] : vector<16x16xf32> to vector<16xf32>
    %785 = vector.shape_cast %784 : vector<16xf32> to vector<16x1xf32>
    %786 = arith.mulf %781, %701 : vector<16x16xf32>
    %cst_298 = arith.constant dense<0.000000e+00> : vector<16xf32>
    %787 = vector.multi_reduction <add>, %786, %cst_298 [1] : vector<16x16xf32> to vector<16xf32>
    %788 = vector.shape_cast %787 : vector<16xf32> to vector<16x1xf32>
    %cst_299 = arith.constant 1.600000e+01 : f32
    %789 = vector.broadcast %cst_299 : f32 to vector<16x1xf32>
    %790 = arith.divf %788, %789 : vector<16x1xf32>
    %791 = arith.subf %785, %790 : vector<16x1xf32>
    %792 = vector.broadcast %791 : vector<16x1xf32> to vector<16x16xf32>
    %793 = arith.mulf %792, %720 : vector<16x16xf32>
    %cst_300 = arith.constant dense<0.000000e+00> : vector<1x16xf32>
    %794 = tpu.matmul %721, %793, %cst_300 {dimension_numbers = #tpu.dot_dimension_numbers<[1], [0], [0], [1], [0, 0, 1, 1], [], []>} : vector<1x16xf32>, vector<16x16xf32>, vector<1x16xf32> -> vector<1x16xf32>
    %795 = vector.broadcast %794 : vector<1x16xf32> to vector<16x16xf32>
    %796 = vector.broadcast %791 : vector<16x1xf32> to vector<16x16xf32>
    %797 = arith.cmpf ogt, %795, %796 : vector<16x16xf32>
    %798 = vector.broadcast %794 : vector<1x16xf32> to vector<16x16xf32>
    %799 = vector.broadcast %791 : vector<16x1xf32> to vector<16x16xf32>
    %800 = arith.cmpf oeq, %798, %799 : vector<16x16xf32>
    %801 = arith.cmpi slt, %716, %715 : vector<16x16xi32>
    %802 = arith.andi %800, %801 : vector<16x16xi1>
    %803 = arith.ori %797, %802 : vector<16x16xi1>
    %cst_301 = arith.constant 1.000000e+00 : f32
    %cst_302 = arith.constant 0.000000e+00 : f32
    %804 = vector.broadcast %cst_301 : f32 to vector<16x16xf32>
    %805 = vector.broadcast %cst_302 : f32 to vector<16x16xf32>
    %806 = arith.select %803, %804, %805 : vector<16x16xi1>, vector<16x16xf32>
    %cst_303 = arith.constant dense<0.000000e+00> : vector<16xf32>
    %807 = vector.multi_reduction <add>, %806, %cst_303 [1] : vector<16x16xf32> to vector<16xf32>
    %808 = vector.shape_cast %807 : vector<16xf32> to vector<16x1xf32>
    %cst_304 = arith.constant 1.500000e+01 : f32
    %809 = vector.broadcast %cst_304 : f32 to vector<16x1xf32>
    %810 = arith.cmpf olt, %808, %809 : vector<16x1xf32>
    %cst_305 = arith.constant 0.353553385 : f32
    %811 = vector.broadcast %cst_305 : f32 to vector<16x16xf32>
    %812 = arith.mulf %781, %811 : vector<16x16xf32>
    %813 = arith.cmpi sgt, %709, %708 : vector<16x16xi32>
    %cst_306 = arith.constant -1.000000e+30 : f32
    %814 = vector.broadcast %cst_306 : f32 to vector<16x16xf32>
    %815 = arith.select %813, %814, %812 : vector<16x16xi1>, vector<16x16xf32>
    %cst_307 = arith.constant dense<0xFF800000> : vector<16xf32>
    %816 = vector.multi_reduction <maximumf>, %815, %cst_307 [1] : vector<16x16xf32> to vector<16xf32>
    %817 = vector.shape_cast %816 : vector<16xf32> to vector<16x1xf32>
    %818 = vector.broadcast %817 : vector<16x1xf32> to vector<16x16xf32>
    %819 = arith.subf %815, %818 : vector<16x16xf32>
    %820 = math.exp %819 : vector<16x16xf32>
    %cst_308 = arith.constant dense<0.000000e+00> : vector<16xf32>
    %821 = vector.multi_reduction <add>, %820, %cst_308 [1] : vector<16x16xf32> to vector<16xf32>
    %822 = vector.shape_cast %821 : vector<16xf32> to vector<16x1xf32>
    %823 = vector.broadcast %822 : vector<16x1xf32> to vector<16x16xf32>
    %824 = arith.divf %820, %823 : vector<16x16xf32>
    %cst_309 = arith.constant dense<0.000000e+00> : vector<16x8xf32>
    %825 = tpu.matmul %824, %780, %cst_309 {dimension_numbers = #tpu.dot_dimension_numbers<[1], [0], [0], [1], [0, 0, 1, 1], [], []>} : vector<16x16xf32>, vector<16x8xf32>, vector<16x8xf32> -> vector<16x8xf32>
    %826 = vector.extract_strided_slice %714 {offsets = [0, 8], sizes = [16, 8], strides = [1, 1]} : vector<16x32xf32> to vector<16x8xf32>
    %827 = vector.shape_cast %810 : vector<16x1xi1> to vector<16x1xi1>
    %828 = vector.broadcast %827 : vector<16x1xi1> to vector<16x8xi1>
    %829 = arith.select %828, %825, %826 : vector<16x8xi1>, vector<16x8xf32>
    %830 = vector.extract_strided_slice %699 {offsets = [8, 0], sizes = [8, 32], strides = [1, 1]} : vector<32x32xf32> to vector<8x32xf32>
    %cst_310 = arith.constant dense<0.000000e+00> : vector<16x32xf32>
    %831 = tpu.matmul %829, %830, %cst_310 {dimension_numbers = #tpu.dot_dimension_numbers<[1], [0], [0], [1], [0, 0, 1, 1], [], []>} : vector<16x8xf32>, vector<8x32xf32>, vector<16x32xf32> -> vector<16x32xf32>
    %832 = arith.addf %777, %831 : vector<16x32xf32>
    %833 = vector.extract_strided_slice %705 {offsets = [0, 16], sizes = [16, 8], strides = [1, 1]} : vector<16x32xf32> to vector<16x8xf32>
    %834 = vector.extract_strided_slice %706 {offsets = [0, 16], sizes = [16, 8], strides = [1, 1]} : vector<16x32xf32> to vector<16x8xf32>
    %835 = vector.extract_strided_slice %707 {offsets = [0, 16], sizes = [16, 8], strides = [1, 1]} : vector<16x32xf32> to vector<16x8xf32>
    %cst_311 = arith.constant dense<0.000000e+00> : vector<16x16xf32>
    %836 = tpu.matmul %833, %834, %cst_311 {dimension_numbers = #tpu.dot_dimension_numbers<[1], [1], [0], [0], [0, 0, 1, 0], [], []>} : vector<16x8xf32>, vector<16x8xf32>, vector<16x16xf32> -> vector<16x16xf32>
    %cst_312 = arith.constant -1.000000e+30 : f32
    %837 = vector.broadcast %cst_312 : f32 to vector<16x16xf32>
    %838 = arith.select %723, %836, %837 : vector<16x16xi1>, vector<16x16xf32>
    %cst_313 = arith.constant dense<0xFF800000> : vector<16xf32>
    %839 = vector.multi_reduction <maximumf>, %838, %cst_313 [1] : vector<16x16xf32> to vector<16xf32>
    %840 = vector.shape_cast %839 : vector<16xf32> to vector<16x1xf32>
    %841 = arith.mulf %836, %701 : vector<16x16xf32>
    %cst_314 = arith.constant dense<0.000000e+00> : vector<16xf32>
    %842 = vector.multi_reduction <add>, %841, %cst_314 [1] : vector<16x16xf32> to vector<16xf32>
    %843 = vector.shape_cast %842 : vector<16xf32> to vector<16x1xf32>
    %cst_315 = arith.constant 1.600000e+01 : f32
    %844 = vector.broadcast %cst_315 : f32 to vector<16x1xf32>
    %845 = arith.divf %843, %844 : vector<16x1xf32>
    %846 = arith.subf %840, %845 : vector<16x1xf32>
    %847 = vector.broadcast %846 : vector<16x1xf32> to vector<16x16xf32>
    %848 = arith.mulf %847, %720 : vector<16x16xf32>
    %cst_316 = arith.constant dense<0.000000e+00> : vector<1x16xf32>
    %849 = tpu.matmul %721, %848, %cst_316 {dimension_numbers = #tpu.dot_dimension_numbers<[1], [0], [0], [1], [0, 0, 1, 1], [], []>} : vector<1x16xf32>, vector<16x16xf32>, vector<1x16xf32> -> vector<1x16xf32>
    %850 = vector.broadcast %849 : vector<1x16xf32> to vector<16x16xf32>
    %851 = vector.broadcast %846 : vector<16x1xf32> to vector<16x16xf32>
    %852 = arith.cmpf ogt, %850, %851 : vector<16x16xf32>
    %853 = vector.broadcast %849 : vector<1x16xf32> to vector<16x16xf32>
    %854 = vector.broadcast %846 : vector<16x1xf32> to vector<16x16xf32>
    %855 = arith.cmpf oeq, %853, %854 : vector<16x16xf32>
    %856 = arith.cmpi slt, %716, %715 : vector<16x16xi32>
    %857 = arith.andi %855, %856 : vector<16x16xi1>
    %858 = arith.ori %852, %857 : vector<16x16xi1>
    %cst_317 = arith.constant 1.000000e+00 : f32
    %cst_318 = arith.constant 0.000000e+00 : f32
    %859 = vector.broadcast %cst_317 : f32 to vector<16x16xf32>
    %860 = vector.broadcast %cst_318 : f32 to vector<16x16xf32>
    %861 = arith.select %858, %859, %860 : vector<16x16xi1>, vector<16x16xf32>
    %cst_319 = arith.constant dense<0.000000e+00> : vector<16xf32>
    %862 = vector.multi_reduction <add>, %861, %cst_319 [1] : vector<16x16xf32> to vector<16xf32>
    %863 = vector.shape_cast %862 : vector<16xf32> to vector<16x1xf32>
    %cst_320 = arith.constant 1.500000e+01 : f32
    %864 = vector.broadcast %cst_320 : f32 to vector<16x1xf32>
    %865 = arith.cmpf olt, %863, %864 : vector<16x1xf32>
    %cst_321 = arith.constant 0.353553385 : f32
    %866 = vector.broadcast %cst_321 : f32 to vector<16x16xf32>
    %867 = arith.mulf %836, %866 : vector<16x16xf32>
    %868 = arith.cmpi sgt, %709, %708 : vector<16x16xi32>
    %cst_322 = arith.constant -1.000000e+30 : f32
    %869 = vector.broadcast %cst_322 : f32 to vector<16x16xf32>
    %870 = arith.select %868, %869, %867 : vector<16x16xi1>, vector<16x16xf32>
    %cst_323 = arith.constant dense<0xFF800000> : vector<16xf32>
    %871 = vector.multi_reduction <maximumf>, %870, %cst_323 [1] : vector<16x16xf32> to vector<16xf32>
    %872 = vector.shape_cast %871 : vector<16xf32> to vector<16x1xf32>
    %873 = vector.broadcast %872 : vector<16x1xf32> to vector<16x16xf32>
    %874 = arith.subf %870, %873 : vector<16x16xf32>
    %875 = math.exp %874 : vector<16x16xf32>
    %cst_324 = arith.constant dense<0.000000e+00> : vector<16xf32>
    %876 = vector.multi_reduction <add>, %875, %cst_324 [1] : vector<16x16xf32> to vector<16xf32>
    %877 = vector.shape_cast %876 : vector<16xf32> to vector<16x1xf32>
    %878 = vector.broadcast %877 : vector<16x1xf32> to vector<16x16xf32>
    %879 = arith.divf %875, %878 : vector<16x16xf32>
    %cst_325 = arith.constant dense<0.000000e+00> : vector<16x8xf32>
    %880 = tpu.matmul %879, %835, %cst_325 {dimension_numbers = #tpu.dot_dimension_numbers<[1], [0], [0], [1], [0, 0, 1, 1], [], []>} : vector<16x16xf32>, vector<16x8xf32>, vector<16x8xf32> -> vector<16x8xf32>
    %881 = vector.extract_strided_slice %714 {offsets = [0, 16], sizes = [16, 8], strides = [1, 1]} : vector<16x32xf32> to vector<16x8xf32>
    %882 = vector.shape_cast %865 : vector<16x1xi1> to vector<16x1xi1>
    %883 = vector.broadcast %882 : vector<16x1xi1> to vector<16x8xi1>
    %884 = arith.select %883, %880, %881 : vector<16x8xi1>, vector<16x8xf32>
    %885 = vector.extract_strided_slice %699 {offsets = [16, 0], sizes = [8, 32], strides = [1, 1]} : vector<32x32xf32> to vector<8x32xf32>
    %cst_326 = arith.constant dense<0.000000e+00> : vector<16x32xf32>
    %886 = tpu.matmul %884, %885, %cst_326 {dimension_numbers = #tpu.dot_dimension_numbers<[1], [0], [0], [1], [0, 0, 1, 1], [], []>} : vector<16x8xf32>, vector<8x32xf32>, vector<16x32xf32> -> vector<16x32xf32>
    %887 = arith.addf %832, %886 : vector<16x32xf32>
    %888 = vector.extract_strided_slice %705 {offsets = [0, 24], sizes = [16, 8], strides = [1, 1]} : vector<16x32xf32> to vector<16x8xf32>
    %889 = vector.extract_strided_slice %706 {offsets = [0, 24], sizes = [16, 8], strides = [1, 1]} : vector<16x32xf32> to vector<16x8xf32>
    %890 = vector.extract_strided_slice %707 {offsets = [0, 24], sizes = [16, 8], strides = [1, 1]} : vector<16x32xf32> to vector<16x8xf32>
    %cst_327 = arith.constant dense<0.000000e+00> : vector<16x16xf32>
    %891 = tpu.matmul %888, %889, %cst_327 {dimension_numbers = #tpu.dot_dimension_numbers<[1], [1], [0], [0], [0, 0, 1, 0], [], []>} : vector<16x8xf32>, vector<16x8xf32>, vector<16x16xf32> -> vector<16x16xf32>
    %cst_328 = arith.constant -1.000000e+30 : f32
    %892 = vector.broadcast %cst_328 : f32 to vector<16x16xf32>
    %893 = arith.select %723, %891, %892 : vector<16x16xi1>, vector<16x16xf32>
    %cst_329 = arith.constant dense<0xFF800000> : vector<16xf32>
    %894 = vector.multi_reduction <maximumf>, %893, %cst_329 [1] : vector<16x16xf32> to vector<16xf32>
    %895 = vector.shape_cast %894 : vector<16xf32> to vector<16x1xf32>
    %896 = arith.mulf %891, %701 : vector<16x16xf32>
    %cst_330 = arith.constant dense<0.000000e+00> : vector<16xf32>
    %897 = vector.multi_reduction <add>, %896, %cst_330 [1] : vector<16x16xf32> to vector<16xf32>
    %898 = vector.shape_cast %897 : vector<16xf32> to vector<16x1xf32>
    %cst_331 = arith.constant 1.600000e+01 : f32
    %899 = vector.broadcast %cst_331 : f32 to vector<16x1xf32>
    %900 = arith.divf %898, %899 : vector<16x1xf32>
    %901 = arith.subf %895, %900 : vector<16x1xf32>
    %902 = vector.broadcast %901 : vector<16x1xf32> to vector<16x16xf32>
    %903 = arith.mulf %902, %720 : vector<16x16xf32>
    %cst_332 = arith.constant dense<0.000000e+00> : vector<1x16xf32>
    %904 = tpu.matmul %721, %903, %cst_332 {dimension_numbers = #tpu.dot_dimension_numbers<[1], [0], [0], [1], [0, 0, 1, 1], [], []>} : vector<1x16xf32>, vector<16x16xf32>, vector<1x16xf32> -> vector<1x16xf32>
    %905 = vector.broadcast %904 : vector<1x16xf32> to vector<16x16xf32>
    %906 = vector.broadcast %901 : vector<16x1xf32> to vector<16x16xf32>
    %907 = arith.cmpf ogt, %905, %906 : vector<16x16xf32>
    %908 = vector.broadcast %904 : vector<1x16xf32> to vector<16x16xf32>
    %909 = vector.broadcast %901 : vector<16x1xf32> to vector<16x16xf32>
    %910 = arith.cmpf oeq, %908, %909 : vector<16x16xf32>
    %911 = arith.cmpi slt, %716, %715 : vector<16x16xi32>
    %912 = arith.andi %910, %911 : vector<16x16xi1>
    %913 = arith.ori %907, %912 : vector<16x16xi1>
    %cst_333 = arith.constant 1.000000e+00 : f32
    %cst_334 = arith.constant 0.000000e+00 : f32
    %914 = vector.broadcast %cst_333 : f32 to vector<16x16xf32>
    %915 = vector.broadcast %cst_334 : f32 to vector<16x16xf32>
    %916 = arith.select %913, %914, %915 : vector<16x16xi1>, vector<16x16xf32>
    %cst_335 = arith.constant dense<0.000000e+00> : vector<16xf32>
    %917 = vector.multi_reduction <add>, %916, %cst_335 [1] : vector<16x16xf32> to vector<16xf32>
    %918 = vector.shape_cast %917 : vector<16xf32> to vector<16x1xf32>
    %cst_336 = arith.constant 1.500000e+01 : f32
    %919 = vector.broadcast %cst_336 : f32 to vector<16x1xf32>
    %920 = arith.cmpf olt, %918, %919 : vector<16x1xf32>
    %cst_337 = arith.constant 0.353553385 : f32
    %921 = vector.broadcast %cst_337 : f32 to vector<16x16xf32>
    %922 = arith.mulf %891, %921 : vector<16x16xf32>
    %923 = arith.cmpi sgt, %709, %708 : vector<16x16xi32>
    %cst_338 = arith.constant -1.000000e+30 : f32
    %924 = vector.broadcast %cst_338 : f32 to vector<16x16xf32>
    %925 = arith.select %923, %924, %922 : vector<16x16xi1>, vector<16x16xf32>
    %cst_339 = arith.constant dense<0xFF800000> : vector<16xf32>
    %926 = vector.multi_reduction <maximumf>, %925, %cst_339 [1] : vector<16x16xf32> to vector<16xf32>
    %927 = vector.shape_cast %926 : vector<16xf32> to vector<16x1xf32>
    %928 = vector.broadcast %927 : vector<16x1xf32> to vector<16x16xf32>
    %929 = arith.subf %925, %928 : vector<16x16xf32>
    %930 = math.exp %929 : vector<16x16xf32>
    %cst_340 = arith.constant dense<0.000000e+00> : vector<16xf32>
    %931 = vector.multi_reduction <add>, %930, %cst_340 [1] : vector<16x16xf32> to vector<16xf32>
    %932 = vector.shape_cast %931 : vector<16xf32> to vector<16x1xf32>
    %933 = vector.broadcast %932 : vector<16x1xf32> to vector<16x16xf32>
    %934 = arith.divf %930, %933 : vector<16x16xf32>
    %cst_341 = arith.constant dense<0.000000e+00> : vector<16x8xf32>
    %935 = tpu.matmul %934, %890, %cst_341 {dimension_numbers = #tpu.dot_dimension_numbers<[1], [0], [0], [1], [0, 0, 1, 1], [], []>} : vector<16x16xf32>, vector<16x8xf32>, vector<16x8xf32> -> vector<16x8xf32>
    %936 = vector.extract_strided_slice %714 {offsets = [0, 24], sizes = [16, 8], strides = [1, 1]} : vector<16x32xf32> to vector<16x8xf32>
    %937 = vector.shape_cast %920 : vector<16x1xi1> to vector<16x1xi1>
    %938 = vector.broadcast %937 : vector<16x1xi1> to vector<16x8xi1>
    %939 = arith.select %938, %935, %936 : vector<16x8xi1>, vector<16x8xf32>
    %940 = vector.extract_strided_slice %699 {offsets = [24, 0], sizes = [8, 32], strides = [1, 1]} : vector<32x32xf32> to vector<8x32xf32>
    %cst_342 = arith.constant dense<0.000000e+00> : vector<16x32xf32>
    %941 = tpu.matmul %939, %940, %cst_342 {dimension_numbers = #tpu.dot_dimension_numbers<[1], [0], [0], [1], [0, 0, 1, 1], [], []>} : vector<16x8xf32>, vector<8x32xf32>, vector<16x32xf32> -> vector<16x32xf32>
    %942 = arith.addf %887, %941 : vector<16x32xf32>
    %943 = vector.broadcast %700 : vector<1x32xf32> to vector<16x32xf32>
    %944 = arith.addf %942, %943 : vector<16x32xf32>
    %945 = arith.addf %696, %944 : vector<16x32xf32>
    %c0_343 = arith.constant 0 : index
    %c0_344 = arith.constant 0 : index
    %946 = vector.load %arg40[%c0_343, %c0_344] : memref<1x32xf32, #tpu.memory_space<vmem>>, vector<1x32xf32>
    %c0_345 = arith.constant 0 : index
    %c0_346 = arith.constant 0 : index
    %947 = vector.load %arg41[%c0_345, %c0_346] : memref<1x32xf32, #tpu.memory_space<vmem>>, vector<1x32xf32>
    %cst_347 = arith.constant dense<0.000000e+00> : vector<16xf32>
    %948 = vector.multi_reduction <add>, %945, %cst_347 [1] : vector<16x32xf32> to vector<16xf32>
    %949 = vector.shape_cast %948 : vector<16xf32> to vector<16x1xf32>
    %cst_348 = arith.constant 3.200000e+01 : f32
    %950 = vector.broadcast %cst_348 : f32 to vector<16x1xf32>
    %951 = arith.divf %949, %950 : vector<16x1xf32>
    %952 = vector.broadcast %951 : vector<16x1xf32> to vector<16x32xf32>
    %953 = arith.subf %945, %952 : vector<16x32xf32>
    %954 = arith.mulf %953, %953 : vector<16x32xf32>
    %cst_349 = arith.constant dense<0.000000e+00> : vector<16xf32>
    %955 = vector.multi_reduction <add>, %954, %cst_349 [1] : vector<16x32xf32> to vector<16xf32>
    %956 = vector.shape_cast %955 : vector<16xf32> to vector<16x1xf32>
    %cst_350 = arith.constant 3.200000e+01 : f32
    %957 = vector.broadcast %cst_350 : f32 to vector<16x1xf32>
    %958 = arith.divf %956, %957 : vector<16x1xf32>
    %959 = vector.broadcast %951 : vector<16x1xf32> to vector<16x32xf32>
    %960 = arith.subf %945, %959 : vector<16x32xf32>
    %cst_351 = arith.constant 9.99999974E-6 : f32
    %961 = vector.broadcast %cst_351 : f32 to vector<16x1xf32>
    %962 = arith.addf %958, %961 : vector<16x1xf32>
    %963 = math.rsqrt %962 : vector<16x1xf32>
    %964 = vector.broadcast %963 : vector<16x1xf32> to vector<16x32xf32>
    %965 = arith.mulf %960, %964 : vector<16x32xf32>
    %966 = vector.broadcast %946 : vector<1x32xf32> to vector<16x32xf32>
    %967 = arith.mulf %965, %966 : vector<16x32xf32>
    %968 = vector.broadcast %947 : vector<1x32xf32> to vector<16x32xf32>
    %969 = arith.addf %967, %968 : vector<16x32xf32>
    %c0_352 = arith.constant 0 : index
    %c0_353 = arith.constant 0 : index
    %970 = vector.load %arg42[%c0_352, %c0_353] : memref<32x96xf32, #tpu.memory_space<vmem>>, vector<32x96xf32>
    %c0_354 = arith.constant 0 : index
    %c0_355 = arith.constant 0 : index
    %971 = vector.load %arg43[%c0_354, %c0_355] : memref<1x96xf32, #tpu.memory_space<vmem>>, vector<1x96xf32>
    %c0_356 = arith.constant 0 : index
    %c0_357 = arith.constant 0 : index
    %972 = vector.load %arg44[%c0_356, %c0_357] : memref<32x32xf32, #tpu.memory_space<vmem>>, vector<32x32xf32>
    %c0_358 = arith.constant 0 : index
    %c0_359 = arith.constant 0 : index
    %973 = vector.load %arg45[%c0_358, %c0_359] : memref<1x32xf32, #tpu.memory_space<vmem>>, vector<1x32xf32>
    %c0_360 = arith.constant 0 : index
    %c0_361 = arith.constant 0 : index
    %974 = vector.load %arg35[%c0_360, %c0_361] : memref<16x16xf32, #tpu.memory_space<vmem>>, vector<16x16xf32>
    %975 = vector.extract_strided_slice %970 {offsets = [0, 0], sizes = [32, 32], strides = [1, 1]} : vector<32x96xf32> to vector<32x32xf32>
    %cst_362 = arith.constant dense<0.000000e+00> : vector<16x32xf32>
    %976 = tpu.matmul %969, %975, %cst_362 {dimension_numbers = #tpu.dot_dimension_numbers<[1], [0], [0], [1], [0, 0, 1, 1], [], []>} : vector<16x32xf32>, vector<32x32xf32>, vector<16x32xf32> -> vector<16x32xf32>
    %977 = vector.extract_strided_slice %971 {offsets = [0, 0], sizes = [1, 32], strides = [1, 1]} : vector<1x96xf32> to vector<1x32xf32>
    %978 = vector.broadcast %977 : vector<1x32xf32> to vector<16x32xf32>
    %979 = arith.addf %976, %978 : vector<16x32xf32>
    %980 = vector.extract_strided_slice %970 {offsets = [0, 32], sizes = [32, 64], strides = [1, 1]} : vector<32x96xf32> to vector<32x64xf32>
    %cst_363 = arith.constant dense<0.000000e+00> : vector<16x64xf32>
    %981 = tpu.matmul %691, %980, %cst_363 {dimension_numbers = #tpu.dot_dimension_numbers<[1], [0], [0], [1], [0, 0, 1, 1], [], []>} : vector<16x32xf32>, vector<32x64xf32>, vector<16x64xf32> -> vector<16x64xf32>
    %982 = vector.extract_strided_slice %971 {offsets = [0, 32], sizes = [1, 64], strides = [1, 1]} : vector<1x96xf32> to vector<1x64xf32>
    %983 = vector.broadcast %982 : vector<1x64xf32> to vector<16x64xf32>
    %984 = arith.addf %981, %983 : vector<16x64xf32>
    %985 = vector.extract_strided_slice %984 {offsets = [0, 0], sizes = [16, 32], strides = [1, 1]} : vector<16x64xf32> to vector<16x32xf32>
    %986 = vector.extract_strided_slice %984 {offsets = [0, 32], sizes = [16, 32], strides = [1, 1]} : vector<16x64xf32> to vector<16x32xf32>
    %cst_364 = arith.constant 6.250000e-02 : f32
    %987 = vector.broadcast %cst_364 : f32 to vector<16x16xf32>
    %cst_365 = arith.constant dense<0.000000e+00> : vector<16x32xf32>
    %988 = tpu.matmul %987, %986, %cst_365 {dimension_numbers = #tpu.dot_dimension_numbers<[1], [0], [0], [1], [0, 0, 1, 1], [], []>} : vector<16x16xf32>, vector<16x32xf32>, vector<16x32xf32> -> vector<16x32xf32>
    %989 = tpu.iota {dimensions = array<i32: 0>} : vector<16x16xi32>
    %990 = tpu.iota {dimensions = array<i32: 1>} : vector<16x16xi32>
    %991 = arith.cmpi eq, %989, %990 : vector<16x16xi32>
    %cst_366 = arith.constant 1.000000e+00 : f32
    %cst_367 = arith.constant 0.000000e+00 : f32
    %992 = vector.broadcast %cst_366 : f32 to vector<16x16xf32>
    %993 = vector.broadcast %cst_367 : f32 to vector<16x16xf32>
    %994 = arith.select %991, %992, %993 : vector<16x16xi1>, vector<16x16xf32>
    %cst_368 = arith.constant 1.000000e+00 : f32
    %995 = vector.broadcast %cst_368 : f32 to vector<1x16xf32>
    %cst_369 = arith.constant 0.000000e+00 : f32
    %996 = vector.broadcast %cst_369 : f32 to vector<16x16xf32>
    %997 = arith.cmpf ogt, %974, %996 : vector<16x16xf32>
    %998 = vector.extract_strided_slice %979 {offsets = [0, 0], sizes = [16, 8], strides = [1, 1]} : vector<16x32xf32> to vector<16x8xf32>
    %999 = vector.extract_strided_slice %985 {offsets = [0, 0], sizes = [16, 8], strides = [1, 1]} : vector<16x32xf32> to vector<16x8xf32>
    %1000 = vector.extract_strided_slice %986 {offsets = [0, 0], sizes = [16, 8], strides = [1, 1]} : vector<16x32xf32> to vector<16x8xf32>
    %cst_370 = arith.constant dense<0.000000e+00> : vector<16x16xf32>
    %1001 = tpu.matmul %998, %999, %cst_370 {dimension_numbers = #tpu.dot_dimension_numbers<[1], [1], [0], [0], [0, 0, 1, 0], [], []>} : vector<16x8xf32>, vector<16x8xf32>, vector<16x16xf32> -> vector<16x16xf32>
    %cst_371 = arith.constant -1.000000e+30 : f32
    %1002 = vector.broadcast %cst_371 : f32 to vector<16x16xf32>
    %1003 = arith.select %997, %1001, %1002 : vector<16x16xi1>, vector<16x16xf32>
    %cst_372 = arith.constant dense<0xFF800000> : vector<16xf32>
    %1004 = vector.multi_reduction <maximumf>, %1003, %cst_372 [1] : vector<16x16xf32> to vector<16xf32>
    %1005 = vector.shape_cast %1004 : vector<16xf32> to vector<16x1xf32>
    %1006 = arith.mulf %1001, %974 : vector<16x16xf32>
    %cst_373 = arith.constant dense<0.000000e+00> : vector<16xf32>
    %1007 = vector.multi_reduction <add>, %1006, %cst_373 [1] : vector<16x16xf32> to vector<16xf32>
    %1008 = vector.shape_cast %1007 : vector<16xf32> to vector<16x1xf32>
    %cst_374 = arith.constant 1.600000e+01 : f32
    %1009 = vector.broadcast %cst_374 : f32 to vector<16x1xf32>
    %1010 = arith.divf %1008, %1009 : vector<16x1xf32>
    %1011 = arith.subf %1005, %1010 : vector<16x1xf32>
    %1012 = vector.broadcast %1011 : vector<16x1xf32> to vector<16x16xf32>
    %1013 = arith.mulf %1012, %994 : vector<16x16xf32>
    %cst_375 = arith.constant dense<0.000000e+00> : vector<1x16xf32>
    %1014 = tpu.matmul %995, %1013, %cst_375 {dimension_numbers = #tpu.dot_dimension_numbers<[1], [0], [0], [1], [0, 0, 1, 1], [], []>} : vector<1x16xf32>, vector<16x16xf32>, vector<1x16xf32> -> vector<1x16xf32>
    %1015 = vector.broadcast %1014 : vector<1x16xf32> to vector<16x16xf32>
    %1016 = vector.broadcast %1011 : vector<16x1xf32> to vector<16x16xf32>
    %1017 = arith.cmpf ogt, %1015, %1016 : vector<16x16xf32>
    %1018 = vector.broadcast %1014 : vector<1x16xf32> to vector<16x16xf32>
    %1019 = vector.broadcast %1011 : vector<16x1xf32> to vector<16x16xf32>
    %1020 = arith.cmpf oeq, %1018, %1019 : vector<16x16xf32>
    %1021 = arith.cmpi slt, %990, %989 : vector<16x16xi32>
    %1022 = arith.andi %1020, %1021 : vector<16x16xi1>
    %1023 = arith.ori %1017, %1022 : vector<16x16xi1>
    %cst_376 = arith.constant 1.000000e+00 : f32
    %cst_377 = arith.constant 0.000000e+00 : f32
    %1024 = vector.broadcast %cst_376 : f32 to vector<16x16xf32>
    %1025 = vector.broadcast %cst_377 : f32 to vector<16x16xf32>
    %1026 = arith.select %1023, %1024, %1025 : vector<16x16xi1>, vector<16x16xf32>
    %cst_378 = arith.constant dense<0.000000e+00> : vector<16xf32>
    %1027 = vector.multi_reduction <add>, %1026, %cst_378 [1] : vector<16x16xf32> to vector<16xf32>
    %1028 = vector.shape_cast %1027 : vector<16xf32> to vector<16x1xf32>
    %cst_379 = arith.constant 1.500000e+01 : f32
    %1029 = vector.broadcast %cst_379 : f32 to vector<16x1xf32>
    %1030 = arith.cmpf olt, %1028, %1029 : vector<16x1xf32>
    %cst_380 = arith.constant 0.353553385 : f32
    %1031 = vector.broadcast %cst_380 : f32 to vector<16x16xf32>
    %1032 = arith.mulf %1001, %1031 : vector<16x16xf32>
    %cst_381 = arith.constant dense<0xFF800000> : vector<16xf32>
    %1033 = vector.multi_reduction <maximumf>, %1032, %cst_381 [1] : vector<16x16xf32> to vector<16xf32>
    %1034 = vector.shape_cast %1033 : vector<16xf32> to vector<16x1xf32>
    %1035 = vector.broadcast %1034 : vector<16x1xf32> to vector<16x16xf32>
    %1036 = arith.subf %1032, %1035 : vector<16x16xf32>
    %1037 = math.exp %1036 : vector<16x16xf32>
    %cst_382 = arith.constant dense<0.000000e+00> : vector<16xf32>
    %1038 = vector.multi_reduction <add>, %1037, %cst_382 [1] : vector<16x16xf32> to vector<16xf32>
    %1039 = vector.shape_cast %1038 : vector<16xf32> to vector<16x1xf32>
    %1040 = vector.broadcast %1039 : vector<16x1xf32> to vector<16x16xf32>
    %1041 = arith.divf %1037, %1040 : vector<16x16xf32>
    %cst_383 = arith.constant dense<0.000000e+00> : vector<16x8xf32>
    %1042 = tpu.matmul %1041, %1000, %cst_383 {dimension_numbers = #tpu.dot_dimension_numbers<[1], [0], [0], [1], [0, 0, 1, 1], [], []>} : vector<16x16xf32>, vector<16x8xf32>, vector<16x8xf32> -> vector<16x8xf32>
    %1043 = vector.extract_strided_slice %988 {offsets = [0, 0], sizes = [16, 8], strides = [1, 1]} : vector<16x32xf32> to vector<16x8xf32>
    %1044 = vector.shape_cast %1030 : vector<16x1xi1> to vector<16x1xi1>
    %1045 = vector.broadcast %1044 : vector<16x1xi1> to vector<16x8xi1>
    %1046 = arith.select %1045, %1042, %1043 : vector<16x8xi1>, vector<16x8xf32>
    %1047 = vector.extract_strided_slice %972 {offsets = [0, 0], sizes = [8, 32], strides = [1, 1]} : vector<32x32xf32> to vector<8x32xf32>
    %cst_384 = arith.constant dense<0.000000e+00> : vector<16x32xf32>
    %1048 = tpu.matmul %1046, %1047, %cst_384 {dimension_numbers = #tpu.dot_dimension_numbers<[1], [0], [0], [1], [0, 0, 1, 1], [], []>} : vector<16x8xf32>, vector<8x32xf32>, vector<16x32xf32> -> vector<16x32xf32>
    %1049 = vector.extract_strided_slice %979 {offsets = [0, 8], sizes = [16, 8], strides = [1, 1]} : vector<16x32xf32> to vector<16x8xf32>
    %1050 = vector.extract_strided_slice %985 {offsets = [0, 8], sizes = [16, 8], strides = [1, 1]} : vector<16x32xf32> to vector<16x8xf32>
    %1051 = vector.extract_strided_slice %986 {offsets = [0, 8], sizes = [16, 8], strides = [1, 1]} : vector<16x32xf32> to vector<16x8xf32>
    %cst_385 = arith.constant dense<0.000000e+00> : vector<16x16xf32>
    %1052 = tpu.matmul %1049, %1050, %cst_385 {dimension_numbers = #tpu.dot_dimension_numbers<[1], [1], [0], [0], [0, 0, 1, 0], [], []>} : vector<16x8xf32>, vector<16x8xf32>, vector<16x16xf32> -> vector<16x16xf32>
    %cst_386 = arith.constant -1.000000e+30 : f32
    %1053 = vector.broadcast %cst_386 : f32 to vector<16x16xf32>
    %1054 = arith.select %997, %1052, %1053 : vector<16x16xi1>, vector<16x16xf32>
    %cst_387 = arith.constant dense<0xFF800000> : vector<16xf32>
    %1055 = vector.multi_reduction <maximumf>, %1054, %cst_387 [1] : vector<16x16xf32> to vector<16xf32>
    %1056 = vector.shape_cast %1055 : vector<16xf32> to vector<16x1xf32>
    %1057 = arith.mulf %1052, %974 : vector<16x16xf32>
    %cst_388 = arith.constant dense<0.000000e+00> : vector<16xf32>
    %1058 = vector.multi_reduction <add>, %1057, %cst_388 [1] : vector<16x16xf32> to vector<16xf32>
    %1059 = vector.shape_cast %1058 : vector<16xf32> to vector<16x1xf32>
    %cst_389 = arith.constant 1.600000e+01 : f32
    %1060 = vector.broadcast %cst_389 : f32 to vector<16x1xf32>
    %1061 = arith.divf %1059, %1060 : vector<16x1xf32>
    %1062 = arith.subf %1056, %1061 : vector<16x1xf32>
    %1063 = vector.broadcast %1062 : vector<16x1xf32> to vector<16x16xf32>
    %1064 = arith.mulf %1063, %994 : vector<16x16xf32>
    %cst_390 = arith.constant dense<0.000000e+00> : vector<1x16xf32>
    %1065 = tpu.matmul %995, %1064, %cst_390 {dimension_numbers = #tpu.dot_dimension_numbers<[1], [0], [0], [1], [0, 0, 1, 1], [], []>} : vector<1x16xf32>, vector<16x16xf32>, vector<1x16xf32> -> vector<1x16xf32>
    %1066 = vector.broadcast %1065 : vector<1x16xf32> to vector<16x16xf32>
    %1067 = vector.broadcast %1062 : vector<16x1xf32> to vector<16x16xf32>
    %1068 = arith.cmpf ogt, %1066, %1067 : vector<16x16xf32>
    %1069 = vector.broadcast %1065 : vector<1x16xf32> to vector<16x16xf32>
    %1070 = vector.broadcast %1062 : vector<16x1xf32> to vector<16x16xf32>
    %1071 = arith.cmpf oeq, %1069, %1070 : vector<16x16xf32>
    %1072 = arith.cmpi slt, %990, %989 : vector<16x16xi32>
    %1073 = arith.andi %1071, %1072 : vector<16x16xi1>
    %1074 = arith.ori %1068, %1073 : vector<16x16xi1>
    %cst_391 = arith.constant 1.000000e+00 : f32
    %cst_392 = arith.constant 0.000000e+00 : f32
    %1075 = vector.broadcast %cst_391 : f32 to vector<16x16xf32>
    %1076 = vector.broadcast %cst_392 : f32 to vector<16x16xf32>
    %1077 = arith.select %1074, %1075, %1076 : vector<16x16xi1>, vector<16x16xf32>
    %cst_393 = arith.constant dense<0.000000e+00> : vector<16xf32>
    %1078 = vector.multi_reduction <add>, %1077, %cst_393 [1] : vector<16x16xf32> to vector<16xf32>
    %1079 = vector.shape_cast %1078 : vector<16xf32> to vector<16x1xf32>
    %cst_394 = arith.constant 1.500000e+01 : f32
    %1080 = vector.broadcast %cst_394 : f32 to vector<16x1xf32>
    %1081 = arith.cmpf olt, %1079, %1080 : vector<16x1xf32>
    %cst_395 = arith.constant 0.353553385 : f32
    %1082 = vector.broadcast %cst_395 : f32 to vector<16x16xf32>
    %1083 = arith.mulf %1052, %1082 : vector<16x16xf32>
    %cst_396 = arith.constant dense<0xFF800000> : vector<16xf32>
    %1084 = vector.multi_reduction <maximumf>, %1083, %cst_396 [1] : vector<16x16xf32> to vector<16xf32>
    %1085 = vector.shape_cast %1084 : vector<16xf32> to vector<16x1xf32>
    %1086 = vector.broadcast %1085 : vector<16x1xf32> to vector<16x16xf32>
    %1087 = arith.subf %1083, %1086 : vector<16x16xf32>
    %1088 = math.exp %1087 : vector<16x16xf32>
    %cst_397 = arith.constant dense<0.000000e+00> : vector<16xf32>
    %1089 = vector.multi_reduction <add>, %1088, %cst_397 [1] : vector<16x16xf32> to vector<16xf32>
    %1090 = vector.shape_cast %1089 : vector<16xf32> to vector<16x1xf32>
    %1091 = vector.broadcast %1090 : vector<16x1xf32> to vector<16x16xf32>
    %1092 = arith.divf %1088, %1091 : vector<16x16xf32>
    %cst_398 = arith.constant dense<0.000000e+00> : vector<16x8xf32>
    %1093 = tpu.matmul %1092, %1051, %cst_398 {dimension_numbers = #tpu.dot_dimension_numbers<[1], [0], [0], [1], [0, 0, 1, 1], [], []>} : vector<16x16xf32>, vector<16x8xf32>, vector<16x8xf32> -> vector<16x8xf32>
    %1094 = vector.extract_strided_slice %988 {offsets = [0, 8], sizes = [16, 8], strides = [1, 1]} : vector<16x32xf32> to vector<16x8xf32>
    %1095 = vector.shape_cast %1081 : vector<16x1xi1> to vector<16x1xi1>
    %1096 = vector.broadcast %1095 : vector<16x1xi1> to vector<16x8xi1>
    %1097 = arith.select %1096, %1093, %1094 : vector<16x8xi1>, vector<16x8xf32>
    %1098 = vector.extract_strided_slice %972 {offsets = [8, 0], sizes = [8, 32], strides = [1, 1]} : vector<32x32xf32> to vector<8x32xf32>
    %cst_399 = arith.constant dense<0.000000e+00> : vector<16x32xf32>
    %1099 = tpu.matmul %1097, %1098, %cst_399 {dimension_numbers = #tpu.dot_dimension_numbers<[1], [0], [0], [1], [0, 0, 1, 1], [], []>} : vector<16x8xf32>, vector<8x32xf32>, vector<16x32xf32> -> vector<16x32xf32>
    %1100 = arith.addf %1048, %1099 : vector<16x32xf32>
    %1101 = vector.extract_strided_slice %979 {offsets = [0, 16], sizes = [16, 8], strides = [1, 1]} : vector<16x32xf32> to vector<16x8xf32>
    %1102 = vector.extract_strided_slice %985 {offsets = [0, 16], sizes = [16, 8], strides = [1, 1]} : vector<16x32xf32> to vector<16x8xf32>
    %1103 = vector.extract_strided_slice %986 {offsets = [0, 16], sizes = [16, 8], strides = [1, 1]} : vector<16x32xf32> to vector<16x8xf32>
    %cst_400 = arith.constant dense<0.000000e+00> : vector<16x16xf32>
    %1104 = tpu.matmul %1101, %1102, %cst_400 {dimension_numbers = #tpu.dot_dimension_numbers<[1], [1], [0], [0], [0, 0, 1, 0], [], []>} : vector<16x8xf32>, vector<16x8xf32>, vector<16x16xf32> -> vector<16x16xf32>
    %cst_401 = arith.constant -1.000000e+30 : f32
    %1105 = vector.broadcast %cst_401 : f32 to vector<16x16xf32>
    %1106 = arith.select %997, %1104, %1105 : vector<16x16xi1>, vector<16x16xf32>
    %cst_402 = arith.constant dense<0xFF800000> : vector<16xf32>
    %1107 = vector.multi_reduction <maximumf>, %1106, %cst_402 [1] : vector<16x16xf32> to vector<16xf32>
    %1108 = vector.shape_cast %1107 : vector<16xf32> to vector<16x1xf32>
    %1109 = arith.mulf %1104, %974 : vector<16x16xf32>
    %cst_403 = arith.constant dense<0.000000e+00> : vector<16xf32>
    %1110 = vector.multi_reduction <add>, %1109, %cst_403 [1] : vector<16x16xf32> to vector<16xf32>
    %1111 = vector.shape_cast %1110 : vector<16xf32> to vector<16x1xf32>
    %cst_404 = arith.constant 1.600000e+01 : f32
    %1112 = vector.broadcast %cst_404 : f32 to vector<16x1xf32>
    %1113 = arith.divf %1111, %1112 : vector<16x1xf32>
    %1114 = arith.subf %1108, %1113 : vector<16x1xf32>
    %1115 = vector.broadcast %1114 : vector<16x1xf32> to vector<16x16xf32>
    %1116 = arith.mulf %1115, %994 : vector<16x16xf32>
    %cst_405 = arith.constant dense<0.000000e+00> : vector<1x16xf32>
    %1117 = tpu.matmul %995, %1116, %cst_405 {dimension_numbers = #tpu.dot_dimension_numbers<[1], [0], [0], [1], [0, 0, 1, 1], [], []>} : vector<1x16xf32>, vector<16x16xf32>, vector<1x16xf32> -> vector<1x16xf32>
    %1118 = vector.broadcast %1117 : vector<1x16xf32> to vector<16x16xf32>
    %1119 = vector.broadcast %1114 : vector<16x1xf32> to vector<16x16xf32>
    %1120 = arith.cmpf ogt, %1118, %1119 : vector<16x16xf32>
    %1121 = vector.broadcast %1117 : vector<1x16xf32> to vector<16x16xf32>
    %1122 = vector.broadcast %1114 : vector<16x1xf32> to vector<16x16xf32>
    %1123 = arith.cmpf oeq, %1121, %1122 : vector<16x16xf32>
    %1124 = arith.cmpi slt, %990, %989 : vector<16x16xi32>
    %1125 = arith.andi %1123, %1124 : vector<16x16xi1>
    %1126 = arith.ori %1120, %1125 : vector<16x16xi1>
    %cst_406 = arith.constant 1.000000e+00 : f32
    %cst_407 = arith.constant 0.000000e+00 : f32
    %1127 = vector.broadcast %cst_406 : f32 to vector<16x16xf32>
    %1128 = vector.broadcast %cst_407 : f32 to vector<16x16xf32>
    %1129 = arith.select %1126, %1127, %1128 : vector<16x16xi1>, vector<16x16xf32>
    %cst_408 = arith.constant dense<0.000000e+00> : vector<16xf32>
    %1130 = vector.multi_reduction <add>, %1129, %cst_408 [1] : vector<16x16xf32> to vector<16xf32>
    %1131 = vector.shape_cast %1130 : vector<16xf32> to vector<16x1xf32>
    %cst_409 = arith.constant 1.500000e+01 : f32
    %1132 = vector.broadcast %cst_409 : f32 to vector<16x1xf32>
    %1133 = arith.cmpf olt, %1131, %1132 : vector<16x1xf32>
    %cst_410 = arith.constant 0.353553385 : f32
    %1134 = vector.broadcast %cst_410 : f32 to vector<16x16xf32>
    %1135 = arith.mulf %1104, %1134 : vector<16x16xf32>
    %cst_411 = arith.constant dense<0xFF800000> : vector<16xf32>
    %1136 = vector.multi_reduction <maximumf>, %1135, %cst_411 [1] : vector<16x16xf32> to vector<16xf32>
    %1137 = vector.shape_cast %1136 : vector<16xf32> to vector<16x1xf32>
    %1138 = vector.broadcast %1137 : vector<16x1xf32> to vector<16x16xf32>
    %1139 = arith.subf %1135, %1138 : vector<16x16xf32>
    %1140 = math.exp %1139 : vector<16x16xf32>
    %cst_412 = arith.constant dense<0.000000e+00> : vector<16xf32>
    %1141 = vector.multi_reduction <add>, %1140, %cst_412 [1] : vector<16x16xf32> to vector<16xf32>
    %1142 = vector.shape_cast %1141 : vector<16xf32> to vector<16x1xf32>
    %1143 = vector.broadcast %1142 : vector<16x1xf32> to vector<16x16xf32>
    %1144 = arith.divf %1140, %1143 : vector<16x16xf32>
    %cst_413 = arith.constant dense<0.000000e+00> : vector<16x8xf32>
    %1145 = tpu.matmul %1144, %1103, %cst_413 {dimension_numbers = #tpu.dot_dimension_numbers<[1], [0], [0], [1], [0, 0, 1, 1], [], []>} : vector<16x16xf32>, vector<16x8xf32>, vector<16x8xf32> -> vector<16x8xf32>
    %1146 = vector.extract_strided_slice %988 {offsets = [0, 16], sizes = [16, 8], strides = [1, 1]} : vector<16x32xf32> to vector<16x8xf32>
    %1147 = vector.shape_cast %1133 : vector<16x1xi1> to vector<16x1xi1>
    %1148 = vector.broadcast %1147 : vector<16x1xi1> to vector<16x8xi1>
    %1149 = arith.select %1148, %1145, %1146 : vector<16x8xi1>, vector<16x8xf32>
    %1150 = vector.extract_strided_slice %972 {offsets = [16, 0], sizes = [8, 32], strides = [1, 1]} : vector<32x32xf32> to vector<8x32xf32>
    %cst_414 = arith.constant dense<0.000000e+00> : vector<16x32xf32>
    %1151 = tpu.matmul %1149, %1150, %cst_414 {dimension_numbers = #tpu.dot_dimension_numbers<[1], [0], [0], [1], [0, 0, 1, 1], [], []>} : vector<16x8xf32>, vector<8x32xf32>, vector<16x32xf32> -> vector<16x32xf32>
    %1152 = arith.addf %1100, %1151 : vector<16x32xf32>
    %1153 = vector.extract_strided_slice %979 {offsets = [0, 24], sizes = [16, 8], strides = [1, 1]} : vector<16x32xf32> to vector<16x8xf32>
    %1154 = vector.extract_strided_slice %985 {offsets = [0, 24], sizes = [16, 8], strides = [1, 1]} : vector<16x32xf32> to vector<16x8xf32>
    %1155 = vector.extract_strided_slice %986 {offsets = [0, 24], sizes = [16, 8], strides = [1, 1]} : vector<16x32xf32> to vector<16x8xf32>
    %cst_415 = arith.constant dense<0.000000e+00> : vector<16x16xf32>
    %1156 = tpu.matmul %1153, %1154, %cst_415 {dimension_numbers = #tpu.dot_dimension_numbers<[1], [1], [0], [0], [0, 0, 1, 0], [], []>} : vector<16x8xf32>, vector<16x8xf32>, vector<16x16xf32> -> vector<16x16xf32>
    %cst_416 = arith.constant -1.000000e+30 : f32
    %1157 = vector.broadcast %cst_416 : f32 to vector<16x16xf32>
    %1158 = arith.select %997, %1156, %1157 : vector<16x16xi1>, vector<16x16xf32>
    %cst_417 = arith.constant dense<0xFF800000> : vector<16xf32>
    %1159 = vector.multi_reduction <maximumf>, %1158, %cst_417 [1] : vector<16x16xf32> to vector<16xf32>
    %1160 = vector.shape_cast %1159 : vector<16xf32> to vector<16x1xf32>
    %1161 = arith.mulf %1156, %974 : vector<16x16xf32>
    %cst_418 = arith.constant dense<0.000000e+00> : vector<16xf32>
    %1162 = vector.multi_reduction <add>, %1161, %cst_418 [1] : vector<16x16xf32> to vector<16xf32>
    %1163 = vector.shape_cast %1162 : vector<16xf32> to vector<16x1xf32>
    %cst_419 = arith.constant 1.600000e+01 : f32
    %1164 = vector.broadcast %cst_419 : f32 to vector<16x1xf32>
    %1165 = arith.divf %1163, %1164 : vector<16x1xf32>
    %1166 = arith.subf %1160, %1165 : vector<16x1xf32>
    %1167 = vector.broadcast %1166 : vector<16x1xf32> to vector<16x16xf32>
    %1168 = arith.mulf %1167, %994 : vector<16x16xf32>
    %cst_420 = arith.constant dense<0.000000e+00> : vector<1x16xf32>
    %1169 = tpu.matmul %995, %1168, %cst_420 {dimension_numbers = #tpu.dot_dimension_numbers<[1], [0], [0], [1], [0, 0, 1, 1], [], []>} : vector<1x16xf32>, vector<16x16xf32>, vector<1x16xf32> -> vector<1x16xf32>
    %1170 = vector.broadcast %1169 : vector<1x16xf32> to vector<16x16xf32>
    %1171 = vector.broadcast %1166 : vector<16x1xf32> to vector<16x16xf32>
    %1172 = arith.cmpf ogt, %1170, %1171 : vector<16x16xf32>
    %1173 = vector.broadcast %1169 : vector<1x16xf32> to vector<16x16xf32>
    %1174 = vector.broadcast %1166 : vector<16x1xf32> to vector<16x16xf32>
    %1175 = arith.cmpf oeq, %1173, %1174 : vector<16x16xf32>
    %1176 = arith.cmpi slt, %990, %989 : vector<16x16xi32>
    %1177 = arith.andi %1175, %1176 : vector<16x16xi1>
    %1178 = arith.ori %1172, %1177 : vector<16x16xi1>
    %cst_421 = arith.constant 1.000000e+00 : f32
    %cst_422 = arith.constant 0.000000e+00 : f32
    %1179 = vector.broadcast %cst_421 : f32 to vector<16x16xf32>
    %1180 = vector.broadcast %cst_422 : f32 to vector<16x16xf32>
    %1181 = arith.select %1178, %1179, %1180 : vector<16x16xi1>, vector<16x16xf32>
    %cst_423 = arith.constant dense<0.000000e+00> : vector<16xf32>
    %1182 = vector.multi_reduction <add>, %1181, %cst_423 [1] : vector<16x16xf32> to vector<16xf32>
    %1183 = vector.shape_cast %1182 : vector<16xf32> to vector<16x1xf32>
    %cst_424 = arith.constant 1.500000e+01 : f32
    %1184 = vector.broadcast %cst_424 : f32 to vector<16x1xf32>
    %1185 = arith.cmpf olt, %1183, %1184 : vector<16x1xf32>
    %cst_425 = arith.constant 0.353553385 : f32
    %1186 = vector.broadcast %cst_425 : f32 to vector<16x16xf32>
    %1187 = arith.mulf %1156, %1186 : vector<16x16xf32>
    %cst_426 = arith.constant dense<0xFF800000> : vector<16xf32>
    %1188 = vector.multi_reduction <maximumf>, %1187, %cst_426 [1] : vector<16x16xf32> to vector<16xf32>
    %1189 = vector.shape_cast %1188 : vector<16xf32> to vector<16x1xf32>
    %1190 = vector.broadcast %1189 : vector<16x1xf32> to vector<16x16xf32>
    %1191 = arith.subf %1187, %1190 : vector<16x16xf32>
    %1192 = math.exp %1191 : vector<16x16xf32>
    %cst_427 = arith.constant dense<0.000000e+00> : vector<16xf32>
    %1193 = vector.multi_reduction <add>, %1192, %cst_427 [1] : vector<16x16xf32> to vector<16xf32>
    %1194 = vector.shape_cast %1193 : vector<16xf32> to vector<16x1xf32>
    %1195 = vector.broadcast %1194 : vector<16x1xf32> to vector<16x16xf32>
    %1196 = arith.divf %1192, %1195 : vector<16x16xf32>
    %cst_428 = arith.constant dense<0.000000e+00> : vector<16x8xf32>
    %1197 = tpu.matmul %1196, %1155, %cst_428 {dimension_numbers = #tpu.dot_dimension_numbers<[1], [0], [0], [1], [0, 0, 1, 1], [], []>} : vector<16x16xf32>, vector<16x8xf32>, vector<16x8xf32> -> vector<16x8xf32>
    %1198 = vector.extract_strided_slice %988 {offsets = [0, 24], sizes = [16, 8], strides = [1, 1]} : vector<16x32xf32> to vector<16x8xf32>
    %1199 = vector.shape_cast %1185 : vector<16x1xi1> to vector<16x1xi1>
    %1200 = vector.broadcast %1199 : vector<16x1xi1> to vector<16x8xi1>
    %1201 = arith.select %1200, %1197, %1198 : vector<16x8xi1>, vector<16x8xf32>
    %1202 = vector.extract_strided_slice %972 {offsets = [24, 0], sizes = [8, 32], strides = [1, 1]} : vector<32x32xf32> to vector<8x32xf32>
    %cst_429 = arith.constant dense<0.000000e+00> : vector<16x32xf32>
    %1203 = tpu.matmul %1201, %1202, %cst_429 {dimension_numbers = #tpu.dot_dimension_numbers<[1], [0], [0], [1], [0, 0, 1, 1], [], []>} : vector<16x8xf32>, vector<8x32xf32>, vector<16x32xf32> -> vector<16x32xf32>
    %1204 = arith.addf %1152, %1203 : vector<16x32xf32>
    %1205 = vector.broadcast %973 : vector<1x32xf32> to vector<16x32xf32>
    %1206 = arith.addf %1204, %1205 : vector<16x32xf32>
    %1207 = arith.addf %969, %1206 : vector<16x32xf32>
    %c0_430 = arith.constant 0 : index
    %c0_431 = arith.constant 0 : index
    %1208 = vector.load %arg46[%c0_430, %c0_431] : memref<1x32xf32, #tpu.memory_space<vmem>>, vector<1x32xf32>
    %c0_432 = arith.constant 0 : index
    %c0_433 = arith.constant 0 : index
    %1209 = vector.load %arg47[%c0_432, %c0_433] : memref<1x32xf32, #tpu.memory_space<vmem>>, vector<1x32xf32>
    %cst_434 = arith.constant dense<0.000000e+00> : vector<16xf32>
    %1210 = vector.multi_reduction <add>, %1207, %cst_434 [1] : vector<16x32xf32> to vector<16xf32>
    %1211 = vector.shape_cast %1210 : vector<16xf32> to vector<16x1xf32>
    %cst_435 = arith.constant 3.200000e+01 : f32
    %1212 = vector.broadcast %cst_435 : f32 to vector<16x1xf32>
    %1213 = arith.divf %1211, %1212 : vector<16x1xf32>
    %1214 = vector.broadcast %1213 : vector<16x1xf32> to vector<16x32xf32>
    %1215 = arith.subf %1207, %1214 : vector<16x32xf32>
    %1216 = arith.mulf %1215, %1215 : vector<16x32xf32>
    %cst_436 = arith.constant dense<0.000000e+00> : vector<16xf32>
    %1217 = vector.multi_reduction <add>, %1216, %cst_436 [1] : vector<16x32xf32> to vector<16xf32>
    %1218 = vector.shape_cast %1217 : vector<16xf32> to vector<16x1xf32>
    %cst_437 = arith.constant 3.200000e+01 : f32
    %1219 = vector.broadcast %cst_437 : f32 to vector<16x1xf32>
    %1220 = arith.divf %1218, %1219 : vector<16x1xf32>
    %1221 = vector.broadcast %1213 : vector<16x1xf32> to vector<16x32xf32>
    %1222 = arith.subf %1207, %1221 : vector<16x32xf32>
    %cst_438 = arith.constant 9.99999974E-6 : f32
    %1223 = vector.broadcast %cst_438 : f32 to vector<16x1xf32>
    %1224 = arith.addf %1220, %1223 : vector<16x1xf32>
    %1225 = math.rsqrt %1224 : vector<16x1xf32>
    %1226 = vector.broadcast %1225 : vector<16x1xf32> to vector<16x32xf32>
    %1227 = arith.mulf %1222, %1226 : vector<16x32xf32>
    %1228 = vector.broadcast %1208 : vector<1x32xf32> to vector<16x32xf32>
    %1229 = arith.mulf %1227, %1228 : vector<16x32xf32>
    %1230 = vector.broadcast %1209 : vector<1x32xf32> to vector<16x32xf32>
    %1231 = arith.addf %1229, %1230 : vector<16x32xf32>
    %c0_439 = arith.constant 0 : index
    %c0_440 = arith.constant 0 : index
    %1232 = vector.load %arg48[%c0_439, %c0_440] : memref<32x64xf32, #tpu.memory_space<vmem>>, vector<32x64xf32>
    %cst_441 = arith.constant dense<0.000000e+00> : vector<16x64xf32>
    %1233 = tpu.matmul %1231, %1232, %cst_441 {dimension_numbers = #tpu.dot_dimension_numbers<[1], [0], [0], [1], [0, 0, 1, 1], [], []>} : vector<16x32xf32>, vector<32x64xf32>, vector<16x64xf32> -> vector<16x64xf32>
    %c0_442 = arith.constant 0 : index
    %c0_443 = arith.constant 0 : index
    %1234 = vector.load %arg49[%c0_442, %c0_443] : memref<1x64xf32, #tpu.memory_space<vmem>>, vector<1x64xf32>
    %1235 = vector.broadcast %1234 : vector<1x64xf32> to vector<16x64xf32>
    %1236 = arith.addf %1233, %1235 : vector<16x64xf32>
    %cst_444 = arith.constant 0.707106769 : f32
    %1237 = vector.broadcast %cst_444 : f32 to vector<16x64xf32>
    %1238 = arith.mulf %1236, %1237 : vector<16x64xf32>
    %1239 = math.absf %1238 : vector<16x64xf32>
    %cst_445 = arith.constant 0.327591091 : f32
    %1240 = vector.broadcast %cst_445 : f32 to vector<16x64xf32>
    %1241 = arith.mulf %1240, %1239 : vector<16x64xf32>
    %cst_446 = arith.constant 1.000000e+00 : f32
    %1242 = vector.broadcast %cst_446 : f32 to vector<16x64xf32>
    %1243 = arith.addf %1242, %1241 : vector<16x64xf32>
    %cst_447 = arith.constant 1.000000e+00 : f32
    %1244 = vector.broadcast %cst_447 : f32 to vector<16x64xf32>
    %1245 = arith.divf %1244, %1243 : vector<16x64xf32>
    %cst_448 = arith.constant 1.06140542 : f32
    %1246 = vector.broadcast %cst_448 : f32 to vector<16x64xf32>
    %1247 = arith.mulf %1245, %1246 : vector<16x64xf32>
    %cst_449 = arith.constant -1.45315206 : f32
    %1248 = vector.broadcast %cst_449 : f32 to vector<16x64xf32>
    %1249 = arith.addf %1248, %1247 : vector<16x64xf32>
    %1250 = arith.mulf %1245, %1249 : vector<16x64xf32>
    %cst_450 = arith.constant 1.42141378 : f32
    %1251 = vector.broadcast %cst_450 : f32 to vector<16x64xf32>
    %1252 = arith.addf %1251, %1250 : vector<16x64xf32>
    %1253 = arith.mulf %1245, %1252 : vector<16x64xf32>
    %cst_451 = arith.constant -0.284496725 : f32
    %1254 = vector.broadcast %cst_451 : f32 to vector<16x64xf32>
    %1255 = arith.addf %1254, %1253 : vector<16x64xf32>
    %1256 = arith.mulf %1245, %1255 : vector<16x64xf32>
    %cst_452 = arith.constant 0.254829586 : f32
    %1257 = vector.broadcast %cst_452 : f32 to vector<16x64xf32>
    %1258 = arith.addf %1257, %1256 : vector<16x64xf32>
    %1259 = arith.mulf %1245, %1258 : vector<16x64xf32>
    %1260 = arith.mulf %1239, %1239 : vector<16x64xf32>
    %cst_453 = arith.constant 0.000000e+00 : f32
    %1261 = vector.broadcast %cst_453 : f32 to vector<16x64xf32>
    %1262 = arith.subf %1261, %1260 : vector<16x64xf32>
    %1263 = math.exp %1262 : vector<16x64xf32>
    %1264 = arith.mulf %1259, %1263 : vector<16x64xf32>
    %cst_454 = arith.constant 1.000000e+00 : f32
    %1265 = vector.broadcast %cst_454 : f32 to vector<16x64xf32>
    %1266 = arith.subf %1265, %1264 : vector<16x64xf32>
    %cst_455 = arith.constant 0.000000e+00 : f32
    %1267 = vector.broadcast %cst_455 : f32 to vector<16x64xf32>
    %1268 = arith.cmpf olt, %1238, %1267 : vector<16x64xf32>
    %cst_456 = arith.constant 0.000000e+00 : f32
    %1269 = vector.broadcast %cst_456 : f32 to vector<16x64xf32>
    %1270 = arith.subf %1269, %1266 : vector<16x64xf32>
    %1271 = arith.select %1268, %1270, %1266 : vector<16x64xi1>, vector<16x64xf32>
    %cst_457 = arith.constant 5.000000e-01 : f32
    %1272 = vector.broadcast %cst_457 : f32 to vector<16x64xf32>
    %1273 = arith.mulf %1272, %1236 : vector<16x64xf32>
    %cst_458 = arith.constant 1.000000e+00 : f32
    %1274 = vector.broadcast %cst_458 : f32 to vector<16x64xf32>
    %1275 = arith.addf %1274, %1271 : vector<16x64xf32>
    %1276 = arith.mulf %1273, %1275 : vector<16x64xf32>
    %c0_459 = arith.constant 0 : index
    %c0_460 = arith.constant 0 : index
    %1277 = vector.load %arg50[%c0_459, %c0_460] : memref<64x32xf32, #tpu.memory_space<vmem>>, vector<64x32xf32>
    %cst_461 = arith.constant dense<0.000000e+00> : vector<16x32xf32>
    %1278 = tpu.matmul %1276, %1277, %cst_461 {dimension_numbers = #tpu.dot_dimension_numbers<[1], [0], [0], [1], [0, 0, 1, 1], [], []>} : vector<16x64xf32>, vector<64x32xf32>, vector<16x32xf32> -> vector<16x32xf32>
    %c0_462 = arith.constant 0 : index
    %c0_463 = arith.constant 0 : index
    %1279 = vector.load %arg51[%c0_462, %c0_463] : memref<1x32xf32, #tpu.memory_space<vmem>>, vector<1x32xf32>
    %1280 = vector.broadcast %1279 : vector<1x32xf32> to vector<16x32xf32>
    %1281 = arith.addf %1278, %1280 : vector<16x32xf32>
    %1282 = arith.addf %1231, %1281 : vector<16x32xf32>
    %c0_464 = arith.constant 0 : index
    %c0_465 = arith.constant 0 : index
    %1283 = vector.load %arg52[%c0_464, %c0_465] : memref<1x32xf32, #tpu.memory_space<vmem>>, vector<1x32xf32>
    %c0_466 = arith.constant 0 : index
    %c0_467 = arith.constant 0 : index
    %1284 = vector.load %arg53[%c0_466, %c0_467] : memref<1x32xf32, #tpu.memory_space<vmem>>, vector<1x32xf32>
    %cst_468 = arith.constant dense<0.000000e+00> : vector<16xf32>
    %1285 = vector.multi_reduction <add>, %1282, %cst_468 [1] : vector<16x32xf32> to vector<16xf32>
    %1286 = vector.shape_cast %1285 : vector<16xf32> to vector<16x1xf32>
    %cst_469 = arith.constant 3.200000e+01 : f32
    %1287 = vector.broadcast %cst_469 : f32 to vector<16x1xf32>
    %1288 = arith.divf %1286, %1287 : vector<16x1xf32>
    %1289 = vector.broadcast %1288 : vector<16x1xf32> to vector<16x32xf32>
    %1290 = arith.subf %1282, %1289 : vector<16x32xf32>
    %1291 = arith.mulf %1290, %1290 : vector<16x32xf32>
    %cst_470 = arith.constant dense<0.000000e+00> : vector<16xf32>
    %1292 = vector.multi_reduction <add>, %1291, %cst_470 [1] : vector<16x32xf32> to vector<16xf32>
    %1293 = vector.shape_cast %1292 : vector<16xf32> to vector<16x1xf32>
    %cst_471 = arith.constant 3.200000e+01 : f32
    %1294 = vector.broadcast %cst_471 : f32 to vector<16x1xf32>
    %1295 = arith.divf %1293, %1294 : vector<16x1xf32>
    %1296 = vector.broadcast %1288 : vector<16x1xf32> to vector<16x32xf32>
    %1297 = arith.subf %1282, %1296 : vector<16x32xf32>
    %cst_472 = arith.constant 9.99999974E-6 : f32
    %1298 = vector.broadcast %cst_472 : f32 to vector<16x1xf32>
    %1299 = arith.addf %1295, %1298 : vector<16x1xf32>
    %1300 = math.rsqrt %1299 : vector<16x1xf32>
    %1301 = vector.broadcast %1300 : vector<16x1xf32> to vector<16x32xf32>
    %1302 = arith.mulf %1297, %1301 : vector<16x32xf32>
    %1303 = vector.broadcast %1283 : vector<1x32xf32> to vector<16x32xf32>
    %1304 = arith.mulf %1302, %1303 : vector<16x32xf32>
    %1305 = vector.broadcast %1284 : vector<1x32xf32> to vector<16x32xf32>
    %1306 = arith.addf %1304, %1305 : vector<16x32xf32>
    %c0_473 = arith.constant 0 : index
    %c0_474 = arith.constant 0 : index
    %1307 = vector.load %arg54[%c0_473, %c0_474] : memref<1x32xf32, #tpu.memory_space<vmem>>, vector<1x32xf32>
    %c0_475 = arith.constant 0 : index
    %c0_476 = arith.constant 0 : index
    %1308 = vector.load %arg55[%c0_475, %c0_476] : memref<1x32xf32, #tpu.memory_space<vmem>>, vector<1x32xf32>
    %cst_477 = arith.constant dense<0.000000e+00> : vector<16xf32>
    %1309 = vector.multi_reduction <add>, %1306, %cst_477 [1] : vector<16x32xf32> to vector<16xf32>
    %1310 = vector.shape_cast %1309 : vector<16xf32> to vector<16x1xf32>
    %cst_478 = arith.constant 3.200000e+01 : f32
    %1311 = vector.broadcast %cst_478 : f32 to vector<16x1xf32>
    %1312 = arith.divf %1310, %1311 : vector<16x1xf32>
    %1313 = vector.broadcast %1312 : vector<16x1xf32> to vector<16x32xf32>
    %1314 = arith.subf %1306, %1313 : vector<16x32xf32>
    %1315 = arith.mulf %1314, %1314 : vector<16x32xf32>
    %cst_479 = arith.constant dense<0.000000e+00> : vector<16xf32>
    %1316 = vector.multi_reduction <add>, %1315, %cst_479 [1] : vector<16x32xf32> to vector<16xf32>
    %1317 = vector.shape_cast %1316 : vector<16xf32> to vector<16x1xf32>
    %cst_480 = arith.constant 3.200000e+01 : f32
    %1318 = vector.broadcast %cst_480 : f32 to vector<16x1xf32>
    %1319 = arith.divf %1317, %1318 : vector<16x1xf32>
    %1320 = vector.broadcast %1312 : vector<16x1xf32> to vector<16x32xf32>
    %1321 = arith.subf %1306, %1320 : vector<16x32xf32>
    %cst_481 = arith.constant 9.99999974E-6 : f32
    %1322 = vector.broadcast %cst_481 : f32 to vector<16x1xf32>
    %1323 = arith.addf %1319, %1322 : vector<16x1xf32>
    %1324 = math.rsqrt %1323 : vector<16x1xf32>
    %1325 = vector.broadcast %1324 : vector<16x1xf32> to vector<16x32xf32>
    %1326 = arith.mulf %1321, %1325 : vector<16x32xf32>
    %1327 = vector.broadcast %1307 : vector<1x32xf32> to vector<16x32xf32>
    %1328 = arith.mulf %1326, %1327 : vector<16x32xf32>
    %1329 = vector.broadcast %1308 : vector<1x32xf32> to vector<16x32xf32>
    %1330 = arith.addf %1328, %1329 : vector<16x32xf32>
    %c0_482 = arith.constant 0 : index
    %c0_483 = arith.constant 0 : index
    %1331 = vector.load %arg56[%c0_482, %c0_483] : memref<32x32xf32, #tpu.memory_space<vmem>>, vector<32x32xf32>
    %cst_484 = arith.constant dense<0.000000e+00> : vector<16x32xf32>
    %1332 = tpu.matmul %1330, %1331, %cst_484 {dimension_numbers = #tpu.dot_dimension_numbers<[1], [0], [0], [1], [0, 0, 1, 1], [], []>} : vector<16x32xf32>, vector<32x32xf32>, vector<16x32xf32> -> vector<16x32xf32>
    %c0_485 = arith.constant 0 : index
    %c0_486 = arith.constant 0 : index
    %1333 = vector.load %arg57[%c0_485, %c0_486] : memref<1x32xf32, #tpu.memory_space<vmem>>, vector<1x32xf32>
    %1334 = vector.broadcast %1333 : vector<1x32xf32> to vector<16x32xf32>
    %1335 = arith.addf %1332, %1334 : vector<16x32xf32>
    %c0_487 = arith.constant 0 : index
    %c0_488 = arith.constant 0 : index
    %c0_489 = arith.constant 0 : index
    %1336 = vector.load %arg58[%c0_487, %c0_488, %c0_489] : memref<1x16x32xf32, #tpu.memory_space<vmem>>, vector<1x16x32xf32>
    %1337 = vector.shape_cast %1336 : vector<1x16x32xf32> to vector<16x32xf32>
    %1338 = vector.shape_cast %1335 : vector<16x32xf32> to vector<1x16x32xf32>
    tpu.vector_store %arg58[%c0_487, %c0_488, %c0_489], %1338 {strides = array<i32>} : memref<1x16x32xf32, #tpu.memory_space<vmem>>, vector<1x16x32xf32>,
    return
  }
  func.func @transform_0(%arg0: i32) -> (i32, i32, i32) {
    %c0_i32 = arith.constant 0 : i32
    %c0_i32_0 = arith.constant 0 : i32
    %c0_i32_1 = arith.constant 0 : i32
    return %arg0, %c0_i32, %c0_i32_0 : i32, i32, i32
  }
  func.func @transform_1(%arg0: i32) -> (i32, i32, i32) {
    %c0_i32 = arith.constant 0 : i32
    %c0_i32_0 = arith.constant 0 : i32
    %c0_i32_1 = arith.constant 0 : i32
    return %arg0, %c0_i32, %c0_i32_0 : i32, i32, i32
  }
  func.func @transform_2(%arg0: i32) -> (i32, i32) {
    %c0_i32 = arith.constant 0 : i32
    %c0_i32_0 = arith.constant 0 : i32
    %c0_i32_1 = arith.constant 0 : i32
    return %c0_i32, %c0_i32_0 : i32, i32
  }
  func.func @transform_3(%arg0: i32) -> (i32, i32) {
    %c0_i32 = arith.constant 0 : i32
    %c0_i32_0 = arith.constant 0 : i32
    %c0_i32_1 = arith.constant 0 : i32
    return %c0_i32, %c0_i32_0 : i32, i32
  }
  func.func @transform_4(%arg0: i32) -> (i32, i32) {
    %c0_i32 = arith.constant 0 : i32
    %c0_i32_0 = arith.constant 0 : i32
    %c0_i32_1 = arith.constant 0 : i32
    return %c0_i32, %c0_i32_0 : i32, i32
  }
  func.func @transform_5(%arg0: i32) -> (i32, i32) {
    %c0_i32 = arith.constant 0 : i32
    %c0_i32_0 = arith.constant 0 : i32
    %c0_i32_1 = arith.constant 0 : i32
    return %c0_i32, %c0_i32_0 : i32, i32
  }
  func.func @transform_6(%arg0: i32) -> (i32, i32) {
    %c0_i32 = arith.constant 0 : i32
    %c0_i32_0 = arith.constant 0 : i32
    %c0_i32_1 = arith.constant 0 : i32
    return %c0_i32, %c0_i32_0 : i32, i32
  }
  func.func @transform_7(%arg0: i32) -> (i32, i32) {
    %c0_i32 = arith.constant 0 : i32
    %c0_i32_0 = arith.constant 0 : i32
    %c0_i32_1 = arith.constant 0 : i32
    return %c0_i32, %c0_i32_0 : i32, i32
  }
  func.func @transform_8(%arg0: i32) -> (i32, i32) {
    %c0_i32 = arith.constant 0 : i32
    %c0_i32_0 = arith.constant 0 : i32
    %c0_i32_1 = arith.constant 0 : i32
    return %c0_i32, %c0_i32_0 : i32, i32
  }
  func.func @transform_9(%arg0: i32) -> (i32, i32) {
    %c0_i32 = arith.constant 0 : i32
    %c0_i32_0 = arith.constant 0 : i32
    %c0_i32_1 = arith.constant 0 : i32
    return %c0_i32, %c0_i32_0 : i32, i32
  }
  func.func @transform_10(%arg0: i32) -> (i32, i32) {
    %c0_i32 = arith.constant 0 : i32
    %c0_i32_0 = arith.constant 0 : i32
    %c0_i32_1 = arith.constant 0 : i32
    return %c0_i32, %c0_i32_0 : i32, i32
  }
  func.func @transform_11(%arg0: i32) -> (i32, i32) {
    %c0_i32 = arith.constant 0 : i32
    %c0_i32_0 = arith.constant 0 : i32
    %c0_i32_1 = arith.constant 0 : i32
    return %c0_i32, %c0_i32_0 : i32, i32
  }
  func.func @transform_12(%arg0: i32) -> (i32, i32) {
    %c0_i32 = arith.constant 0 : i32
    %c0_i32_0 = arith.constant 0 : i32
    %c0_i32_1 = arith.constant 0 : i32
    return %c0_i32, %c0_i32_0 : i32, i32
  }
  func.func @transform_13(%arg0: i32) -> (i32, i32) {
    %c0_i32 = arith.constant 0 : i32
    %c0_i32_0 = arith.constant 0 : i32
    %c0_i32_1 = arith.constant 0 : i32
    return %c0_i32, %c0_i32_0 : i32, i32
  }
  func.func @transform_14(%arg0: i32) -> (i32, i32) {
    %c0_i32 = arith.constant 0 : i32
    %c0_i32_0 = arith.constant 0 : i32
    %c0_i32_1 = arith.constant 0 : i32
    return %c0_i32, %c0_i32_0 : i32, i32
  }
  func.func @transform_15(%arg0: i32) -> (i32, i32) {
    %c0_i32 = arith.constant 0 : i32
    %c0_i32_0 = arith.constant 0 : i32
    %c0_i32_1 = arith.constant 0 : i32
    return %c0_i32, %c0_i32_0 : i32, i32
  }
  func.func @transform_16(%arg0: i32) -> (i32, i32) {
    %c0_i32 = arith.constant 0 : i32
    %c0_i32_0 = arith.constant 0 : i32
    %c0_i32_1 = arith.constant 0 : i32
    return %c0_i32, %c0_i32_0 : i32, i32
  }
  func.func @transform_17(%arg0: i32) -> (i32, i32) {
    %c0_i32 = arith.constant 0 : i32
    %c0_i32_0 = arith.constant 0 : i32
    %c0_i32_1 = arith.constant 0 : i32
    return %c0_i32, %c0_i32_0 : i32, i32
  }
  func.func @transform_18(%arg0: i32) -> (i32, i32) {
    %c0_i32 = arith.constant 0 : i32
    %c0_i32_0 = arith.constant 0 : i32
    %c0_i32_1 = arith.constant 0 : i32
    return %c0_i32, %c0_i32_0 : i32, i32
  }
  func.func @transform_19(%arg0: i32) -> (i32, i32) {
    %c0_i32 = arith.constant 0 : i32
    %c0_i32_0 = arith.constant 0 : i32
    %c0_i32_1 = arith.constant 0 : i32
    return %c0_i32, %c0_i32_0 : i32, i32
  }
  func.func @transform_20(%arg0: i32) -> (i32, i32) {
    %c0_i32 = arith.constant 0 : i32
    %c0_i32_0 = arith.constant 0 : i32
    %c0_i32_1 = arith.constant 0 : i32
    return %c0_i32, %c0_i32_0 : i32, i32
  }
  func.func @transform_21(%arg0: i32) -> (i32, i32) {
    %c0_i32 = arith.constant 0 : i32
    %c0_i32_0 = arith.constant 0 : i32
    %c0_i32_1 = arith.constant 0 : i32
    return %c0_i32, %c0_i32_0 : i32, i32
  }
  func.func @transform_22(%arg0: i32) -> (i32, i32) {
    %c0_i32 = arith.constant 0 : i32
    %c0_i32_0 = arith.constant 0 : i32
    %c0_i32_1 = arith.constant 0 : i32
    return %c0_i32, %c0_i32_0 : i32, i32
  }
  func.func @transform_23(%arg0: i32) -> (i32, i32) {
    %c0_i32 = arith.constant 0 : i32
    %c0_i32_0 = arith.constant 0 : i32
    %c0_i32_1 = arith.constant 0 : i32
    return %c0_i32, %c0_i32_0 : i32, i32
  }
  func.func @transform_24(%arg0: i32) -> (i32, i32) {
    %c0_i32 = arith.constant 0 : i32
    %c0_i32_0 = arith.constant 0 : i32
    %c0_i32_1 = arith.constant 0 : i32
    return %c0_i32, %c0_i32_0 : i32, i32
  }
  func.func @transform_25(%arg0: i32) -> (i32, i32) {
    %c0_i32 = arith.constant 0 : i32
    %c0_i32_0 = arith.constant 0 : i32
    %c0_i32_1 = arith.constant 0 : i32
    return %c0_i32, %c0_i32_0 : i32, i32
  }
  func.func @transform_26(%arg0: i32) -> (i32, i32) {
    %c0_i32 = arith.constant 0 : i32
    %c0_i32_0 = arith.constant 0 : i32
    %c0_i32_1 = arith.constant 0 : i32
    return %c0_i32, %c0_i32_0 : i32, i32
  }
  func.func @transform_27(%arg0: i32) -> (i32, i32) {
    %c0_i32 = arith.constant 0 : i32
    %c0_i32_0 = arith.constant 0 : i32
    %c0_i32_1 = arith.constant 0 : i32
    return %c0_i32, %c0_i32_0 : i32, i32
  }
  func.func @transform_28(%arg0: i32) -> (i32, i32) {
    %c0_i32 = arith.constant 0 : i32
    %c0_i32_0 = arith.constant 0 : i32
    %c0_i32_1 = arith.constant 0 : i32
    return %c0_i32, %c0_i32_0 : i32, i32
  }
  func.func @transform_29(%arg0: i32) -> (i32, i32) {
    %c0_i32 = arith.constant 0 : i32
    %c0_i32_0 = arith.constant 0 : i32
    %c0_i32_1 = arith.constant 0 : i32
    return %c0_i32, %c0_i32_0 : i32, i32
  }
  func.func @transform_30(%arg0: i32) -> (i32, i32) {
    %c0_i32 = arith.constant 0 : i32
    %c0_i32_0 = arith.constant 0 : i32
    %c0_i32_1 = arith.constant 0 : i32
    return %c0_i32, %c0_i32_0 : i32, i32
  }
  func.func @transform_31(%arg0: i32) -> (i32, i32) {
    %c0_i32 = arith.constant 0 : i32
    %c0_i32_0 = arith.constant 0 : i32
    %c0_i32_1 = arith.constant 0 : i32
    return %c0_i32, %c0_i32_0 : i32, i32
  }
  func.func @transform_32(%arg0: i32) -> (i32, i32) {
    %c0_i32 = arith.constant 0 : i32
    %c0_i32_0 = arith.constant 0 : i32
    %c0_i32_1 = arith.constant 0 : i32
    return %c0_i32, %c0_i32_0 : i32, i32
  }
  func.func @transform_33(%arg0: i32) -> (i32, i32) {
    %c0_i32 = arith.constant 0 : i32
    %c0_i32_0 = arith.constant 0 : i32
    %c0_i32_1 = arith.constant 0 : i32
    return %c0_i32, %c0_i32_0 : i32, i32
  }
  func.func @transform_34(%arg0: i32) -> (i32, i32) {
    %c0_i32 = arith.constant 0 : i32
    %c0_i32_0 = arith.constant 0 : i32
    %c0_i32_1 = arith.constant 0 : i32
    return %c0_i32, %c0_i32_0 : i32, i32
  }
  func.func @transform_35(%arg0: i32) -> (i32, i32) {
    %c0_i32 = arith.constant 0 : i32
    %c0_i32_0 = arith.constant 0 : i32
    %c0_i32_1 = arith.constant 0 : i32
    return %c0_i32, %c0_i32_0 : i32, i32
  }
  func.func @transform_36(%arg0: i32) -> (i32, i32) {
    %c0_i32 = arith.constant 0 : i32
    %c0_i32_0 = arith.constant 0 : i32
    %c0_i32_1 = arith.constant 0 : i32
    return %c0_i32, %c0_i32_0 : i32, i32
  }
  func.func @transform_37(%arg0: i32) -> (i32, i32) {
    %c0_i32 = arith.constant 0 : i32
    %c0_i32_0 = arith.constant 0 : i32
    %c0_i32_1 = arith.constant 0 : i32
    return %c0_i32, %c0_i32_0 : i32, i32
  }
  func.func @transform_38(%arg0: i32) -> (i32, i32) {
    %c0_i32 = arith.constant 0 : i32
    %c0_i32_0 = arith.constant 0 : i32
    %c0_i32_1 = arith.constant 0 : i32
    return %c0_i32, %c0_i32_0 : i32, i32
  }
  func.func @transform_39(%arg0: i32) -> (i32, i32) {
    %c0_i32 = arith.constant 0 : i32
    %c0_i32_0 = arith.constant 0 : i32
    %c0_i32_1 = arith.constant 0 : i32
    return %c0_i32, %c0_i32_0 : i32, i32
  }
  func.func @transform_40(%arg0: i32) -> (i32, i32) {
    %c0_i32 = arith.constant 0 : i32
    %c0_i32_0 = arith.constant 0 : i32
    %c0_i32_1 = arith.constant 0 : i32
    return %c0_i32, %c0_i32_0 : i32, i32
  }
  func.func @transform_41(%arg0: i32) -> (i32, i32) {
    %c0_i32 = arith.constant 0 : i32
    %c0_i32_0 = arith.constant 0 : i32
    %c0_i32_1 = arith.constant 0 : i32
    return %c0_i32, %c0_i32_0 : i32, i32
  }
  func.func @transform_42(%arg0: i32) -> (i32, i32) {
    %c0_i32 = arith.constant 0 : i32
    %c0_i32_0 = arith.constant 0 : i32
    %c0_i32_1 = arith.constant 0 : i32
    return %c0_i32, %c0_i32_0 : i32, i32
  }
  func.func @transform_43(%arg0: i32) -> (i32, i32) {
    %c0_i32 = arith.constant 0 : i32
    %c0_i32_0 = arith.constant 0 : i32
    %c0_i32_1 = arith.constant 0 : i32
    return %c0_i32, %c0_i32_0 : i32, i32
  }
  func.func @transform_44(%arg0: i32) -> (i32, i32) {
    %c0_i32 = arith.constant 0 : i32
    %c0_i32_0 = arith.constant 0 : i32
    %c0_i32_1 = arith.constant 0 : i32
    return %c0_i32, %c0_i32_0 : i32, i32
  }
  func.func @transform_45(%arg0: i32) -> (i32, i32) {
    %c0_i32 = arith.constant 0 : i32
    %c0_i32_0 = arith.constant 0 : i32
    %c0_i32_1 = arith.constant 0 : i32
    return %c0_i32, %c0_i32_0 : i32, i32
  }
  func.func @transform_46(%arg0: i32) -> (i32, i32) {
    %c0_i32 = arith.constant 0 : i32
    %c0_i32_0 = arith.constant 0 : i32
    %c0_i32_1 = arith.constant 0 : i32
    return %c0_i32, %c0_i32_0 : i32, i32
  }
  func.func @transform_47(%arg0: i32) -> (i32, i32) {
    %c0_i32 = arith.constant 0 : i32
    %c0_i32_0 = arith.constant 0 : i32
    %c0_i32_1 = arith.constant 0 : i32
    return %c0_i32, %c0_i32_0 : i32, i32
  }
  func.func @transform_48(%arg0: i32) -> (i32, i32) {
    %c0_i32 = arith.constant 0 : i32
    %c0_i32_0 = arith.constant 0 : i32
    %c0_i32_1 = arith.constant 0 : i32
    return %c0_i32, %c0_i32_0 : i32, i32
  }
  func.func @transform_49(%arg0: i32) -> (i32, i32) {
    %c0_i32 = arith.constant 0 : i32
    %c0_i32_0 = arith.constant 0 : i32
    %c0_i32_1 = arith.constant 0 : i32
    return %c0_i32, %c0_i32_0 : i32, i32
  }
  func.func @transform_50(%arg0: i32) -> (i32, i32) {
    %c0_i32 = arith.constant 0 : i32
    %c0_i32_0 = arith.constant 0 : i32
    %c0_i32_1 = arith.constant 0 : i32
    return %c0_i32, %c0_i32_0 : i32, i32
  }
  func.func @transform_51(%arg0: i32) -> (i32, i32) {
    %c0_i32 = arith.constant 0 : i32
    %c0_i32_0 = arith.constant 0 : i32
    %c0_i32_1 = arith.constant 0 : i32
    return %c0_i32, %c0_i32_0 : i32, i32
  }
  func.func @transform_52(%arg0: i32) -> (i32, i32) {
    %c0_i32 = arith.constant 0 : i32
    %c0_i32_0 = arith.constant 0 : i32
    %c0_i32_1 = arith.constant 0 : i32
    return %c0_i32, %c0_i32_0 : i32, i32
  }
  func.func @transform_53(%arg0: i32) -> (i32, i32) {
    %c0_i32 = arith.constant 0 : i32
    %c0_i32_0 = arith.constant 0 : i32
    %c0_i32_1 = arith.constant 0 : i32
    return %c0_i32, %c0_i32_0 : i32, i32
  }
  func.func @transform_54(%arg0: i32) -> (i32, i32) {
    %c0_i32 = arith.constant 0 : i32
    %c0_i32_0 = arith.constant 0 : i32
    %c0_i32_1 = arith.constant 0 : i32
    return %c0_i32, %c0_i32_0 : i32, i32
  }
  func.func @transform_55(%arg0: i32) -> (i32, i32) {
    %c0_i32 = arith.constant 0 : i32
    %c0_i32_0 = arith.constant 0 : i32
    %c0_i32_1 = arith.constant 0 : i32
    return %c0_i32, %c0_i32_0 : i32, i32
  }
  func.func @transform_56(%arg0: i32) -> (i32, i32) {
    %c0_i32 = arith.constant 0 : i32
    %c0_i32_0 = arith.constant 0 : i32
    %c0_i32_1 = arith.constant 0 : i32
    return %c0_i32, %c0_i32_0 : i32, i32
  }
  func.func @transform_57(%arg0: i32) -> (i32, i32, i32) {
    %c0_i32 = arith.constant 0 : i32
    %c0_i32_0 = arith.constant 0 : i32
    %c0_i32_1 = arith.constant 0 : i32
    return %arg0, %c0_i32, %c0_i32_0 : i32, i32, i32
  }
}

</mosaic_0001>

<bundles_post_ra>
// kernel: model_forward.3
= control target key start
LH: loop header
LB: loop body
LE: loop exit
PB: predicated region body
PF: predicated region fallthrough
CT: control target
= control target key end

     0   :  { %s12787_s6 = smov 1   ;;  %s12788_s10 = smov 2   ;;  %s14806_s0 = inlined_call_operand.smem [shape: u32[58], index: -1, kind: input, shape index: {}] }
   0x1   :  { %s12878_s5 = sld [smem:[%s14806_s0]]   ;;  %s12789_s14 = smov 3  }
   0x2   :  { %s12883_s9 = sld [smem:[%s14806_s0 + %s12787_s6]]   ;;  %s12790_s18 = smov 4  }
   0x3   :  { %s12888_s13 = sld [smem:[%s14806_s0 + %s12788_s10]]   ;;  %s12791_s22 = smov 5  }
   0x4   :  { %s12893_s17 = sld [smem:[%s14806_s0 + %s12789_s14]]   ;;  %s12792_s26 = smov 6  }
   0x5   :  { %s12898_s21 = sld [smem:[%s14806_s0 + %s12790_s18]]   ;;  %s12793_s30 = smov 7  }
   0x6   :  { %s12903_s25 = sld [smem:[%s14806_s0 + %s12791_s22]]   ;;  %s12794_s4 = smov 8  }
   0x7   :  { %14860 = sst [smem:[#allocation25_spill]] %s12878_s5  ;;  %s12795_s10 = smov 9  }
   0x8   :  { %14861 = sst [smem:[#allocation26_spill]] %s12883_s9  ;;  %s12796_s15 = smov 10  }
   0x9   :  { %s12908_s29 = sld [smem:[%s14806_s0 + %s12792_s26]]   ;;  %s12797_s20 = smov 11  }
   0xa   :  { %s12913_s3 = sld [smem:[%s14806_s0 + %s12793_s30]]   ;;  %s12798_s26 = smov 12  }
   0xb   :  { %14862 = sst [smem:[#allocation27_spill]] %s12898_s21  ;;  %s12799_s1 = smov 13  }
   0xc   :  { %14863 = sst [smem:[#allocation28_spill]] %s12903_s25  ;;  %s12800_s7 = smov 14  }
   0xd   :  { %s12918_s8 = sld [smem:[%s14806_s0 + %s12794_s4]]   ;;  %s12802_s22 = smov 16  }
   0xe   :  { %s12923_s14 = sld [smem:[%s14806_s0 + %s12795_s10]]   ;;  %s12803_s28 = smov 17  }
   0xf   :  { %s12928_s19 = sld [smem:[%s14806_s0 + %s12796_s15]]   ;;  %s12801_s15 = smov 15  }
  0x10   :  { %14864 = sst [smem:[#allocation29_spill]] %s12913_s3 }
  0x11   :  { %s12933_s24 = sld [smem:[%s14806_s0 + %s12797_s20]]  }
  0x12   :  { %s12938_s30 = sld [smem:[%s14806_s0 + %s12798_s26]]  }
  0x13   :  { %14865 = sst [smem:[#allocation30_spill]] %s12918_s8 }
  0x14   :  { %14866 = sst [smem:[#allocation31_spill]] %s12923_s14 }
  0x15   :  { %14867 = sst [smem:[#allocation32_spill]] %s12928_s19 }
  0x16   :  { %s12943_s6 = sld [smem:[%s14806_s0 + %s12799_s1]]  }
  0x17   :  { %14868 = sst [smem:[#allocation33_spill]] %s12933_s24 }
  0x18   :  { %14869 = sst [smem:[#allocation34_spill]] %s12938_s30 }
  0x19   :  { %s12948_s12 = sld [smem:[%s14806_s0 + %s12800_s7]]   ;;  %s12804_s7 = smov 18  }
  0x1a   :  { %s12953_s20 = sld [smem:[%s14806_s0 + %s12801_s15]]   ;;  %s12805_s15 = smov 19  }
  0x1b   :  { %s12958_s27 = sld [smem:[%s14806_s0 + %s12802_s22]]   ;;  %s12806_s22 = smov 20  }
  0x1c   :  { %14870 = sst [smem:[#allocation35_spill]] %s12943_s6 }
  0x1d   :  { %s12963_s4 = sld [smem:[%s14806_s0 + %s12803_s28]]   ;;  %s12807_s28 = smov 21  }
  0x1e   :  { %s12968_s9 = sld [smem:[%s14806_s0 + %s12804_s7]]   ;;  %s12808_s7 = smov 22  }
  0x1f   :  { %14871 = sst [smem:[#allocation36_spill]] %s12948_s12 }
  0x20   :  { %14872 = sst [smem:[#allocation37_spill]] %s12953_s20 }
  0x21   :  { %14873 = sst [smem:[#allocation38_spill]] %s12958_s27 }
  0x22   :  { %s12973_s21 = sld [smem:[%s14806_s0 + %s12805_s15]]   ;;  %s12809_s15 = smov 23  }
  0x23   :  { %14874 = sst [smem:[#allocation39_spill]] %s12963_s4 }
  0x24   :  { %14875 = sst [smem:[#allocation40_spill]] %s12968_s9 }
  0x25   :  { %s12978_s27 = sld [smem:[%s14806_s0 + %s12806_s22]]   ;;  %s12810_s22 = smov 24  }
  0x26   :  { %s12983_s4 = sld [smem:[%s14806_s0 + %s12807_s28]]   ;;  %s12811_s28 = smov 25  }
  0x27   :  { %s12988_s9 = sld [smem:[%s14806_s0 + %s12808_s7]]   ;;  %s12812_s7 = smov 26  }
  0x28   :  { %14876 = sst [smem:[#allocation41_spill]] %s12973_s21 }
  0x29   :  { %s12993_s21 = sld [smem:[%s14806_s0 + %s12809_s15]]   ;;  %s12813_s15 = smov 27  }
  0x2b   :  { %14877 = sst [smem:[#allocation42_spill]] %s12978_s27 }
  0x2c   :  { %14878 = sst [smem:[#allocation43_spill]] %s12983_s4 }
  0x2d   :  { %14879 = sst [smem:[#allocation44_spill]] %s12988_s9 }
  0x2e   :  { %s12998_s27 = sld [smem:[%s14806_s0 + %s12810_s22]]   ;;  %s12814_s22 = smov 28  }
  0x2f   :  { %14880 = sst [smem:[#allocation45_spill]] %s12993_s21 }
  0x30   :  { %s13003_s4 = sld [smem:[%s14806_s0 + %s12811_s28]]   ;;  %s12815_s28 = smov 29  }
  0x31   :  { %s13008_s9 = sld [smem:[%s14806_s0 + %s12812_s7]]   ;;  %s12816_s7 = smov 30  }
  0x32   :  { %s13013_s21 = sld [smem:[%s14806_s0 + %s12813_s15]]   ;;  %s12817_s15 = smov 31  }
  0x34   :  { %14881 = sst [smem:[#allocation46_spill]] %s12998_s27 }
  0x35   :  { %s13018_s27 = sld [smem:[%s14806_s0 + %s12814_s22]]   ;;  %s12818_s22 = smov 32  }
  0x36   :  { %14882 = sst [smem:[#allocation47_spill]] %s13003_s4 }
  0x37   :  { %14883 = sst [smem:[#allocation48_spill]] %s13008_s9 }
  0x38   :  { %14884 = sst [smem:[#allocation49_spill]] %s13013_s21 }
  0x39   :  { %s13023_s4 = sld [smem:[%s14806_s0 + %s12815_s28]]   ;;  %s12819_s28 = smov 33  }
  0x3a   :  { %s13028_s9 = sld [smem:[%s14806_s0 + %s12816_s7]]   ;;  %s12820_s7 = smov 34  }
  0x3b   :  { %14885 = sst [smem:[#allocation50_spill]] %s13018_s27 }
  0x3c   :  { %s13033_s21 = sld [smem:[%s14806_s0 + %s12817_s15]]   ;;  %s12821_s15 = smov 35  }
  0x3d   :  { %s13038_s27 = sld [smem:[%s14806_s0 + %s12818_s22]]   ;;  %s12822_s22 = smov 36  }
  0x3f   :  { %14886 = sst [smem:[#allocation51_spill]] %s13023_s4 }
  0x40   :  { %14887 = sst [smem:[#allocation52_spill]] %s13028_s9 }
  0x41   :  { %s13043_s4 = sld [smem:[%s14806_s0 + %s12819_s28]]   ;;  %s12823_s28 = smov 37  }
  0x42   :  { %14888 = sst [smem:[#allocation53_spill]] %s13033_s21 }
  0x43   :  { %14889 = sst [smem:[#allocation54_spill]] %s13038_s27 }
  0x44   :  { %s13048_s9 = sld [smem:[%s14806_s0 + %s12820_s7]]   ;;  %s12824_s7 = smov 38  }
  0x45   :  { %s13053_s21 = sld [smem:[%s14806_s0 + %s12821_s15]]   ;;  %s12825_s15 = smov 39  }
  0x46   :  { %s13058_s27 = sld [smem:[%s14806_s0 + %s12822_s22]]   ;;  %s12826_s22 = smov 40  }
  0x47   :  { %14890 = sst [smem:[#allocation55_spill]] %s13043_s4 }
  0x48   :  { %s13063_s4 = sld [smem:[%s14806_s0 + %s12823_s28]]   ;;  %s12827_s28 = smov 41  }
  0x4a   :  { %14891 = sst [smem:[#allocation56_spill]] %s13048_s9 }
  0x4b   :  { %14892 = sst [smem:[#allocation57_spill]] %s13053_s21 }
  0x4c   :  { %14893 = sst [smem:[#allocation58_spill]] %s13058_s27 }
  0x4d   :  { %s13068_s9 = sld [smem:[%s14806_s0 + %s12824_s7]]   ;;  %s12828_s7 = smov 42  }
  0x4e   :  { %14894 = sst [smem:[#allocation59_spill]] %s13063_s4 }
  0x4f   :  { %s13073_s21 = sld [smem:[%s14806_s0 + %s12825_s15]]   ;;  %s12829_s15 = smov 43  }
  0x50   :  { %s13078_s27 = sld [smem:[%s14806_s0 + %s12826_s22]]   ;;  %s12830_s22 = smov 44  }
  0x51   :  { %s13083_s4 = sld [smem:[%s14806_s0 + %s12827_s28]]   ;;  %s12831_s28 = smov 45  }
  0x53   :  { %14895 = sst [smem:[#allocation60_spill]] %s13068_s9 }
  0x54   :  { %s13088_s9 = sld [smem:[%s14806_s0 + %s12828_s7]]   ;;  %s12832_s7 = smov 46  }
  0x55   :  { %14896 = sst [smem:[#allocation61_spill]] %s13073_s21 }
  0x56   :  { %14897 = sst [smem:[#allocation62_spill]] %s13078_s27 }
  0x57   :  { %14898 = sst [smem:[#allocation63_spill]] %s13083_s4 }
  0x58   :  { %s13093_s21 = sld [smem:[%s14806_s0 + %s12829_s15]]   ;;  %s12833_s15 = smov 47  }
  0x59   :  { %s13098_s27 = sld [smem:[%s14806_s0 + %s12830_s22]]   ;;  %s12834_s22 = smov 48  }
  0x5a   :  { %14899 = sst [smem:[#allocation64_spill]] %s13088_s9 }
  0x5b   :  { %s13103_s4 = sld [smem:[%s14806_s0 + %s12831_s28]]   ;;  %s12835_s28 = smov 49  }
  0x5c   :  { %s13108_s20 = sld [smem:[%s14806_s0 + %s12832_s7]]   ;;  %s12836_s7 = smov 50  }
  0x5d   :  { %s13118_s6 = sld [smem:[%s14806_s0 + %s12834_s22]]   ;;  %s12838_s22 = smov 52  }
  0x5e   :  { %14900 = sst [smem:[#allocation65_spill]] %s13093_s21 }
  0x5f   :  { %s13113_s21 = sld [smem:[%s14806_s0 + %s12833_s15]]   ;;  %s12837_s15 = smov 51  }
  0x60   :  { %s13123_s12 = sld [smem:[%s14806_s0 + %s12835_s28]]   ;;  %s12839_s28 = smov 53  }
  0x61   :  { %14901 = sst [smem:[#allocation66_spill]] %s13103_s4 }
  0x62   :  { %s13128_s24 = sld [smem:[%s14806_s0 + %s12836_s7]]   ;;  %s12840_s7 = smov 54  }
  0x63   :  { %14903 = sst [smem:[#allocation68_spill]] %s13118_s6 }
  0x64   :  { %s13138_s19 = sld [smem:[%s14806_s0 + %s12838_s22]]   ;;  %s12842_s22 = smov 56  }
  0x65   :  { %14902 = sst [smem:[#allocation67_spill]] %s13113_s21 }
  0x66   :  { %14904 = sst [smem:[#allocation69_spill]] %s13123_s12 }
  0x67   :  { %s13133_s21 = sld [smem:[%s14806_s0 + %s12837_s15]]   ;;  %s12841_s15 = smov 55  }
  0x68   :  { %s13143_s12 = sld [smem:[%s14806_s0 + %s12839_s28]]   ;;  %s12843_s28 = smov 57  }
  0x69   :  { %s13148_s30 = sld [smem:[%s14806_s0 + %s12840_s7]]  }
  0x6a   :  { %14905 = sst [smem:[#allocation70_spill]] %s13138_s19 }
  0x6b   :  { %s13153_s14 = sld [smem:[%s14806_s0 + %s12841_s15]]  }
  0x6c   :  { %s13158_s8 = sld [smem:[%s14806_s0 + %s12842_s22]]  }
  0x6d   :  { %s13163_s25 = sld [smem:[%s14806_s0 + %s12843_s28]]  }
  0x72   :  { %14906 = sst [smem:[#allocation71_spill]] %s13158_s8 }
  0x73   :  { %120 = vsyncpa [#allocation3], 0 }
  0x74   :  { %121 = vsyncpa [#allocation5], 0 }
  0x75   :  { %122 = vsyncpa [#allocation8], 0 }
  0x76   :  { %123 = vsyncpa [#allocation11], 0 }
  0x77   :  { %124 = vsyncpa [#allocation14], 0 }
  0x78   :  { %125 = vsyncpa [#allocation17], 0  ;;  %s13165_s7 = smov 0  }
  0x79 LB: > { %s12844_s10 = smov [#allocation4]   ;;  %s13171_s0 = sadd.s32 4294967295, %s12785_s7   ;;  %s12785_s7 = sphi %s13165_s7, %s131_s7  }
  0x7a   : > { %s1516_s11 = sshll.u32 %s12844_s10, 4  ;;  %p10893_p0 = scmp.ge.s32.totalorder %s12785_s7, 1  ;;  %s1517_s11 = int_to_ptr.vmem [resolvable:$true] %s1516_s11 }
  0x7b   : > { %p1369_p1 = scmp.lt.s32.totalorder %s12785_s7, 3  ;;  %p14825_p2 = scmp.eq.s32.totalorder %s13171_s0, 0 }
  0x7c   : > { %s12845_s16 = smov [#allocation7]   ;;  %s12846_s22 = smov [#allocation10]  }
  0x7d   : > { %p13176_p3 = pnand %p10893_p0, %p1369_p1  ;;  %s1538_s18 = sshll.u32 %s12845_s16, 4  ;;  %s13182_s18 = int_to_ptr.vmem [resolvable:$true] %s1538_s18 }
  0x7e   : > { %s1566_s23 = sshll.u32 %s12846_s22, 4  ;;  %s12847_s28 = smov [#allocation13]   ;;  %s13190_s23 = int_to_ptr.vmem [resolvable:$true] %s1566_s23 }
  0x7f   : > { %s14907_s15 = scalar_select %p13176_p3, 1, 0 }
  0x80   : > { %p12132_p4 = pneg %p13176_p3  ;;  %s1588_s1 = sshll.u32 %s12847_s28, 4  ;;  %s13192_s1 = int_to_ptr.vmem [resolvable:$true] %s1588_s1 }
  0x81   : > { %s12480_s10 = scalar_lea.vmem %s1517_s11, 16  ;;  %s12487_s16 = scalar_lea.vmem %s1517_s11, 32 }
  0x82   : > { %p13186_p5 = pnand %p14825_p2, %p12132_p4  ;;  %p12481_p7 = scmp.ne.s32.totalorder %s1517_s11, %s12480_s10 }
  0x83   : > { %p12488_p10 = scmp.lt.s32.totalorder %s1517_s11, %s1517_s11  ;;  %p12489_p11 = scmp.lt.s32.totalorder %s12487_s16, %s12480_s10 }
  0x84   : > { %p13196_p6 = pneg %p13186_p5 }
  0x85   : > { %p12490_p12 = por %p12489_p11, %p12488_p10 }
  0x86   : > { %p12483_p8 = pnand %p12481_p7, %p13196_p6 }
  0x88   : > { %p12484_p9 = pneg %p12483_p8 }
  0x8a   : > { %p12491_p13 = pnand %p12490_p12, %p12484_p9 }
  0x8c   : > { %12494 = shalt.err (!%p12491_p13)
}
  0x8d   : > { %12138 = dma.hbm_to_vmem [thread:$0]  (!%p13186_p5), %s13098_s27, 16, %s1517_s11, [#allocation5]  }
  0x8e   : > { %s12506_s22 = scalar_lea.vmem %s13182_s18, 16  ;;  %s12513_s28 = scalar_lea.vmem %s13182_s18, 32 }
  0x8f   : > { %p12507_p0 = scmp.ne.s32.totalorder %s13182_s18, %s12506_s22  ;;  %p12514_p7 = scmp.lt.s32.totalorder %s13182_s18, %s13182_s18 }
  0x90   : > { %p12515_p8 = scmp.lt.s32.totalorder %s12513_s28, %s12506_s22 }
  0x91   : > { %p12509_p1 = pnand %p12507_p0, %p13196_p6 }
  0x92   : > { %p12516_p9 = por %p12515_p8, %p12514_p7 }
  0x93   : > { %p12510_p4 = pneg %p12509_p1 }
  0x95   : > { %p12517_p10 = pnand %p12516_p9, %p12510_p4 }
  0x97   : > { %12520 = shalt.err (!%p12517_p10)
}
  0x98   : > { %12144 = dma.hbm_to_vmem [thread:$0]  (!%p13186_p5), %s13108_s20, 16, %s13182_s18, [#allocation8]  }
  0x99   : > { %s12532_s11 = scalar_lea.vmem %s13190_s23, 16  ;;  %s12539_s10 = scalar_lea.vmem %s13190_s23, 32 }
  0x9a   : > { %p12533_p11 = scmp.ne.s32.totalorder %s13190_s23, %s12532_s11  ;;  %p12540_p0 = scmp.lt.s32.totalorder %s13190_s23, %s13190_s23 }
  0x9b   : > { %p12541_p1 = scmp.lt.s32.totalorder %s12539_s10, %s12532_s11 }
  0x9c   : > { %p12535_p12 = pnand %p12533_p11, %p13196_p6 }
  0x9d   : > { %p12542_p4 = por %p12541_p1, %p12540_p0 }
  0x9e   : > { %p12536_p13 = pneg %p12535_p12 }
  0xa0   : > { %p12543_p7 = pnand %p12542_p4, %p12536_p13 }
  0xa2   : > { %12546 = shalt.err (!%p12543_p7)
}
  0xa3   : > { %12150 = dma.hbm_to_vmem [thread:$0]  (!%p13186_p5), %s13128_s24, 16, %s13190_s23, [#allocation11]  }
  0xa4   : > { %s12558_s18 = scalar_lea.vmem %s13192_s1, 16  ;;  %s12565_s16 = scalar_lea.vmem %s13192_s1, 32 }
  0xa5   : > { %p12559_p8 = scmp.ne.s32.totalorder %s13192_s1, %s12558_s18  ;;  %p12566_p11 = scmp.lt.s32.totalorder %s13192_s1, %s13192_s1 }
  0xa6   : > { %p12567_p12 = scmp.lt.s32.totalorder %s12565_s16, %s12558_s18 }
  0xa7   : > { %p12561_p9 = pnand %p12559_p8, %p13196_p6 }
  0xa8   : > { %p12568_p13 = por %p12567_p12, %p12566_p11 }
  0xa9   : > { %p12562_p10 = pneg %p12561_p9 }
  0xab   : > { %p12569_p0 = pnand %p12568_p13, %p12562_p10 }
  0xad   : > { %12572 = shalt.err (!%p12569_p0)
}
  0xae   : > { %s14910_s19 = sld [smem:[#allocation70_spill]]  ;;  %s12848_s22 = smov [#allocation16]  }
  0xaf   : > { %s1610_s23 = sshll.u32 %s12848_s22, 4  ;;  %s12849_s28 = smov [#allocation2]   ;;  %s1611_s23 = int_to_ptr.vmem [resolvable:$true] %s1610_s23 }
  0xb0   : > { %s1502_s11 = sshll.u32 %s12849_s28, 4  ;;  %s12584_s10 = scalar_lea.vmem %s1611_s23, 16  ;;  %s1503_s11 = int_to_ptr.vmem [resolvable:$true] %s1502_s11 }
  0xb1   : > { %p12585_p1 = scmp.ne.s32.totalorder %s1611_s23, %s12584_s10  ;;  %s12591_s18 = scalar_lea.vmem %s1611_s23, 32 }
  0xb2   : > { %p12592_p8 = scmp.lt.s32.totalorder %s1611_s23, %s1611_s23  ;;  %p12593_p9 = scmp.lt.s32.totalorder %s12591_s18, %s12584_s10 }
  0xb3   : > { %p12587_p4 = pnand %p12585_p1, %p13196_p6 }
  0xb4   : > { %12156 = dma.hbm_to_vmem [thread:$0]  (!%p13186_p5), %s14910_s19, 16, %s13192_s1, [#allocation14]  }
  0xb5   : > { %p12588_p7 = pneg %p12587_p4  ;;  %p12594_p10 = por %p12593_p9, %p12592_p8 }
  0xb7   : > { %p12595_p11 = pnand %p12594_p10, %p12588_p7 }
  0xb9   : > { %12598 = shalt.err (!%p12595_p11)
}
  0xba   : > { %12162 = dma.hbm_to_vmem [thread:$0]  (!%p13186_p5), %s13148_s30, 16, %s1611_s23, [#allocation17]  }
  0xbb   : > { %s12610_s1 = scalar_lea.vmem %s1503_s11, 16  ;;  %s12617_s16 = scalar_lea.vmem %s1503_s11, 32 }
  0xbc   : > { %p12611_p12 = scmp.ne.s32.totalorder %s1503_s11, %s12610_s1  ;;  %p12618_p1 = scmp.lt.s32.totalorder %s1503_s11, %s1503_s11 }
  0xbd   : > { %p12619_p4 = scmp.lt.s32.totalorder %s12617_s16, %s12610_s1 }
  0xbe   : > { %p12613_p13 = pnand %p12611_p12, %p13196_p6 }
  0xbf   : > { %p12620_p2 = por %p12619_p4, %p12618_p1 }
  0xc0   : > { %p12614_p0 = pneg %p12613_p13 }
  0xc2   : > { %p12621_p3 = pnand %p12620_p2, %p12614_p0 }
  0xc4   : > { %12624 = shalt.err (!%p12621_p3)
}
  0xc5   : > { %s14911_s9 = sld [smem:[#allocation64_spill]]  ;;  %s12850_s22 = smov [#allocation6]  }
  0xc6   : > { %s1527_s28 = sshll.u32 %s12850_s22, 4  ;;  %s12851_s23 = smov [#allocation9]   ;;  %s1528_s28 = int_to_ptr.vmem [resolvable:$true] %s1527_s28 }
  0xc7   : > { %s1552_s10 = sshll.u32 %s12851_s23, 4  ;;  %s12636_s18 = scalar_lea.vmem %s1528_s28, 16  ;;  %s1553_s10 = int_to_ptr.vmem [resolvable:$true] %s1552_s10 }
  0xc8   : > { %p12637_p7 = scmp.ne.s32.totalorder %s1528_s28, %s12636_s18  ;;  %s12643_s19 = scalar_lea.vmem %s1528_s28, 32 }
  0xc9   : > { %p12644_p10 = scmp.lt.s32.totalorder %s1528_s28, %s1528_s28  ;;  %p12645_p11 = scmp.lt.s32.totalorder %s12643_s19, %s12636_s18 }
  0xca   : > { %p12639_p8 = pnand %p12637_p7, %p13196_p6 }
  0xcb   : > { %12135 = dma.hbm_to_vmem [thread:$0]  (!%p13186_p5), %s14911_s9, 16, %s1503_s11, [#allocation3]  }
  0xcc   : > { %p12640_p9 = pneg %p12639_p8  ;;  %p12646_p2 = por %p12645_p11, %p12644_p10 }
  0xce   : > { %p12647_p3 = pnand %p12646_p2, %p12640_p9 }
  0xd0   : > { %12650 = shalt.err (!%p12647_p3)
}
  0xd1   : > { %s14912_s4 = sld [smem:[#allocation66_spill]]  ;;  %s12662_s11 = scalar_lea.vmem %s1553_s10, 16 }
  0xd2   : > { %p12663_p12 = scmp.ne.s32.totalorder %s1553_s10, %s12662_s11  ;;  %s12669_s1 = scalar_lea.vmem %s1553_s10, 32 }
  0xd3   : > { %p12670_p1 = scmp.lt.s32.totalorder %s1553_s10, %s1553_s10  ;;  %p12671_p4 = scmp.lt.s32.totalorder %s12669_s1, %s12662_s11 }
  0xd4   : > { %p12665_p13 = pnand %p12663_p12, %p13196_p6 }
  0xd5   : > { %p12672_p7 = por %p12671_p4, %p12670_p1 }
  0xd6   : > { %p12666_p0 = pneg %p12665_p13 }
  0xd7   : > { %12141 = dma.hbm_to_vmem [thread:$0]  (!%p13186_p5), %s14912_s4, 16, %s1528_s28, [#allocation5]  }
  0xd8   : > { %p12673_p8 = pnand %p12672_p7, %p12666_p0 }
  0xda   : > { %12676 = shalt.err (!%p12673_p8)
}
  0xdb   : > { %s14913_s6 = sld [smem:[#allocation68_spill]]  ;;  %s12852_s19 = smov [#allocation12]  }
  0xdc   : > { %s1577_s16 = sshll.u32 %s12852_s19, 4  ;;  %s12853_s22 = smov [#allocation15]   ;;  %s1578_s16 = int_to_ptr.vmem [resolvable:$true] %s1577_s16 }
  0xdd   : > { %s1599_s28 = sshll.u32 %s12853_s22, 4  ;;  %s12688_s23 = scalar_lea.vmem %s1578_s16, 16  ;;  %s1600_s28 = int_to_ptr.vmem [resolvable:$true] %s1599_s28 }
  0xde   : > { %p12689_p9 = scmp.ne.s32.totalorder %s1578_s16, %s12688_s23  ;;  %s12695_s18 = scalar_lea.vmem %s1578_s16, 32 }
  0xdf   : > { %p12696_p2 = scmp.lt.s32.totalorder %s1578_s16, %s1578_s16  ;;  %p12697_p3 = scmp.lt.s32.totalorder %s12695_s18, %s12688_s23 }
  0xe0   : > { %p12691_p10 = pnand %p12689_p9, %p13196_p6 }
  0xe1   : > { %12147 = dma.hbm_to_vmem [thread:$0]  (!%p13186_p5), %s14913_s6, 16, %s1553_s10, [#allocation8]  }
  0xe2   : > { %p12692_p11 = pneg %p12691_p10  ;;  %p12698_p12 = por %p12697_p3, %p12696_p2 }
  0xe4   : > { %p12699_p13 = pnand %p12698_p12, %p12692_p11 }
  0xe6   : > { %12702 = shalt.err (!%p12699_p13)
}
  0xe7   : > { %12153 = dma.hbm_to_vmem [thread:$0]  (!%p13186_p5), %s13133_s21, 16, %s1578_s16, [#allocation11]  }
  0xe8   : > { %s12714_s10 = scalar_lea.vmem %s1600_s28, 16  ;;  %s12721_s11 = scalar_lea.vmem %s1600_s28, 32 }
  0xe9   : > { %p12715_p0 = scmp.ne.s32.totalorder %s1600_s28, %s12714_s10  ;;  %p12722_p7 = scmp.lt.s32.totalorder %s1600_s28, %s1600_s28 }
  0xea   : > { %p12723_p8 = scmp.lt.s32.totalorder %s12721_s11, %s12714_s10 }
  0xeb   : > { %p12717_p1 = pnand %p12715_p0, %p13196_p6 }
  0xec   : > { %p12724_p9 = por %p12723_p8, %p12722_p7 }
  0xed   : > { %p12718_p4 = pneg %p12717_p1 }
  0xef   : > { %p12725_p10 = pnand %p12724_p9, %p12718_p4 }
  0xf1   : > { %12728 = shalt.err (!%p12725_p10)
}
  0xf2   : > { %12159 = dma.hbm_to_vmem [thread:$0]  (!%p13186_p5), %s13143_s12, 16, %s1600_s28, [#allocation14]  }
  0xf3   : > { %s12854_s1 = smov [#allocation18]  }
  0xf4   : > { %s1624_s19 = sshll.u32 %s12854_s1, 4  ;;  %s1625_s19 = int_to_ptr.vmem [resolvable:$true] %s1624_s19 }
  0xf5   : > { %s12740_s16 = scalar_lea.vmem %s1625_s19, 16  ;;  %s12747_s22 = scalar_lea.vmem %s1625_s19, 32 }
  0xf6   : > { %p12741_p11 = scmp.ne.s32.totalorder %s1625_s19, %s12740_s16  ;;  %p12748_p12 = scmp.lt.s32.totalorder %s1625_s19, %s1625_s19 }
  0xf7   : > { %p12749_p13 = scmp.lt.s32.totalorder %s12747_s22, %s12740_s16 }
  0xf8   : > { %p12743_p2 = pnand %p12741_p11, %p13196_p6 }
  0xf9   : > { %p12750_p0 = por %p12749_p13, %p12748_p12 }
  0xfa   : > { %p12744_p3 = pneg %p12743_p2 }
  0xfc   : > { %p12751_p1 = pnand %p12750_p0, %p12744_p3 }
  0xfe   : > { %12754 = shalt.err (!%p12751_p1)
}
  0xff   : > { %s14914_s8 = sld [smem:[#allocation71_spill]]  ;;  %p14915_p4 = scmp.ne.s32.totalorder %s14907_s15, 0 }
 0x100   : > { %p14916_p7 = scmp.eq.s32.totalorder (!%p14915_p4), %s13171_s0, 0 }
 0x101   : > { %1653 = sbr.rel (%p14915_p4) target bundleno = 14415 (0x384f), region = 248 }
 0x105   : > { %12165 = dma.hbm_to_vmem [thread:$0]  (!%p13186_p5), %s14914_s8, 16, %s1625_s19, [#allocation17]  }
 0x106   : > { %12760 = dma.done.wait (%p14916_p7), [#allocation3], 16   ;;  %p14917_p8 = pmov %p14916_p7 }
 0x107   : > { %p14918_p6 = pmov %p14916_p7 }
 0x108   : > { %12762 = vsyncadd (%p14917_p8), [#allocation3], 4294967280 }
 0x109   : > { %12764 = dma.done.wait (%p14918_p6), [#allocation5], 32   ;;  %p14919_p9 = pmov %p14918_p6 }
 0x10a   : > { %p14920_p10 = pmov %p14918_p6 }
 0x10b   : > { %12766 = vsyncadd (%p14919_p9), [#allocation5], 4294967264 }
 0x10c   : > { %12768 = dma.done.wait (%p14920_p10), [#allocation8], 32   ;;  %p14921_p5 = pmov %p14918_p6 }
 0x10e   : > { %12770 = vsyncadd (%p14921_p5), [#allocation8], 4294967264  ;;  %p14922_p11 = pmov %p14921_p5 }
 0x10f   : > { %p14923_p2 = pmov %p14921_p5 }
 0x110   : > { %12772 = dma.done.wait (%p14922_p11), [#allocation11], 32  }
 0x111   : > { %12774 = vsyncadd (%p14923_p2), [#allocation11], 4294967264  ;;  %p14924_p3 = pmov %p14923_p2 }
 0x112   : > { %p14925_p12 = pmov %p14923_p2 }
 0x113   : > { %12776 = dma.done.wait (%p14924_p3), [#allocation14], 32  }
 0x114   : > { %12778 = vsyncadd (%p14925_p12), [#allocation14], 4294967264  ;;  %p14926_p13 = pmov %p14923_p2 }
 0x115   : > { %p14927_p0 = pmov %p14923_p2 }
 0x116   : > { %12780 = dma.done.wait (%p14926_p13), [#allocation17], 32  }
 0x117   : > { %12782 = vsyncadd (%p14927_p0), [#allocation17], 4294967264  ;;  %s14928_s5 = sld [smem:[#allocation25_spill]]  ;;  %p1830_p1 = scmp.lt.s32.totalorder %s13171_s0, 1  ;;  %vm1851_vm0 = vcmask 130048   ;;  %v1850_v0 = vld [vmem:[%s12893_s17 + $0x8] sm:$0xff] }
 0x118   : > { %v1849_v1 = vld [vmem:[%s12893_s17] sm:$0xff]  ;;  %11474 = vmatprep.subr.mxu0 %v1850_v0  ;;  %v1936_v3 = vld [vmem:[%s12908_s29 + $0x18] sm:$0xff]  ;;  %v1935_v5 = vld [vmem:[%s12908_s29 + $0x10] sm:$0xff]  ;;  %s14929_s3 = sld [smem:[#allocation29_spill]]  ;;  %vm14855_vm1 = vcmask 261120   ;;  %v12855_v14 = vmov 0.0625  }
 0x119   : > { %s15024_s0 = smov (!%p1830_p1, %s13171_s0), 1  ;;  %11475 = vmatpush3.msra.mxu0 %v1850_v0  ;;  %11481 = vmatprep.subr.mxu1 %v1936_v3  ;;  %v1934_v6 = vld [vmem:[%s12908_s29 + $0x8] sm:$0xff]  ;;  %v1933_v7 = vld [vmem:[%s12908_s29] sm:$0xff]  ;;  %s14841_s2 = smov 64   ;;  %vm2134_vm2 = vcmask 64512   ;;  %vm14856_vm5 = vmmov 0  }
 0x11a   : > { %s13301_s15 = sshll.u32 %s15024_s0, 4  ;;  %11476 = vmatprep.subr.mxu0 %v1849_v1  ;;  %11482 = vmatpush3.msra.mxu1 %v1936_v3  ;;  %v1845_v9 = vld [vmem:[%s12888_s13] sm:$0xff]  ;;  %v1846_v10 = vld [vmem:[%s12888_s13 + $0x8] sm:$0xff]  ;;  %s14848_s0 = smov 96  }
 0x11b   : > { %11477 = vmatpush3.msra.mxu0 %v1849_v1  ;;  %11483 = vmatprep.subr.mxu1 %v1935_v5  ;;  %s14846_s28 = smov 88   ;;  %s14844_s23 = smov 120  }
 0x11c   : > { %11484 = vmatpush3.msra.mxu1 %v1935_v5  ;;  %s14930_s18 = sld [smem:[#allocation28_spill]]  ;;  %s14839_s11 = smov 56  }
 0x11d   : > { %s1834_s26 = scalar_lea.vmem %s14928_s5, %s13301_s15  ;;  %11485 = vmatprep.subr.mxu1 %v1934_v6  ;;  %s14931_s10 = sld [smem:[#allocation30_spill]] }
 0x11e   : > { %v1847_v2 = vld [vmem:[%s1834_s26] sm:$0xff]  ;;  %v1848_v4 = vld [vmem:[%s1834_s26 + $0x8] sm:$0xff]  ;;  %11486 = vmatpush3.msra.mxu1 %v1934_v6  ;;  %s14837_s1 = smov 80   ;;  %s14835_s19 = smov 112  }
 0x11f   : > { %11478 = vmatprep.mubr.msk.f32.mxu0 %vm1851_vm0, %v1847_v2  ;;  %11487 = vmatprep.subr.mxu1 %v1933_v7  ;;  %v10926_v15 = vld [vmem:[%s14929_s3] ss:$0 sm:$0xff]  ;;  %s14833_s16 = smov 48   ;;  %s14827_s22 = smov 72  }
 0x120   : > { %11479 = vmatmul.mubr.msk.f32.vlgmr.msra.gmra.mxu0 %vm1851_vm0, %v1848_v4  ;;  %11488 = vmatpush3.msra.mxu1 %v1933_v7  ;;  %s14831_s26 = smov 104   ;;  %s14954_s3 = smov 104  }
 0x121   : > { %11496 = vmatprep.mubr.msk.f32.mxu0 %vm1851_vm0, %v12855_v14  ;;  %s14955_s4 = smov 40   ;;  %s14956_s5 = sld [smem:[#allocation44_spill]] }
 0x122   : > { %v13379_v50 = vld [vmem:[%s14930_s18 + $0x8] sm:$0xff]  ;;  %v13385_v54 = vld [vmem:[%s14930_s18] sm:$0xff]  ;;  %s14957_s6 = sld [smem:[#allocation47_spill]] }
 0x123   : > { %vm2129_vm3 = vcmp.gt.f32.partialorder %v13379_v50, 0.0  ;;  %vm2128_vm4 = vcmp.gt.f32.partialorder %v13385_v54, 0.0  ;;  %s14959_s8 = sld [smem:[#allocation45_spill]] }
 0x124   : > { %s14960_s9 = sld [smem:[#allocation46_spill]] }
 0x1e0   : > { %v11480_v8 = vpop.f32.mrf.mxu0 }
 0x1e1   : > { %v13317_v13 = vadd.f32 %v11480_v8, %v1846_v10 }
 0x1e2   : > { %v1924_v11 = vpop.f32.mrf.mxu0 }
 0x1e3   : > { %v13315_v12 = vadd.f32 %v1924_v11, %v1845_v9 }
 0x1e5   : > { %11489 = vmatprep.mubr.msk.f32.mxu1 %vm14855_vm1, %v13315_v12 }
 0x1e6   : > { %11490 = vmatmul.mubr.msk.f32.vlgmr.msra.gmra.mxu1 %vm14855_vm1, %v13317_v13 }
 0x2a6   : > { %v11491_v16 = vpop.f32.mrf.mxu1 }
 0x2a7   : > { %v13326_v17 = vadd.f32 %v11491_v16, %v10926_v15 }
 0x2a8   : > { %v2024_v18 = vpop.f32.mrf.mxu1 }
 0x2a9   : > { %2132 = vrot.lane.b32.xlu1 %v13326_v17, %s14848_s0  ;;  %2037 = vrot.lane.b32.xlu0 %v13326_v17, %s14841_s2  ;;  %v13332_v19 = vadd.f32 %v10926_v15, %v2024_v18 }
 0x2ad   : > { %2130 = vrot.lane.b32.xlu1 %v13332_v19, %s14848_s0  ;;  %2035 = vrot.lane.b32.xlu0 %v13332_v19, %s14841_s2 }
 0x2b1   : > { %2453 = vrot.lane.b32.xlu1 %v13332_v19, %s14846_s28  ;;  %2455 = vrot.lane.b32.xlu0 %v13326_v17, %s14846_s28 }
 0x2b5   : > { %2451 = vrot.lane.b32.xlu1 %v13326_v17, %s14844_s23  ;;  %2449 = vrot.lane.b32.xlu0 %v13332_v19, %s14844_s23 }
 0x31b   : > { %v13346_v20 = vpop.permute.xlu0 %2037  ;;  %v2133_v21 = vpop.permute.xlu1 %2132 }
 0x31c   : > { %11492 = vmatprep.subr.mxu0 %v13346_v20 }
 0x31d   : > { %11493 = vmatpush3.msra.mxu0 %v13346_v20 }
 0x31f   : > { %v13350_v22 = vpop.permute.xlu0 %2035  ;;  %v2131_v23 = vpop.permute.xlu1 %2130 }
 0x320   : > { %11494 = vmatprep.subr.mxu0 %v13350_v22 }
 0x321   : > { %11495 = vmatpush3.msra.mxu0 %v13350_v22 }
 0x322   : > { %11497 = vmatmul.mubr.msk.f32.vlgmr.msra.gmra.mxu0 %vm1851_vm0, %v12855_v14  ;;  %11499 = vmatprep.subr.msk.mxu0 %vm2134_vm2, %v2133_v21 }
 0x323   : > { %11500 = vmatpush3.xpose.msk.msra.mxu0 %vm2134_vm2, %v2133_v21  ;;  %11503 = vmatprep.mubr.msk.f32.mxu0 %vm2134_vm2, %v13332_v19  ;;  %v2456_v24 = vpop.permute.xlu0 %2455  ;;  %v2454_v26 = vpop.permute.xlu1 %2453  ;;  %v12860_v21 = vmov 0.0  }
 0x324   : > { %11501 = vmatprep.subr.msk.mxu0 %vm2134_vm2, %v2131_v23  ;;  %11506 = vmatprep.subr.mxu1 %v12860_v21 }
 0x325   : > { %11510 = vmatprep.mubr.msk.f32.mxu1 %vm14856_vm5, %v12860_v21 }
 0x327   : > { %11502 = vmatpush3.xpose.msk.msra.mxu0 %vm2134_vm2, %v2131_v23  ;;  %v2450_v25 = vpop.permute.xlu0 %2449  ;;  %v2452_v27 = vpop.permute.xlu1 %2451 }
 0x328   : > { %11520 = vmatprep.subr.msk.mxu0 %vm2134_vm2, %v2456_v24 }
 0x32a   : > { %11504 = vmatmul.mubr.msk.f32.vlgmr.msra.gmra.mxu0 %vm2134_vm2, %v13326_v17 }
 0x32b   : > { %11521 = vmatpush3.xpose.msk.msra.mxu0 %vm2134_vm2, %v2456_v24  ;;  %11524 = vmatprep.mubr.msk.f32.mxu0 %vm2134_vm2, %v2450_v25  ;;  %v1939_v24 = vld [vmem:[%s14931_s10 + $0x8] sm:$0xff]  ;;  %v2119_v25 = vlaneseq }
 0x32c   : > { %11522 = vmatprep.subr.msk.mxu0 %vm2134_vm2, %v2454_v26 }
 0x32f   : > { %11523 = vmatpush3.xpose.msk.msra.mxu0 %vm2134_vm2, %v2454_v26  ;;  %v13438_v26 = vshrl.u32 %v2119_v25, 7 }
 0x330   : > { %11541 = vmatprep.subr.mxu0 %v1939_v24 }
 0x332   : > { %11525 = vmatmul.mubr.msk.f32.vlgmr.msra.gmra.mxu0 %vm2134_vm2, %v2452_v27 }
 0x333   : > { %11542 = vmatpush3.msra.mxu0 %v1939_v24 }
 0x3e2   : > { %v13370_v28 = vpop.f32.mrf.mxu0 }
 0x3e4   : > { %v13372_v29 = vpop.f32.mrf.mxu0 }
 0x3ea   : > { %v11505_v30 = vpop.f32.mrf.mxu0 }
 0x3eb   : > { %v2339_v31 = vmul.f32 0.35355338, %v11505_v30  ;;  %v2219_v58 = vsel %vm2129_vm3, %v11505_v30, -1e+30  ;;  %v2227_v61 = vmul.f32 %v11505_v30, %v13379_v50  ;;  %v13441_v30 = vadd.s32 8, %v13438_v26 }
 0x3ec   : > { %v2209_v32 = vpop.f32.mrf.mxu0  ;;  %v2223_v62 = vsel %vm1851_vm0, %v2219_v58, -inf  ;;  %v12864_v58 = vmov 1.0  }
 0x3ed   : > { %v2343_v33 = vsel %vm1851_vm0, %v2339_v31, -inf  ;;  %v2338_v34 = vmul.f32 0.35355338, %v2209_v32  ;;  %v2218_v63 = vsel %vm2128_vm4, %v2209_v32, -1e+30  ;;  %v2231_v0 = vsel %vm1851_vm0, %v2227_v61, 0.0 }
 0x3ee   : > { %2344 = vmax.xlane.f32.xlu1 %v2343_v33  ;;  %v2226_v1 = vmul.f32 %v2209_v32, %v13385_v54  ;;  %v2220_v2 = vsel %vm1851_vm0, %v2218_v63, -inf }
 0x3ef   : > { %v2340_v35 = vsel %vm1851_vm0, %v2338_v34, -inf }
 0x3f0   : > { %2341 = vmax.xlane.f32.xlu0 %v2340_v35  ;;  %v2228_v4 = vsel %vm1851_vm0, %v2226_v1, 0.0 }
 0x3f2   : > { %v11526_v36 = vpop.f32.mrf.mxu0 }
 0x3f3   : > { %v2655_v40 = vmul.f32 0.35355338, %v11526_v36  ;;  %v2541_v3 = vsel %vm2129_vm3, %v11526_v36, -1e+30  ;;  %v2549_v5 = vmul.f32 %v11526_v36, %v13379_v50 }
 0x3f4   : > { %v2531_v37 = vpop.f32.mrf.mxu0  ;;  %v2545_v6 = vsel %vm1851_vm0, %v2541_v3, -inf }
 0x3f5   : > { %v2654_v38 = vmul.f32 0.35355338, %v2531_v37  ;;  %v2659_v41 = vsel %vm1851_vm0, %v2655_v40, -inf  ;;  %v2540_v7 = vsel %vm2128_vm4, %v2531_v37, -1e+30  ;;  %v2553_v8 = vsel %vm1851_vm0, %v2549_v5, 0.0 }
 0x3f6   : > { %v2548_v9 = vmul.f32 %v2531_v37, %v13385_v54  ;;  %v2542_v10 = vsel %vm1851_vm0, %v2540_v7, -inf }
 0x3f7   : > { %v2656_v39 = vsel %vm1851_vm0, %v2654_v38, -inf }
 0x3f8   : > { %2657 = vmax.xlane.f32.xlu0 %v2656_v39  ;;  %v2550_v15 = vsel %vm1851_vm0, %v2548_v9, 0.0 }
 0x3fc   : > { %2660 = vmax.xlane.f32.xlu0 %v2659_v41 }
 0x477   : > { %v2345_v42 = vpop.xlane.xlu1 %2344 }
 0x478   : > { %v2347_v43 = vsub.f32 %v2339_v31, %v2345_v42  ;;  %v13443_v31 = vand.u32 127, %v2119_v25 }
 0x479   : > { %v2342_v44 = vpop.xlane.xlu0 %2341 }
 0x47a   : > { %v2350_v45 = vmul.f32 1.442695, %v2347_v43  ;;  %v2346_v46 = vsub.f32 %v2338_v34, %v2342_v44  ;;  %vm2125_vm6 = vcmp.eq.s32.totalorder %v13441_v30, %v13443_v31  ;;  %vm2124_vm7 = vcmp.eq.s32.totalorder %v13438_v26, %v13443_v31 }
 0x47b   : > { %v13448_v37 = vsel %vm2125_vm6, 1.0, %v12860_v21  ;;  %v13457_v43 = vsel %vm2124_vm7, 1.0, %v12860_v21  ;;  %vm13497_vm8 = vcmp.lt.s32.totalorder %v13443_v31, %v13441_v30  ;;  %vm13505_vm15 = vcmp.lt.s32.totalorder %v13443_v31, %v13438_v26 }
 0x47c   : > { %12279 = vpow2.f32 %v2350_v45  ;;  %v2348_v47 = vmul.f32 1.442695, %v2346_v46 }
 0x47e   : > { %12281 = vpow2.f32 %v2348_v47 }
 0x481   : > { %v2658_v48 = vpop.xlane.xlu0 %2657 }
 0x482   : > { %v2662_v52 = vsub.f32 %v2654_v38, %v2658_v48 }
 0x484   : > { %v2664_v59 = vmul.f32 1.442695, %v2662_v52 }
 0x485   : > { %v2661_v49 = vpop.xlane.xlu0 %2660 }
 0x486   : > { %v2663_v51 = vsub.f32 %v2655_v40, %v2661_v49 }
 0x488   : > { %v2666_v55 = vmul.f32 1.442695, %v2663_v51 }
 0x489   : > { %v13382_v53 = vpop.eup %12279 }
 0x48a   : > { %v2355_v56 = vsel %vm1851_vm0, %v13382_v53, 0.0  ;;  %12283 = vpow2.f32 %v2666_v55 }
 0x48b   : > { %v13389_v57 = vpop.eup %12281  ;;  %2356 = vadd.xlane.f32.xlu0 %v2355_v56  ;;  %12285 = vpow2.f32 %v2664_v59 }
 0x48c   : > { %v2352_v60 = vsel %vm1851_vm0, %v13389_v57, 0.0 }
 0x48d   : > { %2353 = vadd.xlane.f32.xlu1 %v2352_v60 }
 0x48f   : > { %2224 = vmax.xlane.f32.xlu0 %v2223_v62 }
 0x491   : > { %2232 = vadd.xlane.f32.xlu1 %v2231_v0 }
 0x493   : > { %2221 = vmax.xlane.f32.xlu0 %v2220_v2 }
 0x495   : > { %2229 = vadd.xlane.f32.xlu1 %v2228_v4 }
 0x497   : > { %2546 = vmax.xlane.f32.xlu0 %v2545_v6  ;;  %v13413_v11 = vpop.eup %12283 }
 0x498   : > { %v13416_v16 = vpop.eup %12285  ;;  %v2671_v18 = vsel %vm1851_vm0, %v13413_v11, 0.0 }
 0x499   : > { %2554 = vadd.xlane.f32.xlu1 %v2553_v8  ;;  %v2668_v23 = vsel %vm1851_vm0, %v13416_v16, 0.0 }
 0x49b   : > { %2543 = vmax.xlane.f32.xlu0 %v2542_v10  ;;  %v13492_v10 = vsub.s32 0, %v13438_v26 }
 0x49d   : > { %2551 = vadd.xlane.f32.xlu1 %v2550_v15 }
 0x49f   : > { %2672 = vadd.xlane.f32.xlu0 %v2671_v18 }
 0x4a1   : > { %2669 = vadd.xlane.f32.xlu1 %v2668_v23 }
 0x4b2   : > { %2680 = vrot.lane.b32.xlu1 %v13326_v17, %s14839_s11 }
 0x4b5   : > { %2678 = vrot.lane.b32.xlu0 %v13332_v19, %s14839_s11  ;;  %s14946_s11 = sld [smem:[#allocation42_spill]] }
 0x4b6   : > { %2771 = vrot.lane.b32.xlu1 %v13372_v29, %s14844_s23 }
 0x4b9   : > { %2773 = vrot.lane.b32.xlu0 %v13370_v28, %s14844_s23 }
 0x4ba   : > { %2947 = vrot.lane.b32.xlu1 %v13326_v17, %s14837_s1 }
 0x4be   : > { %2945 = vrot.lane.b32.xlu1 %v13332_v19, %s14837_s1  ;;  %s14945_s1 = sld [smem:[#allocation39_spill]] }
 0x514   : > { %v2357_v27 = vpop.xlane.xlu0 %2356 }
 0x516   : > { %v2354_v32 = vpop.xlane.xlu1 %2353 }
 0x517   : > { %12287 = vrcp.f32 %v2354_v32 }
 0x518   : > { %12289 = vrcp.f32 %v2357_v27  ;;  %v2225_v33 = vpop.xlane.xlu0 %2224 }
 0x51a   : > { %v2233_v34 = vpop.xlane.xlu1 %2232 }
 0x51b   : > { %v2236_v35 = vmul.f32 0.0625, %v2233_v34 }
 0x51c   : > { %v2222_v36 = vpop.xlane.xlu0 %2221 }
 0x51d   : > { %v13450_v38 = vsub.f32 %v2225_v33, %v2236_v35 }
 0x51e   : > { %v2230_v39 = vpop.xlane.xlu1 %2229 }
 0x51f   : > { %v2235_v40 = vmul.f32 0.0625, %v2230_v39  ;;  %v2240_v41 = vmul.f32 %v13450_v38, %v13448_v37 }
 0x520   : > { %v2547_v42 = vpop.xlane.xlu0 %2546 }
 0x521   : > { %v13459_v44 = vsub.f32 %v2222_v36, %v2235_v40  ;;  %11507 = vmatpush3.msra.mxu1 %v2240_v41 }
 0x522   : > { %v2555_v45 = vpop.xlane.xlu1 %2554  ;;  %11508 = vmatprep.subr.mxu1 %v12860_v21 }
 0x523   : > { %v2557_v46 = vmul.f32 0.0625, %v2555_v45  ;;  %v2239_v47 = vmul.f32 %v13459_v44, %v13457_v43 }
 0x524   : > { %v12288_v48 = vpop.eup %12287  ;;  %v2544_v49 = vpop.xlane.xlu0 %2543 }
 0x525   : > { %v12290_v51 = vpop.eup %12289  ;;  %v2559_v52 = vsub.f32 %v2547_v42, %v2557_v46  ;;  %11509 = vmatpush3.msra.mxu1 %v2239_v47  ;;  %v2359_v55 = vmul.f32 %v12288_v48, %v13389_v57 }
 0x526   : > { %v2552_v56 = vpop.xlane.xlu1 %2551  ;;  %11511 = vmatmul.mubr.msk.f32.vlgmr.msra.gmra.mxu1 %vm1851_vm0, %v12864_v58  ;;  %11513 = vmatprep.subr.mxu1 %v13346_v20  ;;  %v2361_v61 = vmul.f32 %v12290_v51, %v13382_v53 }
 0x527   : > { %v2556_v59 = vmul.f32 0.0625, %v2552_v56  ;;  %11514 = vmatpush3.msra.mxu1 %v13346_v20  ;;  %11517 = vmatprep.mubr.msk.f32.mxu1 %vm1851_vm0, %v2359_v55  ;;  %v2561_v57 = vmul.f32 %v2559_v52, %v13448_v37 }
 0x528   : > { %11515 = vmatprep.subr.mxu1 %v13350_v22  ;;  %v2673_v60 = vpop.xlane.xlu0 %2672 }
 0x529   : > { %v2558_v62 = vsub.f32 %v2544_v49, %v2556_v59  ;;  %11516 = vmatpush3.msra.mxu1 %v13350_v22  ;;  %12291 = vrcp.f32 %v2673_v60 }
 0x52a   : > { %v2670_v63 = vpop.xlane.xlu1 %2669  ;;  %11518 = vmatmul.mubr.msk.f32.vlgmr.msra.gmra.mxu1 %vm1851_vm0, %v2361_v61  ;;  %11527 = vmatprep.subr.mxu1 %v12860_v21 }
 0x52b   : > { %12293 = vrcp.f32 %v2670_v63  ;;  %11528 = vmatpush3.msra.mxu1 %v2561_v57  ;;  %v2560_v20 = vmul.f32 %v2558_v62, %v13457_v43  ;;  %11531 = vmatprep.mubr.msk.f32.mxu1 %vm14856_vm5, %v12860_v21 }
 0x52c   : > { %11529 = vmatprep.subr.mxu1 %v12860_v21  ;;  %v2679_v22 = vpop.permute.xlu0 %2678 }
 0x52d   : > { %11530 = vmatpush3.msra.mxu1 %v2560_v20 }
 0x52e   : > { %v2681_v53 = vpop.permute.xlu1 %2680  ;;  %11532 = vmatmul.mubr.msk.f32.vlgmr.msra.gmra.mxu1 %vm1851_vm0, %v12864_v58 }
 0x52f   : > { %11534 = vmatprep.subr.mxu1 %v2681_v53 }
 0x530   : > { %11535 = vmatpush3.msra.mxu1 %v2681_v53  ;;  %v2774_v33 = vpop.permute.xlu0 %2773 }
 0x531   : > { %11536 = vmatprep.subr.mxu1 %v2679_v22 }
 0x532   : > { %v2772_v0 = vpop.permute.xlu1 %2771  ;;  %11537 = vmatpush3.msra.mxu1 %v2679_v22 }
 0x536   : > { %v2948_v1 = vpop.permute.xlu1 %2947  ;;  %v12292_v2 = vpop.eup %12291 }
 0x537   : > { %11551 = vmatprep.subr.msk.mxu0 %vm2134_vm2, %v2948_v1  ;;  %v2677_v5 = vmul.f32 %v12292_v2, %v13413_v11 }
 0x538   : > { %v12294_v3 = vpop.eup %12293 }
 0x539   : > { %v2675_v4 = vmul.f32 %v12294_v3, %v13416_v16 }
 0x53a   : > { %v2946_v34 = vpop.permute.xlu1 %2945 }
 0x53b   : > { %11538 = vmatprep.mubr.msk.f32.mxu1 %vm1851_vm0, %v2675_v4 }
 0x53c   : > { %11539 = vmatmul.mubr.msk.f32.vlgmr.msra.gmra.mxu1 %vm1851_vm0, %v2677_v5 }
 0x5e6   : > { %v2310_v6 = vpop.f32.mrf.mxu1 }
 0x5e7   : > { %v2317_v48 = vrot.slane %v2310_v6, %v13492_v10 }
 0x5e8   : > { %v11512_v7 = vpop.f32.mrf.mxu1 }
 0x5ea   : > { %v13487_v8 = vpop.f32.mrf.mxu1 }
 0x5ec   : > { %v13489_v9 = vpop.f32.mrf.mxu1 }
 0x5ee   : > { %v2628_v15 = vpop.f32.mrf.mxu1 }
 0x5ef   : > { %v2635_v18 = vrot.slane %v2628_v15, %v13492_v10 }
 0x5f0   : > { %v11533_v23 = vpop.f32.mrf.mxu1 }
 0x5f1   : > { %vm2637_vm9 = vcmp.gt.f32.partialorder %v2635_v18, %v2559_v52  ;;  %vm2639_vm10 = vcmp.eq.f32.partialorder %v2635_v18, %v2559_v52  ;;  %vm2638_vm11 = vcmp.eq.f32.partialorder %v2635_v18, %v2558_v62  ;;  %vm2636_vm13 = vcmp.gt.f32.partialorder %v2635_v18, %v2558_v62 }
 0x5f2   : > { %vm2641_vm12 = vmand %vm2639_vm10, %vm13497_vm8 }
 0x5f3   : > { %vm2643_vm14 = vmor %vm2637_vm9, %vm2641_vm12  ;;  %vm2320_vm12 = vcmp.eq.f32.partialorder %v2317_v48, %v13459_v44 }
 0x5f4   : > { %v2645_v24 = vsel %vm2643_vm14, 1.0, %v12860_v21  ;;  %vm2640_vm6 = vmand %vm2638_vm11, %vm13505_vm15  ;;  %vm2321_vm11 = vcmp.eq.f32.partialorder %v2317_v48, %v13450_v38 }
 0x5f5   : > { %v2649_v25 = vsel %vm1851_vm0, %v2645_v24, 0.0  ;;  %vm2642_vm7 = vmor %vm2636_vm13, %vm2640_vm6  ;;  %vm2319_vm13 = vcmp.gt.f32.partialorder %v2317_v48, %v13450_v38  ;;  %vm2318_vm6 = vcmp.gt.f32.partialorder %v2317_v48, %v13459_v44 }
 0x5f6   : > { %2650 = vadd.xlane.f32.xlu0 %v2649_v25  ;;  %v2644_v27 = vsel %vm2642_vm7, 1.0, %v12860_v21  ;;  %vm2325_vm14 = vmand %vm2321_vm11, %vm13497_vm8 }
 0x5f7   : > { %v2646_v32 = vsel %vm1851_vm0, %v2644_v27, 0.0  ;;  %vm2324_vm7 = vmand %vm2320_vm12, %vm13505_vm15 }
 0x5f8   : > { %2647 = vadd.xlane.f32.xlu1 %v2646_v32 }
 0x5fc   : > { %v11540_v35 = vpop.f32.mrf.mxu1 }
 0x5fe   : > { %v2756_v40 = vpop.f32.mrf.mxu1 }
 0x609   : > { %2943 = vrot.lane.b32.xlu1 %v13326_v17, %s14835_s19 }
 0x60c   : > { %2941 = vrot.lane.b32.xlu0 %v13332_v19, %s14835_s19 }
 0x67f   : > { %v2651_v36 = vpop.xlane.xlu0 %2650 }
 0x680   : > { %vm2653_vm9 = vcmp.lt.f32.partialorder %v2651_v36, 15.0 }
 0x681   : > { %v2648_v39 = vpop.xlane.xlu1 %2647  ;;  %v2778_v41 = vsel %vm2653_vm9, %v11540_v35, %v2774_v33  ;;  %vm2327_vm9 = vmor %vm2319_vm13, %vm2325_vm14 }
 0x682   : > { %vm2652_vm10 = vcmp.lt.f32.partialorder %v2648_v39, 15.0  ;;  %v2329_v57 = vsel %vm2327_vm9, 1.0, %v12860_v21 }
 0x683   : > { %v2777_v42 = vsel %vm2652_vm10, %v2756_v40, %v2772_v0  ;;  %v2942_v45 = vpop.permute.xlu0 %2941  ;;  %vm2326_vm10 = vmor %vm2318_vm6, %vm2324_vm7  ;;  %v2333_v20 = vsel %vm1851_vm0, %v2329_v57, 0.0 }
 0x684   : > { %11543 = vmatprep.mubr.msk.f32.mxu0 %vm2134_vm2, %v2777_v42  ;;  %v2328_v44 = vsel %vm2326_vm10, 1.0, %v12860_v21 }
 0x685   : > { %11544 = vmatmul.mubr.msk.f32.vlgmr.msra.gmra.mxu0 %vm2134_vm2, %v2778_v41  ;;  %v2944_v46 = vpop.permute.xlu1 %2943  ;;  %v2330_v53 = vsel %vm1851_vm0, %v2328_v44, 0.0 }
 0x686   : > { %11552 = vmatpush3.xpose.msk.msra.mxu0 %vm2134_vm2, %v2948_v1  ;;  %11555 = vmatprep.mubr.msk.f32.mxu0 %vm2134_vm2, %v2942_v45  ;;  %v1938_v1 = vld [vmem:[%s14931_s10] sm:$0xff] }
 0x687   : > { %11553 = vmatprep.subr.msk.mxu0 %vm2134_vm2, %v2946_v34  ;;  %11546 = vmatprep.subr.mxu1 %v1938_v1 }
 0x688   : > { %11547 = vmatpush3.msra.mxu1 %v1938_v1 }
 0x689   : > { %11558 = vmatprep.subr.mxu1 %v12860_v21 }
 0x68a   : > { %11554 = vmatpush3.xpose.msk.msra.mxu0 %vm2134_vm2, %v2946_v34 }
 0x68d   : > { %11556 = vmatmul.mubr.msk.f32.vlgmr.msra.gmra.mxu0 %vm2134_vm2, %v2944_v46 }
 0x745   : > { %v13526_v47 = vpop.f32.mrf.mxu0 }
 0x747   : > { %v13529_v49 = vpop.f32.mrf.mxu0 }
 0x74d   : > { %v11557_v51 = vpop.f32.mrf.mxu0 }
 0x74e   : > { %v3147_v52 = vmul.f32 0.35355338, %v11557_v51  ;;  %v3041_v60 = vmul.f32 %v11557_v51, %v13379_v50  ;;  %v3033_v38 = vsel %vm2129_vm3, %v11557_v51, -1e+30 }
 0x74f   : > { %v3023_v55 = vpop.f32.mrf.mxu0  ;;  %v3037_v63 = vsel %vm1851_vm0, %v3033_v38, -inf }
 0x750   : > { %v3151_v56 = vsel %vm1851_vm0, %v3147_v52, -inf  ;;  %v3146_v59 = vmul.f32 0.35355338, %v3023_v55  ;;  %v3045_v62 = vsel %vm1851_vm0, %v3041_v60, 0.0  ;;  %v3032_v22 = vsel %vm2128_vm4, %v3023_v55, -1e+30 }
 0x751   : > { %3152 = vmax.xlane.f32.xlu1 %v3151_v56  ;;  %v3034_v0 = vsel %vm1851_vm0, %v3032_v22, -inf  ;;  %v3040_v2 = vmul.f32 %v3023_v55, %v13385_v54 }
 0x752   : > { %v3148_v61 = vsel %vm1851_vm0, %v3146_v59, -inf }
 0x753   : > { %3149 = vmax.xlane.f32.xlu0 %v3148_v61  ;;  %v3042_v3 = vsel %vm1851_vm0, %v3040_v2, 0.0 }
 0x755   : > { %3046 = vadd.xlane.f32.xlu1 %v3045_v62 }
 0x757   : > { %3038 = vmax.xlane.f32.xlu0 %v3037_v63 }
 0x759   : > { %2334 = vadd.xlane.f32.xlu1 %v2333_v20 }
 0x75b   : > { %2331 = vadd.xlane.f32.xlu0 %v2330_v53 }
 0x75f   : > { %3035 = vmax.xlane.f32.xlu0 %v3034_v0 }
 0x76a   : > { %3172 = vrot.lane.b32.xlu1 %v13326_v17, %s14833_s16 }
 0x78e   : > { %3043 = vadd.xlane.f32.xlu1 %v3042_v3 }
 0x79f   : > { %3358 = vrot.lane.b32.xlu1 %v13326_v17, %s14827_s22 }
 0x7a3   : > { %3356 = vrot.lane.b32.xlu1 %v13332_v19, %s14827_s22  ;;  %s14829_s22 = smov 40  }
 0x7a7   : > { %3354 = vrot.lane.b32.xlu1 %v13326_v17, %s14831_s26 }
 0x7da   : > { %v3153_v4 = vpop.xlane.xlu1 %3152 }
 0x7db   : > { %v3155_v5 = vsub.f32 %v3147_v52, %v3153_v4 }
 0x7dc   : > { %v3150_v6 = vpop.xlane.xlu0 %3149 }
 0x7dd   : > { %v3158_v7 = vmul.f32 1.442695, %v3155_v5  ;;  %v3154_v15 = vsub.f32 %v3146_v59, %v3150_v6 }
 0x7de   : > { %v3047_v18 = vpop.xlane.xlu1 %3046 }
 0x7df   : > { %12295 = vpow2.f32 %v3158_v7  ;;  %v3156_v23 = vmul.f32 1.442695, %v3154_v15  ;;  %v3049_v24 = vmul.f32 0.0625, %v3047_v18 }
 0x7e0   : > { %v3039_v25 = vpop.xlane.xlu0 %3038 }
 0x7e1   : > { %12297 = vpow2.f32 %v3156_v23  ;;  %v13565_v32 = vsub.f32 %v3039_v25, %v3049_v24 }
 0x7e2   : > { %v2335_v27 = vpop.xlane.xlu1 %2334 }
 0x7e3   : > { %vm2337_vm11 = vcmp.lt.f32.partialorder %v2335_v27, 15.0  ;;  %v3053_v35 = vmul.f32 %v13565_v32, %v13448_v37 }
 0x7e4   : > { %v2332_v33 = vpop.xlane.xlu0 %2331  ;;  %v2448_v36 = vsel %vm2337_vm11, %v13487_v8, %v13370_v28 }
 0x7e5   : > { %vm2336_vm12 = vcmp.lt.f32.partialorder %v2332_v33, 15.0 }
 0x7e6   : > { %v2447_v34 = vsel %vm2336_vm12, %v13489_v9, %v13372_v29  ;;  %v3173_v8 = vpop.permute.xlu1 %3172 }
 0x7e7   : > { %11548 = vmatprep.mubr.msk.f32.mxu1 %vm2134_vm2, %v2447_v34 }
 0x7e8   : > { %11549 = vmatmul.mubr.msk.f32.vlgmr.msra.gmra.mxu1 %vm2134_vm2, %v2448_v36  ;;  %v3036_v46 = vpop.xlane.xlu0 %3035 }
 0x7e9   : > { %11559 = vmatpush3.msra.mxu1 %v3053_v35  ;;  %11562 = vmatprep.mubr.msk.f32.mxu1 %vm14856_vm5, %v12860_v21 }
 0x7ea   : > { %11560 = vmatprep.subr.mxu1 %v12860_v21 }
 0x7ec   : > { %v12296_v39 = vpop.eup %12295 }
 0x7ed   : > { %v3163_v40 = vsel %vm1851_vm0, %v12296_v39, 0.0 }
 0x7ee   : > { %v12298_v9 = vpop.eup %12297  ;;  %3164 = vadd.xlane.f32.xlu0 %v3163_v40 }
 0x7ef   : > { %v3160_v41 = vsel %vm1851_vm0, %v12298_v9, 0.0 }
 0x7f2   : > { %3161 = vadd.xlane.f32.xlu0 %v3160_v41 }
 0x808   : > { %3170 = vrot.lane.b32.xlu0 %v13332_v19, %s14833_s16  ;;  %s14939_s16 = sld [smem:[#allocation33_spill]] }
 0x80c   : > { %3352 = vrot.lane.b32.xlu0 %v13332_v19, %s14831_s26 }
 0x817   : > { %v3044_v42 = vpop.xlane.xlu1 %3043 }
 0x818   : > { %v3048_v45 = vmul.f32 0.0625, %v3044_v42 }
 0x81a   : > { %v3050_v48 = vsub.f32 %v3036_v46, %v3048_v45 }
 0x81b   : > { %v3359_v59 = vpop.permute.xlu1 %3358 }
 0x81c   : > { %v3052_v51 = vmul.f32 %v3050_v48, %v13457_v43 }
 0x81e   : > { %11561 = vmatpush3.msra.mxu1 %v3052_v51 }
 0x81f   : > { %11563 = vmatmul.mubr.msk.f32.vlgmr.msra.gmra.mxu1 %vm1851_vm0, %v12864_v58  ;;  %11565 = vmatprep.subr.mxu1 %v3173_v8  ;;  %v3357_v63 = vpop.permute.xlu1 %3356 }
 0x820   : > { %11566 = vmatpush3.msra.mxu1 %v3173_v8 }
 0x823   : > { %v3355_v44 = vpop.permute.xlu1 %3354 }
 0x877   : > { %v3165_v52 = vpop.xlane.xlu0 %3164 }
 0x878   : > { %12299 = vrcp.f32 %v3165_v52 }
 0x87b   : > { %v3162_v55 = vpop.xlane.xlu0 %3161 }
 0x87c   : > { %12301 = vrcp.f32 %v3162_v55 }
 0x87f   : > { %v3171_v56 = vpop.permute.xlu0 %3170 }
 0x880   : > { %11567 = vmatprep.subr.mxu1 %v3171_v56 }
 0x881   : > { %11568 = vmatpush3.msra.mxu1 %v3171_v56 }
 0x882   : > { %11577 = vmatprep.subr.msk.mxu1 %vm2134_vm2, %v3359_v59 }
 0x883   : > { %v3353_v57 = vpop.permute.xlu0 %3352 }
 0x885   : > { %v12300_v60 = vpop.eup %12299 }
 0x886   : > { %v3169_v62 = vmul.f32 %v12300_v60, %v12296_v39 }
 0x889   : > { %v12302_v61 = vpop.eup %12301 }
 0x88a   : > { %v3167_v38 = vmul.f32 %v12302_v61, %v12298_v9  ;;  %v1940_v9 = vld [vmem:[%s14931_s10 + $0x10] sm:$0xff] }
 0x88b   : > { %11572 = vmatprep.subr.mxu0 %v1940_v9 }
 0x88c   : > { %11569 = vmatprep.mubr.msk.f32.mxu1 %vm1851_vm0, %v3167_v38  ;;  %11573 = vmatpush3.msra.mxu0 %v1940_v9 }
 0x88d   : > { %11570 = vmatmul.mubr.msk.f32.vlgmr.msra.gmra.mxu1 %vm1851_vm0, %v3169_v62  ;;  %11584 = vmatprep.subr.mxu0 %v12860_v21 }
 0x88e   : > { %11578 = vmatpush3.xpose.msk.msra.mxu1 %vm2134_vm2, %v3359_v59  ;;  %11581 = vmatprep.mubr.msk.f32.mxu1 %vm2134_vm2, %v3353_v57 }
 0x88f   : > { %11579 = vmatprep.subr.msk.mxu1 %vm2134_vm2, %v3357_v63 }
 0x892   : > { %11580 = vmatpush3.xpose.msk.msra.mxu1 %vm2134_vm2, %v3357_v63 }
 0x895   : > { %11582 = vmatmul.mubr.msk.f32.vlgmr.msra.gmra.mxu1 %vm2134_vm2, %v3355_v44 }
 0x8a8   : > { %v13595_v20 = vpop.f32.mrf.mxu1 }
 0x8aa   : > { %v13597_v53 = vpop.f32.mrf.mxu1 }
 0x8df   : > { %v3120_v22 = vpop.f32.mrf.mxu1 }
 0x8e0   : > { %v3127_v0 = vrot.slane %v3120_v22, %v13492_v10 }
 0x8e1   : > { %v11564_v1 = vpop.f32.mrf.mxu1 }
 0x8e2   : > { %vm3129_vm13 = vcmp.gt.f32.partialorder %v3127_v0, %v13565_v32  ;;  %vm3131_vm14 = vcmp.eq.f32.partialorder %v3127_v0, %v13565_v32  ;;  %vm3130_vm6 = vcmp.eq.f32.partialorder %v3127_v0, %v3050_v48  ;;  %vm3128_vm9 = vcmp.gt.f32.partialorder %v3127_v0, %v3050_v48 }
 0x8e3   : > { %vm3133_vm7 = vmand %vm3131_vm14, %vm13497_vm8 }
 0x8e4   : > { %vm3135_vm10 = vmor %vm3129_vm13, %vm3133_vm7 }
 0x8e5   : > { %v3137_v2 = vsel %vm3135_vm10, 1.0, %v12860_v21  ;;  %vm3132_vm11 = vmand %vm3130_vm6, %vm13505_vm15 }
 0x8e6   : > { %v3141_v3 = vsel %vm1851_vm0, %v3137_v2, 0.0  ;;  %vm3134_vm12 = vmor %vm3128_vm9, %vm3132_vm11 }
 0x8e7   : > { %3142 = vadd.xlane.f32.xlu1 %v3141_v3  ;;  %v3136_v4 = vsel %vm3134_vm12, 1.0, %v12860_v21 }
 0x8e8   : > { %v3138_v5 = vsel %vm1851_vm0, %v3136_v4, 0.0 }
 0x8e9   : > { %3139 = vadd.xlane.f32.xlu0 %v3138_v5 }
 0x94d   : > { %v11571_v6 = vpop.f32.mrf.mxu1 }
 0x94f   : > { %v3248_v7 = vpop.f32.mrf.mxu1 }
 0x955   : > { %v11583_v15 = vpop.f32.mrf.mxu1 }
 0x956   : > { %v3444_v18 = vsel %vm2129_vm3, %v11583_v15, -1e+30  ;;  %v3452_v23 = vmul.f32 %v11583_v15, %v13379_v50  ;;  %v3558_v27 = vmul.f32 0.35355338, %v11583_v15 }
 0x957   : > { %v3434_v24 = vpop.f32.mrf.mxu1  ;;  %v3448_v25 = vsel %vm1851_vm0, %v3444_v18, -inf }
 0x958   : > { %3449 = vmax.xlane.f32.xlu1 %v3448_v25  ;;  %v3456_v32 = vsel %vm1851_vm0, %v3452_v23, 0.0  ;;  %v3557_v33 = vmul.f32 0.35355338, %v3434_v24  ;;  %v3562_v34 = vsel %vm1851_vm0, %v3558_v27, -inf  ;;  %v3443_v36 = vsel %vm2128_vm4, %v3434_v24, -1e+30 }
 0x959   : > { %3457 = vadd.xlane.f32.xlu0 %v3456_v32  ;;  %v3445_v50 = vsel %vm1851_vm0, %v3443_v36, -inf  ;;  %v3451_v39 = vmul.f32 %v3434_v24, %v13385_v54  ;;  %v2933_v32 = vadd.f32 %v13597_v53, %v13529_v49 }
 0x95a   : > { %v3559_v35 = vsel %vm1851_vm0, %v3557_v33, -inf }
 0x95b   : > { %v3453_v40 = vsel %vm1851_vm0, %v3451_v39, 0.0 }
 0x95c   : > { %3563 = vmax.xlane.f32.xlu1 %v3562_v34 }
 0x95d   : > { %3560 = vmax.xlane.f32.xlu0 %v3559_v35 }
 0x961   : > { %3446 = vmax.xlane.f32.xlu0 %v3445_v50 }
 0x965   : > { %3454 = vadd.xlane.f32.xlu0 %v3453_v40  ;;  %v1941_v40 = vld [vmem:[%s14931_s10 + $0x18] sm:$0xff]  ;;  %s14961_s10 = sld [smem:[#allocation26_spill]] }
 0x966   : > { %11598 = vmatprep.subr.mxu1 %v1941_v40 }
 0x967   : > { %11599 = vmatpush3.msra.mxu1 %v1941_v40 }
 0x96d   : > { %3261 = vrot.lane.b32.xlu1 %v13372_v29, %s14835_s19 }
 0x970   : > { %v3143_v41 = vpop.xlane.xlu1 %3142 }
 0x971   : > { %vm3145_vm4 = vcmp.lt.f32.partialorder %v3143_v41, 15.0 }
 0x972   : > { %v3140_v8 = vpop.xlane.xlu0 %3139 }
 0x973   : > { %vm3144_vm3 = vcmp.lt.f32.partialorder %v3140_v8, 15.0 }
 0x97b   : > { %3263 = vrot.lane.b32.xlu0 %v13370_v28, %s14835_s19  ;;  %s14940_s19 = sld [smem:[#allocation36_spill]] }
 0x981   : > { %v3968_v40 = vld [vmem:[%s14940_s19 + $0x20] sm:$0xff] }
 0x9e1   : > { %v3450_v42 = vpop.xlane.xlu1 %3449 }
 0x9e2   : > { %v3458_v45 = vpop.xlane.xlu0 %3457 }
 0x9e3   : > { %v3460_v61 = vmul.f32 0.0625, %v3458_v45 }
 0x9e5   : > { %v3564_v54 = vpop.xlane.xlu1 %3563  ;;  %v3462_v62 = vsub.f32 %v3450_v42, %v3460_v61 }
 0x9e6   : > { %v3566_v46 = vsub.f32 %v3558_v27, %v3564_v54  ;;  %v3561_v48 = vpop.xlane.xlu0 %3560 }
 0x9e7   : > { %v3565_v51 = vsub.f32 %v3557_v33, %v3561_v48  ;;  %v3464_v0 = vmul.f32 %v3462_v62, %v13448_v37 }
 0x9e8   : > { %v3569_v52 = vmul.f32 1.442695, %v3566_v46 }
 0x9e9   : > { %v3567_v55 = vmul.f32 1.442695, %v3565_v51  ;;  %v3262_v56 = vpop.permute.xlu1 %3261 }
 0x9ea   : > { %12303 = vpow2.f32 %v3569_v52  ;;  %v3267_v59 = vsel %vm3144_vm3, %v3248_v7, %v3262_v56  ;;  %v3447_v60 = vpop.xlane.xlu0 %3446 }
 0x9eb   : > { %12305 = vpow2.f32 %v3567_v55  ;;  %11574 = vmatprep.mubr.msk.f32.mxu0 %vm2134_vm2, %v3267_v59 }
 0x9ee   : > { %v3455_v38 = vpop.xlane.xlu0 %3454 }
 0x9ef   : > { %v3459_v57 = vmul.f32 0.0625, %v3455_v38 }
 0x9f1   : > { %v3461_v63 = vsub.f32 %v3447_v60, %v3459_v57 }
 0x9f2   : > { %v3264_v44 = vpop.permute.xlu0 %3263 }
 0x9f3   : > { %v3268_v22 = vsel %vm3145_vm4, %v11571_v6, %v3264_v44  ;;  %v3463_v1 = vmul.f32 %v3461_v63, %v13457_v43 }
 0x9f4   : > { %11575 = vmatmul.mubr.msk.f32.vlgmr.msra.gmra.mxu0 %vm2134_vm2, %v3268_v22 }
 0x9f5   : > { %11585 = vmatpush3.msra.mxu0 %v3464_v0  ;;  %11588 = vmatprep.mubr.msk.f32.mxu0 %vm14856_vm5, %v12860_v21 }
 0x9f6   : > { %11586 = vmatprep.subr.mxu0 %v12860_v21 }
 0x9f7   : > { %v12304_v2 = vpop.eup %12303  ;;  %11587 = vmatpush3.msra.mxu0 %v3463_v1 }
 0x9f8   : > { %v12306_v3 = vpop.eup %12305  ;;  %11589 = vmatmul.mubr.msk.f32.vlgmr.msra.gmra.mxu0 %vm1851_vm0, %v12864_v58  ;;  %v3574_v4 = vsel %vm1851_vm0, %v12304_v2, 0.0 }
 0x9f9   : > { %3575 = vadd.xlane.f32.xlu0 %v3574_v4  ;;  %v3571_v5 = vsel %vm1851_vm0, %v12306_v3, 0.0 }
 0x9fa   : > { %3572 = vadd.xlane.f32.xlu1 %v3571_v5 }
 0xa0b   : > { %3583 = vrot.lane.b32.xlu1 %v13326_v17, %s14829_s22  ;;  %v2938_v17 = vadd.f32 %v13595_v20, %v13526_v47 }
 0xa0f   : > { %3581 = vrot.lane.b32.xlu0 %v13332_v19, %s14829_s22  ;;  %s14936_s22 = sld [smem:[#allocation31_spill]] }
 0xa82   : > { %v3576_v6 = vpop.xlane.xlu0 %3575 }
 0xa83   : > { %12307 = vrcp.f32 %v3576_v6  ;;  %v3573_v7 = vpop.xlane.xlu1 %3572 }
 0xa84   : > { %12309 = vrcp.f32 %v3573_v7 }
 0xa86   : > { %v3582_v18 = vpop.permute.xlu0 %3581 }
 0xa87   : > { %v3584_v15 = vpop.permute.xlu1 %3583 }
 0xa88   : > { %11591 = vmatprep.subr.mxu0 %v3584_v15 }
 0xa89   : > { %11592 = vmatpush3.msra.mxu0 %v3584_v15 }
 0xa8a   : > { %11593 = vmatprep.subr.mxu0 %v3582_v18 }
 0xa8b   : > { %11594 = vmatpush3.msra.mxu0 %v3582_v18 }
 0xa90   : > { %v12308_v23 = vpop.eup %12307 }
 0xa91   : > { %v12310_v24 = vpop.eup %12309  ;;  %v3580_v27 = vmul.f32 %v12308_v23, %v12304_v2 }
 0xa92   : > { %v3578_v25 = vmul.f32 %v12310_v24, %v12306_v3 }
 0xa94   : > { %11595 = vmatprep.mubr.msk.f32.mxu0 %vm1851_vm0, %v3578_v25 }
 0xa95   : > { %11596 = vmatmul.mubr.msk.f32.vlgmr.msra.gmra.mxu0 %vm1851_vm0, %v3580_v27 }
 0xab4   : > { %v11576_v19 = vpop.f32.mrf.mxu0 }
 0xab5   : > { %v3351_v33 = vadd.f32 %v11576_v19, %v2938_v17 }
 0xab6   : > { %v3341_v34 = vpop.f32.mrf.mxu0 }
 0xab7   : > { %v3350_v35 = vadd.f32 %v3341_v34, %v2933_v32 }
 0xab8   : > { %v3531_v36 = vpop.f32.mrf.mxu0 }
 0xab9   : > { %v3538_v50 = vrot.slane %v3531_v36, %v13492_v10  ;;  %v10969_v36 = vld [vmem:[%s14939_s16] ss:$0 sm:$0xff]  ;;  %s14941_s16 = sld [smem:[#allocation35_spill]] }
 0xaba   : > { %v11590_v39 = vpop.f32.mrf.mxu0 }
 0xabb   : > { %vm3540_vm13 = vcmp.gt.f32.partialorder %v3538_v50, %v3462_v62  ;;  %vm3542_vm14 = vcmp.eq.f32.partialorder %v3538_v50, %v3462_v62  ;;  %vm3541_vm6 = vcmp.eq.f32.partialorder %v3538_v50, %v3461_v63  ;;  %vm3539_vm9 = vcmp.gt.f32.partialorder %v3538_v50, %v3461_v63 }
 0xabc   : > { %vm3544_vm7 = vmand %vm3542_vm14, %vm13497_vm8 }
 0xabd   : > { %vm3546_vm10 = vmor %vm3540_vm13, %vm3544_vm7 }
 0xabe   : > { %v3548_v47 = vsel %vm3546_vm10, 1.0, %v12860_v21  ;;  %vm3543_vm11 = vmand %vm3541_vm6, %vm13505_vm15  ;;  %vm14843_vm6 = vcmask 523264  }
 0xabf   : > { %v3552_v49 = vsel %vm1851_vm0, %v3548_v47, 0.0  ;;  %vm3545_vm12 = vmor %vm3539_vm9, %vm3543_vm11 }
 0xac0   : > { %3553 = vadd.xlane.f32.xlu0 %v3552_v49  ;;  %v3547_v20 = vsel %vm3545_vm12, 1.0, %v12860_v21  ;;  %v3971_v49 = vld [vmem:[%s14940_s19 + $0x38] sm:$0xff] }
 0xac1   : > { %v3549_v53 = vsel %vm1851_vm0, %v3547_v20, 0.0  ;;  %11614 = vmatprep.subr.mxu1 %v3971_v49  ;;  %v3970_v20 = vld [vmem:[%s14940_s19 + $0x30] sm:$0xff] }
 0xac2   : > { %3550 = vadd.xlane.f32.xlu1 %v3549_v53  ;;  %v3969_v53 = vld [vmem:[%s14940_s19 + $0x28] sm:$0xff] }
 0xad3   : > { %3672 = vrot.lane.b32.xlu1 %v13372_v29, %s14831_s26  ;;  %v10967_v29 = vld [vmem:[%s14936_s22] ss:$0 sm:$0xff]  ;;  %s14938_s22 = sld [smem:[#allocation32_spill]] }
 0xad6   : > { %3674 = vrot.lane.b32.xlu0 %v13370_v28, %s14831_s26  ;;  %s14937_s26 = sld [smem:[#allocation34_spill]] }
 0xad9   : > { %v10968_v19 = vld [vmem:[%s14938_s22] ss:$0 sm:$0xff]  ;;  %s14942_s22 = sld [smem:[#allocation37_spill]] }
 0xadc   : > { %v3821_v4 = vld [vmem:[%s14937_s26 + $0x18] sm:$0xff]  ;;  %v3820_v5 = vld [vmem:[%s14937_s26 + $0x10] sm:$0xff]  ;;  %v3819_v6 = vld [vmem:[%s14937_s26 + $0x8] sm:$0xff] }
 0xadd   : > { %11603 = vmatprep.subr.mxu0 %v3821_v4  ;;  %v3818_v7 = vld [vmem:[%s14937_s26] sm:$0xff] }
 0xade   : > { %11604 = vmatpush3.msra.mxu0 %v3821_v4 }
 0xadf   : > { %11605 = vmatprep.subr.mxu0 %v3820_v5 }
 0xae0   : > { %11606 = vmatpush3.msra.mxu0 %v3820_v5 }
 0xae1   : > { %11607 = vmatprep.subr.mxu0 %v3819_v6 }
 0xae2   : > { %11608 = vmatpush3.msra.mxu0 %v3819_v6 }
 0xae3   : > { %11609 = vmatprep.subr.mxu0 %v3818_v7 }
 0xae4   : > { %11610 = vmatpush3.msra.mxu0 %v3818_v7 }
 0xb49   : > { %v3554_v41 = vpop.xlane.xlu0 %3553 }
 0xb4a   : > { %vm3556_vm4 = vcmp.lt.f32.partialorder %v3554_v41, 15.0  ;;  %v3966_v41 = vld [vmem:[%s14940_s19 + $0x10] sm:$0xff] }
 0xb4b   : > { %v3551_v9 = vpop.xlane.xlu1 %3550 }
 0xb4c   : > { %vm3555_vm3 = vcmp.lt.f32.partialorder %v3551_v9, 15.0  ;;  %v3967_v9 = vld [vmem:[%s14940_s19 + $0x18] sm:$0xff] }
 0xb4d   : > { %v3675_v54 = vpop.permute.xlu0 %3674 }
 0xb4f   : > { %v3673_v42 = vpop.permute.xlu1 %3672 }
 0xb55   : > { %v11597_v8 = vpop.f32.mrf.mxu0 }
 0xb56   : > { %v3679_v48 = vsel %vm3556_vm4, %v11597_v8, %v3675_v54  ;;  %v3965_v8 = vld [vmem:[%s14940_s19 + $0x8] sm:$0xff] }
 0xb57   : > { %v3659_v45 = vpop.f32.mrf.mxu0 }
 0xb58   : > { %v3678_v46 = vsel %vm3555_vm3, %v3659_v45, %v3673_v42  ;;  %v3964_v42 = vld [vmem:[%s14940_s19] sm:$0xff] }
 0xb59   : > { %11600 = vmatprep.mubr.msk.f32.mxu1 %vm2134_vm2, %v3678_v46  ;;  %v10970_v45 = vld [vmem:[%s14941_s16] ss:$0 sm:$0xff]  ;;  %s14943_s16 = sld [smem:[#allocation41_spill]] }
 0xb5a   : > { %11601 = vmatmul.mubr.msk.f32.vlgmr.msra.gmra.mxu1 %vm2134_vm2, %v3679_v48 }
 0xb5b   : > { %11615 = vmatpush3.msra.mxu1 %v3971_v49 }
 0xb5c   : > { %11616 = vmatprep.subr.mxu1 %v3970_v20 }
 0xb5d   : > { %11617 = vmatpush3.msra.mxu1 %v3970_v20 }
 0xb5e   : > { %11618 = vmatprep.subr.mxu1 %v3969_v53 }
 0xb5f   : > { %11619 = vmatpush3.msra.mxu1 %v3969_v53 }
 0xb60   : > { %11620 = vmatprep.subr.mxu1 %v3968_v40 }
 0xb61   : > { %11621 = vmatpush3.msra.mxu1 %v3968_v40 }
 0xb62   : > { %11622 = vmatprep.subr.mxu1 %v3967_v9 }
 0xb63   : > { %11623 = vmatpush3.msra.mxu1 %v3967_v9 }
 0xb64   : > { %11624 = vmatprep.subr.mxu1 %v3966_v41 }
 0xb65   : > { %11625 = vmatpush3.msra.mxu1 %v3966_v41 }
 0xb66   : > { %11626 = vmatprep.subr.mxu1 %v3965_v8 }
 0xb67   : > { %11627 = vmatpush3.msra.mxu1 %v3965_v8 }
 0xb68   : > { %11628 = vmatprep.subr.mxu1 %v3964_v42 }
 0xb69   : > { %11629 = vmatpush3.msra.mxu1 %v3964_v42 }
 0xc1a   : > { %v11602_v28 = vpop.f32.mrf.mxu1 }
 0xc1b   : > { %v3762_v51 = vadd.f32 %v11602_v28, %v3351_v33 }
 0xc1c   : > { %v3752_v52 = vpop.f32.mrf.mxu1 }
 0xc1d   : > { %v3770_v55 = vadd.f32 %v10967_v29, %v3762_v51  ;;  %v3761_v56 = vadd.f32 %v3752_v52, %v3350_v35 }
 0xc1f   : > { %v3769_v59 = vadd.f32 %v10967_v29, %v3761_v56  ;;  %v3772_v60 = vadd.f32 %v3770_v55, %v13317_v13 }
 0xc21   : > { %v3778_v61 = vsel %vm14855_vm1, %v3772_v60, 0.0  ;;  %v3771_v38 = vadd.f32 %v3769_v59, %v13315_v12 }
 0xc22   : > { %3779 = vadd.xlane.f32.xlu0 %v3778_v61 }
 0xc23   : > { %v3775_v62 = vsel %vm14855_vm1, %v3771_v38, 0.0 }
 0xc24   : > { %3776 = vadd.xlane.f32.xlu1 %v3775_v62 }
 0xcab   : > { %v3780_v57 = vpop.xlane.xlu0 %3779 }
 0xcac   : > { %v3783_v63 = vmul.f32 0.03125, %v3780_v57 }
 0xcad   : > { %v3777_v44 = vpop.xlane.xlu1 %3776 }
 0xcae   : > { %v3785_v22 = vsub.f32 %v3772_v60, %v3783_v63  ;;  %v3782_v0 = vmul.f32 0.03125, %v3777_v44 }
 0xcb0   : > { %v3784_v1 = vsub.f32 %v3771_v38, %v3782_v0  ;;  %v3787_v2 = vmul.f32 %v3785_v22, %v3785_v22 }
 0xcb2   : > { %v3791_v13 = vsel %vm14855_vm1, %v3787_v2, 0.0  ;;  %v3786_v3 = vmul.f32 %v3784_v1, %v3784_v1 }
 0xcb3   : > { %3792 = vadd.xlane.f32.xlu0 %v3791_v13 }
 0xcb4   : > { %v3788_v12 = vsel %vm14855_vm1, %v3786_v3, 0.0 }
 0xcb5   : > { %3789 = vadd.xlane.f32.xlu1 %v3788_v12 }
 0xd3c   : > { %v3793_v15 = vpop.xlane.xlu0 %3792 }
 0xd3d   : > { %v3795_v18 = vmul.f32 0.03125, %v3793_v15 }
 0xd3e   : > { %v3790_v23 = vpop.xlane.xlu1 %3789 }
 0xd3f   : > { %v3797_v24 = vadd.f32 1e-05, %v3795_v18  ;;  %v3794_v25 = vmul.f32 0.03125, %v3790_v23 }
 0xd41   : > { %12311 = vrsqrt.f32 %v3797_v24  ;;  %v3796_v27 = vadd.f32 1e-05, %v3794_v25 }
 0xd43   : > { %12313 = vrsqrt.f32 %v3796_v27 }
 0xd4e   : > { %v12312_v17 = vpop.eup %12311 }
 0xd4f   : > { %v3801_v32 = vmul.f32 %v12312_v17, %v3785_v22 }
 0xd50   : > { %v12314_v33 = vpop.eup %12313 }
 0xd51   : > { %v3800_v34 = vmul.f32 %v12314_v33, %v3784_v1  ;;  %v3809_v35 = vmul.f32 %v10968_v19, %v3801_v32 }
 0xd53   : > { %v3808_v50 = vmul.f32 %v10968_v19, %v3800_v34  ;;  %v13680_v47 = vadd.f32 %v10969_v36, %v3809_v35 }
 0xd55   : > { %v13678_v39 = vadd.f32 %v10969_v36, %v3808_v50 }
 0xd57   : > { %11611 = vmatprep.mubr.msk.f32.mxu0 %vm14855_vm1, %v13678_v39 }
 0xd58   : > { %11612 = vmatmul.mubr.msk.f32.vlgmr.msra.gmra.mxu0 %vm14855_vm1, %v13680_v47 }
 0xe18   : > { %v11613_v54 = vpop.f32.mrf.mxu0 }
 0xe19   : > { %v3907_v46 = vadd.f32 %v11613_v54, %v10970_v45 }
 0xe1a   : > { %v3901_v48 = vpop.f32.mrf.mxu0 }
 0xe1b   : > { %v3911_v29 = vmul.f32 0.70710677, %v3907_v46  ;;  %v3902_v28 = vadd.f32 %v10970_v45, %v3901_v48  ;;  %v3959_v54 = vmul.f32 0.5, %v3907_v46 }
 0xe1d   : > { %v3913_v51 = vand.u32 2147483647, %v3911_v29  ;;  %v3910_v52 = vmul.f32 0.70710677, %v3902_v28  ;;  %vm3953_vm13 = vcmp.lt.f32.partialorder %v3911_v29, 0.0  ;;  %v3958_v42 = vmul.f32 0.5, %v3902_v28 }
 0xe1f   : > { %v3915_v55 = vmul.f32 0.3275911, %v3913_v51  ;;  %v3912_v56 = vand.u32 2147483647, %v3910_v52  ;;  %v3941_v38 = vmul.f32 %v3913_v51, %v3913_v51  ;;  %vm3952_vm14 = vcmp.lt.f32.partialorder %v3910_v52, 0.0 }
 0xe21   : > { %v3917_v59 = vadd.f32 1.0, %v3915_v55  ;;  %v3914_v60 = vmul.f32 0.3275911, %v3912_v56  ;;  %v3940_v62 = vmul.f32 %v3912_v56, %v3912_v56  ;;  %v3943_v57 = vsub.f32 0.0, %v3941_v38  ;;  %v10973_v55 = vld [vmem:[%s14942_s22] ss:$0 sm:$0xff] }
 0xe22   : > { %s14944_s22 = sld [smem:[#allocation38_spill]] }
 0xe23   : > { %12315 = vrcp.f32 %v3917_v59  ;;  %v3916_v61 = vadd.f32 1.0, %v3914_v60  ;;  %v3942_v44 = vsub.f32 0.0, %v3940_v62  ;;  %v3946_v0 = vmul.f32 1.442695, %v3943_v57 }
 0xe25   : > { %12317 = vrcp.f32 %v3916_v61  ;;  %v3944_v3 = vmul.f32 1.442695, %v3942_v44 }
 0xe26   : > { %12319 = vpow2.f32 %v3946_v0 }
 0xe27   : > { %12321 = vpow2.f32 %v3944_v3  ;;  %v4108_v3 = vld [vmem:[%s14943_s16 + $0x8] sm:$0xff] }
 0xe30   : > { %v12316_v63 = vpop.eup %12315 }
 0xe31   : > { %v3923_v22 = vmul.f32 1.0614054, %v12316_v63 }
 0xe32   : > { %v12318_v1 = vpop.eup %12317 }
 0xe33   : > { %v3925_v2 = vadd.f32 -1.4531521, %v3923_v22  ;;  %v3922_v13 = vmul.f32 1.0614054, %v12318_v1  ;;  %v12320_v32 = vpop.eup %12319 }
 0xe34   : > { %v12322_v36 = vpop.eup %12321 }
 0xe35   : > { %v3927_v12 = vmul.f32 %v12316_v63, %v3925_v2  ;;  %v3924_v4 = vadd.f32 -1.4531521, %v3922_v13  ;;  %v4110_v2 = vld [vmem:[%s14943_s16 + $0x18] sm:$0xff]  ;;  %v4109_v13 = vld [vmem:[%s14943_s16 + $0x10] sm:$0xff] }
 0xe36   : > { %11633 = vmatprep.subr.mxu0 %v4110_v2 }
 0xe37   : > { %v3929_v5 = vadd.f32 1.4214138, %v3927_v12  ;;  %v3926_v6 = vmul.f32 %v12318_v1, %v3924_v4  ;;  %11634 = vmatpush3.msra.mxu0 %v4110_v2  ;;  %v4107_v12 = vld [vmem:[%s14943_s16] sm:$0xff] }
 0xe38   : > { %11635 = vmatprep.subr.mxu0 %v4109_v13 }
 0xe39   : > { %v3931_v7 = vmul.f32 %v12316_v63, %v3929_v5  ;;  %v3928_v15 = vadd.f32 1.4214138, %v3926_v6  ;;  %11636 = vmatpush3.msra.mxu0 %v4109_v13 }
 0xe3a   : > { %11637 = vmatprep.subr.mxu0 %v4108_v3 }
 0xe3b   : > { %v3933_v18 = vadd.f32 -0.28449672, %v3931_v7  ;;  %v3930_v23 = vmul.f32 %v12318_v1, %v3928_v15  ;;  %11638 = vmatpush3.msra.mxu0 %v4108_v3 }
 0xe3c   : > { %11639 = vmatprep.subr.mxu0 %v4107_v12 }
 0xe3d   : > { %v3935_v24 = vmul.f32 %v12316_v63, %v3933_v18  ;;  %v3932_v25 = vadd.f32 -0.28449672, %v3930_v23  ;;  %11640 = vmatpush3.msra.mxu0 %v4107_v12 }
 0xe3f   : > { %v3937_v27 = vadd.f32 0.2548296, %v3935_v24  ;;  %v3934_v17 = vmul.f32 %v12318_v1, %v3932_v25  ;;  %v10976_v24 = vld [vmem:[%s14944_s22] ss:$0 sm:$0xff]  ;;  %s14949_s22 = sld [smem:[#allocation43_spill]] }
 0xe41   : > { %v3939_v19 = vmul.f32 %v12316_v63, %v3937_v27  ;;  %v3936_v33 = vadd.f32 0.2548296, %v3934_v17 }
 0xe43   : > { %v3949_v34 = vmul.f32 %v12320_v32, %v3939_v19  ;;  %v3938_v35 = vmul.f32 %v12318_v1, %v3936_v33  ;;  %v10977_v32 = vld [vmem:[%s14945_s1] ss:$0 sm:$0xff]  ;;  %s14948_s1 = smov 56  }
 0xe45   : > { %v3951_v50 = vsub.f32 1.0, %v3949_v34  ;;  %v3948_v49 = vmul.f32 %v12322_v36, %v3938_v35  ;;  %v10978_v36 = vld [vmem:[%s14946_s11] ss:$0 sm:$0xff]  ;;  %s14947_s11 = sld [smem:[#allocation40_spill]] }
 0xe47   : > { %v3955_v20 = vsub.f32 0.0, %v3951_v50  ;;  %v3950_v53 = vsub.f32 1.0, %v3948_v49 }
 0xe49   : > { %v3957_v40 = vsel %vm3953_vm13, %v3955_v20, %v3951_v50  ;;  %v3954_v9 = vsub.f32 0.0, %v3950_v53 }
 0xe4a   : > { %v3961_v41 = vadd.f32 1.0, %v3957_v40 }
 0xe4b   : > { %v3956_v8 = vsel %vm3952_vm14, %v3954_v9, %v3950_v53 }
 0xe4c   : > { %v3960_v45 = vadd.f32 1.0, %v3956_v8  ;;  %v3963_v51 = vmul.f32 %v3961_v41, %v3959_v54 }
 0xe4e   : > { %v3962_v48 = vmul.f32 %v3960_v45, %v3958_v42 }
 0xe50   : > { %11630 = vmatprep.mubr.msk.f32.mxu1 %vm14843_vm6, %v3962_v48  ;;  %v13752_v48 = vld [vmem:[%s14947_s11 + $0x8] sm:$0xff] }
 0xe51   : > { %11631 = vmatmul.mubr.msk.f32.vlgmr.msra.gmra.mxu1 %vm14843_vm6, %v3963_v51  ;;  %vm4290_vm7 = vcmp.gt.f32.partialorder %v13752_v48, 0.0 }
 0xf11   : > { %v11632_v56 = vpop.f32.mrf.mxu1 }
 0xf12   : > { %v4058_v59 = vadd.f32 %v11632_v56, %v10973_v55 }
 0xf13   : > { %v4052_v29 = vpop.f32.mrf.mxu1 }
 0xf14   : > { %v4053_v60 = vadd.f32 %v10973_v55, %v4052_v29  ;;  %v4062_v61 = vadd.f32 %v4058_v59, %v13680_v47 }
 0xf16   : > { %v4068_v52 = vsel %vm14855_vm1, %v4062_v61, 0.0  ;;  %v4061_v28 = vadd.f32 %v4053_v60, %v13678_v39  ;;  %v13758_v60 = vld [vmem:[%s14947_s11] sm:$0xff]  ;;  %s1839_s11 = scalar_lea.vmem %s14961_s10, %s13301_s15  ;;  %s14965_s10 = sld [smem:[#allocation58_spill]] }
 0xf17   : > { %4069 = vadd.xlane.f32.xlu0 %v4068_v52  ;;  %vm4289_vm9 = vcmp.gt.f32.partialorder %v13758_v60, 0.0 }
 0xf18   : > { %v4065_v46 = vsel %vm14855_vm1, %v4061_v28, 0.0 }
 0xf19   : > { %4066 = vadd.xlane.f32.xlu1 %v4065_v46 }
 0xfa0   : > { %v4070_v38 = vpop.xlane.xlu0 %4069 }
 0xfa1   : > { %v4072_v62 = vmul.f32 0.03125, %v4070_v38 }
 0xfa2   : > { %v4067_v57 = vpop.xlane.xlu1 %4066 }
 0xfa3   : > { %v4074_v63 = vsub.f32 %v4062_v61, %v4072_v62  ;;  %v4071_v44 = vmul.f32 0.03125, %v4067_v57 }
 0xfa5   : > { %v4073_v22 = vsub.f32 %v4061_v28, %v4071_v44  ;;  %v4076_v0 = vmul.f32 %v4074_v63, %v4074_v63 }
 0xfa7   : > { %v4080_v47 = vsel %vm14855_vm1, %v4076_v0, 0.0  ;;  %v4075_v1 = vmul.f32 %v4073_v22, %v4073_v22 }
 0xfa8   : > { %4081 = vadd.xlane.f32.xlu0 %v4080_v47 }
 0xfa9   : > { %v4077_v39 = vsel %vm14855_vm1, %v4075_v1, 0.0 }
 0xfaa   : > { %4078 = vadd.xlane.f32.xlu1 %v4077_v39 }
0x1031   : > { %v4082_v4 = vpop.xlane.xlu0 %4081 }
0x1032   : > { %v4084_v5 = vmul.f32 0.03125, %v4082_v4 }
0x1033   : > { %v4079_v6 = vpop.xlane.xlu1 %4078 }
0x1034   : > { %v4086_v7 = vadd.f32 1e-05, %v4084_v5  ;;  %v4083_v15 = vmul.f32 0.03125, %v4079_v6 }
0x1036   : > { %12323 = vrsqrt.f32 %v4086_v7  ;;  %v4085_v18 = vadd.f32 1e-05, %v4083_v15 }
0x1038   : > { %12325 = vrsqrt.f32 %v4085_v18 }
0x1043   : > { %v12324_v23 = vpop.eup %12323 }
0x1044   : > { %v4090_v25 = vmul.f32 %v12324_v23, %v4074_v63 }
0x1045   : > { %v12326_v27 = vpop.eup %12325 }
0x1046   : > { %v4089_v17 = vmul.f32 %v12326_v27, %v4073_v22  ;;  %v4098_v19 = vmul.f32 %v10976_v24, %v4090_v25 }
0x1048   : > { %v4097_v33 = vmul.f32 %v10976_v24, %v4089_v17  ;;  %v13712_v35 = vadd.f32 %v10977_v32, %v4098_v19 }
0x104a   : > { %v13710_v34 = vadd.f32 %v10977_v32, %v4097_v33 }
0x104c   : > { %11641 = vmatprep.mubr.msk.f32.mxu0 %vm14855_vm1, %v13710_v34 }
0x104d   : > { %11642 = vmatmul.mubr.msk.f32.vlgmr.msra.gmra.mxu0 %vm14855_vm1, %v13712_v35 }
0x104e   : > { %11648 = vmatprep.mubr.msk.f32.mxu0 %vm1851_vm0, %v12855_v14 }
0x110d   : > { %v11643_v50 = vpop.f32.mrf.mxu0 }
0x110e   : > { %v13721_v49 = vadd.f32 %v11643_v50, %v10978_v36 }
0x110f   : > { %v4197_v20 = vpop.f32.mrf.mxu0 }
0x1110   : > { %v13723_v53 = vadd.f32 %v10978_v36, %v4197_v20  ;;  %4293 = vrot.lane.b32.xlu1 %v13721_v49, %s14848_s0 }
0x1112   : > { %4291 = vrot.lane.b32.xlu0 %v13723_v53, %s14848_s0  ;;  %11655 = vmatprep.mubr.msk.f32.mxu1 %vm2134_vm2, %v13723_v53  ;;  %s14953_s0 = smov 72  }
0x1114   : > { %4609 = vrot.lane.b32.xlu1 %v13721_v49, %s14846_s28 }
0x1116   : > { %4603 = vrot.lane.b32.xlu0 %v13723_v53, %s14844_s23 }
0x1118   : > { %4607 = vrot.lane.b32.xlu1 %v13723_v53, %s14846_s28  ;;  %s14952_s28 = smov 48  }
0x111c   : > { %4605 = vrot.lane.b32.xlu1 %v13721_v49, %s14844_s23 }
0x1182   : > { %v4294_v40 = vpop.permute.xlu1 %4293 }
0x1183   : > { %11651 = vmatprep.subr.msk.mxu1 %vm2134_vm2, %v4294_v40 }
0x1184   : > { %11652 = vmatpush3.xpose.msk.msra.mxu1 %vm2134_vm2, %v4294_v40  ;;  %v4292_v9 = vpop.permute.xlu0 %4291 }
0x1185   : > { %11653 = vmatprep.subr.msk.mxu1 %vm2134_vm2, %v4292_v9 }
0x1186   : > { %v4610_v41 = vpop.permute.xlu1 %4609 }
0x1188   : > { %11654 = vmatpush3.xpose.msk.msra.mxu1 %vm2134_vm2, %v4292_v9  ;;  %v4604_v8 = vpop.permute.xlu0 %4603 }
0x1189   : > { %11672 = vmatprep.subr.msk.mxu1 %vm2134_vm2, %v4610_v41 }
0x118a   : > { %v4608_v42 = vpop.permute.xlu1 %4607 }
0x118b   : > { %11656 = vmatmul.mubr.msk.f32.vlgmr.msra.gmra.mxu1 %vm2134_vm2, %v13721_v49 }
0x118c   : > { %11673 = vmatpush3.xpose.msk.msra.mxu1 %vm2134_vm2, %v4610_v41  ;;  %11676 = vmatprep.mubr.msk.f32.mxu1 %vm2134_vm2, %v4604_v8 }
0x118d   : > { %11674 = vmatprep.subr.msk.mxu1 %vm2134_vm2, %v4608_v42 }
0x118e   : > { %v4606_v45 = vpop.permute.xlu1 %4605 }
0x1190   : > { %11675 = vmatpush3.xpose.msk.msra.mxu1 %vm2134_vm2, %v4608_v42 }
0x1193   : > { %11677 = vmatmul.mubr.msk.f32.vlgmr.msra.gmra.mxu1 %vm2134_vm2, %v4606_v45 }
0x124b   : > { %v11657_v54 = vpop.f32.mrf.mxu1 }
0x124c   : > { %v4493_v51 = vmul.f32 0.35355338, %v11657_v54  ;;  %v4387_v29 = vmul.f32 %v11657_v54, %v13752_v48  ;;  %v4379_v52 = vsel %vm4290_vm7, %v11657_v54, -1e+30 }
0x124d   : > { %v4369_v55 = vpop.f32.mrf.mxu1  ;;  %v4383_v62 = vsel %vm1851_vm0, %v4379_v52, -inf }
0x124e   : > { %v4497_v56 = vsel %vm1851_vm0, %v4493_v51, -inf  ;;  %v4492_v59 = vmul.f32 0.35355338, %v4369_v55  ;;  %v4391_v28 = vsel %vm1851_vm0, %v4387_v29, 0.0  ;;  %v4386_v46 = vmul.f32 %v4369_v55, %v13758_v60 }
0x124f   : > { %4498 = vmax.xlane.f32.xlu1 %v4497_v56  ;;  %v4378_v57 = vsel %vm4289_vm9, %v4369_v55, -1e+30 }
0x1250   : > { %v4494_v61 = vsel %vm1851_vm0, %v4492_v59, -inf  ;;  %v4388_v63 = vsel %vm1851_vm0, %v4386_v46, 0.0  ;;  %v4380_v0 = vsel %vm1851_vm0, %v4378_v57, -inf }
0x1251   : > { %4495 = vmax.xlane.f32.xlu0 %v4494_v61 }
0x1253   : > { %4392 = vadd.xlane.f32.xlu1 %v4391_v28  ;;  %v11678_v38 = vpop.f32.mrf.mxu1 }
0x1254   : > { %v4703_v44 = vmul.f32 %v11678_v38, %v13752_v48  ;;  %v4695_v47 = vsel %vm4290_vm7, %v11678_v38, -1e+30  ;;  %v4809_v13 = vmul.f32 0.35355338, %v11678_v38 }
0x1255   : > { %4384 = vmax.xlane.f32.xlu0 %v4383_v62  ;;  %v4685_v22 = vpop.f32.mrf.mxu1  ;;  %v4699_v2 = vsel %vm1851_vm0, %v4695_v47, -inf }
0x1256   : > { %v4707_v1 = vsel %vm1851_vm0, %v4703_v44, 0.0  ;;  %v4702_v39 = vmul.f32 %v4685_v22, %v13758_v60  ;;  %v4813_v12 = vsel %vm1851_vm0, %v4809_v13, -inf  ;;  %v4694_v4 = vsel %vm4289_vm9, %v4685_v22, -1e+30 }
0x1257   : > { %4389 = vadd.xlane.f32.xlu1 %v4388_v63  ;;  %v4696_v5 = vsel %vm1851_vm0, %v4694_v4, -inf  ;;  %v4808_v6 = vmul.f32 0.35355338, %v4685_v22 }
0x1258   : > { %v4704_v3 = vsel %vm1851_vm0, %v4702_v39, 0.0 }
0x1259   : > { %4381 = vmax.xlane.f32.xlu0 %v4380_v0  ;;  %v4810_v7 = vsel %vm1851_vm0, %v4808_v6, -inf }
0x125b   : > { %4708 = vadd.xlane.f32.xlu1 %v4707_v1 }
0x125d   : > { %4700 = vmax.xlane.f32.xlu0 %v4699_v2 }
0x125f   : > { %4705 = vadd.xlane.f32.xlu1 %v4704_v3 }
0x1261   : > { %4814 = vmax.xlane.f32.xlu0 %v4813_v12 }
0x1265   : > { %4697 = vmax.xlane.f32.xlu0 %v4696_v5 }
0x1269   : > { %4811 = vmax.xlane.f32.xlu0 %v4810_v7 }
0x12d8   : > { %v4499_v15 = vpop.xlane.xlu1 %4498 }
0x12d9   : > { %v4501_v18 = vsub.f32 %v4493_v51, %v4499_v15 }
0x12da   : > { %v4496_v23 = vpop.xlane.xlu0 %4495 }
0x12db   : > { %v4504_v24 = vmul.f32 1.442695, %v4501_v18  ;;  %v4500_v25 = vsub.f32 %v4492_v59, %v4496_v23 }
0x12dc   : > { %v4393_v29 = vpop.xlane.xlu1 %4392 }
0x12dd   : > { %12327 = vpow2.f32 %v4504_v24  ;;  %v4502_v27 = vmul.f32 1.442695, %v4500_v25  ;;  %v4395_v38 = vmul.f32 0.0625, %v4393_v29 }
0x12de   : > { %v4385_v17 = vpop.xlane.xlu0 %4384 }
0x12df   : > { %12329 = vpow2.f32 %v4502_v27  ;;  %v13804_v63 = vsub.f32 %v4385_v17, %v4395_v38 }
0x12e0   : > { %v4390_v61 = vpop.xlane.xlu1 %4389 }
0x12e1   : > { %v4394_v57 = vmul.f32 0.0625, %v4390_v61  ;;  %v4399_v47 = vmul.f32 %v13804_v63, %v13448_v37 }
0x12e2   : > { %v4382_v50 = vpop.xlane.xlu0 %4381 }
0x12e3   : > { %v13806_v22 = vsub.f32 %v4382_v50, %v4394_v57 }
0x12e4   : > { %v4709_v52 = vpop.xlane.xlu1 %4708 }
0x12e5   : > { %v4711_v1 = vmul.f32 0.0625, %v4709_v52  ;;  %v4398_v39 = vmul.f32 %v13806_v22, %v13457_v43 }
0x12e6   : > { %v4701_v20 = vpop.xlane.xlu0 %4700 }
0x12e8   : > { %v4706_v28 = vpop.xlane.xlu1 %4705 }
0x12e9   : > { %v4710_v3 = vmul.f32 0.0625, %v4706_v28 }
0x12ea   : > { %v13783_v19 = vpop.eup %12327  ;;  %v4815_v40 = vpop.xlane.xlu0 %4814 }
0x12eb   : > { %v4509_v32 = vsel %vm1851_vm0, %v13783_v19, 0.0  ;;  %v4817_v8 = vsub.f32 %v4809_v13, %v4815_v40  ;;  %v4713_v13 = vsub.f32 %v4701_v20, %v4711_v1 }
0x12ec   : > { %v12330_v33 = vpop.eup %12329  ;;  %4510 = vadd.xlane.f32.xlu0 %v4509_v32 }
0x12ed   : > { %v4506_v36 = vsel %vm1851_vm0, %v12330_v33, 0.0  ;;  %v4820_v45 = vmul.f32 1.442695, %v4817_v8  ;;  %v4715_v7 = vmul.f32 %v4713_v13, %v13448_v37 }
0x12ee   : > { %4507 = vadd.xlane.f32.xlu1 %v4506_v36  ;;  %v4698_v9 = vpop.xlane.xlu0 %4697 }
0x12ef   : > { %12331 = vpow2.f32 %v4820_v45  ;;  %v4712_v4 = vsub.f32 %v4698_v9, %v4710_v3 }
0x12f1   : > { %v4714_v15 = vmul.f32 %v4712_v4, %v13457_v43 }
0x12f2   : > { %v4812_v41 = vpop.xlane.xlu0 %4811 }
0x12f3   : > { %v4816_v42 = vsub.f32 %v4808_v6, %v4812_v41 }
0x12f5   : > { %v4818_v54 = vmul.f32 1.442695, %v4816_v42 }
0x12f7   : > { %12333 = vpow2.f32 %v4818_v54 }
0x12fc   : > { %v13792_v51 = vpop.eup %12331 }
0x12fd   : > { %v4825_v56 = vsel %vm1851_vm0, %v13792_v51, 0.0 }
0x12ff   : > { %4210 = vrot.lane.b32.xlu1 %v13721_v49, %s14841_s2 }
0x1302   : > { %4208 = vrot.lane.b32.xlu0 %v13723_v53, %s14841_s2  ;;  %s14950_s2 = smov 80  }
0x1304   : > { %v13794_v55 = vpop.eup %12333 }
0x1305   : > { %v4822_v59 = vsel %vm1851_vm0, %v13794_v55, 0.0 }
0x1321   : > { %4826 = vadd.xlane.f32.xlu0 %v4825_v56 }
0x1323   : > { %4823 = vadd.xlane.f32.xlu1 %v4822_v59 }
0x1334   : > { %4834 = vrot.lane.b32.xlu1 %v13721_v49, %s14948_s1 }
0x1337   : > { %4832 = vrot.lane.b32.xlu0 %v13723_v53, %s14948_s1 }
0x1375   : > { %v4511_v46 = vpop.xlane.xlu0 %4510 }
0x1376   : > { %12335 = vrcp.f32 %v4511_v46 }
0x1377   : > { %v4508_v62 = vpop.xlane.xlu1 %4507 }
0x1378   : > { %12337 = vrcp.f32 %v4508_v62 }
0x1379   : > { %v4209_v0 = vpop.permute.xlu0 %4208 }
0x137b   : > { %v4211_v44 = vpop.permute.xlu1 %4210 }
0x137c   : > { %11644 = vmatprep.subr.mxu0 %v4211_v44 }
0x137d   : > { %11645 = vmatpush3.msra.mxu0 %v4211_v44 }
0x137e   : > { %11646 = vmatprep.subr.mxu0 %v4209_v0 }
0x137f   : > { %11647 = vmatpush3.msra.mxu0 %v4209_v0 }
0x1380   : > { %11649 = vmatmul.mubr.msk.f32.vlgmr.msra.gmra.mxu0 %vm1851_vm0, %v12855_v14  ;;  %11658 = vmatprep.subr.mxu0 %v12860_v21 }
0x1381   : > { %11659 = vmatpush3.msra.mxu0 %v4399_v47  ;;  %11662 = vmatprep.mubr.msk.f32.mxu0 %vm14856_vm5, %v12860_v21 }
0x1382   : > { %11660 = vmatprep.subr.mxu0 %v12860_v21 }
0x1383   : > { %11661 = vmatpush3.msra.mxu0 %v4398_v39  ;;  %v12336_v2 = vpop.eup %12335 }
0x1384   : > { %11663 = vmatmul.mubr.msk.f32.vlgmr.msra.gmra.mxu0 %vm1851_vm0, %v12864_v58  ;;  %11665 = vmatprep.subr.mxu0 %v4211_v44  ;;  %v4515_v6 = vmul.f32 %v12336_v2, %v13783_v19 }
0x1385   : > { %v12338_v12 = vpop.eup %12337  ;;  %11666 = vmatpush3.msra.mxu0 %v4211_v44 }
0x1386   : > { %11667 = vmatprep.subr.mxu0 %v4209_v0  ;;  %v4513_v5 = vmul.f32 %v12338_v12, %v12330_v33  ;;  %v4113_v33 = vld [vmem:[%s14949_s22 + $0x8] sm:$0xff] }
0x1387   : > { %11668 = vmatpush3.msra.mxu0 %v4209_v0  ;;  %11693 = vmatprep.subr.mxu1 %v4113_v33 }
0x1388   : > { %11669 = vmatprep.mubr.msk.f32.mxu0 %vm1851_vm0, %v4513_v5  ;;  %11679 = vmatprep.subr.mxu0 %v12860_v21 }
0x1389   : > { %11670 = vmatmul.mubr.msk.f32.vlgmr.msra.gmra.mxu0 %vm1851_vm0, %v4515_v6  ;;  %11694 = vmatpush3.msra.mxu1 %v4113_v33 }
0x138a   : > { %11680 = vmatpush3.msra.mxu0 %v4715_v7  ;;  %11683 = vmatprep.mubr.msk.f32.mxu0 %vm14856_vm5, %v12860_v21 }
0x138b   : > { %11681 = vmatprep.subr.mxu0 %v12860_v21 }
0x138c   : > { %11682 = vmatpush3.msra.mxu0 %v4714_v15 }
0x138d   : > { %11684 = vmatmul.mubr.msk.f32.vlgmr.msra.gmra.mxu0 %vm1851_vm0, %v12864_v58 }
0x13aa   : > { %v4827_v18 = vpop.xlane.xlu0 %4826 }
0x13ab   : > { %12339 = vrcp.f32 %v4827_v18 }
0x13ac   : > { %v4824_v23 = vpop.xlane.xlu1 %4823 }
0x13ad   : > { %12341 = vrcp.f32 %v4824_v23 }
0x13ae   : > { %v4833_v25 = vpop.permute.xlu0 %4832 }
0x13b0   : > { %v4835_v24 = vpop.permute.xlu1 %4834 }
0x13b1   : > { %11686 = vmatprep.subr.mxu0 %v4835_v24 }
0x13b2   : > { %11687 = vmatpush3.msra.mxu0 %v4835_v24 }
0x13b3   : > { %11688 = vmatprep.subr.mxu0 %v4833_v25 }
0x13b4   : > { %11689 = vmatpush3.msra.mxu0 %v4833_v25 }
0x13b8   : > { %v12340_v27 = vpop.eup %12339 }
0x13b9   : > { %v4831_v32 = vmul.f32 %v12340_v27, %v13792_v51 }
0x13ba   : > { %v12342_v17 = vpop.eup %12341 }
0x13bb   : > { %v4829_v19 = vmul.f32 %v12342_v17, %v13794_v55 }
0x13bd   : > { %11690 = vmatprep.mubr.msk.f32.mxu0 %vm1851_vm0, %v4829_v19  ;;  %v4112_v19 = vld [vmem:[%s14949_s22] sm:$0xff] }
0x13be   : > { %11691 = vmatmul.mubr.msk.f32.vlgmr.msra.gmra.mxu0 %vm1851_vm0, %v4831_v32  ;;  %11698 = vmatprep.subr.mxu0 %v4112_v19 }
0x13bf   : > { %11699 = vmatpush3.msra.mxu0 %v4112_v19 }
0x13c0   : > { %11710 = vmatprep.subr.mxu0 %v12860_v21 }
0x1440   : > { %v13836_v36 = vpop.f32.mrf.mxu0 }
0x1441   : > { %4927 = vrot.lane.b32.xlu0 %v13836_v36, %s14844_s23 }
0x1442   : > { %v13840_v50 = vpop.f32.mrf.mxu0 }
0x1443   : > { %4925 = vrot.lane.b32.xlu1 %v13840_v50, %s14844_s23  ;;  %s14951_s23 = smov 112  }
0x1444   : > { %v4466_v20 = vpop.f32.mrf.mxu0 }
0x1445   : > { %v4473_v39 = vrot.slane %v4466_v20, %v13492_v10 }
0x1446   : > { %v11664_v40 = vpop.f32.mrf.mxu0 }
0x1447   : > { %5101 = vrot.lane.b32.xlu1 %v13721_v49, %s14950_s2 }
0x1449   : > { %v13846_v9 = vpop.f32.mrf.mxu0 }
0x144b   : > { %5099 = vrot.lane.b32.xlu1 %v13723_v53, %s14950_s2  ;;  %v13850_v41 = vpop.f32.mrf.mxu0 }
0x144d   : > { %v4782_v8 = vpop.f32.mrf.mxu0 }
0x144e   : > { %v4789_v42 = vrot.slane %v4782_v8, %v13492_v10 }
0x144f   : > { %v11685_v45 = vpop.f32.mrf.mxu0 }
0x1450   : > { %vm4793_vm10 = vcmp.eq.f32.partialorder %v4789_v42, %v4713_v13  ;;  %vm4791_vm11 = vcmp.gt.f32.partialorder %v4789_v42, %v4713_v13  ;;  %vm4792_vm4 = vcmp.eq.f32.partialorder %v4789_v42, %v4712_v4  ;;  %vm4790_vm13 = vcmp.gt.f32.partialorder %v4789_v42, %v4712_v4 }
0x1451   : > { %vm4795_vm12 = vmand %vm4793_vm10, %vm13497_vm8 }
0x1452   : > { %vm4797_vm3 = vmor %vm4791_vm11, %vm4795_vm12  ;;  %vm4477_vm11 = vcmp.eq.f32.partialorder %v4473_v39, %v13804_v63  ;;  %vm4476_vm12 = vcmp.eq.f32.partialorder %v4473_v39, %v13806_v22 }
0x1453   : > { %v4799_v54 = vsel %vm4797_vm3, 1.0, %v12860_v21  ;;  %vm4794_vm14 = vmand %vm4792_vm4, %vm13505_vm15  ;;  %vm4475_vm3 = vcmp.gt.f32.partialorder %v4473_v39, %v13804_v63 }
0x1454   : > { %v4803_v51 = vsel %vm1851_vm0, %v4799_v54, 0.0  ;;  %vm4796_vm6 = vmor %vm4790_vm13, %vm4794_vm14  ;;  %vm4474_vm13 = vcmp.gt.f32.partialorder %v4473_v39, %v13806_v22 }
0x1455   : > { %v4798_v55 = vsel %vm4796_vm6, 1.0, %v12860_v21  ;;  %vm4479_vm4 = vmand %vm4477_vm11, %vm13497_vm8 }
0x1456   : > { %v4800_v56 = vsel %vm1851_vm0, %v4798_v55, 0.0  ;;  %vm4478_vm14 = vmand %vm4476_vm12, %vm13505_vm15 }
0x1460   : > { %4804 = vadd.xlane.f32.xlu0 %v4803_v51 }
0x146f   : > { %4801 = vadd.xlane.f32.xlu1 %v4800_v56 }
0x1476   : > { %5095 = vrot.lane.b32.xlu0 %v13723_v53, %s14951_s23 }
0x147e   : > { %v11692_v28 = vpop.f32.mrf.mxu0 }
0x1480   : > { %5097 = vrot.lane.b32.xlu1 %v13721_v49, %s14951_s23  ;;  %v4910_v62 = vpop.f32.mrf.mxu0 }
0x14b3   : > { %v4928_v61 = vpop.permute.xlu0 %4927 }
0x14b5   : > { %v4926_v59 = vpop.permute.xlu1 %4925 }
0x14b9   : > { %v5102_v29 = vpop.permute.xlu1 %5101 }
0x14ba   : > { %11703 = vmatprep.subr.msk.mxu1 %vm2134_vm2, %v5102_v29 }
0x14bd   : > { %v5100_v52 = vpop.permute.xlu1 %5099 }
0x14e9   : > { %v4805_v46 = vpop.xlane.xlu0 %4804 }
0x14ea   : > { %vm4807_vm10 = vcmp.lt.f32.partialorder %v4805_v46, 15.0 }
0x14eb   : > { %v4932_v44 = vsel %vm4807_vm10, %v11692_v28, %v4928_v61  ;;  %vm4481_vm10 = vmor %vm4475_vm3, %vm4479_vm4 }
0x14ec   : > { %v4483_v18 = vsel %vm4481_vm10, 1.0, %v12860_v21 }
0x14ed   : > { %v5096_v0 = vpop.permute.xlu0 %5095  ;;  %v4487_v24 = vsel %vm1851_vm0, %v4483_v18, 0.0 }
0x14f8   : > { %v4802_v38 = vpop.xlane.xlu1 %4801 }
0x14f9   : > { %vm4806_vm6 = vcmp.lt.f32.partialorder %v4802_v38, 15.0 }
0x14fa   : > { %v4931_v57 = vsel %vm4806_vm6, %v4910_v62, %v4926_v59  ;;  %vm4480_vm6 = vmor %vm4474_vm13, %vm4478_vm14 }
0x14fb   : > { %11695 = vmatprep.mubr.msk.f32.mxu1 %vm2134_vm2, %v4931_v57  ;;  %v4482_v22 = vsel %vm4480_vm6, 1.0, %v12860_v21 }
0x14fc   : > { %11696 = vmatmul.mubr.msk.f32.vlgmr.msra.gmra.mxu1 %vm2134_vm2, %v4932_v44  ;;  %v5098_v47 = vpop.permute.xlu1 %5097  ;;  %v4484_v25 = vsel %vm1851_vm0, %v4482_v22, 0.0 }
0x14fd   : > { %11704 = vmatpush3.xpose.msk.msra.mxu1 %vm2134_vm2, %v5102_v29  ;;  %11707 = vmatprep.mubr.msk.f32.mxu1 %vm2134_vm2, %v5096_v0 }
0x14fe   : > { %11705 = vmatprep.subr.msk.mxu1 %vm2134_vm2, %v5100_v52 }
0x1501   : > { %11706 = vmatpush3.xpose.msk.msra.mxu1 %vm2134_vm2, %v5100_v52 }
0x1504   : > { %11708 = vmatmul.mubr.msk.f32.vlgmr.msra.gmra.mxu1 %vm2134_vm2, %v5098_v47 }
0x15bc   : > { %v13873_v1 = vpop.f32.mrf.mxu1 }
0x15be   : > { %v13876_v2 = vpop.f32.mrf.mxu1 }
0x15c4   : > { %v11709_v13 = vpop.f32.mrf.mxu1 }
0x15c5   : > { %v5301_v3 = vmul.f32 0.35355338, %v11709_v13  ;;  %v5195_v4 = vmul.f32 %v11709_v13, %v13752_v48  ;;  %v5187_v63 = vsel %vm4290_vm7, %v11709_v13, -1e+30 }
0x15c6   : > { %v5177_v12 = vpop.f32.mrf.mxu1  ;;  %v5191_v23 = vsel %vm1851_vm0, %v5187_v63, -inf }
0x15c7   : > { %v5300_v5 = vmul.f32 0.35355338, %v5177_v12  ;;  %v5305_v6 = vsel %vm1851_vm0, %v5301_v3, -inf  ;;  %v5199_v15 = vsel %vm1851_vm0, %v5195_v4, 0.0  ;;  %v5186_v27 = vsel %vm4289_vm9, %v5177_v12, -1e+30 }
0x15c8   : > { %5306 = vmax.xlane.f32.xlu1 %v5305_v6  ;;  %v5188_v17 = vsel %vm1851_vm0, %v5186_v27, -inf  ;;  %v5194_v32 = vmul.f32 %v5177_v12, %v13758_v60 }
0x15c9   : > { %v5302_v7 = vsel %vm1851_vm0, %v5300_v5, -inf }
0x15ca   : > { %5303 = vmax.xlane.f32.xlu0 %v5302_v7  ;;  %v5196_v33 = vsel %vm1851_vm0, %v5194_v32, 0.0 }
0x15cc   : > { %5200 = vadd.xlane.f32.xlu1 %v5199_v15 }
0x15ce   : > { %5192 = vmax.xlane.f32.xlu0 %v5191_v23 }
0x15d0   : > { %4488 = vadd.xlane.f32.xlu1 %v4487_v24 }
0x15d2   : > { %4485 = vadd.xlane.f32.xlu0 %v4484_v25 }
0x15d6   : > { %5189 = vmax.xlane.f32.xlu0 %v5188_v17 }
0x15e1   : > { %5326 = vrot.lane.b32.xlu1 %v13721_v49, %s14952_s28 }
0x1605   : > { %5197 = vadd.xlane.f32.xlu1 %v5196_v33 }
0x1616   : > { %5512 = vrot.lane.b32.xlu1 %v13721_v49, %s14953_s0 }
0x161a   : > { %5510 = vrot.lane.b32.xlu1 %v13723_v53, %s14953_s0 }
0x161e   : > { %5508 = vrot.lane.b32.xlu1 %v13721_v49, %s14954_s3 }
0x1651   : > { %v5307_v20 = vpop.xlane.xlu1 %5306 }
0x1652   : > { %v5309_v40 = vsub.f32 %v5301_v3, %v5307_v20 }
0x1653   : > { %v5304_v8 = vpop.xlane.xlu0 %5303 }
0x1654   : > { %v5312_v42 = vmul.f32 1.442695, %v5309_v40  ;;  %v5308_v45 = vsub.f32 %v5300_v5, %v5304_v8 }
0x1655   : > { %v5201_v54 = vpop.xlane.xlu1 %5200 }
0x1656   : > { %12343 = vpow2.f32 %v5312_v42  ;;  %v5310_v51 = vmul.f32 1.442695, %v5308_v45  ;;  %v5203_v55 = vmul.f32 0.0625, %v5201_v54 }
0x1657   : > { %v5193_v56 = vpop.xlane.xlu0 %5192 }
0x1658   : > { %12345 = vpow2.f32 %v5310_v51  ;;  %v13912_v29 = vsub.f32 %v5193_v56, %v5203_v55 }
0x1659   : > { %v4489_v59 = vpop.xlane.xlu1 %4488 }
0x165a   : > { %vm4491_vm11 = vcmp.lt.f32.partialorder %v4489_v59, 15.0  ;;  %v5207_v28 = vmul.f32 %v13912_v29, %v13448_v37 }
0x165b   : > { %v4486_v61 = vpop.xlane.xlu0 %4485  ;;  %v4602_v46 = vsel %vm4491_vm11, %v13846_v9, %v13836_v36 }
0x165c   : > { %vm4490_vm12 = vcmp.lt.f32.partialorder %v4486_v61, 15.0 }
0x165d   : > { %v4601_v52 = vsel %vm4490_vm12, %v13850_v41, %v13840_v50  ;;  %v5327_v9 = vpop.permute.xlu1 %5326 }
0x165e   : > { %11700 = vmatprep.mubr.msk.f32.mxu0 %vm2134_vm2, %v4601_v52 }
0x165f   : > { %11701 = vmatmul.mubr.msk.f32.vlgmr.msra.gmra.mxu0 %vm2134_vm2, %v4602_v46  ;;  %v5190_v47 = vpop.xlane.xlu0 %5189 }
0x1660   : > { %11711 = vmatpush3.msra.mxu0 %v5207_v28  ;;  %11714 = vmatprep.mubr.msk.f32.mxu0 %vm14856_vm5, %v12860_v21 }
0x1661   : > { %11712 = vmatprep.subr.mxu0 %v12860_v21 }
0x1663   : > { %v12344_v38 = vpop.eup %12343 }
0x1664   : > { %v5317_v62 = vsel %vm1851_vm0, %v12344_v38, 0.0 }
0x1665   : > { %v12346_v41 = vpop.eup %12345  ;;  %5318 = vadd.xlane.f32.xlu0 %v5317_v62 }
0x1666   : > { %v5314_v57 = vsel %vm1851_vm0, %v12346_v41, 0.0 }
0x1669   : > { %5315 = vadd.xlane.f32.xlu0 %v5314_v57 }
0x167f   : > { %5324 = vrot.lane.b32.xlu0 %v13723_v53, %s14952_s28 }
0x1683   : > { %5506 = vrot.lane.b32.xlu0 %v13723_v53, %s14954_s3 }
0x168e   : > { %v5198_v44 = vpop.xlane.xlu1 %5197 }
0x168f   : > { %v5202_v0 = vmul.f32 0.0625, %v5198_v44 }
0x1691   : > { %v5204_v39 = vsub.f32 %v5190_v47, %v5202_v0 }
0x1692   : > { %v5513_v5 = vpop.permute.xlu1 %5512 }
0x1693   : > { %v5206_v13 = vmul.f32 %v5204_v39, %v13457_v43 }
0x1695   : > { %11713 = vmatpush3.msra.mxu0 %v5206_v13 }
0x1696   : > { %11715 = vmatmul.mubr.msk.f32.vlgmr.msra.gmra.mxu0 %vm1851_vm0, %v12864_v58  ;;  %11717 = vmatprep.subr.mxu0 %v5327_v9  ;;  %v5511_v23 = vpop.permute.xlu1 %5510 }
0x1697   : > { %11718 = vmatpush3.msra.mxu0 %v5327_v9 }
0x169a   : > { %v5509_v22 = vpop.permute.xlu1 %5508 }
0x16ee   : > { %v5319_v3 = vpop.xlane.xlu0 %5318 }
0x16ef   : > { %12347 = vrcp.f32 %v5319_v3 }
0x16f2   : > { %v5316_v12 = vpop.xlane.xlu0 %5315 }
0x16f3   : > { %12349 = vrcp.f32 %v5316_v12 }
0x16f6   : > { %v5325_v4 = vpop.permute.xlu0 %5324 }
0x16f7   : > { %11719 = vmatprep.subr.mxu0 %v5325_v4 }
0x16f8   : > { %11720 = vmatpush3.msra.mxu0 %v5325_v4 }
0x16f9   : > { %11729 = vmatprep.subr.msk.mxu0 %vm2134_vm2, %v5513_v5 }
0x16fa   : > { %v5507_v18 = vpop.permute.xlu0 %5506 }
0x16fc   : > { %v12348_v6 = vpop.eup %12347 }
0x16fd   : > { %v5323_v15 = vmul.f32 %v12348_v6, %v12344_v38 }
0x1700   : > { %v12350_v7 = vpop.eup %12349 }
0x1701   : > { %v5321_v63 = vmul.f32 %v12350_v7, %v12346_v41  ;;  %v4114_v41 = vld [vmem:[%s14949_s22 + $0x10] sm:$0xff] }
0x1702   : > { %11724 = vmatprep.subr.mxu1 %v4114_v41 }
0x1703   : > { %11721 = vmatprep.mubr.msk.f32.mxu0 %vm1851_vm0, %v5321_v63  ;;  %11725 = vmatpush3.msra.mxu1 %v4114_v41 }
0x1704   : > { %11722 = vmatmul.mubr.msk.f32.vlgmr.msra.gmra.mxu0 %vm1851_vm0, %v5323_v15  ;;  %11736 = vmatprep.subr.mxu1 %v12860_v21 }
0x1705   : > { %11730 = vmatpush3.xpose.msk.msra.mxu0 %vm2134_vm2, %v5513_v5  ;;  %11733 = vmatprep.mubr.msk.f32.mxu0 %vm2134_vm2, %v5507_v18 }
0x1706   : > { %11731 = vmatprep.subr.msk.mxu0 %vm2134_vm2, %v5511_v23 }
0x1709   : > { %11732 = vmatpush3.xpose.msk.msra.mxu0 %vm2134_vm2, %v5511_v23 }
0x170c   : > { %11734 = vmatmul.mubr.msk.f32.vlgmr.msra.gmra.mxu0 %vm2134_vm2, %v5509_v22 }
0x171f   : > { %v13942_v24 = vpop.f32.mrf.mxu0 }
0x1721   : > { %v13944_v25 = vpop.f32.mrf.mxu0 }
0x1756   : > { %v5274_v27 = vpop.f32.mrf.mxu0 }
0x1757   : > { %v5281_v17 = vrot.slane %v5274_v27, %v13492_v10 }
0x1758   : > { %v11716_v19 = vpop.f32.mrf.mxu0 }
0x1759   : > { %vm5283_vm3 = vcmp.gt.f32.partialorder %v5281_v17, %v13912_v29  ;;  %vm5285_vm4 = vcmp.eq.f32.partialorder %v5281_v17, %v13912_v29  ;;  %vm5284_vm13 = vcmp.eq.f32.partialorder %v5281_v17, %v5204_v39  ;;  %vm5282_vm10 = vcmp.gt.f32.partialorder %v5281_v17, %v5204_v39 }
0x175a   : > { %vm5287_vm14 = vmand %vm5285_vm4, %vm13497_vm8 }
0x175b   : > { %vm5289_vm6 = vmor %vm5283_vm3, %vm5287_vm14 }
0x175c   : > { %v5291_v32 = vsel %vm5289_vm6, 1.0, %v12860_v21  ;;  %vm5286_vm11 = vmand %vm5284_vm13, %vm13505_vm15 }
0x175d   : > { %v5295_v33 = vsel %vm1851_vm0, %v5291_v32, 0.0  ;;  %vm5288_vm12 = vmor %vm5282_vm10, %vm5286_vm11 }
0x175e   : > { %5296 = vadd.xlane.f32.xlu1 %v5295_v33  ;;  %v5290_v20 = vsel %vm5288_vm12, 1.0, %v12860_v21 }
0x175f   : > { %v5292_v40 = vsel %vm1851_vm0, %v5290_v20, 0.0 }
0x1760   : > { %5293 = vadd.xlane.f32.xlu0 %v5292_v40 }
0x17c4   : > { %v11723_v8 = vpop.f32.mrf.mxu0 }
0x17c6   : > { %v5402_v42 = vpop.f32.mrf.mxu0 }
0x17cc   : > { %v11735_v45 = vpop.f32.mrf.mxu0 }
0x17cd   : > { %v5606_v54 = vmul.f32 %v11735_v45, %v13752_v48  ;;  %v5598_v51 = vsel %vm4290_vm7, %v11735_v45, -1e+30  ;;  %v5712_v55 = vmul.f32 0.35355338, %v11735_v45 }
0x17ce   : > { %v5588_v56 = vpop.f32.mrf.mxu0  ;;  %v5602_v59 = vsel %vm1851_vm0, %v5598_v51, -inf }
0x17cf   : > { %v5711_v29 = vmul.f32 0.35355338, %v5588_v56  ;;  %5603 = vmax.xlane.f32.xlu1 %v5602_v59  ;;  %v5610_v61 = vsel %vm1851_vm0, %v5606_v54, 0.0  ;;  %v5716_v52 = vsel %vm1851_vm0, %v5712_v55, -inf  ;;  %v5597_v48 = vsel %vm4289_vm9, %v5588_v56, -1e+30 }
0x17d0   : > { %5611 = vadd.xlane.f32.xlu0 %v5610_v61  ;;  %v5605_v46 = vmul.f32 %v5588_v56, %v13758_v60  ;;  %v5599_v38 = vsel %vm1851_vm0, %v5597_v48, -inf }
0x17d1   : > { %v5713_v28 = vsel %vm1851_vm0, %v5711_v29, -inf }
0x17d2   : > { %v5607_v62 = vsel %vm1851_vm0, %v5605_v46, 0.0 }
0x17d3   : > { %5717 = vmax.xlane.f32.xlu1 %v5716_v52 }
0x17d4   : > { %5714 = vmax.xlane.f32.xlu0 %v5713_v28 }
0x17d8   : > { %5600 = vmax.xlane.f32.xlu0 %v5599_v38 }
0x17dc   : > { %5608 = vadd.xlane.f32.xlu0 %v5607_v62  ;;  %v4115_v62 = vld [vmem:[%s14949_s22 + $0x18] sm:$0xff] }
0x17dd   : > { %11750 = vmatprep.subr.mxu0 %v4115_v62 }
0x17de   : > { %11751 = vmatpush3.msra.mxu0 %v4115_v62  ;;  %v6304_v62 = vld [vmem:[%s1839_s11 + $0x8] sm:$0xff] }
0x17e4   : > { %5415 = vrot.lane.b32.xlu1 %v13840_v50, %s14951_s23 }
0x17e7   : > { %v5297_v57 = vpop.xlane.xlu1 %5296 }
0x17e8   : > { %vm5299_vm9 = vcmp.lt.f32.partialorder %v5297_v57, 15.0 }
0x17e9   : > { %v5294_v9 = vpop.xlane.xlu0 %5293 }
0x17ea   : > { %vm5298_vm7 = vcmp.lt.f32.partialorder %v5294_v9, 15.0 }
0x17f2   : > { %5417 = vrot.lane.b32.xlu0 %v13836_v36, %s14951_s23 }
0x1858   : > { %v5604_v60 = vpop.xlane.xlu1 %5603 }
0x1859   : > { %v5612_v44 = vpop.xlane.xlu0 %5611 }
0x185a   : > { %v5614_v7 = vmul.f32 0.0625, %v5612_v44 }
0x185c   : > { %v5718_v0 = vpop.xlane.xlu1 %5717  ;;  %v5616_v15 = vsub.f32 %v5604_v60, %v5614_v7 }
0x185d   : > { %v5720_v47 = vsub.f32 %v5712_v55, %v5718_v0  ;;  %v5715_v39 = vpop.xlane.xlu0 %5714 }
0x185e   : > { %v5719_v13 = vsub.f32 %v5711_v29, %v5715_v39  ;;  %v5618_v17 = vmul.f32 %v5616_v15, %v13448_v37  ;;  %v5087_v29 = vadd.f32 %v13944_v25, %v13876_v2 }
0x185f   : > { %v5723_v3 = vmul.f32 1.442695, %v5720_v47 }
0x1860   : > { %v5721_v12 = vmul.f32 1.442695, %v5719_v13  ;;  %v5416_v4 = vpop.permute.xlu1 %5415 }
0x1861   : > { %12351 = vpow2.f32 %v5723_v3  ;;  %v5421_v5 = vsel %vm5298_vm7, %v5402_v42, %v5416_v4  ;;  %v5601_v6 = vpop.xlane.xlu0 %5600 }
0x1862   : > { %12353 = vpow2.f32 %v5721_v12  ;;  %11726 = vmatprep.mubr.msk.f32.mxu1 %vm2134_vm2, %v5421_v5 }
0x1865   : > { %v5609_v63 = vpop.xlane.xlu0 %5608 }
0x1866   : > { %v5613_v18 = vmul.f32 0.0625, %v5609_v63 }
0x1868   : > { %v5615_v23 = vsub.f32 %v5601_v6, %v5613_v18 }
0x1869   : > { %v5418_v22 = vpop.permute.xlu0 %5417 }
0x186a   : > { %v5422_v27 = vsel %vm5299_vm9, %v11723_v8, %v5418_v22  ;;  %v5617_v19 = vmul.f32 %v5615_v23, %v13457_v43 }
0x186b   : > { %11727 = vmatmul.mubr.msk.f32.vlgmr.msra.gmra.mxu1 %vm2134_vm2, %v5422_v27 }
0x186c   : > { %11737 = vmatpush3.msra.mxu1 %v5618_v17  ;;  %11740 = vmatprep.mubr.msk.f32.mxu1 %vm14856_vm5, %v12860_v21 }
0x186d   : > { %11738 = vmatprep.subr.mxu1 %v12860_v21 }
0x186e   : > { %v12352_v32 = vpop.eup %12351  ;;  %11739 = vmatpush3.msra.mxu1 %v5617_v19 }
0x186f   : > { %v12354_v33 = vpop.eup %12353  ;;  %11741 = vmatmul.mubr.msk.f32.vlgmr.msra.gmra.mxu1 %vm1851_vm0, %v12864_v58  ;;  %v5728_v20 = vsel %vm1851_vm0, %v12352_v32, 0.0 }
0x1870   : > { %5729 = vadd.xlane.f32.xlu0 %v5728_v20  ;;  %v5725_v40 = vsel %vm1851_vm0, %v12354_v33, 0.0  ;;  %v5974_v20 = vld [vmem:[%s14957_s6 + $0x18] sm:$0xff] }
0x1871   : > { %5726 = vadd.xlane.f32.xlu1 %v5725_v40  ;;  %v5973_v40 = vld [vmem:[%s14957_s6 + $0x10] sm:$0xff] }
0x1882   : > { %5737 = vrot.lane.b32.xlu1 %v13721_v49, %s14955_s4  ;;  %v5092_v49 = vadd.f32 %v13942_v24, %v13873_v1 }
0x1886   : > { %5735 = vrot.lane.b32.xlu0 %v13723_v53, %s14955_s4 }
0x18f9   : > { %v5730_v8 = vpop.xlane.xlu0 %5729 }
0x18fa   : > { %12355 = vrcp.f32 %v5730_v8  ;;  %v5727_v42 = vpop.xlane.xlu1 %5726  ;;  %v5972_v8 = vld [vmem:[%s14957_s6 + $0x8] sm:$0xff] }
0x18fb   : > { %12357 = vrcp.f32 %v5727_v42  ;;  %v5971_v42 = vld [vmem:[%s14957_s6] sm:$0xff]  ;;  %s14962_s6 = sld [smem:[#allocation57_spill]] }
0x18fd   : > { %v5736_v54 = vpop.permute.xlu0 %5735 }
0x18fe   : > { %v5738_v45 = vpop.permute.xlu1 %5737 }
0x18ff   : > { %11743 = vmatprep.subr.mxu1 %v5738_v45 }
0x1900   : > { %11744 = vmatpush3.msra.mxu1 %v5738_v45 }
0x1901   : > { %11745 = vmatprep.subr.mxu1 %v5736_v54 }
0x1902   : > { %11746 = vmatpush3.msra.mxu1 %v5736_v54 }
0x1903   : > { %11755 = vmatprep.subr.mxu1 %v5974_v20 }
0x1907   : > { %v12356_v51 = vpop.eup %12355 }
0x1908   : > { %v12358_v55 = vpop.eup %12357  ;;  %v5734_v59 = vmul.f32 %v12356_v51, %v12352_v32 }
0x1909   : > { %v5732_v56 = vmul.f32 %v12358_v55, %v12354_v33 }
0x190b   : > { %11747 = vmatprep.mubr.msk.f32.mxu1 %vm1851_vm0, %v5732_v56 }
0x190c   : > { %11748 = vmatmul.mubr.msk.f32.vlgmr.msra.gmra.mxu1 %vm1851_vm0, %v5734_v59 }
0x190d   : > { %11756 = vmatpush3.msra.mxu1 %v5974_v20 }
0x190e   : > { %11757 = vmatprep.subr.mxu1 %v5973_v40 }
0x190f   : > { %11758 = vmatpush3.msra.mxu1 %v5973_v40 }
0x1910   : > { %11759 = vmatprep.subr.mxu1 %v5972_v8 }
0x1911   : > { %11760 = vmatpush3.msra.mxu1 %v5972_v8 }
0x1912   : > { %11761 = vmatprep.subr.mxu1 %v5971_v42 }
0x1913   : > { %11762 = vmatpush3.msra.mxu1 %v5971_v42 }
0x192b   : > { %v11728_v53 = vpop.f32.mrf.mxu1 }
0x192c   : > { %v5505_v61 = vadd.f32 %v11728_v53, %v5092_v49 }
0x192d   : > { %v5495_v52 = vpop.f32.mrf.mxu1 }
0x192e   : > { %v5504_v28 = vadd.f32 %v5495_v52, %v5087_v29  ;;  %v11020_v29 = vld [vmem:[%s14959_s8] ss:$0 sm:$0xff]  ;;  %s14964_s8 = sld [smem:[#allocation48_spill]] }
0x192f   : > { %v5685_v48 = vpop.f32.mrf.mxu1 }
0x1930   : > { %v5692_v46 = vrot.slane %v5685_v48, %v13492_v10 }
0x1931   : > { %v11742_v38 = vpop.f32.mrf.mxu1 }
0x1932   : > { %vm5694_vm3 = vcmp.gt.f32.partialorder %v5692_v46, %v5616_v15  ;;  %vm5696_vm4 = vcmp.eq.f32.partialorder %v5692_v46, %v5616_v15  ;;  %vm5695_vm13 = vcmp.eq.f32.partialorder %v5692_v46, %v5615_v23  ;;  %vm5693_vm10 = vcmp.gt.f32.partialorder %v5692_v46, %v5615_v23  ;;  %v11021_v46 = vld [vmem:[%s14960_s9] ss:$0 sm:$0xff]  ;;  %s14963_s9 = sld [smem:[#allocation49_spill]] }
0x1933   : > { %vm5698_vm14 = vmand %vm5696_vm4, %vm13497_vm8 }
0x1934   : > { %vm5700_vm6 = vmor %vm5694_vm3, %vm5698_vm14 }
0x1935   : > { %v5702_v1 = vsel %vm5700_vm6, 1.0, %v12860_v21  ;;  %vm5697_vm11 = vmand %vm5695_vm13, %vm13505_vm15  ;;  %vm14966_vm13 = vcmask 523264   ;;  %vm6785_vm6 = vcmp.gt.s32.totalorder %v13443_v31, %v13438_v26 }
0x1936   : > { %v5706_v2 = vsel %vm1851_vm0, %v5702_v1, 0.0  ;;  %vm5699_vm12 = vmor %vm5693_vm10, %vm5697_vm11  ;;  %vm6786_vm10 = vcmp.gt.s32.totalorder %v13443_v31, %v13441_v30 }
0x1937   : > { %5707 = vadd.xlane.f32.xlu0 %v5706_v2  ;;  %v5701_v24 = vsel %vm5699_vm12, 1.0, %v12860_v21  ;;  %vm14967_vm14 = vmmov %vm14966_vm13 }
0x1938   : > { %v5703_v25 = vsel %vm1851_vm0, %v5701_v24, 0.0  ;;  %v6303_v24 = vld [vmem:[%s1839_s11] sm:$0xff]  ;;  %s14968_s11 = smov 96  }
0x1939   : > { %5704 = vadd.xlane.f32.xlu1 %v5703_v25 }
0x194a   : > { %5826 = vrot.lane.b32.xlu1 %v13840_v50, %s14954_s3  ;;  %v11019_v50 = vld [vmem:[%s14956_s5] ss:$0 sm:$0xff]  ;;  %s14958_s5 = sld [smem:[#allocation27_spill]] }
0x194d   : > { %5828 = vrot.lane.b32.xlu0 %v13836_v36, %s14954_s3 }
0x1950   : > { %v6306_v45 = vld [vmem:[%s14958_s5 + $0x8] sm:$0xff]  ;;  %v6305_v25 = vld [vmem:[%s14958_s5] sm:$0xff]  ;;  %s14970_s5 = smov 120  }
0x1951   : > { %11785 = vmatprep.subr.mxu1 %v6306_v45 }
0x19c0   : > { %v5708_v57 = vpop.xlane.xlu0 %5707 }
0x19c1   : > { %vm5710_vm9 = vcmp.lt.f32.partialorder %v5708_v57, 15.0  ;;  %v6390_v57 = vld [vmem:[%s14962_s6 + $0x10] sm:$0xff] }
0x19c2   : > { %v5705_v41 = vpop.xlane.xlu1 %5704 }
0x19c3   : > { %vm5709_vm7 = vcmp.lt.f32.partialorder %v5705_v41, 15.0  ;;  %v6391_v41 = vld [vmem:[%s14962_s6 + $0x18] sm:$0xff] }
0x19c4   : > { %v5829_v0 = vpop.permute.xlu0 %5828 }
0x19c6   : > { %v5827_v60 = vpop.permute.xlu1 %5826 }
0x19cc   : > { %v11749_v9 = vpop.f32.mrf.mxu1 }
0x19cd   : > { %v5833_v39 = vsel %vm5710_vm9, %v11749_v9, %v5829_v0  ;;  %v6389_v9 = vld [vmem:[%s14962_s6 + $0x8] sm:$0xff]  ;;  %v6123_v0 = vld [vmem:[%s14963_s9 + $0x30] sm:$0xff]  ;;  %vm6488_vm9 = vcmp.le.s32.totalorder %v13443_v31, %v13441_v30 }
0x19ce   : > { %v5813_v44 = vpop.f32.mrf.mxu1 }
0x19cf   : > { %v5832_v47 = vsel %vm5709_vm7, %v5813_v44, %v5827_v60  ;;  %v6388_v60 = vld [vmem:[%s14962_s6] sm:$0xff]  ;;  %v6124_v44 = vld [vmem:[%s14963_s9 + $0x38] sm:$0xff]  ;;  %vm6487_vm7 = vcmp.le.s32.totalorder %v13443_v31, %v13438_v26  ;;  %s14972_s6 = smov 64  }
0x19d0   : > { %11752 = vmatprep.mubr.msk.f32.mxu0 %vm2134_vm2, %v5832_v47  ;;  %11766 = vmatprep.subr.mxu0 %v6124_v44  ;;  %v6122_v47 = vld [vmem:[%s14963_s9 + $0x28] sm:$0xff] }
0x19d1   : > { %11753 = vmatmul.mubr.msk.f32.vlgmr.msra.gmra.mxu0 %vm2134_vm2, %v5833_v39  ;;  %v6121_v39 = vld [vmem:[%s14963_s9 + $0x20] sm:$0xff] }
0x19d2   : > { %11767 = vmatpush3.msra.mxu0 %v6124_v44 }
0x19d3   : > { %11768 = vmatprep.subr.mxu0 %v6123_v0 }
0x19d4   : > { %11769 = vmatpush3.msra.mxu0 %v6123_v0 }
0x19d5   : > { %11770 = vmatprep.subr.mxu0 %v6122_v47 }
0x19d6   : > { %11771 = vmatpush3.msra.mxu0 %v6122_v47 }
0x19d7   : > { %11772 = vmatprep.subr.mxu0 %v6121_v39 }
0x19d8   : > { %11773 = vmatpush3.msra.mxu0 %v6121_v39 }
0x1a91   : > { %v11754_v36 = vpop.f32.mrf.mxu0 }
0x1a92   : > { %v5916_v13 = vadd.f32 %v11754_v36, %v5505_v61  ;;  %v6119_v36 = vld [vmem:[%s14963_s9 + $0x10] sm:$0xff] }
0x1a93   : > { %v5906_v3 = vpop.f32.mrf.mxu0 }
0x1a94   : > { %v5924_v12 = vadd.f32 %v11019_v50, %v5916_v13  ;;  %v5915_v4 = vadd.f32 %v5906_v3, %v5504_v28  ;;  %v6118_v13 = vld [vmem:[%s14963_s9 + $0x8] sm:$0xff]  ;;  %v6117_v3 = vld [vmem:[%s14963_s9] sm:$0xff] }
0x1a96   : > { %v5923_v5 = vadd.f32 %v11019_v50, %v5915_v4  ;;  %v5926_v6 = vadd.f32 %v5924_v12, %v13712_v35  ;;  %v6120_v50 = vld [vmem:[%s14963_s9 + $0x18] sm:$0xff]  ;;  %v11022_v12 = vld [vmem:[%s14964_s8] ss:$0 sm:$0xff]  ;;  %s14969_s8 = smov 88  }
0x1a97   : > { %11774 = vmatprep.subr.mxu0 %v6120_v50 }
0x1a98   : > { %v5932_v7 = vsel %vm14855_vm1, %v5926_v6, 0.0  ;;  %v5925_v63 = vadd.f32 %v5923_v5, %v13710_v34  ;;  %11775 = vmatpush3.msra.mxu0 %v6120_v50 }
0x1a99   : > { %5933 = vadd.xlane.f32.xlu0 %v5932_v7  ;;  %11776 = vmatprep.subr.mxu0 %v6119_v36 }
0x1a9a   : > { %v5929_v15 = vsel %vm14855_vm1, %v5925_v63, 0.0  ;;  %11777 = vmatpush3.msra.mxu0 %v6119_v36 }
0x1a9b   : > { %5930 = vadd.xlane.f32.xlu1 %v5929_v15  ;;  %11778 = vmatprep.subr.mxu0 %v6118_v13 }
0x1a9c   : > { %11779 = vmatpush3.msra.mxu0 %v6118_v13 }
0x1a9d   : > { %11780 = vmatprep.subr.mxu0 %v6117_v3 }
0x1a9e   : > { %11781 = vmatpush3.msra.mxu0 %v6117_v3 }
0x1b22   : > { %v5934_v18 = vpop.xlane.xlu0 %5933 }
0x1b23   : > { %v5936_v23 = vmul.f32 0.03125, %v5934_v18 }
0x1b24   : > { %v5931_v22 = vpop.xlane.xlu1 %5930 }
0x1b25   : > { %v5938_v27 = vsub.f32 %v5926_v6, %v5936_v23  ;;  %v5935_v17 = vmul.f32 0.03125, %v5931_v22 }
0x1b27   : > { %v5937_v19 = vsub.f32 %v5925_v63, %v5935_v17  ;;  %v5940_v32 = vmul.f32 %v5938_v27, %v5938_v27 }
0x1b29   : > { %v5944_v35 = vsel %vm14855_vm1, %v5940_v32, 0.0  ;;  %v5939_v33 = vmul.f32 %v5937_v19, %v5937_v19 }
0x1b2a   : > { %5945 = vadd.xlane.f32.xlu0 %v5944_v35 }
0x1b2b   : > { %v5941_v34 = vsel %vm14855_vm1, %v5939_v33, 0.0 }
0x1b2c   : > { %5942 = vadd.xlane.f32.xlu1 %v5941_v34  ;;  %v12468_v34 = vld [vmem:[%s12888_s13 + $0x8] sm:$0xff] }
0x1bb3   : > { %v5946_v54 = vpop.xlane.xlu0 %5945 }
0x1bb4   : > { %v5948_v51 = vmul.f32 0.03125, %v5946_v54 }
0x1bb5   : > { %v5943_v55 = vpop.xlane.xlu1 %5942 }
0x1bb6   : > { %v5950_v56 = vadd.f32 1e-05, %v5948_v51  ;;  %v5947_v59 = vmul.f32 0.03125, %v5943_v55 }
0x1bb8   : > { %12359 = vrsqrt.f32 %v5950_v56  ;;  %v5949_v49 = vadd.f32 1e-05, %v5947_v59 }
0x1bba   : > { %12361 = vrsqrt.f32 %v5949_v49 }
0x1bc5   : > { %v12360_v53 = vpop.eup %12359 }
0x1bc6   : > { %v5954_v61 = vmul.f32 %v12360_v53, %v5938_v27 }
0x1bc7   : > { %v12362_v52 = vpop.eup %12361 }
0x1bc8   : > { %v5953_v28 = vmul.f32 %v12362_v52, %v5937_v19  ;;  %v5962_v48 = vmul.f32 %v11020_v29, %v5954_v61  ;;  %v12467_v19 = vld [vmem:[%s12888_s13] sm:$0xff] }
0x1bca   : > { %v5961_v38 = vmul.f32 %v11020_v29, %v5953_v28  ;;  %v14030_v2 = vadd.f32 %v11021_v46, %v5962_v48 }
0x1bcc   : > { %v14028_v1 = vadd.f32 %v11021_v46, %v5961_v38 }
0x1bce   : > { %11763 = vmatprep.mubr.msk.f32.mxu1 %vm14855_vm1, %v14028_v1 }
0x1bcf   : > { %11764 = vmatmul.mubr.msk.f32.vlgmr.msra.gmra.mxu1 %vm14855_vm1, %v14030_v2 }
0x1bd0   : > { %11786 = vmatpush3.msra.mxu1 %v6306_v45  ;;  %11789 = vmatprep.mubr.msk.f32.mxu1 %vm1851_vm0, %v6303_v24 }
0x1bd1   : > { %11787 = vmatprep.subr.mxu1 %v6305_v25 }
0x1bd2   : > { %11788 = vmatpush3.msra.mxu1 %v6305_v25 }
0x1bd3   : > { %11790 = vmatmul.mubr.msk.f32.vlgmr.msra.gmra.mxu1 %vm1851_vm0, %v6304_v62  ;;  %11792 = vmatprep.subr.mxu1 %v6391_v41 }
0x1bd4   : > { %11793 = vmatpush3.msra.mxu1 %v6391_v41 }
0x1bd5   : > { %11794 = vmatprep.subr.mxu1 %v6390_v57 }
0x1bd6   : > { %11795 = vmatpush3.msra.mxu1 %v6390_v57 }
0x1bd7   : > { %11796 = vmatprep.subr.mxu1 %v6389_v9 }
0x1bd8   : > { %11797 = vmatpush3.msra.mxu1 %v6389_v9 }
0x1bd9   : > { %11798 = vmatprep.subr.mxu1 %v6388_v60 }
0x1bda   : > { %11799 = vmatpush3.msra.mxu1 %v6388_v60 }
0x1c8f   : > { %v11765_v4 = vpop.f32.mrf.mxu1 }
0x1c90   : > { %v14052_v5 = vadd.f32 %v11765_v4, %v11022_v12 }
0x1c91   : > { %v6054_v6 = vpop.f32.mrf.mxu1 }
0x1c92   : > { %v6064_v7 = vmul.f32 0.70710677, %v14052_v5  ;;  %v6055_v63 = vadd.f32 %v11022_v12, %v6054_v6 }
0x1c93   : > { %v11791_v15 = vpop.f32.mrf.mxu1 }
0x1c94   : > { %v6066_v18 = vand.u32 2147483647, %v6064_v7  ;;  %v6063_v23 = vmul.f32 0.70710677, %v6055_v63  ;;  %v14059_v20 = vadd.f32 %v12468_v34, %v11791_v15  ;;  %vm6106_vm3 = vcmp.lt.f32.partialorder %v6064_v7, 0.0 }
0x1c95   : > { %v6379_v22 = vpop.f32.mrf.mxu1 }
0x1c96   : > { %v6068_v27 = vmul.f32 0.3275911, %v6066_v18  ;;  %v6065_v17 = vand.u32 2147483647, %v6063_v23  ;;  %v14056_v32 = vadd.f32 %v12467_v19, %v6379_v22  ;;  %v6094_v8 = vmul.f32 %v6066_v18, %v6066_v18 }
0x1c97   : > { %vm6105_vm4 = vcmp.lt.f32.partialorder %v6063_v23, 0.0  ;;  %v6111_v22 = vmul.f32 0.5, %v6055_v63 }
0x1c98   : > { %v6070_v35 = vadd.f32 1.0, %v6068_v27  ;;  %v6067_v33 = vmul.f32 0.3275911, %v6065_v17  ;;  %11800 = vmatprep.mubr.msk.f32.mxu1 %vm14855_vm1, %v14056_v32  ;;  %v6093_v42 = vmul.f32 %v6065_v17, %v6065_v17  ;;  %v6096_v45 = vsub.f32 0.0, %v6094_v8 }
0x1c99   : > { %11801 = vmatmul.mubr.msk.f32.vlgmr.msra.gmra.mxu1 %vm14855_vm1, %v14059_v20  ;;  %v6112_v17 = vmul.f32 0.5, %v14052_v5 }
0x1c9a   : > { %12363 = vrcp.f32 %v6070_v35  ;;  %v6069_v40 = vadd.f32 1.0, %v6067_v33  ;;  %v6095_v51 = vsub.f32 0.0, %v6093_v42  ;;  %v6099_v56 = vmul.f32 1.442695, %v6096_v45  ;;  %v11034_v33 = vld [vmem:[%s14965_s10] ss:$0 sm:$0xff] }
0x1c9b   : > { %s14971_s10 = sld [smem:[#allocation55_spill]] }
0x1c9c   : > { %12365 = vrcp.f32 %v6069_v40  ;;  %v6097_v29 = vmul.f32 1.442695, %v6095_v51 }
0x1c9d   : > { %12367 = vpow2.f32 %v6099_v56 }
0x1c9e   : > { %12369 = vpow2.f32 %v6097_v29 }
0x1ca7   : > { %v12364_v54 = vpop.eup %12363 }
0x1ca8   : > { %v6076_v55 = vmul.f32 1.0614054, %v12364_v54 }
0x1ca9   : > { %v12366_v59 = vpop.eup %12365 }
0x1caa   : > { %v6078_v49 = vadd.f32 -1.4531521, %v6076_v55  ;;  %v6075_v53 = vmul.f32 1.0614054, %v12366_v59  ;;  %v12368_v44 = vpop.eup %12367  ;;  %v14102_v55 = vld [vmem:[%s14971_s10 + $0x8] sm:$0xff] }
0x1cab   : > { %v12370_v50 = vpop.eup %12369  ;;  %vm6581_vm11 = vcmp.gt.f32.partialorder %v14102_v55, 0.0 }
0x1cac   : > { %v6080_v61 = vmul.f32 %v12364_v54, %v6078_v49  ;;  %v6077_v52 = vadd.f32 -1.4531521, %v6075_v53 }
0x1cae   : > { %v6082_v28 = vadd.f32 1.4214138, %v6080_v61  ;;  %v6079_v48 = vmul.f32 %v12366_v59, %v6077_v52  ;;  %v14113_v52 = vld [vmem:[%s14971_s10] sm:$0xff] }
0x1caf   : > { %vm6580_vm12 = vcmp.gt.f32.partialorder %v14113_v52, 0.0 }
0x1cb0   : > { %v6084_v46 = vmul.f32 %v12364_v54, %v6082_v28  ;;  %v6081_v38 = vadd.f32 1.4214138, %v6079_v48 }
0x1cb2   : > { %v6086_v24 = vadd.f32 -0.28449672, %v6084_v46  ;;  %v6083_v25 = vmul.f32 %v12366_v59, %v6081_v38 }
0x1cb4   : > { %v6088_v62 = vmul.f32 %v12364_v54, %v6086_v24  ;;  %v6085_v41 = vadd.f32 -0.28449672, %v6083_v25 }
0x1cb6   : > { %v6090_v57 = vadd.f32 0.2548296, %v6088_v62  ;;  %v6087_v9 = vmul.f32 %v12366_v59, %v6085_v41 }
0x1cb8   : > { %v6092_v60 = vmul.f32 %v12364_v54, %v6090_v57  ;;  %v6089_v0 = vadd.f32 0.2548296, %v6087_v9 }
0x1cba   : > { %v6102_v47 = vmul.f32 %v12368_v44, %v6092_v60  ;;  %v6091_v39 = vmul.f32 %v12366_v59, %v6089_v0 }
0x1cbc   : > { %v6104_v36 = vsub.f32 1.0, %v6102_v47  ;;  %v6101_v13 = vmul.f32 %v12370_v50, %v6091_v39 }
0x1cbe   : > { %v6108_v3 = vsub.f32 0.0, %v6104_v36  ;;  %v6103_v12 = vsub.f32 1.0, %v6101_v13 }
0x1cc0   : > { %v6110_v4 = vsel %vm6106_vm3, %v6108_v3, %v6104_v36  ;;  %v6107_v6 = vsub.f32 0.0, %v6103_v12 }
0x1cc1   : > { %v6114_v15 = vadd.f32 1.0, %v6110_v4 }
0x1cc2   : > { %v6109_v18 = vsel %vm6105_vm4, %v6107_v6, %v6103_v12 }
0x1cc3   : > { %v6113_v27 = vadd.f32 1.0, %v6109_v18  ;;  %v6116_v35 = vmul.f32 %v6114_v15, %v6112_v17 }
0x1cc5   : > { %v6115_v19 = vmul.f32 %v6113_v27, %v6111_v22 }
0x1cc7   : > { %11782 = vmatprep.mubr.msk.f32.mxu0 %vm14966_vm13, %v6115_v19 }
0x1cc8   : > { %11783 = vmatmul.mubr.msk.f32.vlgmr.msra.gmra.mxu0 %vm14967_vm14, %v6116_v35 }
0x1d59   : > { %v11802_v34 = vpop.f32.mrf.mxu1 }
0x1d5a   : > { %v14069_v40 = vadd.f32 %v11802_v34, %v11034_v33 }
0x1d5b   : > { %v6478_v7 = vpop.f32.mrf.mxu1 }
0x1d5c   : > { %v14071_v8 = vadd.f32 %v11034_v33, %v6478_v7  ;;  %6584 = vrot.lane.b32.xlu1 %v14069_v40, %s14968_s11 }
0x1d5e   : > { %6582 = vrot.lane.b32.xlu0 %v14071_v8, %s14968_s11  ;;  %11814 = vmatprep.mubr.msk.f32.mxu1 %vm2134_vm2, %v14071_v8 }
0x1d60   : > { %6904 = vrot.lane.b32.xlu1 %v14069_v40, %s14969_s8 }
0x1d62   : > { %6898 = vrot.lane.b32.xlu0 %v14071_v8, %s14970_s5 }
0x1d64   : > { %6902 = vrot.lane.b32.xlu1 %v14071_v8, %s14969_s8 }
0x1d68   : > { %6900 = vrot.lane.b32.xlu1 %v14069_v40, %s14970_s5 }
0x1dce   : > { %v6585_v5 = vpop.permute.xlu1 %6584 }
0x1dcf   : > { %11810 = vmatprep.subr.msk.mxu1 %vm2134_vm2, %v6585_v5 }
0x1dd0   : > { %11811 = vmatpush3.xpose.msk.msra.mxu1 %vm2134_vm2, %v6585_v5  ;;  %v6583_v63 = vpop.permute.xlu0 %6582 }
0x1dd1   : > { %11812 = vmatprep.subr.msk.mxu1 %vm2134_vm2, %v6583_v63 }
0x1dd2   : > { %v6905_v23 = vpop.permute.xlu1 %6904 }
0x1dd4   : > { %11813 = vmatpush3.xpose.msk.msra.mxu1 %vm2134_vm2, %v6583_v63  ;;  %v6899_v42 = vpop.permute.xlu0 %6898 }
0x1dd5   : > { %11831 = vmatprep.subr.msk.mxu1 %vm2134_vm2, %v6905_v23 }
0x1dd6   : > { %v6903_v45 = vpop.permute.xlu1 %6902 }
0x1dd7   : > { %11815 = vmatmul.mubr.msk.f32.vlgmr.msra.gmra.mxu1 %vm2134_vm2, %v14069_v40 }
0x1dd8   : > { %11832 = vmatpush3.xpose.msk.msra.mxu1 %vm2134_vm2, %v6905_v23  ;;  %11835 = vmatprep.mubr.msk.f32.mxu1 %vm2134_vm2, %v6899_v42 }
0x1dd9   : > { %11833 = vmatprep.subr.msk.mxu1 %vm2134_vm2, %v6903_v45 }
0x1dda   : > { %v6901_v54 = vpop.permute.xlu1 %6900 }
0x1ddc   : > { %11834 = vmatpush3.xpose.msk.msra.mxu1 %vm2134_vm2, %v6903_v45 }
0x1ddf   : > { %11836 = vmatmul.mubr.msk.f32.vlgmr.msra.gmra.mxu1 %vm2134_vm2, %v6901_v54 }
0x1e97   : > { %v11816_v51 = vpop.f32.mrf.mxu1 }
0x1e98   : > { %v6784_v56 = vmul.f32 0.35355338, %v11816_v51  ;;  %v6678_v29 = vmul.f32 %v11816_v51, %v14102_v55  ;;  %v6670_v46 = vsel %vm6581_vm11, %v11816_v51, -1e+30 }
0x1e99   : > { %v6660_v59 = vpop.f32.mrf.mxu1  ;;  %v6674_v62 = vsel %vm1851_vm0, %v6670_v46, -inf }
0x1e9a   : > { %v6783_v49 = vmul.f32 0.35355338, %v6660_v59  ;;  %v6788_v53 = vsel %vm6786_vm10, -1e+30, %v6784_v56  ;;  %v6677_v38 = vmul.f32 %v6660_v59, %v14113_v52  ;;  %v6682_v24 = vsel %vm1851_vm0, %v6678_v29, 0.0 }
0x1e9b   : > { %v6792_v61 = vsel %vm1851_vm0, %v6788_v53, -inf  ;;  %v6669_v41 = vsel %vm6580_vm12, %v6660_v59, -1e+30  ;;  %v6489_v56 = vsel %vm6487_vm7, 1.0, %v12860_v21 }
0x1e9c   : > { %6793 = vmax.xlane.f32.xlu1 %v6792_v61  ;;  %v6787_v28 = vsel %vm6785_vm6, -1e+30, %v6783_v49  ;;  %v6679_v9 = vsel %vm1851_vm0, %v6677_v38, 0.0  ;;  %v6671_v44 = vsel %vm1851_vm0, %v6669_v41, -inf  ;;  %11807 = vmatprep.mubr.msk.f32.mxu0 %vm1851_vm0, %v6489_v56  ;;  %v14210_v56 = vpop.f32.mrf.mxu0 }
0x1e9d   : > { %v6789_v48 = vsel %vm1851_vm0, %v6787_v28, -inf }
0x1e9e   : > { %6790 = vmax.xlane.f32.xlu0 %v6789_v48 }
0x1e9f   : > { %v11837_v25 = vpop.f32.mrf.mxu1 }
0x1ea0   : > { %6683 = vadd.xlane.f32.xlu1 %v6682_v24  ;;  %v6998_v57 = vmul.f32 %v11837_v25, %v14102_v55  ;;  %v7104_v0 = vmul.f32 0.35355338, %v11837_v25  ;;  %v6990_v47 = vsel %vm6581_vm11, %v11837_v25, -1e+30 }
0x1ea1   : > { %v6980_v60 = vpop.f32.mrf.mxu1  ;;  %v6994_v36 = vsel %vm1851_vm0, %v6990_v47, -inf }
0x1ea2   : > { %6675 = vmax.xlane.f32.xlu0 %v6674_v62  ;;  %v6997_v39 = vmul.f32 %v6980_v60, %v14113_v52  ;;  %v7002_v50 = vsel %vm1851_vm0, %v6998_v57, 0.0  ;;  %v7106_v13 = vsel %vm6786_vm10, -1e+30, %v7104_v0  ;;  %v7103_v4 = vmul.f32 0.35355338, %v6980_v60 }
0x1ea3   : > { %v7110_v12 = vsel %vm1851_vm0, %v7106_v13, -inf  ;;  %v6989_v6 = vsel %vm6580_vm12, %v6980_v60, -1e+30 }
0x1ea4   : > { %6680 = vadd.xlane.f32.xlu1 %v6679_v9  ;;  %v6999_v3 = vsel %vm1851_vm0, %v6997_v39, 0.0  ;;  %v6991_v15 = vsel %vm1851_vm0, %v6989_v6, -inf  ;;  %v7105_v18 = vsel %vm6785_vm6, -1e+30, %v7103_v4 }
0x1ea5   : > { %v7107_v22 = vsel %vm1851_vm0, %v7105_v18, -inf }
0x1ea6   : > { %6672 = vmax.xlane.f32.xlu0 %v6671_v44 }
0x1ea8   : > { %7003 = vadd.xlane.f32.xlu1 %v7002_v50 }
0x1eaa   : > { %6995 = vmax.xlane.f32.xlu0 %v6994_v36 }
0x1eac   : > { %7000 = vadd.xlane.f32.xlu1 %v6999_v3 }
0x1eae   : > { %7111 = vmax.xlane.f32.xlu0 %v7110_v12 }
0x1eb2   : > { %6992 = vmax.xlane.f32.xlu0 %v6991_v15 }
0x1eb6   : > { %7108 = vmax.xlane.f32.xlu0 %v7107_v22 }
0x1f25   : > { %v6794_v27 = vpop.xlane.xlu1 %6793 }
0x1f26   : > { %v6796_v17 = vsub.f32 %v6788_v53, %v6794_v27 }
0x1f27   : > { %v6791_v19 = vpop.xlane.xlu0 %6790 }
0x1f28   : > { %v6799_v35 = vmul.f32 1.442695, %v6796_v17  ;;  %v6795_v33 = vsub.f32 %v6787_v28, %v6791_v19 }
0x1f29   : > { %v6684_v25 = vpop.xlane.xlu1 %6683 }
0x1f2a   : > { %12371 = vpow2.f32 %v6799_v35  ;;  %v6797_v34 = vmul.f32 1.442695, %v6795_v33  ;;  %v6686_v60 = vmul.f32 0.0625, %v6684_v25 }
0x1f2b   : > { %v6676_v7 = vpop.xlane.xlu0 %6675 }
0x1f2c   : > { %12373 = vpow2.f32 %v6797_v34  ;;  %v14177_v47 = vsub.f32 %v6676_v7, %v6686_v60 }
0x1f2d   : > { %v6681_v62 = vpop.xlane.xlu1 %6680 }
0x1f2e   : > { %v6685_v0 = vmul.f32 0.0625, %v6681_v62  ;;  %v6690_v3 = vmul.f32 %v14177_v47, %v13448_v37 }
0x1f2f   : > { %v6673_v45 = vpop.xlane.xlu0 %6672 }
0x1f30   : > { %v14179_v50 = vsub.f32 %v6673_v45, %v6685_v0 }
0x1f31   : > { %v7004_v41 = vpop.xlane.xlu1 %7003 }
0x1f32   : > { %v7006_v12 = vmul.f32 0.0625, %v7004_v41  ;;  %v6689_v4 = vmul.f32 %v14179_v50, %v13457_v43 }
0x1f33   : > { %v6996_v54 = vpop.xlane.xlu0 %6995 }
0x1f34   : > { %v7008_v15 = vsub.f32 %v6996_v54, %v7006_v12 }
0x1f35   : > { %v7001_v57 = vpop.xlane.xlu1 %7000 }
0x1f36   : > { %v7010_v35 = vmul.f32 %v7008_v15, %v13448_v37 }
0x1f37   : > { %v14147_v5 = vpop.eup %12371  ;;  %v7112_v51 = vpop.xlane.xlu0 %7111 }
0x1f38   : > { %v6804_v63 = vsel %vm1851_vm0, %v14147_v5, 0.0  ;;  %v7114_v53 = vsub.f32 %v7106_v13, %v7112_v51  ;;  %v6490_v13 = vsel %vm6488_vm9, 1.0, %v12860_v21 }
0x1f39   : > { %v14151_v23 = vpop.eup %12373  ;;  %6805 = vadd.xlane.f32.xlu0 %v6804_v63 }
0x1f3a   : > { %v6801_v42 = vsel %vm1851_vm0, %v14151_v23, 0.0  ;;  %v7117_v61 = vmul.f32 1.442695, %v7114_v53 }
0x1f3b   : > { %6802 = vadd.xlane.f32.xlu1 %v6801_v42  ;;  %v6993_v59 = vpop.xlane.xlu0 %6992 }
0x1f3c   : > { %12375 = vpow2.f32 %v7117_v61 }
0x1f3f   : > { %v7109_v49 = vpop.xlane.xlu0 %7108 }
0x1f40   : > { %v7113_v29 = vsub.f32 %v7105_v18, %v7109_v49  ;;  %v7005_v18 = vmul.f32 0.0625, %v7001_v57 }
0x1f42   : > { %v7115_v28 = vmul.f32 1.442695, %v7113_v29  ;;  %v7007_v27 = vsub.f32 %v6993_v59, %v7005_v18  ;;  %v14212_v59 = vpop.f32.mrf.mxu0 }
0x1f44   : > { %12377 = vpow2.f32 %v7115_v28  ;;  %v7009_v33 = vmul.f32 %v7007_v27, %v13457_v43 }
0x1f49   : > { %v14163_v48 = vpop.eup %12375 }
0x1f4a   : > { %v7122_v38 = vsel %vm1851_vm0, %v14163_v48, 0.0 }
0x1f4c   : > { %6495 = vrot.lane.b32.xlu1 %v14069_v40, %s14972_s6 }
0x1f4f   : > { %6493 = vrot.lane.b32.xlu0 %v14071_v8, %s14972_s6  ;;  %s14973_s6 = sld [smem:[#allocation59_spill]] }
0x1f51   : > { %v14165_v46 = vpop.eup %12377 }
0x1f52   : > { %v7119_v24 = vsel %vm1851_vm0, %v14165_v46, 0.0 }
0x1f55   : > { %v6394_v51 = vld [vmem:[%s14973_s6 + $0x8] sm:$0xff] }
0x1f56   : > { %11852 = vmatprep.subr.mxu1 %v6394_v51 }
0x1f57   : > { %11853 = vmatpush3.msra.mxu1 %v6394_v51 }
0x1f6e   : > { %7123 = vadd.xlane.f32.xlu0 %v7122_v38 }
0x1f70   : > { %7120 = vadd.xlane.f32.xlu1 %v7119_v24 }
0x1f81   : > { %7131 = vrot.lane.b32.xlu1 %v14069_v40, %s14948_s1 }
0x1f84   : > { %7129 = vrot.lane.b32.xlu0 %v14071_v8, %s14948_s1  ;;  %s14981_s1 = sld [smem:[#allocation51_spill]] }
0x1fc2   : > { %v6806_v9 = vpop.xlane.xlu0 %6805 }
0x1fc3   : > { %12379 = vrcp.f32 %v6806_v9 }
0x1fc4   : > { %v6803_v44 = vpop.xlane.xlu1 %6802 }
0x1fc5   : > { %12381 = vrcp.f32 %v6803_v44 }
0x1fc6   : > { %v6494_v36 = vpop.permute.xlu0 %6493 }
0x1fc8   : > { %v6496_v39 = vpop.permute.xlu1 %6495 }
0x1fc9   : > { %11803 = vmatprep.subr.mxu0 %v6496_v39 }
0x1fca   : > { %11804 = vmatpush3.msra.mxu0 %v6496_v39 }
0x1fcb   : > { %11805 = vmatprep.subr.mxu0 %v6494_v36 }
0x1fcc   : > { %11806 = vmatpush3.msra.mxu0 %v6494_v36 }
0x1fcd   : > { %11808 = vmatmul.mubr.msk.f32.vlgmr.msra.gmra.mxu0 %vm1851_vm0, %v6490_v13  ;;  %11817 = vmatprep.subr.mxu0 %v12860_v21 }
0x1fce   : > { %11818 = vmatpush3.msra.mxu0 %v6690_v3  ;;  %11821 = vmatprep.mubr.msk.f32.mxu0 %vm14856_vm5, %v12860_v21 }
0x1fcf   : > { %11819 = vmatprep.subr.mxu0 %v12860_v21 }
0x1fd0   : > { %11820 = vmatpush3.msra.mxu0 %v6689_v4  ;;  %v12380_v6 = vpop.eup %12379 }
0x1fd1   : > { %11822 = vmatmul.mubr.msk.f32.vlgmr.msra.gmra.mxu0 %vm1851_vm0, %v12864_v58  ;;  %11824 = vmatprep.subr.mxu0 %v6496_v39  ;;  %v6810_v19 = vmul.f32 %v12380_v6, %v14147_v5 }
0x1fd2   : > { %v12382_v22 = vpop.eup %12381  ;;  %11825 = vmatpush3.msra.mxu0 %v6496_v39 }
0x1fd3   : > { %11826 = vmatprep.subr.mxu0 %v6494_v36  ;;  %v6808_v17 = vmul.f32 %v12382_v22, %v14151_v23 }
0x1fd4   : > { %11827 = vmatpush3.msra.mxu0 %v6494_v36 }
0x1fd5   : > { %11828 = vmatprep.mubr.msk.f32.mxu0 %vm1851_vm0, %v6808_v17  ;;  %11838 = vmatprep.subr.mxu0 %v12860_v21 }
0x1fd6   : > { %11829 = vmatmul.mubr.msk.f32.vlgmr.msra.gmra.mxu0 %vm1851_vm0, %v6810_v19 }
0x1fd7   : > { %11839 = vmatpush3.msra.mxu0 %v7010_v35  ;;  %11842 = vmatprep.mubr.msk.f32.mxu0 %vm14856_vm5, %v12860_v21 }
0x1fd8   : > { %11840 = vmatprep.subr.mxu0 %v12860_v21 }
0x1fd9   : > { %11841 = vmatpush3.msra.mxu0 %v7009_v33 }
0x1fda   : > { %11843 = vmatmul.mubr.msk.f32.vlgmr.msra.gmra.mxu0 %vm1851_vm0, %v12864_v58 }
0x1ff7   : > { %v7124_v34 = vpop.xlane.xlu0 %7123 }
0x1ff8   : > { %12383 = vrcp.f32 %v7124_v34 }
0x1ff9   : > { %v7121_v7 = vpop.xlane.xlu1 %7120 }
0x1ffa   : > { %12385 = vrcp.f32 %v7121_v7 }
0x1ffb   : > { %v7130_v63 = vpop.permute.xlu0 %7129 }
0x1ffd   : > { %v7132_v5 = vpop.permute.xlu1 %7131 }
0x1ffe   : > { %11845 = vmatprep.subr.mxu0 %v7132_v5 }
0x1fff   : > { %11846 = vmatpush3.msra.mxu0 %v7132_v5 }
0x2000   : > { %11847 = vmatprep.subr.mxu0 %v7130_v63 }
0x2001   : > { %11848 = vmatpush3.msra.mxu0 %v7130_v63 }
0x2005   : > { %v12384_v23 = vpop.eup %12383 }
0x2006   : > { %v7128_v54 = vmul.f32 %v12384_v23, %v14163_v48 }
0x2007   : > { %v12386_v42 = vpop.eup %12385 }
0x2008   : > { %v7126_v45 = vmul.f32 %v12386_v42, %v14165_v46 }
0x200a   : > { %11849 = vmatprep.mubr.msk.f32.mxu0 %vm1851_vm0, %v7126_v45 }
0x200b   : > { %11850 = vmatmul.mubr.msk.f32.vlgmr.msra.gmra.mxu0 %vm1851_vm0, %v7128_v54 }
0x208d   : > { %v14214_v49 = vpop.f32.mrf.mxu0 }
0x208e   : > { %7224 = vrot.lane.b32.xlu0 %v14214_v49, %s14970_s5 }
0x208f   : > { %v14218_v53 = vpop.f32.mrf.mxu0 }
0x2090   : > { %7222 = vrot.lane.b32.xlu1 %v14218_v53, %s14970_s5 }
0x2091   : > { %v6757_v29 = vpop.f32.mrf.mxu0 }
0x2092   : > { %v6764_v22 = vrot.slane %v6757_v29, %v13492_v10 }
0x2093   : > { %v11823_v61 = vpop.f32.mrf.mxu0 }
0x2094   : > { %7398 = vrot.lane.b32.xlu1 %v14069_v40, %s14950_s2 }
0x2096   : > { %v14224_v28 = vpop.f32.mrf.mxu0 }
0x2098   : > { %7396 = vrot.lane.b32.xlu1 %v14071_v8, %s14950_s2  ;;  %v14228_v48 = vpop.f32.mrf.mxu0 }
0x209a   : > { %v7077_v46 = vpop.f32.mrf.mxu0 }
0x209b   : > { %v7084_v38 = vrot.slane %v7077_v46, %v13492_v10 }
0x209c   : > { %v11844_v24 = vpop.f32.mrf.mxu0 }
0x209d   : > { %vm7088_vm3 = vcmp.eq.f32.partialorder %v7084_v38, %v7008_v15  ;;  %vm7086_vm4 = vcmp.gt.f32.partialorder %v7084_v38, %v7008_v15  ;;  %vm7087_vm7 = vcmp.eq.f32.partialorder %v7084_v38, %v7007_v27  ;;  %vm7085_vm9 = vcmp.gt.f32.partialorder %v7084_v38, %v7007_v27 }
0x209e   : > { %vm7090_vm13 = vmand %vm7088_vm3, %vm13497_vm8  ;;  %vm6767_vm3 = vcmp.eq.f32.partialorder %v6764_v22, %v14179_v50 }
0x209f   : > { %vm7092_vm14 = vmor %vm7086_vm4, %vm7090_vm13  ;;  %vm6768_vm4 = vcmp.eq.f32.partialorder %v6764_v22, %v14177_v47  ;;  %vm6765_vm13 = vcmp.gt.f32.partialorder %v6764_v22, %v14179_v50 }
0x20a0   : > { %v7094_v25 = vsel %vm7092_vm14, 1.0, %v12860_v21  ;;  %vm7089_vm1 = vmand %vm7087_vm7, %vm13505_vm15  ;;  %vm6766_vm7 = vcmp.gt.f32.partialorder %v6764_v22, %v14177_v47 }
0x20a1   : > { %v7098_v62 = vsel %vm1851_vm0, %v7094_v25, 0.0  ;;  %vm7091_vm5 = vmor %vm7085_vm9, %vm7089_vm1  ;;  %v6393_v25 = vld [vmem:[%s14973_s6] sm:$0xff] }
0x20a2   : > { %v7093_v41 = vsel %vm7091_vm5, 1.0, %v12860_v21  ;;  %vm6769_vm14 = vmand %vm6767_vm3, %vm13505_vm15  ;;  %11857 = vmatprep.subr.mxu0 %v6393_v25 }
0x20a3   : > { %v7095_v57 = vsel %vm1851_vm0, %v7093_v41, 0.0  ;;  %vm6770_vm9 = vmand %vm6768_vm4, %vm13497_vm8  ;;  %11858 = vmatpush3.msra.mxu0 %v6393_v25 }
0x20a4   : > { %11869 = vmatprep.subr.mxu0 %v12860_v21 }
0x20ad   : > { %7099 = vadd.xlane.f32.xlu0 %v7098_v62 }
0x20bc   : > { %7096 = vadd.xlane.f32.xlu1 %v7095_v57 }
0x20c3   : > { %7392 = vrot.lane.b32.xlu0 %v14071_v8, %s14951_s23 }
0x20cb   : > { %v11851_v39 = vpop.f32.mrf.mxu0 }
0x20cd   : > { %7394 = vrot.lane.b32.xlu1 %v14069_v40, %s14951_s23  ;;  %v7207_v3 = vpop.f32.mrf.mxu0 }
0x2100   : > { %v7225_v44 = vpop.permute.xlu0 %7224 }
0x2102   : > { %v7223_v9 = vpop.permute.xlu1 %7222 }
0x2106   : > { %v7399_v60 = vpop.permute.xlu1 %7398 }
0x2107   : > { %11862 = vmatprep.subr.msk.mxu1 %vm2134_vm2, %v7399_v60 }
0x210a   : > { %v7397_v0 = vpop.permute.xlu1 %7396 }
0x2136   : > { %v7100_v36 = vpop.xlane.xlu0 %7099 }
0x2137   : > { %vm7102_vm1 = vcmp.lt.f32.partialorder %v7100_v36, 15.0 }
0x2138   : > { %v7229_v4 = vsel %vm7102_vm1, %v11851_v39, %v7225_v44  ;;  %vm6771_vm1 = vmor %vm6765_vm13, %vm6769_vm14  ;;  %vm14974_vm13 = vmmov 0  }
0x2139   : > { %v6773_v51 = vsel %vm6771_vm1, 1.0, %v12860_v21 }
0x213a   : > { %v7393_v6 = vpop.permute.xlu0 %7392  ;;  %v6775_v61 = vsel %vm1851_vm0, %v6773_v51, 0.0 }
0x2145   : > { %v7097_v13 = vpop.xlane.xlu1 %7096 }
0x2146   : > { %vm7101_vm5 = vcmp.lt.f32.partialorder %v7097_v13, 15.0 }
0x2147   : > { %v7228_v12 = vsel %vm7101_vm5, %v7207_v3, %v7223_v9  ;;  %vm6772_vm5 = vmor %vm6766_vm7, %vm6770_vm9 }
0x2148   : > { %11854 = vmatprep.mubr.msk.f32.mxu1 %vm2134_vm2, %v7228_v12  ;;  %v6774_v47 = vsel %vm6772_vm5, 1.0, %v12860_v21 }
0x2149   : > { %11855 = vmatmul.mubr.msk.f32.vlgmr.msra.gmra.mxu1 %vm2134_vm2, %v7229_v4  ;;  %v7395_v15 = vpop.permute.xlu1 %7394  ;;  %v6778_v38 = vsel %vm1851_vm0, %v6774_v47, 0.0 }
0x214a   : > { %11863 = vmatpush3.xpose.msk.msra.mxu1 %vm2134_vm2, %v7399_v60  ;;  %11866 = vmatprep.mubr.msk.f32.mxu1 %vm2134_vm2, %v7393_v6 }
0x214b   : > { %11864 = vmatprep.subr.msk.mxu1 %vm2134_vm2, %v7397_v0 }
0x214e   : > { %11865 = vmatpush3.xpose.msk.msra.mxu1 %vm2134_vm2, %v7397_v0 }
0x2151   : > { %11867 = vmatmul.mubr.msk.f32.vlgmr.msra.gmra.mxu1 %vm2134_vm2, %v7395_v15 }
0x2209   : > { %v14251_v18 = vpop.f32.mrf.mxu1 }
0x220b   : > { %v14254_v27 = vpop.f32.mrf.mxu1 }
0x2211   : > { %v11868_v17 = vpop.f32.mrf.mxu1 }
0x2212   : > { %v7598_v19 = vmul.f32 0.35355338, %v11868_v17  ;;  %v7492_v7 = vmul.f32 %v11868_v17, %v14102_v55  ;;  %v7484_v42 = vsel %vm6581_vm11, %v11868_v17, -1e+30 }
0x2213   : > { %v7474_v35 = vpop.f32.mrf.mxu1  ;;  %v7488_v50 = vsel %vm1851_vm0, %v7484_v42, -inf }
0x2214   : > { %v7597_v33 = vmul.f32 0.35355338, %v7474_v35  ;;  %v7600_v34 = vsel %vm6786_vm10, -1e+30, %v7598_v19  ;;  %v7491_v45 = vmul.f32 %v7474_v35, %v14113_v52  ;;  %v7496_v54 = vsel %vm1851_vm0, %v7492_v7, 0.0 }
0x2215   : > { %v7604_v5 = vsel %vm1851_vm0, %v7600_v34, -inf  ;;  %v7483_v46 = vsel %vm6580_vm12, %v7474_v35, -1e+30 }
0x2216   : > { %7605 = vmax.xlane.f32.xlu1 %v7604_v5  ;;  %v7599_v63 = vsel %vm6785_vm6, -1e+30, %v7597_v33  ;;  %v7493_v29 = vsel %vm1851_vm0, %v7491_v45, 0.0  ;;  %v7485_v24 = vsel %vm1851_vm0, %v7483_v46, -inf }
0x2217   : > { %v7601_v23 = vsel %vm1851_vm0, %v7599_v63, -inf }
0x2218   : > { %7602 = vmax.xlane.f32.xlu0 %v7601_v23 }
0x221a   : > { %7497 = vadd.xlane.f32.xlu1 %v7496_v54 }
0x221c   : > { %7489 = vmax.xlane.f32.xlu0 %v7488_v50 }
0x221e   : > { %7494 = vadd.xlane.f32.xlu1 %v7493_v29 }
0x2220   : > { %6776 = vadd.xlane.f32.xlu0 %v6775_v61 }
0x2222   : > { %6779 = vadd.xlane.f32.xlu1 %v6778_v38 }
0x2224   : > { %7486 = vmax.xlane.f32.xlu0 %v7485_v24 }
0x2233   : > { %7625 = vrot.lane.b32.xlu1 %v14069_v40, %s14952_s28 }
0x2237   : > { %7811 = vrot.lane.b32.xlu1 %v14069_v40, %s14953_s0 }
0x223b   : > { %7809 = vrot.lane.b32.xlu1 %v14071_v8, %s14953_s0 }
0x223f   : > { %7807 = vrot.lane.b32.xlu1 %v14069_v40, %s14954_s3 }
0x229f   : > { %v7606_v62 = vpop.xlane.xlu1 %7605 }
0x22a0   : > { %v7608_v41 = vsub.f32 %v7600_v34, %v7606_v62 }
0x22a1   : > { %v7603_v57 = vpop.xlane.xlu0 %7602 }
0x22a2   : > { %v7611_v9 = vmul.f32 1.442695, %v7608_v41  ;;  %v7607_v60 = vsub.f32 %v7599_v63, %v7603_v57 }
0x22a3   : > { %v7498_v44 = vpop.xlane.xlu1 %7497 }
0x22a4   : > { %12387 = vpow2.f32 %v7611_v9  ;;  %v7609_v0 = vmul.f32 1.442695, %v7607_v60  ;;  %v7500_v39 = vmul.f32 0.0625, %v7498_v44 }
0x22a5   : > { %v7490_v36 = vpop.xlane.xlu0 %7489 }
0x22a6   : > { %12389 = vpow2.f32 %v7609_v0  ;;  %v14296_v3 = vsub.f32 %v7490_v36, %v7500_v39 }
0x22a7   : > { %v7495_v13 = vpop.xlane.xlu1 %7494 }
0x22a8   : > { %v7499_v15 = vmul.f32 0.0625, %v7495_v13  ;;  %v7504_v22 = vmul.f32 %v14296_v3, %v13448_v37 }
0x22a9   : > { %v6777_v12 = vpop.xlane.xlu0 %6776 }
0x22aa   : > { %vm6781_vm3 = vcmp.lt.f32.partialorder %v6777_v12, 15.0 }
0x22ab   : > { %v6780_v4 = vpop.xlane.xlu1 %6779  ;;  %v6896_v6 = vsel %vm6781_vm3, %v14228_v48, %v14218_v53 }
0x22ac   : > { %vm6782_vm4 = vcmp.lt.f32.partialorder %v6780_v4, 15.0  ;;  %11859 = vmatprep.mubr.msk.f32.mxu0 %vm2134_vm2, %v6896_v6 }
0x22ad   : > { %v6897_v17 = vsel %vm6782_vm4, %v14224_v28, %v14214_v49  ;;  %v7487_v19 = vpop.xlane.xlu0 %7486 }
0x22ae   : > { %v7501_v35 = vsub.f32 %v7487_v19, %v7499_v15  ;;  %11860 = vmatmul.mubr.msk.f32.vlgmr.msra.gmra.mxu0 %vm2134_vm2, %v6897_v17 }
0x22af   : > { %11870 = vmatpush3.msra.mxu0 %v7504_v22  ;;  %11873 = vmatprep.mubr.msk.f32.mxu0 %vm14974_vm13, %v12860_v21  ;;  %v7626_v5 = vpop.permute.xlu1 %7625 }
0x22b0   : > { %v7503_v48 = vmul.f32 %v7501_v35, %v13457_v43  ;;  %11871 = vmatprep.subr.mxu0 %v12860_v21 }
0x22b1   : > { %v12388_v33 = vpop.eup %12387 }
0x22b2   : > { %11872 = vmatpush3.msra.mxu0 %v7503_v48  ;;  %v7616_v34 = vsel %vm1851_vm0, %v12388_v33, 0.0 }
0x22b3   : > { %v12390_v7 = vpop.eup %12389  ;;  %7617 = vadd.xlane.f32.xlu0 %v7616_v34  ;;  %11874 = vmatmul.mubr.msk.f32.vlgmr.msra.gmra.mxu0 %vm1851_vm0, %v12864_v58  ;;  %v7812_v45 = vpop.permute.xlu1 %7811 }
0x22b4   : > { %11876 = vmatprep.subr.mxu0 %v7626_v5  ;;  %v7613_v28 = vsel %vm1851_vm0, %v12390_v7, 0.0 }
0x22b5   : > { %11877 = vmatpush3.msra.mxu0 %v7626_v5 }
0x22b7   : > { %7614 = vadd.xlane.f32.xlu0 %v7613_v28  ;;  %v7810_v61 = vpop.permute.xlu1 %7809 }
0x22bb   : > { %v7808_v46 = vpop.permute.xlu1 %7807 }
0x22cd   : > { %7623 = vrot.lane.b32.xlu0 %v14071_v8, %s14952_s28  ;;  %s14979_s28 = sld [smem:[#allocation60_spill]] }
0x22d1   : > { %7805 = vrot.lane.b32.xlu0 %v14071_v8, %s14954_s3 }
0x233c   : > { %v7618_v63 = vpop.xlane.xlu0 %7617 }
0x233d   : > { %12391 = vrcp.f32 %v7618_v63 }
0x2340   : > { %v7615_v23 = vpop.xlane.xlu0 %7614 }
0x2341   : > { %12393 = vrcp.f32 %v7615_v23 }
0x2344   : > { %v7624_v42 = vpop.permute.xlu0 %7623 }
0x2345   : > { %11878 = vmatprep.subr.mxu0 %v7624_v42 }
0x2346   : > { %11879 = vmatpush3.msra.mxu0 %v7624_v42 }
0x2347   : > { %11888 = vmatprep.subr.msk.mxu0 %vm2134_vm2, %v7812_v45 }
0x2348   : > { %v7806_v47 = vpop.permute.xlu0 %7805 }
0x234a   : > { %v12392_v54 = vpop.eup %12391 }
0x234b   : > { %v7622_v29 = vmul.f32 %v12392_v54, %v12388_v33  ;;  %v6395_v33 = vld [vmem:[%s14973_s6 + $0x10] sm:$0xff] }
0x234c   : > { %11883 = vmatprep.subr.mxu1 %v6395_v33 }
0x234d   : > { %11884 = vmatpush3.msra.mxu1 %v6395_v33  ;;  %v6396_v33 = vld [vmem:[%s14973_s6 + $0x18] sm:$0xff]  ;;  %s14983_s6 = sld [smem:[#allocation63_spill]] }
0x234e   : > { %v12394_v50 = vpop.eup %12393  ;;  %11895 = vmatprep.subr.mxu1 %v12860_v21 }
0x234f   : > { %v7620_v51 = vmul.f32 %v12394_v50, %v12390_v7 }
0x2351   : > { %11880 = vmatprep.mubr.msk.f32.mxu0 %vm1851_vm0, %v7620_v51 }
0x2352   : > { %11881 = vmatmul.mubr.msk.f32.vlgmr.msra.gmra.mxu0 %vm1851_vm0, %v7622_v29 }
0x2353   : > { %11889 = vmatpush3.xpose.msk.msra.mxu0 %vm2134_vm2, %v7812_v45  ;;  %11892 = vmatprep.mubr.msk.f32.mxu0 %vm2134_vm2, %v7806_v47 }
0x2354   : > { %11890 = vmatprep.subr.msk.mxu0 %vm2134_vm2, %v7810_v61 }
0x2357   : > { %11891 = vmatpush3.xpose.msk.msra.mxu0 %vm2134_vm2, %v7810_v61 }
0x2358   : > { %11909 = vmatprep.subr.mxu0 %v6396_v33 }
0x235a   : > { %11893 = vmatmul.mubr.msk.f32.vlgmr.msra.gmra.mxu0 %vm2134_vm2, %v7808_v46 }
0x235b   : > { %11910 = vmatpush3.msra.mxu0 %v6396_v33 }
0x236e   : > { %v14326_v38 = vpop.f32.mrf.mxu0 }
0x2370   : > { %v14328_v24 = vpop.f32.mrf.mxu0 }
0x2373   : > { %v7571_v25 = vpop.f32.mrf.mxu0 }
0x2374   : > { %v7578_v62 = vrot.slane %v7571_v25, %v13492_v10 }
0x2375   : > { %v11875_v41 = vpop.f32.mrf.mxu0 }
0x2376   : > { %vm7579_vm14 = vcmp.gt.f32.partialorder %v7578_v62, %v7501_v35  ;;  %vm7581_vm7 = vcmp.eq.f32.partialorder %v7578_v62, %v7501_v35  ;;  %vm7582_vm5 = vcmp.eq.f32.partialorder %v7578_v62, %v14296_v3  ;;  %vm7580_vm3 = vcmp.gt.f32.partialorder %v7578_v62, %v14296_v3 }
0x2377   : > { %vm7583_vm9 = vmand %vm7581_vm7, %vm13505_vm15 }
0x2378   : > { %vm7585_vm1 = vmor %vm7579_vm14, %vm7583_vm9 }
0x2379   : > { %v7587_v57 = vsel %vm7585_vm1, 1.0, %v12860_v21  ;;  %vm7584_vm4 = vmand %vm7582_vm5, %vm13497_vm8 }
0x237a   : > { %v7589_v9 = vsel %vm1851_vm0, %v7587_v57, 0.0  ;;  %vm7586_vm14 = vmor %vm7580_vm3, %vm7584_vm4 }
0x237b   : > { %7590 = vadd.xlane.f32.xlu0 %v7589_v9  ;;  %v7588_v35 = vsel %vm7586_vm14, 1.0, %v12860_v21  ;;  %vm14976_vm14 = vcmask 261120  }
0x237c   : > { %v7592_v30 = vsel %vm1851_vm0, %v7588_v35, 0.0 }
0x2404   : > { %v7591_v34 = vpop.xlane.xlu0 %7590 }
0x2412   : > { %v11882_v60 = vpop.f32.mrf.mxu0 }
0x2414   : > { %v7701_v44 = vpop.f32.mrf.mxu0 }
0x241a   : > { %v11894_v0 = vpop.f32.mrf.mxu0 }
0x241b   : > { %v7905_v39 = vmul.f32 %v11894_v0, %v14102_v55  ;;  %v8011_v36 = vmul.f32 0.35355338, %v11894_v0  ;;  %v7897_v13 = vsel %vm6581_vm11, %v11894_v0, -1e+30 }
0x241c   : > { %v7887_v12 = vpop.f32.mrf.mxu0  ;;  %v7901_v4 = vsel %vm1851_vm0, %v7897_v13, -inf }
0x241d   : > { %v8010_v6 = vmul.f32 0.35355338, %v7887_v12  ;;  %7902 = vmax.xlane.f32.xlu1 %v7901_v4  ;;  %v7909_v15 = vsel %vm1851_vm0, %v7905_v39, 0.0  ;;  %v8013_v22 = vsel %vm6786_vm10, -1e+30, %v8011_v36  ;;  %v7904_v19 = vmul.f32 %v7887_v12, %v14113_v52 }
0x241e   : > { %7910 = vadd.xlane.f32.xlu0 %v7909_v15  ;;  %v8017_v3 = vsel %vm1851_vm0, %v8013_v22, -inf  ;;  %v7896_v26 = vsel %vm6580_vm12, %v7887_v12, -1e+30  ;;  %vm7595_vm10 = vcmp.lt.f32.partialorder %v7591_v34, 15.0 }
0x241f   : > { %v8012_v55 = vsel %vm6785_vm6, -1e+30, %v8010_v6  ;;  %v7906_v48 = vsel %vm1851_vm0, %v7904_v19, 0.0  ;;  %v7898_v31 = vsel %vm1851_vm0, %v7896_v26, -inf }
0x2420   : > { %v8014_v17 = vsel %vm1851_vm0, %v8012_v55, -inf }
0x2421   : > { %8018 = vmax.xlane.f32.xlu1 %v8017_v3 }
0x2422   : > { %8015 = vmax.xlane.f32.xlu0 %v8014_v17  ;;  %v7384_v17 = vadd.f32 %v14328_v24, %v14254_v27 }
0x2425   : > { %7593 = vadd.xlane.f32.xlu1 %v7592_v30 }
0x2426   : > { %7907 = vadd.xlane.f32.xlu0 %v7906_v48 }
0x242a   : > { %7899 = vmax.xlane.f32.xlu0 %v7898_v31 }
0x2436   : > { %7714 = vrot.lane.b32.xlu1 %v14218_v53, %s14951_s23 }
0x2440   : > { %7716 = vrot.lane.b32.xlu0 %v14214_v49, %s14951_s23 }
0x24a6   : > { %v7903_v7 = vpop.xlane.xlu1 %7902 }
0x24a7   : > { %v7911_v5 = vpop.xlane.xlu0 %7910 }
0x24a8   : > { %v7913_v51 = vmul.f32 0.0625, %v7911_v5 }
0x24aa   : > { %v8019_v28 = vpop.xlane.xlu1 %8018  ;;  %v7915_v46 = vsub.f32 %v7903_v7, %v7913_v51 }
0x24ab   : > { %v8021_v52 = vsub.f32 %v8013_v22, %v8019_v28  ;;  %v8016_v63 = vpop.xlane.xlu0 %8015 }
0x24ac   : > { %v8020_v23 = vsub.f32 %v8012_v55, %v8016_v63  ;;  %v7917_v9 = vmul.f32 %v7915_v46, %v13448_v37 }
0x24ad   : > { %v8024_v42 = vmul.f32 1.442695, %v8021_v52 }
0x24ae   : > { %v8022_v45 = vmul.f32 1.442695, %v8020_v23  ;;  %v7594_v54 = vpop.xlane.xlu1 %7593 }
0x24af   : > { %12395 = vpow2.f32 %v8024_v42  ;;  %v7908_v50 = vpop.xlane.xlu0 %7907  ;;  %vm7596_vm6 = vcmp.lt.f32.partialorder %v7594_v54, 15.0 }
0x24b0   : > { %12397 = vpow2.f32 %v8022_v45  ;;  %v7912_v25 = vmul.f32 0.0625, %v7908_v50 }
0x24b2   : > { %v7715_v29 = vpop.permute.xlu1 %7714 }
0x24b3   : > { %v7720_v47 = vsel %vm7595_vm10, %v7701_v44, %v7715_v29  ;;  %v7900_v61 = vpop.xlane.xlu0 %7899  ;;  %vm14977_vm10 = vmmov %vm14976_vm14 }
0x24b4   : > { %11885 = vmatprep.mubr.msk.f32.mxu1 %vm2134_vm2, %v7720_v47  ;;  %v7914_v62 = vsub.f32 %v7900_v61, %v7912_v25 }
0x24b6   : > { %v7916_v0 = vmul.f32 %v7914_v62, %v13457_v43 }
0x24b7   : > { %v7717_v41 = vpop.permute.xlu0 %7716 }
0x24b8   : > { %v7721_v57 = vsel %vm7596_vm6, %v11882_v60, %v7717_v41 }
0x24b9   : > { %11886 = vmatmul.mubr.msk.f32.vlgmr.msra.gmra.mxu1 %vm2134_vm2, %v7721_v57 }
0x24ba   : > { %11896 = vmatpush3.msra.mxu1 %v7917_v9  ;;  %11899 = vmatprep.mubr.msk.f32.mxu1 %vm14974_vm13, %v12860_v21 }
0x24bb   : > { %11897 = vmatprep.subr.mxu1 %v12860_v21 }
0x24bc   : > { %v12396_v44 = vpop.eup %12395  ;;  %11898 = vmatpush3.msra.mxu1 %v7916_v0 }
0x24bd   : > { %v12398_v39 = vpop.eup %12397  ;;  %11900 = vmatmul.mubr.msk.f32.vlgmr.msra.gmra.mxu1 %vm1851_vm0, %v12864_v58  ;;  %v8029_v60 = vsel %vm1851_vm0, %v12396_v44, 0.0 }
0x24be   : > { %8030 = vadd.xlane.f32.xlu0 %v8029_v60  ;;  %v8026_v36 = vsel %vm1851_vm0, %v12398_v39, 0.0 }
0x24bf   : > { %8027 = vadd.xlane.f32.xlu1 %v8026_v36 }
0x24d0   : > { %8038 = vrot.lane.b32.xlu1 %v14069_v40, %s14955_s4  ;;  %v7389_v40 = vadd.f32 %v14326_v38, %v14251_v18 }
0x24d4   : > { %8036 = vrot.lane.b32.xlu0 %v14071_v8, %s14955_s4  ;;  %s14975_s4 = sld [smem:[#allocation50_spill]] }
0x24da   : > { %v11025_v34 = vld [vmem:[%s14975_s4] ss:$0 sm:$0xff]  ;;  %s14982_s4 = sld [smem:[#allocation52_spill]] }
0x24db   : > { %v6210_v7 = vadd.f32 %v14210_v56, %v11025_v34  ;;  %v6205_v5 = vadd.f32 %v11025_v34, %v14212_v59  ;;  %v8275_v34 = vld [vmem:[%s14983_s6 + $0x18] sm:$0xff] }
0x24dd   : > { %v6214_v28 = vadd.f32 %v6210_v7, %v14030_v2  ;;  %v6213_v52 = vadd.f32 %v6205_v5, %v14028_v1  ;;  %v8274_v7 = vld [vmem:[%s14983_s6 + $0x10] sm:$0xff]  ;;  %v8273_v5 = vld [vmem:[%s14983_s6 + $0x8] sm:$0xff] }
0x24df   : > { %v6220_v63 = vsel %vm14976_vm14, %v6214_v28, 0.0 }
0x2547   : > { %v8031_v13 = vpop.xlane.xlu0 %8030 }
0x2548   : > { %12399 = vrcp.f32 %v8031_v13  ;;  %v8028_v12 = vpop.xlane.xlu1 %8027 }
0x2549   : > { %12401 = vrcp.f32 %v8028_v12 }
0x254b   : > { %v8037_v6 = vpop.permute.xlu0 %8036 }
0x254c   : > { %v8039_v4 = vpop.permute.xlu1 %8038 }
0x254d   : > { %11902 = vmatprep.subr.mxu1 %v8039_v4 }
0x254e   : > { %11903 = vmatpush3.msra.mxu1 %v8039_v4 }
0x254f   : > { %11904 = vmatprep.subr.mxu1 %v8037_v6 }
0x2550   : > { %11905 = vmatpush3.msra.mxu1 %v8037_v6  ;;  %v11075_v6 = vld [vmem:[%s14979_s28] ss:$0 sm:$0xff]  ;;  %s14992_s28 = sld [smem:[#allocation53_spill]] }
0x2551   : > { %11914 = vmatprep.subr.mxu1 %v8275_v34 }
0x2555   : > { %v12400_v15 = vpop.eup %12399 }
0x2556   : > { %v12402_v22 = vpop.eup %12401  ;;  %v8035_v3 = vmul.f32 %v12400_v15, %v12396_v44  ;;  %v11028_v15 = vld [vmem:[%s14981_s1] ss:$0 sm:$0xff]  ;;  %s14993_s1 = sld [smem:[#allocation54_spill]] }
0x2557   : > { %v8033_v55 = vmul.f32 %v12402_v22, %v12398_v39 }
0x2559   : > { %11906 = vmatprep.mubr.msk.f32.mxu1 %vm1851_vm0, %v8033_v55 }
0x255a   : > { %11907 = vmatmul.mubr.msk.f32.vlgmr.msra.gmra.mxu1 %vm1851_vm0, %v8035_v3 }
0x255b   : > { %11915 = vmatpush3.msra.mxu1 %v8275_v34 }
0x255c   : > { %11916 = vmatprep.subr.mxu1 %v8274_v7 }
0x255d   : > { %11917 = vmatpush3.msra.mxu1 %v8274_v7 }
0x255e   : > { %11918 = vmatprep.subr.mxu1 %v8273_v5 }
0x255f   : > { %11919 = vmatpush3.msra.mxu1 %v8273_v5 }
0x2579   : > { %v11887_v8 = vpop.f32.mrf.mxu1 }
0x257a   : > { %v14386_v19 = vadd.f32 %v11887_v8, %v7389_v40  ;;  %v11029_v40 = vld [vmem:[%s14982_s4] ss:$0 sm:$0xff]  ;;  %s14995_s4 = sld [smem:[#allocation61_spill]] }
0x257b   : > { %v7794_v35 = vpop.f32.mrf.mxu1 }
0x257c   : > { %v14388_v30 = vadd.f32 %v7794_v35, %v7384_v17 }
0x257d   : > { %v7984_v48 = vpop.f32.mrf.mxu1 }
0x257e   : > { %v7991_v26 = vrot.slane %v7984_v48, %v13492_v10 }
0x257f   : > { %v11901_v31 = vpop.f32.mrf.mxu1 }
0x2580   : > { %vm7993_vm11 = vcmp.gt.f32.partialorder %v7991_v26, %v7915_v46  ;;  %vm7995_vm12 = vcmp.eq.f32.partialorder %v7991_v26, %v7915_v46  ;;  %vm7994_vm7 = vcmp.eq.f32.partialorder %v7991_v26, %v7914_v62  ;;  %vm7992_vm1 = vcmp.gt.f32.partialorder %v7991_v26, %v7914_v62 }
0x2581   : > { %vm7997_vm9 = vmand %vm7995_vm12, %vm13497_vm8 }
0x2582   : > { %vm7999_vm5 = vmor %vm7993_vm11, %vm7997_vm9 }
0x2583   : > { %v8001_v18 = vsel %vm7999_vm5, 1.0, %v12860_v21  ;;  %vm7996_vm3 = vmand %vm7994_vm7, %vm13505_vm15 }
0x2584   : > { %v8005_v27 = vsel %vm1851_vm0, %v8001_v18, 0.0  ;;  %vm7998_vm4 = vmor %vm7992_vm1, %vm7996_vm3 }
0x2585   : > { %8006 = vadd.xlane.f32.xlu0 %v8005_v27  ;;  %v8000_v38 = vsel %vm7998_vm4, 1.0, %v12860_v21  ;;  %vm14978_vm12 = vmmov %vm14977_vm10 }
0x2586   : > { %v8002_v24 = vsel %vm1851_vm0, %v8000_v38, 0.0  ;;  %vm14980_vm7 = vmmov %vm14977_vm10 }
0x2587   : > { %8003 = vadd.xlane.f32.xlu1 %v8002_v24  ;;  %vm14984_vm9 = vmmov %vm14980_vm7 }
0x2588   : > { %vm14985_vm1 = vmmov %vm14980_vm7 }
0x2589   : > { %vm14986_vm5 = vmmov %vm14985_vm1 }
0x258a   : > { %vm14987_vm3 = vmmov %vm14985_vm1 }
0x258b   : > { %vm14988_vm4 = vmmov %vm14985_vm1 }
0x258c   : > { %vm14989_vm14 = vmmov %vm14985_vm1 }
0x2598   : > { %8127 = vrot.lane.b32.xlu1 %v14218_v53, %s14954_s3  ;;  %v6217_v53 = vsel %vm14977_vm10, %v6213_v52, 0.0  ;;  %vm14990_vm10 = vmmov %vm14985_vm1 }
0x259b   : > { %8129 = vrot.lane.b32.xlu0 %v14214_v49, %s14954_s3 }
0x25ba   : > { %6221 = vadd.xlane.f32.xlu0 %v6220_v63 }
0x25bc   : > { %6218 = vadd.xlane.f32.xlu1 %v6217_v53 }
0x260e   : > { %v8007_v49 = vpop.xlane.xlu0 %8006 }
0x260f   : > { %vm8009_vm11 = vcmp.lt.f32.partialorder %v8007_v49, 15.0 }
0x2610   : > { %v8004_v23 = vpop.xlane.xlu1 %8003 }
0x2611   : > { %vm8008_vm6 = vcmp.lt.f32.partialorder %v8004_v23, 15.0 }
0x2612   : > { %v8130_v56 = vpop.permute.xlu0 %8129 }
0x2614   : > { %v8128_v45 = vpop.permute.xlu1 %8127 }
0x261a   : > { %v11908_v42 = vpop.f32.mrf.mxu1 }
0x261b   : > { %v8134_v59 = vsel %vm8009_vm11, %v11908_v42, %v8130_v56  ;;  %vm14994_vm11 = vmmov %vm14985_vm1 }
0x261c   : > { %v8114_v54 = vpop.f32.mrf.mxu1 }
0x261d   : > { %v8133_v50 = vsel %vm8008_vm6, %v8114_v54, %v8128_v45  ;;  %vm14991_vm6 = vmmov %vm14985_vm1 }
0x261e   : > { %11911 = vmatprep.mubr.msk.f32.mxu0 %vm2134_vm2, %v8133_v50 }
0x261f   : > { %11912 = vmatmul.mubr.msk.f32.vlgmr.msra.gmra.mxu0 %vm2134_vm2, %v8134_v59 }
0x2643   : > { %v6222_v1 = vpop.xlane.xlu0 %6221 }
0x2644   : > { %v6224_v2 = vmul.f32 0.03125, %v6222_v1 }
0x2645   : > { %v6219_v51 = vpop.xlane.xlu1 %6218 }
0x2646   : > { %v6226_v29 = vsub.f32 %v6214_v28, %v6224_v2  ;;  %v6223_v47 = vmul.f32 0.03125, %v6219_v51 }
0x2648   : > { %v6225_v61 = vsub.f32 %v6213_v52, %v6223_v47  ;;  %v6228_v46 = vmul.f32 %v6226_v29, %v6226_v29 }
0x264a   : > { %v6232_v25 = vsel %vm14978_vm12, %v6228_v46, 0.0  ;;  %v6227_v62 = vmul.f32 %v6225_v61, %v6225_v61  ;;  %vm14997_vm12 = vmmov %vm14985_vm1 }
0x264b   : > { %6233 = vadd.xlane.f32.xlu0 %v6232_v25  ;;  %v14438_v25 = vld [vmem:[#allocation2] ss:$0 sm:$0xff] }
0x264c   : > { %v6229_v41 = vsel %vm14980_vm7, %v6227_v62, 0.0  ;;  %vm14998_vm7 = vmmov %vm14985_vm1 }
0x264d   : > { %6230 = vadd.xlane.f32.xlu1 %v6229_v41 }
0x26d4   : > { %v6234_v57 = vpop.xlane.xlu0 %6233 }
0x26d5   : > { %v6236_v9 = vmul.f32 0.03125, %v6234_v57 }
0x26d6   : > { %v6231_v0 = vpop.xlane.xlu1 %6230 }
0x26d7   : > { %v6238_v44 = vadd.f32 1e-05, %v6236_v9  ;;  %v6235_v39 = vmul.f32 0.03125, %v6231_v0 }
0x26d9   : > { %12403 = vrsqrt.f32 %v6238_v44  ;;  %v6237_v60 = vadd.f32 1e-05, %v6235_v39 }
0x26db   : > { %12405 = vrsqrt.f32 %v6237_v60 }
0x26df   : > { %v11913_v36 = vpop.f32.mrf.mxu0 }
0x26e0   : > { %v8217_v12 = vadd.f32 %v11913_v36, %v14386_v19 }
0x26e1   : > { %v8207_v13 = vpop.f32.mrf.mxu0 }
0x26e2   : > { %v8216_v22 = vadd.f32 %v8207_v13, %v14388_v30  ;;  %v8225_v8 = vadd.f32 %v11075_v6, %v8217_v12  ;;  %v11030_v13 = vld [vmem:[%s14992_s28] ss:$0 sm:$0xff] }
0x26e4   : > { %v8224_v48 = vadd.f32 %v11075_v6, %v8216_v22  ;;  %v8227_v27 = vadd.f32 %v8225_v8, %v14059_v20  ;;  %v8272_v20 = vld [vmem:[%s14983_s6] sm:$0xff]  ;;  %s14996_s6 = sld [smem:[#allocation62_spill]] }
0x26e5   : > { %11920 = vmatprep.subr.mxu1 %v8272_v20 }
0x26e6   : > { %v12404_v4 = vpop.eup %12403  ;;  %v8226_v38 = vadd.f32 %v8224_v48, %v14056_v32  ;;  %v8233_v24 = vsel %vm14986_vm5, %v8227_v27, 0.0  ;;  %11921 = vmatpush3.msra.mxu1 %v8272_v20 }
0x26e7   : > { %v6242_v55 = vmul.f32 %v12404_v4, %v6226_v29  ;;  %v11031_v4 = vld [vmem:[%s14993_s1] ss:$0 sm:$0xff] }
0x26e8   : > { %v12406_v3 = vpop.eup %12405  ;;  %v8230_v33 = vsel %vm14987_vm3, %v8226_v38, 0.0 }
0x26e9   : > { %v6250_v17 = vmul.f32 %v11028_v15, %v6242_v55  ;;  %v6241_v35 = vmul.f32 %v12406_v3, %v6225_v61 }
0x26eb   : > { %v6258_v26 = vadd.f32 %v11029_v40, %v6250_v17  ;;  %v6249_v31 = vmul.f32 %v11028_v15, %v6241_v35 }
0x26ed   : > { %v6264_v18 = vsel %vm14984_vm9, %v6258_v26, 0.0  ;;  %v6257_v19 = vadd.f32 %v11029_v40, %v6249_v31  ;;  %vm14999_vm9 = vmmov %vm14985_vm1 }
0x26ee   : > { %6265 = vadd.xlane.f32.xlu0 %v6264_v18 }
0x26ef   : > { %v6261_v30 = vsel %vm14985_vm1, %v6257_v19, 0.0 }
0x26f0   : > { %6262 = vadd.xlane.f32.xlu1 %v6261_v30 }
0x26f2   : > { %8234 = vadd.xlane.f32.xlu0 %v8233_v24 }
0x26f4   : > { %8231 = vadd.xlane.f32.xlu1 %v8230_v33 }
0x2777   : > { %v6266_v32 = vpop.xlane.xlu0 %6265 }
0x2778   : > { %v6268_v28 = vmul.f32 0.03125, %v6266_v32 }
0x2779   : > { %v6263_v52 = vpop.xlane.xlu1 %6262 }
0x277a   : > { %v6270_v63 = vsub.f32 %v6258_v26, %v6268_v28  ;;  %v6267_v53 = vmul.f32 0.03125, %v6263_v52 }
0x277b   : > { %v8235_v23 = vpop.xlane.xlu0 %8234 }
0x277c   : > { %v6269_v49 = vsub.f32 %v6257_v19, %v6267_v53  ;;  %v8237_v42 = vmul.f32 0.03125, %v8235_v23  ;;  %v6272_v45 = vmul.f32 %v6270_v63, %v6270_v63 }
0x277d   : > { %v8232_v51 = vpop.xlane.xlu1 %8231 }
0x277e   : > { %v8239_v54 = vsub.f32 %v8227_v27, %v8237_v42  ;;  %v6276_v56 = vsel %vm14988_vm4, %v6272_v45, 0.0  ;;  %v6271_v50 = vmul.f32 %v6269_v49, %v6269_v49  ;;  %v8236_v29 = vmul.f32 0.03125, %v8232_v51 }
0x277f   : > { %6277 = vadd.xlane.f32.xlu0 %v6276_v56 }
0x2780   : > { %v6273_v59 = vsel %vm14989_vm14, %v6271_v50, 0.0  ;;  %v8241_v1 = vmul.f32 %v8239_v54, %v8239_v54  ;;  %v8238_v47 = vsub.f32 %v8226_v38, %v8236_v29  ;;  %v11076_v38 = vld [vmem:[%s14995_s4] ss:$0 sm:$0xff] }
0x2781   : > { %6274 = vadd.xlane.f32.xlu1 %v6273_v59 }
0x2782   : > { %v8245_v2 = vsel %vm14990_vm10, %v8241_v1, 0.0  ;;  %v8240_v61 = vmul.f32 %v8238_v47, %v8238_v47 }
0x2783   : > { %8246 = vadd.xlane.f32.xlu0 %v8245_v2 }
0x2784   : > { %v8242_v46 = vsel %vm14991_vm6, %v8240_v61, 0.0 }
0x2792   : > { %8381 = vrot.lane.b32.xlu1 %v8275_v34, %s14968_s11 }
0x2796   : > { %8377 = vrot.lane.b32.xlu1 %v8273_v5, %s14968_s11 }
0x2799   : > { %8379 = vrot.lane.b32.xlu0 %v8274_v7, %s14968_s11  ;;  %v11077_v7 = vld [vmem:[%s14996_s6] ss:$0 sm:$0xff]  ;;  %s15000_s6 = sld [smem:[#allocation56_spill]] }
0x279d   : > { %8387 = vrot.lane.b32.xlu0 %v14438_v25, %s14968_s11 }
0x279f   : > { %v14495_v2 = vld [vmem:[%s15000_s6 + $0x8] sm:$0xff] }
0x27a0   : > { %vm8555_vm1 = vcmp.gt.f32.partialorder %v14495_v2, 0.0 }
0x27ba   : > { %8243 = vadd.xlane.f32.xlu1 %v8242_v46 }
0x27cb   : > { %8375 = vrot.lane.b32.xlu1 %v8272_v20, %s14968_s11 }
0x2808   : > { %v6278_v62 = vpop.xlane.xlu0 %6277 }
0x2809   : > { %v6280_v22 = vmul.f32 0.03125, %v6278_v62  ;;  %v14501_v62 = vld [vmem:[%s15000_s6] sm:$0xff] }
0x280a   : > { %v6275_v41 = vpop.xlane.xlu1 %6274  ;;  %vm8554_vm5 = vcmp.gt.f32.partialorder %v14501_v62, 0.0 }
0x280b   : > { %v6279_v57 = vmul.f32 0.03125, %v6275_v41  ;;  %v6282_v55 = vadd.f32 1e-05, %v6280_v22 }
0x280c   : > { %v8247_v9 = vpop.xlane.xlu0 %8246 }
0x280d   : > { %v6281_v0 = vadd.f32 1e-05, %v6279_v57  ;;  %v8249_v3 = vmul.f32 0.03125, %v8247_v9 }
0x280e   : > { %v8382_v44 = vpop.permute.xlu1 %8381 }
0x280f   : > { %12407 = vrsqrt.f32 %v6281_v0  ;;  %11925 = vmatprep.subr.mxu0 %v8382_v44  ;;  %v8251_v8 = vadd.f32 1e-05, %v8249_v3 }
0x2810   : > { %11926 = vmatpush3.msra.mxu0 %v8382_v44  ;;  %v8380_v39 = vpop.permute.xlu0 %8379  ;;  %12409 = vrsqrt.f32 %v6282_v55 }
0x2811   : > { %11927 = vmatprep.subr.mxu0 %v8380_v39  ;;  %12411 = vrsqrt.f32 %v8251_v8 }
0x2812   : > { %v8378_v60 = vpop.permute.xlu1 %8377  ;;  %11928 = vmatpush3.msra.mxu0 %v8380_v39 }
0x2813   : > { %11929 = vmatprep.subr.mxu0 %v8378_v60 }
0x2814   : > { %11930 = vmatpush3.msra.mxu0 %v8378_v60  ;;  %v8388_v28 = vpop.permute.xlu0 %8387 }
0x281c   : > { %v12408_v36 = vpop.eup %12407 }
0x281d   : > { %v6285_v12 = vmul.f32 %v12408_v36, %v6269_v49  ;;  %v12410_v40 = vpop.eup %12409 }
0x281e   : > { %v6286_v17 = vmul.f32 %v12410_v40, %v6270_v63  ;;  %v12412_v27 = vpop.eup %12411 }
0x281f   : > { %v6293_v6 = vmul.f32 %v11030_v13, %v6285_v12  ;;  %v8255_v30 = vmul.f32 %v12412_v27, %v8239_v54 }
0x2820   : > { %v6294_v48 = vmul.f32 %v11030_v13, %v6286_v17 }
0x2821   : > { %v6301_v15 = vadd.f32 %v11031_v4, %v6293_v6  ;;  %v8263_v34 = vmul.f32 %v11076_v38, %v8255_v30 }
0x2822   : > { %v6302_v19 = vadd.f32 %v11031_v4, %v6294_v48 }
0x2823   : > { %11933 = vmatprep.mubr.msk.f32.mxu0 %vm14994_vm11, %v6301_v15  ;;  %v14450_v32 = vadd.f32 %v11077_v7, %v8263_v34 }
0x2843   : > { %v8244_v35 = vpop.xlane.xlu1 %8243 }
0x2844   : > { %v8248_v26 = vmul.f32 0.03125, %v8244_v35 }
0x2846   : > { %v8250_v31 = vadd.f32 1e-05, %v8248_v26 }
0x2847   : > { %v8376_v18 = vpop.permute.xlu1 %8375 }
0x2848   : > { %12413 = vrsqrt.f32 %v8250_v31  ;;  %11931 = vmatprep.subr.mxu0 %v8376_v18 }
0x2849   : > { %11932 = vmatpush3.msra.mxu0 %v8376_v18 }
0x284a   : > { %11934 = vmatmul.mubr.msk.f32.vlgmr.msra.gmra.mxu0 %vm14997_vm12, %v6302_v19 }
0x2855   : > { %v12414_v24 = vpop.eup %12413 }
0x2856   : > { %v8254_v33 = vmul.f32 %v12414_v24, %v8238_v47 }
0x2858   : > { %v8262_v5 = vmul.f32 %v11076_v38, %v8254_v33 }
0x285a   : > { %v14448_v20 = vadd.f32 %v11077_v7, %v8262_v5 }
0x285c   : > { %11922 = vmatprep.mubr.msk.f32.mxu1 %vm14998_vm7, %v14448_v20 }
0x285d   : > { %11923 = vmatmul.mubr.msk.f32.vlgmr.msra.gmra.mxu1 %vm14999_vm9, %v14450_v32 }
0x285e   : > { %11940 = vmatprep.mubr.msk.f32.mxu1 %vm1851_vm0, %v12855_v14 }
0x290a   : > { %v11935_v52 = vpop.f32.mrf.mxu0 }
0x290b   : > { %v14458_v63 = vadd.f32 %v11935_v52, %v8388_v28 }
0x290c   : > { %v8462_v53 = vpop.f32.mrf.mxu0 }
0x290d   : > { %v14460_v23 = vadd.f32 %v8462_v53, %v8388_v28  ;;  %8872 = vrot.lane.b32.xlu1 %v14458_v63, %s14970_s5  ;;  %11943 = vmatprep.subr.msk.mxu0 %vm2134_vm2, %v14458_v63 }
0x290e   : > { %11944 = vmatpush3.xpose.msk.msra.mxu0 %vm2134_vm2, %v14458_v63 }
0x290f   : > { %8870 = vrot.lane.b32.xlu0 %v14460_v23, %s14970_s5  ;;  %11945 = vmatprep.subr.msk.mxu0 %vm2134_vm2, %v14460_v23 }
0x2912   : > { %11946 = vmatpush3.xpose.msk.msra.mxu0 %vm2134_vm2, %v14460_v23 }
0x291d   : > { %v11924_v49 = vpop.f32.mrf.mxu1 }
0x291e   : > { %v14475_v42 = vadd.f32 %v11924_v49, %v14438_v25 }
0x291f   : > { %v8362_v45 = vpop.f32.mrf.mxu1 }
0x2920   : > { %v14478_v54 = vadd.f32 %v14438_v25, %v8362_v45  ;;  %8868 = vrot.lane.b32.xlu0 %v14475_v42, %s14970_s5 }
0x2922   : > { %11947 = vmatprep.mubr.msk.f32.mxu0 %vm2134_vm2, %v14478_v54  ;;  %8866 = vrot.lane.b32.xlu1 %v14478_v54, %s14970_s5 }
0x2923   : > { %11948 = vmatmul.mubr.msk.f32.vlgmr.msra.gmra.mxu0 %vm2134_vm2, %v14475_v42 }
0x297f   : > { %v8873_v56 = vpop.permute.xlu1 %8872 }
0x2980   : > { %11964 = vmatprep.subr.msk.mxu0 %vm2134_vm2, %v8873_v56 }
0x2981   : > { %v8871_v50 = vpop.permute.xlu0 %8870  ;;  %11965 = vmatpush3.xpose.msk.msra.mxu0 %vm2134_vm2, %v8873_v56 }
0x2982   : > { %11966 = vmatprep.subr.msk.mxu0 %vm2134_vm2, %v8871_v50 }
0x2985   : > { %11967 = vmatpush3.xpose.msk.msra.mxu0 %vm2134_vm2, %v8871_v50 }
0x2992   : > { %v8869_v1 = vpop.permute.xlu0 %8868 }
0x2994   : > { %v8867_v59 = vpop.permute.xlu1 %8866 }
0x2995   : > { %11968 = vmatprep.mubr.msk.f32.mxu0 %vm2134_vm2, %v8867_v59 }
0x2996   : > { %11969 = vmatmul.mubr.msk.f32.vlgmr.msra.gmra.mxu0 %vm2134_vm2, %v8869_v1 }
0x29e3   : > { %v11949_v51 = vpop.f32.mrf.mxu0 }
0x29e4   : > { %v8756_v29 = vmul.f32 0.35355338, %v11949_v51  ;;  %v8650_v61 = vmul.f32 %v11949_v51, %v14495_v2  ;;  %v8642_v57 = vsel %vm8555_vm1, %v11949_v51, -1e+30 }
0x29e5   : > { %v8632_v47 = vpop.f32.mrf.mxu0  ;;  %v8646_v44 = vsel %vm1851_vm0, %v8642_v57, -inf }
0x29e6   : > { %v8755_v46 = vmul.f32 0.35355338, %v8632_v47  ;;  %v8760_v25 = vsel %vm1851_vm0, %v8756_v29, -inf  ;;  %v8649_v9 = vmul.f32 %v8632_v47, %v14501_v62  ;;  %v8654_v0 = vsel %vm1851_vm0, %v8650_v61, 0.0 }
0x29e7   : > { %8761 = vmax.xlane.f32.xlu0 %v8760_v25  ;;  %v8641_v39 = vsel %vm8554_vm5, %v8632_v47, -1e+30 }
0x29e8   : > { %v8757_v41 = vsel %vm1851_vm0, %v8755_v46, -inf  ;;  %v8651_v60 = vsel %vm1851_vm0, %v8649_v9, 0.0  ;;  %v8643_v36 = vsel %vm1851_vm0, %v8641_v39, -inf }
0x29e9   : > { %8758 = vmax.xlane.f32.xlu1 %v8757_v41 }
0x29eb   : > { %8655 = vadd.xlane.f32.xlu0 %v8654_v0 }
0x29ed   : > { %8647 = vmax.xlane.f32.xlu1 %v8646_v44 }
0x29ef   : > { %8652 = vadd.xlane.f32.xlu0 %v8651_v60 }
0x29f1   : > { %8644 = vmax.xlane.f32.xlu1 %v8643_v36 }
0x2a56   : > { %v11970_v13 = vpop.f32.mrf.mxu0 }
0x2a57   : > { %v8966_v12 = vmul.f32 %v11970_v13, %v14495_v2  ;;  %v8958_v4 = vsel %vm8555_vm1, %v11970_v13, -1e+30  ;;  %v9072_v6 = vmul.f32 0.35355338, %v11970_v13 }
0x2a58   : > { %v8948_v15 = vpop.f32.mrf.mxu0  ;;  %v8962_v22 = vsel %vm1851_vm0, %v8958_v4, -inf }
0x2a59   : > { %v9071_v55 = vmul.f32 0.35355338, %v8948_v15  ;;  %8963 = vmax.xlane.f32.xlu1 %v8962_v22  ;;  %v8970_v3 = vsel %vm1851_vm0, %v8966_v12, 0.0  ;;  %v9076_v40 = vsel %vm1851_vm0, %v9072_v6, -inf  ;;  %v8965_v8 = vmul.f32 %v8948_v15, %v14501_v62 }
0x2a5a   : > { %8971 = vadd.xlane.f32.xlu0 %v8970_v3  ;;  %v8957_v35 = vsel %vm8554_vm5, %v8948_v15, -1e+30 }
0x2a5b   : > { %v9073_v17 = vsel %vm1851_vm0, %v9071_v55, -inf  ;;  %v8959_v48 = vsel %vm1851_vm0, %v8957_v35, -inf  ;;  %v8967_v26 = vsel %vm1851_vm0, %v8965_v8, 0.0 }
0x2a5d   : > { %9077 = vmax.xlane.f32.xlu1 %v9076_v40 }
0x2a5e   : > { %9074 = vmax.xlane.f32.xlu0 %v9073_v17 }
0x2a61   : > { %8960 = vmax.xlane.f32.xlu1 %v8959_v48 }
0x2a62   : > { %8968 = vadd.xlane.f32.xlu0 %v8967_v26 }
0x2a70   : > { %v8762_v31 = vpop.xlane.xlu0 %8761 }
0x2a71   : > { %v8764_v18 = vsub.f32 %v8756_v29, %v8762_v31 }
0x2a72   : > { %v8759_v19 = vpop.xlane.xlu1 %8758 }
0x2a73   : > { %v8767_v27 = vmul.f32 1.442695, %v8764_v18  ;;  %v8763_v30 = vsub.f32 %v8755_v46, %v8759_v19 }
0x2a74   : > { %v8656_v28 = vpop.xlane.xlu0 %8655 }
0x2a75   : > { %12415 = vpow2.f32 %v8767_v27  ;;  %v8765_v38 = vmul.f32 1.442695, %v8763_v30  ;;  %v8658_v0 = vmul.f32 0.0625, %v8656_v28 }
0x2a76   : > { %v8648_v5 = vpop.xlane.xlu1 %8647 }
0x2a77   : > { %12417 = vpow2.f32 %v8765_v38  ;;  %v14547_v60 = vsub.f32 %v8648_v5, %v8658_v0 }
0x2a78   : > { %v8653_v53 = vpop.xlane.xlu0 %8652 }
0x2a79   : > { %v8657_v39 = vmul.f32 0.0625, %v8653_v53  ;;  %v8662_v4 = vmul.f32 %v14547_v60, %v13448_v37 }
0x2a7a   : > { %v8645_v52 = vpop.xlane.xlu1 %8644 }
0x2a7b   : > { %v14549_v13 = vsub.f32 %v8645_v52, %v8657_v39 }
0x2a7d   : > { %v8661_v15 = vmul.f32 %v14549_v13, %v13457_v43 }
0x2a82   : > { %v14526_v24 = vpop.eup %12415 }
0x2a83   : > { %v8772_v33 = vsel %vm1851_vm0, %v14526_v24, 0.0 }
0x2a84   : > { %v12418_v34 = vpop.eup %12417  ;;  %8773 = vadd.xlane.f32.xlu1 %v8772_v33 }
0x2a85   : > { %v8769_v7 = vsel %vm1851_vm0, %v12418_v34, 0.0 }
0x2a86   : > { %8770 = vadd.xlane.f32.xlu0 %v8769_v7 }
0x2a95   : > { %8473 = vrot.lane.b32.xlu1 %v14460_v23, %s14968_s11 }
0x2a9c   : > { %8475 = vrot.lane.b32.xlu0 %v14458_v63, %s14968_s11  ;;  %s15001_s11 = sld [smem:[#allocation65_spill]] }
0x2aa2   : > { %v8278_v33 = vld [vmem:[%s15001_s11 + $0x8] sm:$0xff]  ;;  %v8280_v11 = vld [vmem:[%s15001_s11 + $0x18] sm:$0xff] }
0x2aa3   : > { %11985 = vmatprep.subr.mxu0 %v8278_v33 }
0x2aa4   : > { %11986 = vmatpush3.msra.mxu0 %v8278_v33 }
0x2ae2   : > { %v8964_v49 = vpop.xlane.xlu1 %8963 }
0x2ae3   : > { %v8972_v45 = vpop.xlane.xlu0 %8971 }
0x2ae6   : > { %v9078_v56 = vpop.xlane.xlu1 %9077 }
0x2ae7   : > { %v9080_v50 = vsub.f32 %v9072_v6, %v9078_v56  ;;  %v9075_v59 = vpop.xlane.xlu0 %9074  ;;  %v8974_v6 = vmul.f32 0.0625, %v8972_v45 }
0x2ae8   : > { %v9079_v1 = vsub.f32 %v9071_v55, %v9075_v59 }
0x2ae9   : > { %v9083_v51 = vmul.f32 1.442695, %v9080_v50  ;;  %v8976_v3 = vsub.f32 %v8964_v49, %v8974_v6 }
0x2aea   : > { %v9081_v29 = vmul.f32 1.442695, %v9079_v1  ;;  %v8961_v41 = vpop.xlane.xlu1 %8960 }
0x2aeb   : > { %12419 = vpow2.f32 %v9083_v51  ;;  %v8969_v57 = vpop.xlane.xlu0 %8968  ;;  %v8978_v35 = vmul.f32 %v8976_v3, %v13448_v37 }
0x2aec   : > { %12421 = vpow2.f32 %v9081_v29  ;;  %v8973_v22 = vmul.f32 0.0625, %v8969_v57 }
0x2aee   : > { %v8975_v40 = vsub.f32 %v8961_v41, %v8973_v22 }
0x2af0   : > { %v8977_v48 = vmul.f32 %v8975_v40, %v13457_v43 }
0x2af8   : > { %v14535_v47 = vpop.eup %12419 }
0x2af9   : > { %v14537_v61 = vpop.eup %12421  ;;  %v9088_v46 = vsel %vm1851_vm0, %v14535_v47, 0.0 }
0x2afa   : > { %9089 = vadd.xlane.f32.xlu0 %v9088_v46  ;;  %v9085_v25 = vsel %vm1851_vm0, %v14537_v61, 0.0 }
0x2afb   : > { %9086 = vadd.xlane.f32.xlu1 %v9085_v25 }
0x2b0c   : > { %9095 = vrot.lane.b32.xlu1 %v14460_v23, %s14969_s8 }
0x2b0d   : > { %v8774_v9 = vpop.xlane.xlu1 %8773 }
0x2b0e   : > { %12423 = vrcp.f32 %v8774_v9 }
0x2b0f   : > { %v8771_v44 = vpop.xlane.xlu0 %8770 }
0x2b10   : > { %12425 = vrcp.f32 %v8771_v44  ;;  %9097 = vrot.lane.b32.xlu0 %v14458_v63, %s14969_s8 }
0x2b11   : > { %v8474_v12 = vpop.permute.xlu1 %8473 }
0x2b13   : > { %v8476_v36 = vpop.permute.xlu0 %8475 }
0x2b14   : > { %11936 = vmatprep.subr.mxu1 %v8476_v36 }
0x2b15   : > { %11937 = vmatpush3.msra.mxu1 %v8476_v36 }
0x2b16   : > { %11938 = vmatprep.subr.mxu1 %v8474_v12 }
0x2b17   : > { %11939 = vmatpush3.msra.mxu1 %v8474_v12 }
0x2b18   : > { %11941 = vmatmul.mubr.msk.f32.vlgmr.msra.gmra.mxu1 %vm1851_vm0, %v12855_v14  ;;  %11950 = vmatprep.subr.mxu1 %v12860_v21 }
0x2b19   : > { %11951 = vmatpush3.msra.mxu1 %v8662_v4  ;;  %11954 = vmatprep.mubr.msk.f32.mxu1 %vm14974_vm13, %v12860_v21 }
0x2b1a   : > { %11952 = vmatprep.subr.mxu1 %v12860_v21 }
0x2b1b   : > { %11953 = vmatpush3.msra.mxu1 %v8661_v15  ;;  %v12424_v55 = vpop.eup %12423 }
0x2b1c   : > { %11955 = vmatmul.mubr.msk.f32.vlgmr.msra.gmra.mxu1 %vm1851_vm0, %v12864_v58  ;;  %11957 = vmatprep.subr.mxu1 %v8476_v36  ;;  %v8778_v17 = vmul.f32 %v12424_v55, %v14526_v24 }
0x2b1d   : > { %v12426_v14 = vpop.eup %12425  ;;  %11958 = vmatpush3.msra.mxu1 %v8476_v36 }
0x2b1e   : > { %11959 = vmatprep.subr.mxu1 %v8474_v12  ;;  %v8776_v8 = vmul.f32 %v12426_v14, %v12418_v34 }
0x2b1f   : > { %11960 = vmatpush3.msra.mxu1 %v8474_v12 }
0x2b20   : > { %11961 = vmatprep.mubr.msk.f32.mxu1 %vm1851_vm0, %v8776_v8  ;;  %11971 = vmatprep.subr.mxu1 %v12860_v21 }
0x2b21   : > { %11962 = vmatmul.mubr.msk.f32.vlgmr.msra.gmra.mxu1 %vm1851_vm0, %v8778_v17 }
0x2b22   : > { %11972 = vmatpush3.msra.mxu1 %v8978_v35  ;;  %11975 = vmatprep.mubr.msk.f32.mxu1 %vm14974_vm13, %v12860_v21 }
0x2b23   : > { %11973 = vmatprep.subr.mxu1 %v12860_v21 }
0x2b24   : > { %11974 = vmatpush3.msra.mxu1 %v8977_v48 }
0x2b25   : > { %11976 = vmatmul.mubr.msk.f32.vlgmr.msra.gmra.mxu1 %vm1851_vm0, %v12864_v58 }
0x2b83   : > { %v9090_v26 = vpop.xlane.xlu0 %9089 }
0x2b84   : > { %12427 = vrcp.f32 %v9090_v26  ;;  %v9087_v31 = vpop.xlane.xlu1 %9086 }
0x2b85   : > { %12429 = vrcp.f32 %v9087_v31 }
0x2b87   : > { %v9098_v18 = vpop.permute.xlu0 %9097 }
0x2b88   : > { %11978 = vmatprep.subr.mxu1 %v9098_v18  ;;  %v9096_v19 = vpop.permute.xlu1 %9095 }
0x2b89   : > { %11979 = vmatpush3.msra.mxu1 %v9098_v18 }
0x2b8a   : > { %11980 = vmatprep.subr.mxu1 %v9096_v19 }
0x2b8b   : > { %11981 = vmatpush3.msra.mxu1 %v9096_v19 }
0x2b91   : > { %v12428_v27 = vpop.eup %12427 }
0x2b92   : > { %v12430_v30 = vpop.eup %12429  ;;  %v9094_v24 = vmul.f32 %v12428_v27, %v14535_v47 }
0x2b93   : > { %v9092_v38 = vmul.f32 %v12430_v30, %v14537_v61 }
0x2b95   : > { %11982 = vmatprep.mubr.msk.f32.mxu1 %vm1851_vm0, %v9092_v38  ;;  %v8277_v38 = vld [vmem:[%s15001_s11] sm:$0xff] }
0x2b96   : > { %11983 = vmatmul.mubr.msk.f32.vlgmr.msra.gmra.mxu1 %vm1851_vm0, %v9094_v24  ;;  %11990 = vmatprep.subr.mxu1 %v8277_v38 }
0x2b97   : > { %11991 = vmatpush3.msra.mxu1 %v8277_v38 }
0x2b98   : > { %12002 = vmatprep.subr.mxu1 %v12860_v21 }
0x2bd8   : > { %v14579_v34 = vpop.f32.mrf.mxu1 }
0x2bd9   : > { %9190 = vrot.lane.b32.xlu1 %v14579_v34, %s14970_s5 }
0x2bda   : > { %v14583_v7 = vpop.f32.mrf.mxu1 }
0x2bdb   : > { %9188 = vrot.lane.b32.xlu0 %v14583_v7, %s14970_s5 }
0x2bdc   : > { %v8729_v5 = vpop.f32.mrf.mxu1 }
0x2bdd   : > { %9364 = vrot.lane.b32.xlu1 %v14458_v63, %s14951_s23  ;;  %v8736_v4 = vrot.slane %v8729_v5, %v13492_v10 }
0x2bde   : > { %v11956_v28 = vpop.f32.mrf.mxu1 }
0x2bdf   : > { %9362 = vrot.lane.b32.xlu0 %v14460_v23, %s14951_s23 }
0x2be1   : > { %v14591_v52 = vpop.f32.mrf.mxu1 }
0x2be3   : > { %v14593_v53 = vpop.f32.mrf.mxu1 }
0x2be5   : > { %v9045_v49 = vpop.f32.mrf.mxu1 }
0x2be6   : > { %v9052_v56 = vrot.slane %v9045_v49, %v13492_v10 }
0x2be7   : > { %v11977_v45 = vpop.f32.mrf.mxu1 }
0x2be8   : > { %vm9056_vm3 = vcmp.eq.f32.partialorder %v9052_v56, %v8976_v3  ;;  %vm9054_vm4 = vcmp.gt.f32.partialorder %v9052_v56, %v8976_v3  ;;  %vm9055_vm10 = vcmp.eq.f32.partialorder %v9052_v56, %v8975_v40  ;;  %vm9053_vm11 = vcmp.gt.f32.partialorder %v9052_v56, %v8975_v40 }
0x2be9   : > { %vm9058_vm14 = vmand %vm9056_vm3, %vm13497_vm8 }
0x2bea   : > { %vm9060_vm6 = vmor %vm9054_vm4, %vm9058_vm14  ;;  %vm8740_vm4 = vcmp.eq.f32.partialorder %v8736_v4, %v14547_v60  ;;  %vm8739_vm14 = vcmp.eq.f32.partialorder %v8736_v4, %v14549_v13 }
0x2beb   : > { %vm9057_vm12 = vmand %vm9055_vm10, %vm13505_vm15  ;;  %v9062_v50 = vsel %vm9060_vm6, 1.0, %v12860_v21  ;;  %vm8738_vm10 = vcmp.gt.f32.partialorder %v8736_v4, %v14547_v60 }
0x2bec   : > { %vm9059_vm7 = vmor %vm9053_vm11, %vm9057_vm12  ;;  %v9066_v59 = vsel %vm1851_vm0, %v9062_v50, 0.0  ;;  %vm8737_vm11 = vcmp.gt.f32.partialorder %v8736_v4, %v14549_v13 }
0x2bed   : > { %v9061_v1 = vsel %vm9059_vm7, 1.0, %v12860_v21  ;;  %vm8742_vm6 = vmand %vm8740_vm4, %vm13497_vm8 }
0x2bee   : > { %v9063_v51 = vsel %vm1851_vm0, %v9061_v1, 0.0  ;;  %vm8741_vm12 = vmand %vm8739_vm14, %vm13505_vm15 }
0x2bef   : > { %vm8744_vm7 = vmor %vm8738_vm10, %vm8742_vm6 }
0x2bf0   : > { %v8746_v35 = vsel %vm8744_vm7, 1.0, %v12860_v21 }
0x2bf1   : > { %v8750_v31 = vsel %vm1851_vm0, %v8746_v35, 0.0 }
0x2bfe   : > { %9067 = vadd.xlane.f32.xlu0 %v9066_v59 }
0x2c01   : > { %9064 = vadd.xlane.f32.xlu1 %v9063_v51 }
0x2c12   : > { %9358 = vrot.lane.b32.xlu1 %v14478_v54, %s14951_s23 }
0x2c14   : > { %9360 = vrot.lane.b32.xlu0 %v14475_v42, %s14951_s23 }
0x2c4b   : > { %v9191_v29 = vpop.permute.xlu1 %9190 }
0x2c4d   : > { %v9189_v61 = vpop.permute.xlu0 %9188 }
0x2c4f   : > { %v9365_v47 = vpop.permute.xlu1 %9364 }
0x2c50   : > { %11995 = vmatprep.subr.msk.mxu0 %vm2134_vm2, %v9365_v47 }
0x2c51   : > { %v9363_v46 = vpop.permute.xlu0 %9362 }
0x2c56   : > { %v11984_v25 = vpop.f32.mrf.mxu1 }
0x2c58   : > { %v9173_v9 = vpop.f32.mrf.mxu1 }
0x2c87   : > { %v9068_v41 = vpop.xlane.xlu0 %9067 }
0x2c88   : > { %vm9070_vm9 = vcmp.lt.f32.partialorder %v9068_v41, 15.0 }
0x2c89   : > { %v9195_v44 = vsel %vm9070_vm9, %v11984_v25, %v9191_v29  ;;  %vm8743_vm9 = vmor %vm8737_vm11, %vm8741_vm12 }
0x2c8a   : > { %v9065_v57 = vpop.xlane.xlu1 %9064  ;;  %v8745_v13 = vsel %vm8743_vm9, 1.0, %v12860_v21 }
0x2c8b   : > { %vm9069_vm3 = vcmp.lt.f32.partialorder %v9065_v57, 15.0  ;;  %v9361_v36 = vpop.permute.xlu0 %9360  ;;  %v8747_v18 = vsel %vm1851_vm0, %v8745_v13, 0.0 }
0x2c8c   : > { %v9194_v0 = vsel %vm9069_vm3, %v9173_v9, %v9189_v61 }
0x2c8d   : > { %11987 = vmatprep.mubr.msk.f32.mxu0 %vm2134_vm2, %v9194_v0 }
0x2c8e   : > { %11988 = vmatmul.mubr.msk.f32.vlgmr.msra.gmra.mxu0 %vm2134_vm2, %v9195_v44  ;;  %v9359_v39 = vpop.permute.xlu1 %9358 }
0x2c8f   : > { %11996 = vmatpush3.xpose.msk.msra.mxu0 %vm2134_vm2, %v9365_v47  ;;  %11999 = vmatprep.mubr.msk.f32.mxu0 %vm2134_vm2, %v9359_v39 }
0x2c90   : > { %11997 = vmatprep.subr.msk.mxu0 %vm2134_vm2, %v9363_v46 }
0x2c93   : > { %11998 = vmatpush3.xpose.msk.msra.mxu0 %vm2134_vm2, %v9363_v46 }
0x2c96   : > { %12000 = vmatmul.mubr.msk.f32.vlgmr.msra.gmra.mxu0 %vm2134_vm2, %v9361_v36 }
0x2d4e   : > { %v14616_v12 = vpop.f32.mrf.mxu0 }
0x2d50   : > { %v14619_v6 = vpop.f32.mrf.mxu0 }
0x2d56   : > { %v12001_v15 = vpop.f32.mrf.mxu0 }
0x2d57   : > { %v9564_v22 = vmul.f32 0.35355338, %v12001_v15  ;;  %v9458_v3 = vmul.f32 %v12001_v15, %v14495_v2  ;;  %v9450_v60 = vsel %vm8555_vm1, %v12001_v15, -1e+30 }
0x2d58   : > { %v9440_v55 = vpop.f32.mrf.mxu0  ;;  %v9454_v48 = vsel %vm1851_vm0, %v9450_v60, -inf }
0x2d59   : > { %v9563_v14 = vmul.f32 0.35355338, %v9440_v55  ;;  %v9568_v40 = vsel %vm1851_vm0, %v9564_v22, -inf  ;;  %v9462_v17 = vsel %vm1851_vm0, %v9458_v3, 0.0  ;;  %v9457_v26 = vmul.f32 %v9440_v55, %v14501_v62 }
0x2d5a   : > { %9569 = vmax.xlane.f32.xlu0 %v9568_v40  ;;  %v9449_v19 = vsel %vm8554_vm5, %v9440_v55, -1e+30 }
0x2d5b   : > { %v9565_v8 = vsel %vm1851_vm0, %v9563_v14, -inf  ;;  %v9459_v27 = vsel %vm1851_vm0, %v9457_v26, 0.0  ;;  %v9451_v30 = vsel %vm1851_vm0, %v9449_v19, -inf }
0x2d5c   : > { %9566 = vmax.xlane.f32.xlu1 %v9565_v8 }
0x2d5e   : > { %9463 = vadd.xlane.f32.xlu0 %v9462_v17 }
0x2d60   : > { %9455 = vmax.xlane.f32.xlu1 %v9454_v48 }
0x2d62   : > { %8751 = vadd.xlane.f32.xlu0 %v8750_v31 }
0x2d64   : > { %8748 = vadd.xlane.f32.xlu1 %v8747_v18 }
0x2d66   : > { %9460 = vadd.xlane.f32.xlu0 %v9459_v27 }
0x2d68   : > { %9452 = vmax.xlane.f32.xlu1 %v9451_v30 }
0x2de3   : > { %v9570_v24 = vpop.xlane.xlu0 %9569 }
0x2de4   : > { %v9572_v33 = vsub.f32 %v9564_v22, %v9570_v24 }
0x2de5   : > { %v9567_v5 = vpop.xlane.xlu1 %9566 }
0x2de6   : > { %v9575_v28 = vmul.f32 1.442695, %v9572_v33  ;;  %v9571_v49 = vsub.f32 %v9563_v14, %v9567_v5 }
0x2de7   : > { %v9464_v45 = vpop.xlane.xlu0 %9463 }
0x2de8   : > { %12431 = vpow2.f32 %v9575_v28  ;;  %v9573_v56 = vmul.f32 1.442695, %v9571_v49  ;;  %v9466_v50 = vmul.f32 0.0625, %v9464_v45 }
0x2de9   : > { %v9456_v59 = vpop.xlane.xlu1 %9455 }
0x2dea   : > { %12433 = vpow2.f32 %v9573_v56  ;;  %v14647_v51 = vsub.f32 %v9456_v59, %v9466_v50 }
0x2deb   : > { %v8752_v1 = vpop.xlane.xlu0 %8751 }
0x2dec   : > { %vm8754_vm3 = vcmp.lt.f32.partialorder %v8752_v1, 15.0  ;;  %v9470_v46 = vmul.f32 %v14647_v51, %v13448_v37 }
0x2ded   : > { %v8749_v29 = vpop.xlane.xlu1 %8748  ;;  %v8865_v25 = vsel %vm8754_vm3, %v14591_v52, %v14579_v34 }
0x2dee   : > { %vm8753_vm4 = vcmp.lt.f32.partialorder %v8749_v29, 15.0 }
0x2def   : > { %v8864_v47 = vsel %vm8753_vm4, %v14593_v53, %v14583_v7  ;;  %v9461_v61 = vpop.xlane.xlu0 %9460 }
0x2df0   : > { %v9465_v41 = vmul.f32 0.0625, %v9461_v61  ;;  %11992 = vmatprep.mubr.msk.f32.mxu1 %vm2134_vm2, %v8864_v47 }
0x2df1   : > { %11993 = vmatmul.mubr.msk.f32.vlgmr.msra.gmra.mxu1 %vm2134_vm2, %v8865_v25  ;;  %v9453_v57 = vpop.xlane.xlu1 %9452 }
0x2df2   : > { %12003 = vmatpush3.msra.mxu1 %v9470_v46  ;;  %v9467_v9 = vsub.f32 %v9453_v57, %v9465_v41  ;;  %12006 = vmatprep.mubr.msk.f32.mxu1 %vm14974_vm13, %v12860_v21  ;;  %v8279_v46 = vld [vmem:[%s15001_s11 + $0x10] sm:$0xff] }
0x2df3   : > { %12004 = vmatprep.subr.mxu1 %v12860_v21  ;;  %12016 = vmatprep.subr.mxu0 %v8279_v46 }
0x2df4   : > { %v9469_v53 = vmul.f32 %v9467_v9, %v13457_v43  ;;  %12017 = vmatpush3.msra.mxu0 %v8279_v46 }
0x2df5   : > { %v12432_v0 = vpop.eup %12431  ;;  %12028 = vmatprep.subr.mxu0 %v12860_v21 }
0x2df6   : > { %12005 = vmatpush3.msra.mxu1 %v9469_v53  ;;  %v9580_v44 = vsel %vm1851_vm0, %v12432_v0, 0.0 }
0x2df7   : > { %v12434_v52 = vpop.eup %12433  ;;  %9581 = vadd.xlane.f32.xlu1 %v9580_v44  ;;  %12007 = vmatmul.mubr.msk.f32.vlgmr.msra.gmra.mxu1 %vm1851_vm0, %v12864_v58 }
0x2df8   : > { %v9577_v39 = vsel %vm1851_vm0, %v12434_v52, 0.0 }
0x2df9   : > { %9578 = vadd.xlane.f32.xlu0 %v9577_v39 }
0x2e08   : > { %9587 = vrot.lane.b32.xlu1 %v14460_v23, %s14950_s2 }
0x2e0c   : > { %9775 = vrot.lane.b32.xlu1 %v14458_v63, %s14954_s3 }
0x2e0f   : > { %9589 = vrot.lane.b32.xlu0 %v14458_v63, %s14950_s2  ;;  %s1844_s2 = scalar_lea.vmem %s13163_s25, %s13301_s15 }
0x2e10   : > { %9769 = vrot.lane.b32.xlu1 %v14478_v54, %s14954_s3 }
0x2e13   : > { %9773 = vrot.lane.b32.xlu0 %v14460_v23, %s14954_s3 }
0x2e17   : > { %9771 = vrot.lane.b32.xlu0 %v14475_v42, %s14954_s3 }
0x2e80   : > { %v9582_v36 = vpop.xlane.xlu1 %9581 }
0x2e81   : > { %12435 = vrcp.f32 %v9582_v36 }
0x2e82   : > { %v9579_v4 = vpop.xlane.xlu0 %9578 }
0x2e83   : > { %12437 = vrcp.f32 %v9579_v4 }
0x2e84   : > { %v9588_v15 = vpop.permute.xlu1 %9587 }
0x2e86   : > { %v9590_v22 = vpop.permute.xlu0 %9589 }
0x2e87   : > { %12009 = vmatprep.subr.mxu1 %v9590_v22 }
0x2e88   : > { %12010 = vmatpush3.msra.mxu1 %v9590_v22  ;;  %v9776_v55 = vpop.permute.xlu1 %9775 }
0x2e89   : > { %12011 = vmatprep.subr.mxu1 %v9588_v15 }
0x2e8a   : > { %12012 = vmatpush3.msra.mxu1 %v9588_v15  ;;  %v9774_v8 = vpop.permute.xlu0 %9773 }
0x2e8b   : > { %12021 = vmatprep.subr.msk.mxu1 %vm2134_vm2, %v9776_v55 }
0x2e8c   : > { %v9770_v42 = vpop.permute.xlu1 %9769 }
0x2e8e   : > { %v12436_v54 = vpop.eup %12435  ;;  %v9772_v60 = vpop.permute.xlu0 %9771 }
0x2e8f   : > { %v9586_v40 = vmul.f32 %v12436_v54, %v12432_v0 }
0x2e90   : > { %v12438_v3 = vpop.eup %12437 }
0x2e91   : > { %v9584_v14 = vmul.f32 %v12438_v3, %v12434_v52 }
0x2e93   : > { %12013 = vmatprep.mubr.msk.f32.mxu1 %vm1851_vm0, %v9584_v14 }
0x2e94   : > { %12014 = vmatmul.mubr.msk.f32.vlgmr.msra.gmra.mxu1 %vm1851_vm0, %v9586_v40 }
0x2e95   : > { %12022 = vmatpush3.xpose.msk.msra.mxu1 %vm2134_vm2, %v9776_v55  ;;  %12025 = vmatprep.mubr.msk.f32.mxu1 %vm2134_vm2, %v9770_v42 }
0x2e96   : > { %12023 = vmatprep.subr.msk.mxu1 %vm2134_vm2, %v9774_v8 }
0x2e99   : > { %12024 = vmatpush3.xpose.msk.msra.mxu1 %vm2134_vm2, %v9774_v8 }
0x2e9a   : > { %12042 = vmatprep.subr.mxu1 %v8280_v11 }
0x2e9c   : > { %12026 = vmatmul.mubr.msk.f32.vlgmr.msra.gmra.mxu1 %vm2134_vm2, %v9772_v60 }
0x2e9d   : > { %12043 = vmatpush3.msra.mxu1 %v8280_v11 }
0x2eb1   : > { %v14685_v17 = vpop.f32.mrf.mxu1 }
0x2eb3   : > { %v14687_v35 = vpop.f32.mrf.mxu1 }
0x2eb7   : > { %v9537_v48 = vpop.f32.mrf.mxu1 }
0x2eb8   : > { %v9544_v13 = vrot.slane %v9537_v48, %v13492_v10 }
0x2eb9   : > { %v12008_v26 = vpop.f32.mrf.mxu1 }
0x2eba   : > { %vm9546_vm14 = vcmp.gt.f32.partialorder %v9544_v13, %v14647_v51  ;;  %vm9548_vm10 = vcmp.eq.f32.partialorder %v9544_v13, %v14647_v51  ;;  %vm9547_vm6 = vcmp.eq.f32.partialorder %v9544_v13, %v9467_v9  ;;  %vm9545_vm12 = vcmp.gt.f32.partialorder %v9544_v13, %v9467_v9 }
0x2ebb   : > { %vm9550_vm11 = vmand %vm9548_vm10, %vm13497_vm8 }
0x2ebc   : > { %vm9552_vm7 = vmor %vm9546_vm14, %vm9550_vm11 }
0x2ebd   : > { %v9554_v31 = vsel %vm9552_vm7, 1.0, %v12860_v21  ;;  %vm9549_vm9 = vmand %vm9547_vm6, %vm13505_vm15 }
0x2ebe   : > { %v9558_v18 = vsel %vm1851_vm0, %v9554_v31, 0.0  ;;  %vm9551_vm3 = vmor %vm9545_vm12, %vm9549_vm9 }
0x2ebf   : > { %9559 = vadd.xlane.f32.xlu0 %v9558_v18  ;;  %v9553_v19 = vsel %vm9551_vm3, 1.0, %v12860_v21 }
0x2ec0   : > { %v9555_v27 = vsel %vm1851_vm0, %v9553_v19, 0.0 }
0x2ec1   : > { %9556 = vadd.xlane.f32.xlu1 %v9555_v27 }
0x2f54   : > { %v12015_v30 = vpop.f32.mrf.mxu1 }
0x2f56   : > { %v9665_v38 = vpop.f32.mrf.mxu1 }
0x2f5c   : > { %v12027_v24 = vpop.f32.mrf.mxu1 }
0x2f5d   : > { %v9861_v33 = vsel %vm8555_vm1, %v12027_v24, -1e+30  ;;  %v9975_v5 = vmul.f32 0.35355338, %v12027_v24  ;;  %v9869_v59 = vmul.f32 %v12027_v24, %v14495_v2  ;;  %v9560_v2 = vpop.xlane.xlu0 %9559 }
0x2f5e   : > { %v9851_v28 = vpop.f32.mrf.mxu1  ;;  %v9865_v49 = vsel %vm1851_vm0, %v9861_v33, -inf }
0x2f5f   : > { %9866 = vmax.xlane.f32.xlu0 %v9865_v49  ;;  %v9860_v45 = vsel %vm8554_vm5, %v9851_v28, -1e+30  ;;  %v9974_v56 = vmul.f32 0.35355338, %v9851_v28  ;;  %v9979_v1 = vsel %vm1851_vm0, %v9975_v5, -inf  ;;  %v9868_v51 = vmul.f32 %v9851_v28, %v14501_v62  ;;  %v9557_v62 = vpop.xlane.xlu1 %9556 }
0x2f60   : > { %v9862_v50 = vsel %vm1851_vm0, %v9860_v45, -inf  ;;  %v9873_v47 = vsel %vm1851_vm0, %v9869_v59, 0.0  ;;  %vm9561_vm1 = vcmp.lt.f32.partialorder %v9557_v62, 15.0  ;;  %vm9562_vm5 = vcmp.lt.f32.partialorder %v9560_v2, 15.0 }
0x2f61   : > { %9863 = vmax.xlane.f32.xlu1 %v9862_v50  ;;  %v9976_v29 = vsel %vm1851_vm0, %v9974_v56, -inf  ;;  %v9870_v61 = vsel %vm1851_vm0, %v9868_v51, 0.0 }
0x2f63   : > { %9980 = vmax.xlane.f32.xlu0 %v9979_v1 }
0x2f65   : > { %9977 = vmax.xlane.f32.xlu1 %v9976_v29 }
0x2f67   : > { %9874 = vadd.xlane.f32.xlu0 %v9873_v47 }
0x2f69   : > { %9871 = vadd.xlane.f32.xlu1 %v9870_v61 }
0x2f7a   : > { %9680 = vrot.lane.b32.xlu1 %v14579_v34, %s14951_s23 }
0x2f7d   : > { %9678 = vrot.lane.b32.xlu0 %v14583_v7, %s14951_s23 }
0x2fe8   : > { %v9867_v25 = vpop.xlane.xlu0 %9866 }
0x2fea   : > { %v9864_v41 = vpop.xlane.xlu1 %9863 }
0x2fec   : > { %v9981_v57 = vpop.xlane.xlu0 %9980 }
0x2fed   : > { %v9983_v9 = vsub.f32 %v9975_v5, %v9981_v57 }
0x2fee   : > { %v9978_v53 = vpop.xlane.xlu1 %9977 }
0x2fef   : > { %v9986_v0 = vmul.f32 1.442695, %v9983_v9  ;;  %v9982_v44 = vsub.f32 %v9974_v56, %v9978_v53 }
0x2ff0   : > { %v9875_v52 = vpop.xlane.xlu0 %9874 }
0x2ff1   : > { %12439 = vpow2.f32 %v9986_v0  ;;  %v9984_v39 = vmul.f32 1.442695, %v9982_v44  ;;  %v9877_v36 = vmul.f32 0.0625, %v9875_v52 }
0x2ff2   : > { %v9872_v4 = vpop.xlane.xlu1 %9871 }
0x2ff3   : > { %12441 = vpow2.f32 %v9984_v39  ;;  %v9879_v15 = vsub.f32 %v9867_v25, %v9877_v36  ;;  %v9876_v22 = vmul.f32 0.0625, %v9872_v4 }
0x2ff4   : > { %v9679_v55 = vpop.permute.xlu0 %9678 }
0x2ff5   : > { %v9881_v54 = vmul.f32 %v9879_v15, %v13448_v37  ;;  %v9878_v3 = vsub.f32 %v9864_v41, %v9876_v22  ;;  %v9684_v14 = vsel %vm9561_vm1, %v9665_v38, %v9679_v55  ;;  %v9350_v38 = vadd.f32 %v14687_v35, %v14619_v6 }
0x2ff6   : > { %12018 = vmatprep.mubr.msk.f32.mxu0 %vm2134_vm2, %v9684_v14  ;;  %v9681_v40 = vpop.permute.xlu1 %9680 }
0x2ff7   : > { %v9880_v42 = vmul.f32 %v9878_v3, %v13457_v43  ;;  %v9685_v8 = vsel %vm9562_vm5, %v12015_v30, %v9681_v40 }
0x2ff8   : > { %12019 = vmatmul.mubr.msk.f32.vlgmr.msra.gmra.mxu0 %vm2134_vm2, %v9685_v8 }
0x2ff9   : > { %12029 = vmatpush3.msra.mxu0 %v9881_v54  ;;  %12032 = vmatprep.mubr.msk.f32.mxu0 %vm14974_vm13, %v12860_v21 }
0x2ffa   : > { %12030 = vmatprep.subr.mxu0 %v12860_v21 }
0x2ffb   : > { %12031 = vmatpush3.msra.mxu0 %v9880_v42 }
0x2ffc   : > { %12033 = vmatmul.mubr.msk.f32.vlgmr.msra.gmra.mxu0 %vm1851_vm0, %v12864_v58 }
0x2ffe   : > { %v12440_v37 = vpop.eup %12439 }
0x2fff   : > { %v9991_v60 = vsel %vm1851_vm0, %v12440_v37, 0.0 }
0x3000   : > { %v12442_v48 = vpop.eup %12441  ;;  %9992 = vadd.xlane.f32.xlu0 %v9991_v60 }
0x3001   : > { %v9988_v43 = vsel %vm1851_vm0, %v12442_v48, 0.0 }
0x3002   : > { %9989 = vadd.xlane.f32.xlu1 %v9988_v43 }
0x3013   : > { %9998 = vrot.lane.b32.xlu1 %v14460_v23, %s14953_s0 }
0x3016   : > { %10000 = vrot.lane.b32.xlu0 %v14458_v63, %s14953_s0  ;;  %v9355_v63 = vadd.f32 %v14685_v17, %v14616_v12  ;;  %s15007_s0 = sld [smem:[#allocation69_spill]] }
0x3089   : > { %v9993_v13 = vpop.xlane.xlu0 %9992 }
0x308a   : > { %12443 = vrcp.f32 %v9993_v13 }
0x308b   : > { %v9990_v26 = vpop.xlane.xlu1 %9989 }
0x308c   : > { %12445 = vrcp.f32 %v9990_v26 }
0x308d   : > { %v10001_v31 = vpop.permute.xlu0 %10000 }
0x308e   : > { %12035 = vmatprep.subr.mxu0 %v10001_v31 }
0x308f   : > { %12036 = vmatpush3.msra.mxu0 %v10001_v31  ;;  %v9999_v58 = vpop.permute.xlu1 %9998 }
0x3090   : > { %12037 = vmatprep.subr.mxu0 %v9999_v58 }
0x3091   : > { %12038 = vmatpush3.msra.mxu0 %v9999_v58  ;;  %v11123_v58 = vld [vmem:[#allocation7] ss:$0 sm:$0xff] }
0x3097   : > { %v12444_v18 = vpop.eup %12443 }
0x3098   : > { %v9997_v30 = vmul.f32 %v12444_v18, %v12440_v37 }
0x3099   : > { %v12446_v19 = vpop.eup %12445 }
0x309a   : > { %v9995_v27 = vmul.f32 %v12446_v19, %v12442_v48  ;;  %v11122_v48 = vld [vmem:[#allocation6] ss:$0 sm:$0xff] }
0x309c   : > { %12039 = vmatprep.mubr.msk.f32.mxu0 %vm1851_vm0, %v9995_v27 }
0x309d   : > { %12040 = vmatmul.mubr.msk.f32.vlgmr.msra.gmra.mxu0 %vm1851_vm0, %v9997_v30  ;;  %v10387_v30 = vld [vmem:[%s15007_s0 + $0x38] sm:$0xff] }
0x309e   : > { %12058 = vmatprep.subr.mxu1 %v10387_v30 }
0x30b8   : > { %v12020_v23 = vpop.f32.mrf.mxu0 }
0x30b9   : > { %v9768_v24 = vadd.f32 %v12020_v23, %v9355_v63  ;;  %v10386_v63 = vld [vmem:[%s15007_s0 + $0x30] sm:$0xff]  ;;  %v10385_v23 = vld [vmem:[%s15007_s0 + $0x28] sm:$0xff] }
0x30ba   : > { %v9758_v33 = vpop.f32.mrf.mxu0 }
0x30bb   : > { %v9767_v5 = vadd.f32 %v9758_v33, %v9350_v38  ;;  %v10384_v38 = vld [vmem:[%s15007_s0 + $0x20] sm:$0xff]  ;;  %v10382_v33 = vld [vmem:[%s15007_s0 + $0x10] sm:$0xff] }
0x30bc   : > { %v9948_v28 = vpop.f32.mrf.mxu0 }
0x30bd   : > { %v9955_v49 = vrot.slane %v9948_v28, %v13492_v10  ;;  %v10380_v28 = vld [vmem:[%s15007_s0] sm:$0xff] }
0x30be   : > { %v12034_v45 = vpop.f32.mrf.mxu0 }
0x30bf   : > { %vm9957_vm13 = vcmp.gt.f32.partialorder %v9955_v49, %v9879_v15  ;;  %vm9959_vm4 = vcmp.eq.f32.partialorder %v9955_v49, %v9879_v15  ;;  %vm9958_vm14 = vcmp.eq.f32.partialorder %v9955_v49, %v9878_v3  ;;  %vm9956_vm6 = vcmp.gt.f32.partialorder %v9955_v49, %v9878_v3  ;;  %v11124_v49 = vld [vmem:[#allocation9] ss:$0 sm:$0xff] }
0x30c0   : > { %vm9961_vm10 = vmand %vm9959_vm4, %vm13497_vm8 }
0x30c1   : > { %vm9963_vm11 = vmor %vm9957_vm13, %vm9961_vm10 }
0x30c2   : > { %v9965_v12 = vsel %vm9963_vm11, 1.0, %v12860_v21  ;;  %vm9960_vm12 = vmand %vm9958_vm14, %vm13505_vm15  ;;  %vm15010_vm14 = vcmask 523264  }
0x30c3   : > { %v9969_v6 = vsel %vm1851_vm0, %v9965_v12, 0.0  ;;  %vm9962_vm7 = vmor %vm9956_vm6, %vm9960_vm12 }
0x30c4   : > { %9970 = vadd.xlane.f32.xlu0 %v9969_v6  ;;  %v9964_v10 = vsel %vm9962_vm7, 1.0, %v12860_v21  ;;  %vm15011_vm10 = vmmov %vm15010_vm14 }
0x30c5   : > { %v9966_v17 = vsel %vm1851_vm0, %v9964_v10, 0.0  ;;  %vm15002_vm0 = vcmask 261120  }
0x30c6   : > { %9967 = vadd.xlane.f32.xlu1 %v9966_v17  ;;  %vm15004_vm9 = vmmov %vm15002_vm0 }
0x30c7   : > { %vm15006_vm3 = vmmov %vm15002_vm0 }
0x30c8   : > { %vm15008_vm1 = vmmov %vm15002_vm0 }
0x30c9   : > { %vm15009_vm5 = vmmov %vm15002_vm0 }
0x30ca   : > { %vm15012_vm6 = vmmov %vm15002_vm0 }
0x30cb   : > { %vm15013_vm11 = vmmov %vm15002_vm0 }
0x30cc   : > { %vm15014_vm12 = vmmov %vm15002_vm0 }
0x30cd   : > { %vm15015_vm7 = vmmov %vm15002_vm0 }
0x30d7   : > { %10091 = vrot.lane.b32.xlu1 %v14579_v34, %s14954_s3  ;;  %v11121_v34 = vld [vmem:[#allocation4] ss:$0 sm:$0xff] }
0x30da   : > { %10089 = vrot.lane.b32.xlu0 %v14583_v7, %s14954_s3  ;;  %s15003_s3 = sld [smem:[#allocation67_spill]] }
0x30e0   : > { %v10237_v15 = vld [vmem:[%s15003_s3 + $0x18] sm:$0xff]  ;;  %v10236_v22 = vld [vmem:[%s15003_s3 + $0x10] sm:$0xff]  ;;  %v10235_v55 = vld [vmem:[%s15003_s3 + $0x8] sm:$0xff] }
0x30e1   : > { %12047 = vmatprep.subr.mxu0 %v10237_v15  ;;  %v10234_v54 = vld [vmem:[%s15003_s3] sm:$0xff] }
0x30e2   : > { %12048 = vmatpush3.msra.mxu0 %v10237_v15 }
0x30e3   : > { %12049 = vmatprep.subr.mxu0 %v10236_v22 }
0x30e4   : > { %12050 = vmatpush3.msra.mxu0 %v10236_v22 }
0x30e5   : > { %12051 = vmatprep.subr.mxu0 %v10235_v55 }
0x30e6   : > { %12052 = vmatpush3.msra.mxu0 %v10235_v55 }
0x30e7   : > { %12053 = vmatprep.subr.mxu0 %v10234_v54 }
0x30e8   : > { %12054 = vmatpush3.msra.mxu0 %v10234_v54 }
0x314d   : > { %v9971_v16 = vpop.xlane.xlu0 %9970 }
0x314e   : > { %vm9973_vm15 = vcmp.lt.f32.partialorder %v9971_v16, 15.0 }
0x314f   : > { %v9968_v35 = vpop.xlane.xlu1 %9967 }
0x3150   : > { %vm9972_vm8 = vcmp.lt.f32.partialorder %v9968_v35, 15.0 }
0x3151   : > { %v10090_v50 = vpop.permute.xlu0 %10089 }
0x3153   : > { %v10092_v21 = vpop.permute.xlu1 %10091 }
0x315d   : > { %v12041_v56 = vpop.f32.mrf.mxu0 }
0x315e   : > { %v10096_v51 = vsel %vm9973_vm15, %v12041_v56, %v10092_v21  ;;  %vm15017_vm15 = vmmov %vm15002_vm0 }
0x315f   : > { %v10076_v59 = vpop.f32.mrf.mxu0 }
0x3160   : > { %v10095_v1 = vsel %vm9972_vm8, %v10076_v59, %v10090_v50  ;;  %vm15016_vm8 = vmmov %vm15002_vm0 }
0x3161   : > { %12044 = vmatprep.mubr.msk.f32.mxu1 %vm2134_vm2, %v10095_v1 }
0x3162   : > { %12045 = vmatmul.mubr.msk.f32.vlgmr.msra.gmra.mxu1 %vm2134_vm2, %v10096_v51  ;;  %vm15005_vm2 = vmmov %vm15002_vm0 }
0x3163   : > { %12059 = vmatpush3.msra.mxu1 %v10387_v30 }
0x3164   : > { %12060 = vmatprep.subr.mxu1 %v10386_v63 }
0x3165   : > { %12061 = vmatpush3.msra.mxu1 %v10386_v63  ;;  %v11127_v63 = vld [vmem:[#allocation10] ss:$0 sm:$0xff] }
0x3166   : > { %12062 = vmatprep.subr.mxu1 %v10385_v23 }
0x3167   : > { %12063 = vmatpush3.msra.mxu1 %v10385_v23 }
0x3168   : > { %12064 = vmatprep.subr.mxu1 %v10384_v38 }
0x3169   : > { %12065 = vmatpush3.msra.mxu1 %v10384_v38 }
0x3222   : > { %v12046_v29 = vpop.f32.mrf.mxu1 }
0x3223   : > { %v10179_v7 = vadd.f32 %v12046_v29, %v9768_v24  ;;  %v10383_v24 = vld [vmem:[%s15007_s0 + $0x18] sm:$0xff] }
0x3224   : > { %v10169_v47 = vpop.f32.mrf.mxu1  ;;  %12066 = vmatprep.subr.mxu1 %v10383_v24 }
0x3225   : > { %v10187_v61 = vadd.f32 %v11121_v34, %v10179_v7  ;;  %v10178_v46 = vadd.f32 %v10169_v47, %v9767_v5  ;;  %12067 = vmatpush3.msra.mxu1 %v10383_v24  ;;  %v10381_v5 = vld [vmem:[%s15007_s0 + $0x8] sm:$0xff] }
0x3226   : > { %12068 = vmatprep.subr.mxu1 %v10382_v33 }
0x3227   : > { %v10186_v2 = vadd.f32 %v11121_v34, %v10178_v46  ;;  %v10189_v62 = vadd.f32 %v10187_v61, %v14450_v32  ;;  %12069 = vmatpush3.msra.mxu1 %v10382_v33 }
0x3228   : > { %12070 = vmatprep.subr.mxu1 %v10381_v5 }
0x3229   : > { %v10195_v25 = vsel %vm15002_vm0, %v10189_v62, 0.0  ;;  %v10188_v41 = vadd.f32 %v10186_v2, %v14448_v20  ;;  %12071 = vmatpush3.msra.mxu1 %v10381_v5 }
0x322a   : > { %10196 = vadd.xlane.f32.xlu0 %v10195_v25  ;;  %12072 = vmatprep.subr.mxu1 %v10380_v28 }
0x322b   : > { %v10192_v57 = vsel %vm15004_vm9, %v10188_v41, 0.0  ;;  %12073 = vmatpush3.msra.mxu1 %v10380_v28  ;;  %vm15018_vm9 = vmmov %vm15002_vm0 }
0x322c   : > { %10193 = vadd.xlane.f32.xlu1 %v10192_v57 }
0x32b3   : > { %v10197_v9 = vpop.xlane.xlu0 %10196 }
0x32b4   : > { %v10199_v53 = vmul.f32 0.03125, %v10197_v9 }
0x32b5   : > { %v10194_v0 = vpop.xlane.xlu1 %10193 }
0x32b6   : > { %v10201_v44 = vsub.f32 %v10189_v62, %v10199_v53  ;;  %v10198_v52 = vmul.f32 0.03125, %v10194_v0 }
0x32b8   : > { %v10200_v39 = vsub.f32 %v10188_v41, %v10198_v52  ;;  %v10203_v36 = vmul.f32 %v10201_v44, %v10201_v44 }
0x32ba   : > { %v10207_v32 = vsel %vm15005_vm2, %v10203_v36, 0.0  ;;  %v10202_v4 = vmul.f32 %v10200_v39, %v10200_v39  ;;  %vm15019_vm2 = vmmov %vm15002_vm0 }
0x32bb   : > { %10208 = vadd.xlane.f32.xlu1 %v10207_v32 }
0x32bc   : > { %v10204_v20 = vsel %vm15006_vm3, %v10202_v4, 0.0  ;;  %vm15020_vm3 = vmmov %vm15002_vm0 }
0x32bd   : > { %10205 = vadd.xlane.f32.xlu0 %v10204_v20 }
0x3344   : > { %v10209_v3 = vpop.xlane.xlu1 %10208 }
0x3345   : > { %v10211_v14 = vmul.f32 0.03125, %v10209_v3 }
0x3346   : > { %v10206_v40 = vpop.xlane.xlu0 %10205 }
0x3347   : > { %v10213_v42 = vadd.f32 1e-05, %v10211_v14  ;;  %v10210_v8 = vmul.f32 0.03125, %v10206_v40 }
0x3349   : > { %12447 = vrsqrt.f32 %v10213_v42  ;;  %v10212_v37 = vadd.f32 1e-05, %v10210_v8 }
0x334b   : > { %12449 = vrsqrt.f32 %v10212_v37 }
0x3356   : > { %v12448_v60 = vpop.eup %12447 }
0x3357   : > { %v10217_v43 = vmul.f32 %v12448_v60, %v10201_v44 }
0x3358   : > { %v12450_v13 = vpop.eup %12449 }
0x3359   : > { %v10216_v26 = vmul.f32 %v12450_v13, %v10200_v39  ;;  %v10225_v31 = vmul.f32 %v11122_v48, %v10217_v43 }
0x335b   : > { %v10224_v18 = vmul.f32 %v11122_v48, %v10216_v26  ;;  %v14767_v27 = vadd.f32 %v11123_v58, %v10225_v31 }
0x335d   : > { %v14765_v19 = vadd.f32 %v11123_v58, %v10224_v18 }
0x335f   : > { %12055 = vmatprep.mubr.msk.f32.mxu0 %vm15008_vm1, %v14765_v19  ;;  %vm15021_vm1 = vmmov %vm15002_vm0 }
0x3360   : > { %12056 = vmatmul.mubr.msk.f32.vlgmr.msra.gmra.mxu0 %vm15009_vm5, %v14767_v27  ;;  %vm15022_vm5 = vmmov %vm15002_vm0 }
0x3420   : > { %v12057_v45 = vpop.f32.mrf.mxu0 }
0x3421   : > { %v10323_v12 = vadd.f32 %v12057_v45, %v11124_v49 }
0x3422   : > { %v10317_v6 = vpop.f32.mrf.mxu0 }
0x3423   : > { %v10327_v10 = vmul.f32 0.70710677, %v10323_v12  ;;  %v10318_v17 = vadd.f32 %v11124_v49, %v10317_v6  ;;  %v10375_v58 = vmul.f32 0.5, %v10323_v12 }
0x3425   : > { %v10329_v11 = vand.u32 2147483647, %v10327_v10  ;;  %v10326_v16 = vmul.f32 0.70710677, %v10318_v17  ;;  %vm10369_vm13 = vcmp.lt.f32.partialorder %v10327_v10, 0.0  ;;  %v10374_v26 = vmul.f32 0.5, %v10318_v17 }
0x3427   : > { %v10331_v35 = vmul.f32 0.3275911, %v10329_v11  ;;  %v10328_v56 = vand.u32 2147483647, %v10326_v16  ;;  %v10357_v1 = vmul.f32 %v10329_v11, %v10329_v11  ;;  %vm10368_vm4 = vcmp.lt.f32.partialorder %v10326_v16, 0.0 }
0x3429   : > { %v10333_v50 = vadd.f32 1.0, %v10331_v35  ;;  %v10330_v59 = vmul.f32 0.3275911, %v10328_v56  ;;  %v10356_v51 = vmul.f32 %v10328_v56, %v10328_v56  ;;  %v10359_v34 = vsub.f32 0.0, %v10357_v1 }
0x342b   : > { %12451 = vrcp.f32 %v10333_v50  ;;  %v10332_v21 = vadd.f32 1.0, %v10330_v59  ;;  %v10358_v7 = vsub.f32 0.0, %v10356_v51  ;;  %v10362_v61 = vmul.f32 1.442695, %v10359_v34 }
0x342d   : > { %12453 = vrcp.f32 %v10332_v21  ;;  %v10360_v25 = vmul.f32 1.442695, %v10358_v7  ;;  %v11130_v7 = vld [vmem:[#allocation12] ss:$0 sm:$0xff] }
0x342e   : > { %12455 = vpow2.f32 %v10362_v61 }
0x342f   : > { %12457 = vpow2.f32 %v10360_v25 }
0x3438   : > { %v12452_v29 = vpop.eup %12451 }
0x3439   : > { %v10339_v47 = vmul.f32 1.0614054, %v12452_v29 }
0x343a   : > { %v12454_v46 = vpop.eup %12453 }
0x343b   : > { %v10341_v2 = vadd.f32 -1.4531521, %v10339_v47  ;;  %v10338_v62 = vmul.f32 1.0614054, %v12454_v46  ;;  %v12456_v22 = vpop.eup %12455 }
0x343c   : > { %v12458_v14 = vpop.eup %12457 }
0x343d   : > { %v10343_v41 = vmul.f32 %v12452_v29, %v10341_v2  ;;  %v10340_v57 = vadd.f32 -1.4531521, %v10338_v62 }
0x343f   : > { %v10345_v9 = vadd.f32 1.4214138, %v10343_v41  ;;  %v10342_v53 = vmul.f32 %v12454_v46, %v10340_v57 }
0x3441   : > { %v10347_v0 = vmul.f32 %v12452_v29, %v10345_v9  ;;  %v10344_v44 = vadd.f32 1.4214138, %v10342_v53 }
0x3443   : > { %v10349_v52 = vadd.f32 -0.28449672, %v10347_v0  ;;  %v10346_v39 = vmul.f32 %v12454_v46, %v10344_v44 }
0x3445   : > { %v10351_v36 = vmul.f32 %v12452_v29, %v10349_v52  ;;  %v10348_v32 = vadd.f32 -0.28449672, %v10346_v39 }
0x3447   : > { %v10353_v4 = vadd.f32 0.2548296, %v10351_v36  ;;  %v10350_v20 = vmul.f32 %v12454_v46, %v10348_v32 }
0x3449   : > { %v10355_v15 = vmul.f32 %v12452_v29, %v10353_v4  ;;  %v10352_v55 = vadd.f32 0.2548296, %v10350_v20 }
0x344b   : > { %v10365_v54 = vmul.f32 %v12456_v22, %v10355_v15  ;;  %v10354_v3 = vmul.f32 %v12454_v46, %v10352_v55  ;;  %v11131_v46 = vld [vmem:[#allocation13] ss:$0 sm:$0xff]  ;;  %v10569_v55 = vld [vmem:[%s13153_s14 + $0x18] sm:$0xff] }
0x344c   : > { %12077 = vmatprep.subr.mxu0 %v10569_v55 }
0x344d   : > { %v10367_v40 = vsub.f32 1.0, %v10365_v54  ;;  %v10364_v42 = vmul.f32 %v12458_v14, %v10354_v3  ;;  %v10568_v54 = vld [vmem:[%s13153_s14 + $0x10] sm:$0xff]  ;;  %12078 = vmatpush3.msra.mxu0 %v10569_v55  ;;  %v10567_v3 = vld [vmem:[%s13153_s14 + $0x8] sm:$0xff]  ;;  %v10566_v14 = vld [vmem:[%s13153_s14] sm:$0xff] }
0x344e   : > { %12079 = vmatprep.subr.mxu0 %v10568_v54 }
0x344f   : > { %v10371_v8 = vsub.f32 0.0, %v10367_v40  ;;  %v10366_v37 = vsub.f32 1.0, %v10364_v42  ;;  %12080 = vmatpush3.msra.mxu0 %v10568_v54 }
0x3450   : > { %12081 = vmatprep.subr.mxu0 %v10567_v3 }
0x3451   : > { %v10373_v60 = vsel %vm10369_vm13, %v10371_v8, %v10367_v40  ;;  %v10370_v48 = vsub.f32 0.0, %v10366_v37  ;;  %12082 = vmatpush3.msra.mxu0 %v10567_v3 }
0x3452   : > { %v10377_v43 = vadd.f32 1.0, %v10373_v60  ;;  %12083 = vmatprep.subr.mxu0 %v10566_v14 }
0x3453   : > { %v10372_v13 = vsel %vm10368_vm4, %v10370_v48, %v10366_v37  ;;  %12084 = vmatpush3.msra.mxu0 %v10566_v14 }
0x3454   : > { %v10376_v31 = vadd.f32 1.0, %v10372_v13  ;;  %v10379_v30 = vmul.f32 %v10377_v43, %v10375_v58  ;;  %v11132_v13 = vld [vmem:[#allocation15] ss:$0 sm:$0xff] }
0x3456   : > { %v10378_v18 = vmul.f32 %v10376_v31, %v10374_v26 }
0x3458   : > { %12074 = vmatprep.mubr.msk.f32.mxu1 %vm15010_vm14, %v10378_v18 }
0x3459   : > { %12075 = vmatmul.mubr.msk.f32.vlgmr.msra.gmra.mxu1 %vm15011_vm10, %v10379_v30  ;;  %v11133_v30 = vld [vmem:[#allocation16] ss:$0 sm:$0xff] }
0x3519   : > { %v12076_v23 = vpop.f32.mrf.mxu1 }
0x351a   : > { %v10473_v38 = vadd.f32 %v12076_v23, %v11127_v63 }
0x351b   : > { %v10467_v24 = vpop.f32.mrf.mxu1 }
0x351c   : > { %v10477_v33 = vadd.f32 %v10473_v38, %v14767_v27  ;;  %v10468_v5 = vadd.f32 %v11127_v63, %v10467_v24  ;;  %v11134_v24 = vld [vmem:[#allocation18] ss:$0 sm:$0xff] }
0x351e   : > { %v10476_v28 = vadd.f32 %v10468_v5, %v14765_v19  ;;  %v10483_v49 = vsel %vm15012_vm6, %v10477_v33, 0.0 }
0x351f   : > { %10484 = vadd.xlane.f32.xlu1 %v10483_v49 }
0x3520   : > { %v10480_v45 = vsel %vm15013_vm11, %v10476_v28, 0.0 }
0x3521   : > { %10481 = vadd.xlane.f32.xlu0 %v10480_v45 }
0x35a8   : > { %v10485_v12 = vpop.xlane.xlu1 %10484 }
0x35a9   : > { %v10487_v6 = vmul.f32 0.03125, %v10485_v12 }
0x35aa   : > { %v10482_v10 = vpop.xlane.xlu0 %10481 }
0x35ab   : > { %v10489_v17 = vsub.f32 %v10477_v33, %v10487_v6  ;;  %v10486_v11 = vmul.f32 0.03125, %v10482_v10 }
0x35ad   : > { %v10488_v16 = vsub.f32 %v10476_v28, %v10486_v11  ;;  %v10491_v35 = vmul.f32 %v10489_v17, %v10489_v17 }
0x35af   : > { %v10495_v56 = vsel %vm15014_vm12, %v10491_v35, 0.0  ;;  %v10490_v50 = vmul.f32 %v10488_v16, %v10488_v16 }
0x35b0   : > { %10496 = vadd.xlane.f32.xlu1 %v10495_v56 }
0x35b1   : > { %v10492_v27 = vsel %vm15015_vm7, %v10490_v50, 0.0 }
0x35b2   : > { %10493 = vadd.xlane.f32.xlu0 %v10492_v27 }
0x3639   : > { %v10497_v19 = vpop.xlane.xlu1 %10496 }
0x363a   : > { %v10499_v59 = vmul.f32 0.03125, %v10497_v19 }
0x363b   : > { %v10494_v21 = vpop.xlane.xlu0 %10493 }
0x363c   : > { %v10501_v1 = vadd.f32 1e-05, %v10499_v59  ;;  %v10498_v51 = vmul.f32 0.03125, %v10494_v21 }
0x363e   : > { %12459 = vrsqrt.f32 %v10501_v1  ;;  %v10500_v34 = vadd.f32 1e-05, %v10498_v51 }
0x3640   : > { %12461 = vrsqrt.f32 %v10500_v34 }
0x364b   : > { %v12460_v29 = vpop.eup %12459 }
0x364c   : > { %v10505_v47 = vmul.f32 %v12460_v29, %v10489_v17 }
0x364d   : > { %v12462_v61 = vpop.eup %12461 }
0x364e   : > { %v10513_v2 = vmul.f32 %v11130_v7, %v10505_v47  ;;  %v10504_v62 = vmul.f32 %v12462_v61, %v10488_v16 }
0x3650   : > { %v10521_v25 = vadd.f32 %v11131_v46, %v10513_v2  ;;  %v10512_v41 = vmul.f32 %v11130_v7, %v10504_v62 }
0x3652   : > { %v10527_v57 = vsel %vm15016_vm8, %v10521_v25, 0.0  ;;  %v10520_v9 = vadd.f32 %v11131_v46, %v10512_v41 }
0x3653   : > { %10528 = vadd.xlane.f32.xlu1 %v10527_v57 }
0x3654   : > { %v10524_v53 = vsel %vm15017_vm15, %v10520_v9, 0.0 }
0x3655   : > { %10525 = vadd.xlane.f32.xlu0 %v10524_v53 }
0x36dc   : > { %v10529_v0 = vpop.xlane.xlu1 %10528 }
0x36dd   : > { %v10531_v44 = vmul.f32 0.03125, %v10529_v0 }
0x36de   : > { %v10526_v52 = vpop.xlane.xlu0 %10525 }
0x36df   : > { %v10533_v39 = vsub.f32 %v10521_v25, %v10531_v44  ;;  %v10530_v36 = vmul.f32 0.03125, %v10526_v52 }
0x36e1   : > { %v10532_v32 = vsub.f32 %v10520_v9, %v10530_v36  ;;  %v10535_v4 = vmul.f32 %v10533_v39, %v10533_v39 }
0x36e3   : > { %v10539_v20 = vsel %vm15002_vm0, %v10535_v4, 0.0  ;;  %v10534_v15 = vmul.f32 %v10532_v32, %v10532_v32 }
0x36e4   : > { %10540 = vadd.xlane.f32.xlu1 %v10539_v20 }
0x36e5   : > { %v10536_v22 = vsel %vm15018_vm9, %v10534_v15, 0.0 }
0x36e6   : > { %10537 = vadd.xlane.f32.xlu0 %v10536_v22 }
0x376d   : > { %v10541_v40 = vpop.xlane.xlu1 %10540 }
0x376e   : > { %v10543_v42 = vmul.f32 0.03125, %v10541_v40 }
0x376f   : > { %v10538_v8 = vpop.xlane.xlu0 %10537 }
0x3770   : > { %v10545_v37 = vadd.f32 1e-05, %v10543_v42  ;;  %v10542_v60 = vmul.f32 0.03125, %v10538_v8 }
0x3772   : > { %12463 = vrsqrt.f32 %v10545_v37  ;;  %v10544_v48 = vadd.f32 1e-05, %v10542_v60 }
0x3774   : > { %12465 = vrsqrt.f32 %v10544_v48 }
0x377f   : > { %v12464_v43 = vpop.eup %12463 }
0x3780   : > { %v10549_v26 = vmul.f32 %v12464_v43, %v10533_v39 }
0x3781   : > { %v12466_v31 = vpop.eup %12465 }
0x3782   : > { %v10548_v58 = vmul.f32 %v12466_v31, %v10532_v32  ;;  %v10557_v18 = vmul.f32 %v11132_v13, %v10549_v26 }
0x3784   : > { %v10556_v63 = vmul.f32 %v11132_v13, %v10548_v58  ;;  %v10565_v38 = vadd.f32 %v11133_v30, %v10557_v18 }
0x3786   : > { %v10564_v23 = vadd.f32 %v11133_v30, %v10556_v63 }
0x3788   : > { %12085 = vmatprep.mubr.msk.f32.mxu0 %vm15019_vm2, %v10564_v23 }
0x3789   : > { %12086 = vmatmul.mubr.msk.f32.vlgmr.msra.gmra.mxu0 %vm15020_vm3, %v10565_v38 }
0x3849   : > { %v12087_v33 = vpop.f32.mrf.mxu0 }
0x384a   : > { %v10655_v5 = vadd.f32 %v12087_v33, %v11134_v24 }
0x384b   : > { %v10649_v28 = vpop.f32.mrf.mxu0 }
0x384c   : > { %10659 = vst.msk [vmem:[%s1844_s2 + $0x8] sm:$0xff] %vm15021_vm1, %v10655_v5  ;;  %v10650_v49 = vadd.f32 %v11134_v24, %v10649_v28 }
0x384e   : > { %10658 = vst.msk [vmem:[%s1844_s2] sm:$0xff] %vm15022_vm5, %v10650_v49 }
0x384f PF: > { %s131_s7 = sadd.s32 1, %s12785_s7  }
0x3850   : > { %p128_p4 = scmp.ge.s32.totalorder %s131_s7, 4  }
0x3852   :  { %130 = sbr.rel (!%p128_p4) target bundleno = 121 (0x79), region = 383 }
0x3857   :  { %10681 = vsyncpa [#allocation3], 1 }
0x3858   :  { %10683 = vsyncpa [#allocation3 + $0x1], 1 }
0x3859   :  { %10684 = vsyncpa [#allocation5], 1 }
0x385a   :  { %10685 = vsyncpa [#allocation8], 1 }
0x385b   :  { %10686 = vsyncpa [#allocation11], 1 }
0x385c   :  { %10687 = vsyncpa [#allocation14], 1 }
0x385d   :  { %10688 = vsyncpa [#allocation17], 1 }

</bundles_post_ra>
